<compile_context>
chip_gen: v7x
topology: tpu7x:2x2x1
jax: 0.10.0
libtpu: 0.0.40
codegen_flags: <defaults>
</compile_context>

<pallas_src>
import numpy as np
import jax
import jax.numpy as jnp
from jax import lax
from jax.experimental import pallas as pl
from jax.experimental.pallas import tpu as pltpu


_L = 8  # sublane-aligned left padding of the VMEM staging buffers


# ----------------------------------------------------------------------------
# Pallas kernel: fused cat([x2, x1], C) + DoubleConv
#   (3x3 conv, pad=1) -> folded BN -> SiLU, twice.
# One grid step per batch element; each 3x3 conv is nine shifted
# (H*W, Cin) x (Cin, Cout) matmuls on the MXU (conv1 uses split weights so the
# channel concat never exists as a tensor).
# ----------------------------------------------------------------------------
def _up_double_conv_kernel(x2_ref, x1_ref, w1a_ref, w1b_ref, s1_ref, b1_ref,
                           w2_ref, s2_ref, b2_ref, o_ref,
                           x2p_ref, x1p_ref, hp_ref):
    # x2_ref : (1, H, W, C2)   skip connection (already full resolution)
    # x1_ref : (1, H, W, C1)   bilinearly upsampled decoder features
    # w1a/b  : (3, 3, C2, Cmid) / (3, 3, C1, Cmid)  conv1 weight split on Cin
    # w2     : (3, 3, Cmid, Cout)
    # s*/b*  : (1, C)          folded BN scale / bias (conv bias included)
    # o_ref  : (1, H, W, Cout)
    # *_p    : (H+2, W+_L+1, C) VMEM staging buffers carrying the zero halo;
    #          the interior starts at column _L so its store is sublane-aligned.
    H, W, Cout = o_ref.shape[1], o_ref.shape[2], o_ref.shape[3]
    C2 = x2_ref.shape[3]
    C1 = x1_ref.shape[3]
    Cmid = w1a_ref.shape[3]
    L = _L

    def zero_halo(ref):
        # Only the 1-pixel border actually read by the conv taps is zeroed;
        # the interior is fully overwritten below.  Re-done every grid step
        # (cheap: O(H + W) elements) because with a "parallel" batch axis a
        # program_id==0-only init would be unsafe on multi-core parts.
        Hp, Wp, C = ref.shape
        zrow = jnp.zeros((1, Wp, C), jnp.float32)
        ref[0:1, :, :] = zrow                  # top halo row
        ref[Hp - 1:Hp, :, :] = zrow            # bottom halo row
        zcol = jnp.zeros((Hp, 1, C), jnp.float32)
        ref[:, L - 1:L, :] = zcol              # left halo column
        ref[:, L + W:L + W + 1, :] = zcol      # right halo column

    zero_halo(x2p_ref)
    zero_halo(x1p_ref)
    zero_halo(hp_ref)

    # Fused channel concat: x2 / x1 land in separate staging buffers and the
    # first conv uses the matching weight halves (cat order is [x2, x1]).
    # Interior stores start at sublane offset _L -> unmasked stores.
    x2p_ref[1:H + 1, L:L + W, :] = x2_ref[0]
    x1p_ref[1:H + 1, L:L + W, :] = x1_ref[0]

    x2p = x2p_ref[:, L - 1:L + W + 1, :]       # (H+2, W+2, C2)
    x1p = x1p_ref[:, L - 1:L + W + 1, :]       # (H+2, W+2, C1)

    # ---- conv1 (3x3, pad=1) + folded BN + SiLU ----
    acc1 = jnp.zeros((H * W, Cmid), jnp.float32)
    for dy in range(3):
        for dx in range(3):
            p2 = x2p[dy:dy + H, dx:dx + W, :].reshape(H * W, C2)
            p1 = x1p[dy:dy + H, dx:dx + W, :].reshape(H * W, C1)
            acc1 = acc1 + jnp.dot(p2, w1a_ref[dy, dx],
                                  preferred_element_type=jnp.float32)
            acc1 = acc1 + jnp.dot(p1, w1b_ref[dy, dx],
                                  preferred_element_type=jnp.float32)
    h = acc1 * s1_ref[0] + b1_ref[0]           # BatchNorm (eval) + conv bias
    h = h * jax.nn.sigmoid(h)                  # SiLU

    # ---- conv2 (3x3, pad=1) + folded BN + SiLU ----
    hp_ref[1:H + 1, L:L + W, :] = h.reshape(H, W, Cmid)
    hp = hp_ref[:, L - 1:L + W + 1, :]         # (H+2, W+2, Cmid)
    acc2 = jnp.zeros((H * W, Cout), jnp.float32)
    for dy in range(3):
        for dx in range(3):
            p = hp[dy:dy + H, dx:dx + W, :].reshape(H * W, Cmid)
            acc2 = acc2 + jnp.dot(p, w2_ref[dy, dx],
                                  preferred_element_type=jnp.float32)
    y = acc2 * s2_ref[0] + b2_ref[0]
    y = y * jax.nn.sigmoid(y)                  # SiLU
    o_ref[0] = y.reshape(H, W, Cout).astype(o_ref.dtype)


def up_double_conv_pallas(x2_nhwc, x1_nhwc, params):
    """Fused cat([x2, x1], C) + DoubleConv.  x2/x1: (N, H, W, C*) float32."""
    w1, s1, b1, w2, s2, b2 = params
    N, H, W, C2 = x2_nhwc.shape
    C1 = x1_nhwc.shape[3]
    Cmid = w1.shape[3]
    Cout = w2.shape[3]
    assert w1.shape[2] == C2 + C1
    # Split conv1's weight along its input-channel axis so the channel concat
    # can stay fused inside the kernel (reference concat order is [x2, x1]).
    w1a = w1[:, :, :C2, :]
    w1b = w1[:, :, C2:, :]

    return pl.pallas_call(
        _up_double_conv_kernel,
        out_shape=jax.ShapeDtypeStruct((N, H, W, Cout), jnp.float32),
        grid_spec=pltpu.PrefetchScalarGridSpec(
            num_scalar_prefetch=0,
            grid=(N,),
            in_specs=[
                pl.BlockSpec((1, H, W, C2), lambda n: (n, 0, 0, 0)),
                pl.BlockSpec((1, H, W, C1), lambda n: (n, 0, 0, 0)),
                pl.BlockSpec((3, 3, C2, Cmid), lambda n: (0, 0, 0, 0)),
                pl.BlockSpec((3, 3, C1, Cmid), lambda n: (0, 0, 0, 0)),
                pl.BlockSpec((1, Cmid), lambda n: (0, 0)),
                pl.BlockSpec((1, Cmid), lambda n: (0, 0)),
                pl.BlockSpec((3, 3, Cmid, Cout), lambda n: (0, 0, 0, 0)),
                pl.BlockSpec((1, Cout), lambda n: (0, 0)),
                pl.BlockSpec((1, Cout), lambda n: (0, 0)),
            ],
            out_specs=pl.BlockSpec((1, H, W, Cout), lambda n: (n, 0, 0, 0)),
            scratch_shapes=[
                pltpu.VMEM((H + 2, W + _L + 1, C2), jnp.float32),
                pltpu.VMEM((H + 2, W + _L + 1, C1), jnp.float32),
                pltpu.VMEM((H + 2, W + _L + 1, Cmid), jnp.float32),
            ],
        ),
        compiler_params=pltpu.CompilerParams(
            dimension_semantics=("parallel",),
            vmem_limit_bytes=64 * 1024 * 1024),
    )(x2_nhwc, x1_nhwc, w1a, w1b, s1, b1, w2, s2, b2)


# ----------------------------------------------------------------------------
# Plain-JAX glue: bilinear 2x upsample (align_corners=True) and skip-pad.
# ----------------------------------------------------------------------------
def _upsample_bilinear_x2_align_corners(x):
    """(N, H, W, C) -> (N, 2H, 2W, C); matches nn.Upsample(2,'bilinear',True).

    Separable (H pass then W pass) with static gather indices / weights, so
    far fewer full-size gathered intermediates than the joint 4-corner form.
    """
    N, H, W, C = x.shape

    def plan(n_in, n_out):
        if n_out == 1:
            z = jnp.zeros((1,), jnp.int32)
            return z, z, jnp.zeros((1,), jnp.float32)
        s = jnp.linspace(0.0, n_in - 1.0, n_out)            # align_corners=True
        i0 = jnp.floor(s).astype(jnp.int32)
        i1 = jnp.minimum(i0 + 1, n_in - 1)
        return i0, i1, (s - i0.astype(s.dtype)).astype(jnp.float32)

    y0, y1, wy = plan(H, 2 * H)
    c0, c1, wx = plan(W, 2 * W)
    wy = wy[None, :, None, None]
    wx = wx[None, None, :, None]
    xh = x[:, y0] * (1.0 - wy) + x[:, y1] * wy               # H pass
    return xh[:, :, c0] * (1.0 - wx) + xh[:, :, c1] * wx     # W pass


def up_forward(x1_nchw, x2_nchw, params):
    """Forward pass of `Up` (bilinear=True). Inputs/outputs are NCHW."""
    x1 = jnp.transpose(x1_nchw, (0, 2, 3, 1))                # -> NHWC
    x2 = jnp.transpose(x2_nchw, (0, 2, 3, 1))
    x1 = _upsample_bilinear_x2_align_corners(x1)
    dY = x2.shape[1] - x1.shape[1]
    dX = x2.shape[2] - x1.shape[2]
    if dY or dX:
        x1 = jnp.pad(x1, ((0, 0),
                          (dY // 2, dY - dY // 2),
                          (dX // 2, dX - dX // 2),
                          (0, 0)))
    out = up_double_conv_pallas(x2, x1, params)              # concat fused
    return jnp.transpose(out, (0, 3, 1, 2))                  # back to NCHW


# ----------------------------------------------------------------------------
# Deterministic parameter construction (eval-mode BN folded with conv bias).
# ----------------------------------------------------------------------------
def init_up_params(key, in_channels, out_channels):
    mid = in_channels // 2
    eps = 1e-5
    ks = jax.random.split(key, 12)

    def make_layer(kw, kb, kg, kbeta, km, kv, cin, cout):
        w_oihw = 0.1 * jax.random.normal(kw, (cout, cin, 3, 3), jnp.float32)
        b_conv = 0.1 * jax.random.normal(kb, (cout,), jnp.float32)
        gamma = 1.0 + 0.1 * jax.random.normal(kg, (cout,), jnp.float32)
        beta = 0.1 * jax.random.normal(kbeta, (cout,), jnp.float32)
        rmean = 0.1 * jax.random.normal(km, (cout,), jnp.float32)
        rvar = 0.5 + jnp.abs(jax.random.normal(kv, (cout,), jnp.float32))
        w_hwio = jnp.transpose(w_oihw, (2, 3, 1, 0))         # OIHW -> HWIO
        scale = gamma / jnp.sqrt(rvar + eps)
        bias = beta + (b_conv - rmean) * scale
        return w_hwio, scale.reshape(1, cout), bias.reshape(1, cout)

    w1, s1, b1 = make_layer(*ks[0:6], in_channels, mid)
    w2, s2, b2 = make_layer(*ks[6:12], mid, out_channels)
    return (w1, s1, b1, w2, s2, b2)


# Pure-JAX reference of the DoubleConv (for a sanity check of the kernel).
def _ref_double_conv(x_nhwc, params):
    w1, s1, b1, w2, s2, b2 = params
    dn = lax.conv_dimension_numbers(x_nhwc.shape, w1.shape,
                                    ('NHWC', 'HWIO', 'NHWC'))
    h = lax.conv_general_dilated(x_nhwc, w1, (1, 1), 'SAME',
                                 dimension_numbers=dn)
    h = h * s1[0] + b1[0]
    h = h * jax.nn.sigmoid(h)
    dn2 = lax.conv_dimension_numbers(h.shape, w2.shape,
                                     ('NHWC', 'HWIO', 'NHWC'))
    o = lax.conv_general_dilated(h, w2, (1, 1), 'SAME',
                                 dimension_numbers=dn2)
    o = o * s2[0] + b2[0]
    return o * jax.nn.sigmoid(o)


if __name__ == "__main__":
    # Up(in_channels=8, out_channels=8, bilinear=True)
    # x1: (N, 4, 8, 8)   -> upsampled to (N, 4, 16, 16)
    # x2: (N, 4, 16, 16) -> cat channels = 8 = in_channels, mid = 4
    N, C_half, H1, W1 = 2, 4, 8, 8
    in_channels, out_channels = 2 * C_half, 8

    key = jax.random.PRNGKey(0)
    k1, k2, kp = jax.random.split(key, 3)
    x1 = jax.random.normal(k1, (N, C_half, H1, W1), jnp.float32)
    x2 = jax.random.normal(k2, (N, C_half, 2 * H1, 2 * W1), jnp.float32)
    params = init_up_params(kp, in_channels, out_channels)

    out = jax.jit(up_forward)(x1, x2, params)
    out = jax.block_until_ready(out)
    assert out.shape == (N, out_channels, 2 * H1, 2 * W1), out.shape

    # Sanity check against a pure-JAX reference of the same forward pass.
    x1n = _upsample_bilinear_x2_align_corners(jnp.transpose(x1, (0, 2, 3, 1)))
    x2n = jnp.transpose(x2, (0, 2, 3, 1))
    xcat = jnp.concatenate([x2n, x1n], axis=-1)
    ref = jnp.transpose(_ref_double_conv(xcat, params), (0, 3, 1, 2))
    np.testing.assert_allclose(np.asarray(out), np.asarray(ref),
                               rtol=2e-2, atol=2e-2)

    print("KERNEL_OK")
</pallas_src>

<mosaic_0001>
module attributes {stable_mosaic.version = 11 : i64} {
  func.func @_up_double_conv_kernel(%arg0: i32, %arg1: memref<1x16x16x4xf32, #tpu.memory_space<vmem>>, %arg2: memref<1x16x16x4xf32, #tpu.memory_space<vmem>>, %arg3: memref<3x3x4x4xf32, #tpu.memory_space<vmem>>, %arg4: memref<3x3x4x4xf32, #tpu.memory_space<vmem>>, %arg5: memref<1x4xf32, #tpu.memory_space<vmem>>, %arg6: memref<1x4xf32, #tpu.memory_space<vmem>>, %arg7: memref<3x3x4x8xf32, #tpu.memory_space<vmem>>, %arg8: memref<1x8xf32, #tpu.memory_space<vmem>>, %arg9: memref<1x8xf32, #tpu.memory_space<vmem>>, %arg10: memref<1x16x16x8xf32, #tpu.memory_space<vmem>>, %arg11: memref<18x25x4xf32, #tpu.memory_space<vmem>>, %arg12: memref<18x25x4xf32, #tpu.memory_space<vmem>>, %arg13: memref<18x25x4xf32, #tpu.memory_space<vmem>>) attributes {dimension_semantics = [#tpu.dimension_semantics<parallel>], iteration_bounds = array<i64: 2>, scalar_prefetch = 0 : i64, scratch_operands = 3 : i64, tpu.core_type = #tpu.core_type<tc>, window_params = [{transform_indices = @transform_0, window_bounds = array<i64: 1, 16, 16, 4>}, {transform_indices = @transform_1, window_bounds = array<i64: 1, 16, 16, 4>}, {pipeline_mode = #tpu.pipeline_mode<synchronous>, transform_indices = @transform_2, window_bounds = array<i64: 3, 3, 4, 4>}, {pipeline_mode = #tpu.pipeline_mode<synchronous>, transform_indices = @transform_3, window_bounds = array<i64: 3, 3, 4, 4>}, {pipeline_mode = #tpu.pipeline_mode<synchronous>, transform_indices = @transform_4, window_bounds = array<i64: 1, 4>}, {pipeline_mode = #tpu.pipeline_mode<synchronous>, transform_indices = @transform_5, window_bounds = array<i64: 1, 4>}, {pipeline_mode = #tpu.pipeline_mode<synchronous>, transform_indices = @transform_6, window_bounds = array<i64: 3, 3, 4, 8>}, {pipeline_mode = #tpu.pipeline_mode<synchronous>, transform_indices = @transform_7, window_bounds = array<i64: 1, 8>}, {pipeline_mode = #tpu.pipeline_mode<synchronous>, transform_indices = @transform_8, window_bounds = array<i64: 1, 8>}, {transform_indices = @transform_9, window_bounds = array<i64: 1, 16, 16, 8>}]} {
    %cst = arith.constant 0.000000e+00 : f32
    %0 = vector.broadcast %cst : f32 to vector<1x25x4xf32>
    %c0 = arith.constant 0 : index
    %c0_0 = arith.constant 0 : index
    %c0_1 = arith.constant 0 : index
    %1 = vector.load %arg11[%c0, %c0_0, %c0_1] : memref<18x25x4xf32, #tpu.memory_space<vmem>>, vector<1x25x4xf32>
    tpu.vector_store %arg11[%c0, %c0_0, %c0_1], %0 {strides = array<i32>} : memref<18x25x4xf32, #tpu.memory_space<vmem>>, vector<1x25x4xf32>,
    %c17 = arith.constant 17 : index
    %c0_2 = arith.constant 0 : index
    %c0_3 = arith.constant 0 : index
    %2 = vector.load %arg11[%c17, %c0_2, %c0_3] : memref<18x25x4xf32, #tpu.memory_space<vmem>>, vector<1x25x4xf32>
    tpu.vector_store %arg11[%c17, %c0_2, %c0_3], %0 {strides = array<i32>} : memref<18x25x4xf32, #tpu.memory_space<vmem>>, vector<1x25x4xf32>,
    %cst_4 = arith.constant 0.000000e+00 : f32
    %3 = vector.broadcast %cst_4 : f32 to vector<18x1x4xf32>
    %c0_5 = arith.constant 0 : index
    %c7 = arith.constant 7 : index
    %c0_6 = arith.constant 0 : index
    %4 = vector.load %arg11[%c0_5, %c7, %c0_6] : memref<18x25x4xf32, #tpu.memory_space<vmem>>, vector<18x1x4xf32>
    tpu.vector_store %arg11[%c0_5, %c7, %c0_6], %3 {strides = array<i32>} : memref<18x25x4xf32, #tpu.memory_space<vmem>>, vector<18x1x4xf32>,
    %c0_7 = arith.constant 0 : index
    %c24 = arith.constant 24 : index
    %c0_8 = arith.constant 0 : index
    %5 = vector.load %arg11[%c0_7, %c24, %c0_8] : memref<18x25x4xf32, #tpu.memory_space<vmem>>, vector<18x1x4xf32>
    tpu.vector_store %arg11[%c0_7, %c24, %c0_8], %3 {strides = array<i32>} : memref<18x25x4xf32, #tpu.memory_space<vmem>>, vector<18x1x4xf32>,
    %cst_9 = arith.constant 0.000000e+00 : f32
    %6 = vector.broadcast %cst_9 : f32 to vector<1x25x4xf32>
    %c0_10 = arith.constant 0 : index
    %c0_11 = arith.constant 0 : index
    %c0_12 = arith.constant 0 : index
    %7 = vector.load %arg12[%c0_10, %c0_11, %c0_12] : memref<18x25x4xf32, #tpu.memory_space<vmem>>, vector<1x25x4xf32>
    tpu.vector_store %arg12[%c0_10, %c0_11, %c0_12], %6 {strides = array<i32>} : memref<18x25x4xf32, #tpu.memory_space<vmem>>, vector<1x25x4xf32>,
    %c17_13 = arith.constant 17 : index
    %c0_14 = arith.constant 0 : index
    %c0_15 = arith.constant 0 : index
    %8 = vector.load %arg12[%c17_13, %c0_14, %c0_15] : memref<18x25x4xf32, #tpu.memory_space<vmem>>, vector<1x25x4xf32>
    tpu.vector_store %arg12[%c17_13, %c0_14, %c0_15], %6 {strides = array<i32>} : memref<18x25x4xf32, #tpu.memory_space<vmem>>, vector<1x25x4xf32>,
    %cst_16 = arith.constant 0.000000e+00 : f32
    %9 = vector.broadcast %cst_16 : f32 to vector<18x1x4xf32>
    %c0_17 = arith.constant 0 : index
    %c7_18 = arith.constant 7 : index
    %c0_19 = arith.constant 0 : index
    %10 = vector.load %arg12[%c0_17, %c7_18, %c0_19] : memref<18x25x4xf32, #tpu.memory_space<vmem>>, vector<18x1x4xf32>
    tpu.vector_store %arg12[%c0_17, %c7_18, %c0_19], %9 {strides = array<i32>} : memref<18x25x4xf32, #tpu.memory_space<vmem>>, vector<18x1x4xf32>,
    %c0_20 = arith.constant 0 : index
    %c24_21 = arith.constant 24 : index
    %c0_22 = arith.constant 0 : index
    %11 = vector.load %arg12[%c0_20, %c24_21, %c0_22] : memref<18x25x4xf32, #tpu.memory_space<vmem>>, vector<18x1x4xf32>
    tpu.vector_store %arg12[%c0_20, %c24_21, %c0_22], %9 {strides = array<i32>} : memref<18x25x4xf32, #tpu.memory_space<vmem>>, vector<18x1x4xf32>,
    %cst_23 = arith.constant 0.000000e+00 : f32
    %12 = vector.broadcast %cst_23 : f32 to vector<1x25x4xf32>
    %c0_24 = arith.constant 0 : index
    %c0_25 = arith.constant 0 : index
    %c0_26 = arith.constant 0 : index
    %13 = vector.load %arg13[%c0_24, %c0_25, %c0_26] : memref<18x25x4xf32, #tpu.memory_space<vmem>>, vector<1x25x4xf32>
    tpu.vector_store %arg13[%c0_24, %c0_25, %c0_26], %12 {strides = array<i32>} : memref<18x25x4xf32, #tpu.memory_space<vmem>>, vector<1x25x4xf32>,
    %c17_27 = arith.constant 17 : index
    %c0_28 = arith.constant 0 : index
    %c0_29 = arith.constant 0 : index
    %14 = vector.load %arg13[%c17_27, %c0_28, %c0_29] : memref<18x25x4xf32, #tpu.memory_space<vmem>>, vector<1x25x4xf32>
    tpu.vector_store %arg13[%c17_27, %c0_28, %c0_29], %12 {strides = array<i32>} : memref<18x25x4xf32, #tpu.memory_space<vmem>>, vector<1x25x4xf32>,
    %cst_30 = arith.constant 0.000000e+00 : f32
    %15 = vector.broadcast %cst_30 : f32 to vector<18x1x4xf32>
    %c0_31 = arith.constant 0 : index
    %c7_32 = arith.constant 7 : index
    %c0_33 = arith.constant 0 : index
    %16 = vector.load %arg13[%c0_31, %c7_32, %c0_33] : memref<18x25x4xf32, #tpu.memory_space<vmem>>, vector<18x1x4xf32>
    tpu.vector_store %arg13[%c0_31, %c7_32, %c0_33], %15 {strides = array<i32>} : memref<18x25x4xf32, #tpu.memory_space<vmem>>, vector<18x1x4xf32>,
    %c0_34 = arith.constant 0 : index
    %c24_35 = arith.constant 24 : index
    %c0_36 = arith.constant 0 : index
    %17 = vector.load %arg13[%c0_34, %c24_35, %c0_36] : memref<18x25x4xf32, #tpu.memory_space<vmem>>, vector<18x1x4xf32>
    tpu.vector_store %arg13[%c0_34, %c24_35, %c0_36], %15 {strides = array<i32>} : memref<18x25x4xf32, #tpu.memory_space<vmem>>, vector<18x1x4xf32>,
    %c0_37 = arith.constant 0 : index
    %c0_38 = arith.constant 0 : index
    %c0_39 = arith.constant 0 : index
    %c0_40 = arith.constant 0 : index
    %18 = vector.load %arg1[%c0_37, %c0_38, %c0_39, %c0_40] : memref<1x16x16x4xf32, #tpu.memory_space<vmem>>, vector<1x16x16x4xf32>
    %19 = vector.shape_cast %18 : vector<1x16x16x4xf32> to vector<16x16x4xf32>
    %c1 = arith.constant 1 : index
    %c8 = arith.constant 8 : index
    %c0_41 = arith.constant 0 : index
    %20 = vector.load %arg11[%c1, %c8, %c0_41] : memref<18x25x4xf32, #tpu.memory_space<vmem>>, vector<16x16x4xf32>
    tpu.vector_store %arg11[%c1, %c8, %c0_41], %19 {strides = array<i32>} : memref<18x25x4xf32, #tpu.memory_space<vmem>>, vector<16x16x4xf32>,
    %c0_42 = arith.constant 0 : index
    %c0_43 = arith.constant 0 : index
    %c0_44 = arith.constant 0 : index
    %c0_45 = arith.constant 0 : index
    %21 = vector.load %arg2[%c0_42, %c0_43, %c0_44, %c0_45] : memref<1x16x16x4xf32, #tpu.memory_space<vmem>>, vector<1x16x16x4xf32>
    %22 = vector.shape_cast %21 : vector<1x16x16x4xf32> to vector<16x16x4xf32>
    %c1_46 = arith.constant 1 : index
    %c8_47 = arith.constant 8 : index
    %c0_48 = arith.constant 0 : index
    %23 = vector.load %arg12[%c1_46, %c8_47, %c0_48] : memref<18x25x4xf32, #tpu.memory_space<vmem>>, vector<16x16x4xf32>
    tpu.vector_store %arg12[%c1_46, %c8_47, %c0_48], %22 {strides = array<i32>} : memref<18x25x4xf32, #tpu.memory_space<vmem>>, vector<16x16x4xf32>,
    %c0_49 = arith.constant 0 : index
    %c7_50 = arith.constant 7 : index
    %c0_51 = arith.constant 0 : index
    %24 = vector.load %arg11[%c0_49, %c7_50, %c0_51] : memref<18x25x4xf32, #tpu.memory_space<vmem>>, vector<18x18x4xf32>
    %c0_52 = arith.constant 0 : index
    %c7_53 = arith.constant 7 : index
    %c0_54 = arith.constant 0 : index
    %25 = vector.load %arg12[%c0_52, %c7_53, %c0_54] : memref<18x25x4xf32, #tpu.memory_space<vmem>>, vector<18x18x4xf32>
    %cst_55 = arith.constant 0.000000e+00 : f32
    %26 = vector.broadcast %cst_55 : f32 to vector<256x4xf32>
    %27 = vector.extract_strided_slice %24 {offsets = [0, 0, 0], sizes = [16, 16, 4], strides = [1, 1, 1]} : vector<18x18x4xf32> to vector<16x16x4xf32>
    %28 = vector.shape_cast %27 : vector<16x16x4xf32> to vector<256x4xf32>
    %29 = vector.extract_strided_slice %25 {offsets = [0, 0, 0], sizes = [16, 16, 4], strides = [1, 1, 1]} : vector<18x18x4xf32> to vector<16x16x4xf32>
    %30 = vector.shape_cast %29 : vector<16x16x4xf32> to vector<256x4xf32>
    %c0_56 = arith.constant 0 : index
    %c0_57 = arith.constant 0 : index
    %c0_58 = arith.constant 0 : index
    %c0_59 = arith.constant 0 : index
    %31 = vector.load %arg3[%c0_56, %c0_57, %c0_58, %c0_59] : memref<3x3x4x4xf32, #tpu.memory_space<vmem>>, vector<1x1x4x4xf32>
    %32 = vector.shape_cast %31 : vector<1x1x4x4xf32> to vector<4x4xf32>
    %cst_60 = arith.constant dense<0.000000e+00> : vector<256x4xf32>
    %33 = tpu.matmul %28, %32, %cst_60 {dimension_numbers = #tpu.dot_dimension_numbers<[1], [0], [0], [1], [0, 0, 1, 1], [], []>} : vector<256x4xf32>, vector<4x4xf32>, vector<256x4xf32> -> vector<256x4xf32>
    %34 = arith.addf %26, %33 : vector<256x4xf32>
    %c0_61 = arith.constant 0 : index
    %c0_62 = arith.constant 0 : index
    %c0_63 = arith.constant 0 : index
    %c0_64 = arith.constant 0 : index
    %35 = vector.load %arg4[%c0_61, %c0_62, %c0_63, %c0_64] : memref<3x3x4x4xf32, #tpu.memory_space<vmem>>, vector<1x1x4x4xf32>
    %36 = vector.shape_cast %35 : vector<1x1x4x4xf32> to vector<4x4xf32>
    %cst_65 = arith.constant dense<0.000000e+00> : vector<256x4xf32>
    %37 = tpu.matmul %30, %36, %cst_65 {dimension_numbers = #tpu.dot_dimension_numbers<[1], [0], [0], [1], [0, 0, 1, 1], [], []>} : vector<256x4xf32>, vector<4x4xf32>, vector<256x4xf32> -> vector<256x4xf32>
    %38 = arith.addf %34, %37 : vector<256x4xf32>
    %39 = vector.extract_strided_slice %24 {offsets = [0, 1, 0], sizes = [16, 16, 4], strides = [1, 1, 1]} : vector<18x18x4xf32> to vector<16x16x4xf32>
    %40 = vector.shape_cast %39 : vector<16x16x4xf32> to vector<256x4xf32>
    %41 = vector.extract_strided_slice %25 {offsets = [0, 1, 0], sizes = [16, 16, 4], strides = [1, 1, 1]} : vector<18x18x4xf32> to vector<16x16x4xf32>
    %42 = vector.shape_cast %41 : vector<16x16x4xf32> to vector<256x4xf32>
    %c0_66 = arith.constant 0 : index
    %c1_67 = arith.constant 1 : index
    %c0_68 = arith.constant 0 : index
    %c0_69 = arith.constant 0 : index
    %43 = vector.load %arg3[%c0_66, %c1_67, %c0_68, %c0_69] : memref<3x3x4x4xf32, #tpu.memory_space<vmem>>, vector<1x1x4x4xf32>
    %44 = vector.shape_cast %43 : vector<1x1x4x4xf32> to vector<4x4xf32>
    %cst_70 = arith.constant dense<0.000000e+00> : vector<256x4xf32>
    %45 = tpu.matmul %40, %44, %cst_70 {dimension_numbers = #tpu.dot_dimension_numbers<[1], [0], [0], [1], [0, 0, 1, 1], [], []>} : vector<256x4xf32>, vector<4x4xf32>, vector<256x4xf32> -> vector<256x4xf32>
    %46 = arith.addf %38, %45 : vector<256x4xf32>
    %c0_71 = arith.constant 0 : index
    %c1_72 = arith.constant 1 : index
    %c0_73 = arith.constant 0 : index
    %c0_74 = arith.constant 0 : index
    %47 = vector.load %arg4[%c0_71, %c1_72, %c0_73, %c0_74] : memref<3x3x4x4xf32, #tpu.memory_space<vmem>>, vector<1x1x4x4xf32>
    %48 = vector.shape_cast %47 : vector<1x1x4x4xf32> to vector<4x4xf32>
    %cst_75 = arith.constant dense<0.000000e+00> : vector<256x4xf32>
    %49 = tpu.matmul %42, %48, %cst_75 {dimension_numbers = #tpu.dot_dimension_numbers<[1], [0], [0], [1], [0, 0, 1, 1], [], []>} : vector<256x4xf32>, vector<4x4xf32>, vector<256x4xf32> -> vector<256x4xf32>
    %50 = arith.addf %46, %49 : vector<256x4xf32>
    %51 = vector.extract_strided_slice %24 {offsets = [0, 2, 0], sizes = [16, 16, 4], strides = [1, 1, 1]} : vector<18x18x4xf32> to vector<16x16x4xf32>
    %52 = vector.shape_cast %51 : vector<16x16x4xf32> to vector<256x4xf32>
    %53 = vector.extract_strided_slice %25 {offsets = [0, 2, 0], sizes = [16, 16, 4], strides = [1, 1, 1]} : vector<18x18x4xf32> to vector<16x16x4xf32>
    %54 = vector.shape_cast %53 : vector<16x16x4xf32> to vector<256x4xf32>
    %c0_76 = arith.constant 0 : index
    %c2 = arith.constant 2 : index
    %c0_77 = arith.constant 0 : index
    %c0_78 = arith.constant 0 : index
    %55 = vector.load %arg3[%c0_76, %c2, %c0_77, %c0_78] : memref<3x3x4x4xf32, #tpu.memory_space<vmem>>, vector<1x1x4x4xf32>
    %56 = vector.shape_cast %55 : vector<1x1x4x4xf32> to vector<4x4xf32>
    %cst_79 = arith.constant dense<0.000000e+00> : vector<256x4xf32>
    %57 = tpu.matmul %52, %56, %cst_79 {dimension_numbers = #tpu.dot_dimension_numbers<[1], [0], [0], [1], [0, 0, 1, 1], [], []>} : vector<256x4xf32>, vector<4x4xf32>, vector<256x4xf32> -> vector<256x4xf32>
    %58 = arith.addf %50, %57 : vector<256x4xf32>
    %c0_80 = arith.constant 0 : index
    %c2_81 = arith.constant 2 : index
    %c0_82 = arith.constant 0 : index
    %c0_83 = arith.constant 0 : index
    %59 = vector.load %arg4[%c0_80, %c2_81, %c0_82, %c0_83] : memref<3x3x4x4xf32, #tpu.memory_space<vmem>>, vector<1x1x4x4xf32>
    %60 = vector.shape_cast %59 : vector<1x1x4x4xf32> to vector<4x4xf32>
    %cst_84 = arith.constant dense<0.000000e+00> : vector<256x4xf32>
    %61 = tpu.matmul %54, %60, %cst_84 {dimension_numbers = #tpu.dot_dimension_numbers<[1], [0], [0], [1], [0, 0, 1, 1], [], []>} : vector<256x4xf32>, vector<4x4xf32>, vector<256x4xf32> -> vector<256x4xf32>
    %62 = arith.addf %58, %61 : vector<256x4xf32>
    %63 = vector.extract_strided_slice %24 {offsets = [1, 0, 0], sizes = [16, 16, 4], strides = [1, 1, 1]} : vector<18x18x4xf32> to vector<16x16x4xf32>
    %64 = vector.shape_cast %63 : vector<16x16x4xf32> to vector<256x4xf32>
    %65 = vector.extract_strided_slice %25 {offsets = [1, 0, 0], sizes = [16, 16, 4], strides = [1, 1, 1]} : vector<18x18x4xf32> to vector<16x16x4xf32>
    %66 = vector.shape_cast %65 : vector<16x16x4xf32> to vector<256x4xf32>
    %c1_85 = arith.constant 1 : index
    %c0_86 = arith.constant 0 : index
    %c0_87 = arith.constant 0 : index
    %c0_88 = arith.constant 0 : index
    %67 = vector.load %arg3[%c1_85, %c0_86, %c0_87, %c0_88] : memref<3x3x4x4xf32, #tpu.memory_space<vmem>>, vector<1x1x4x4xf32>
    %68 = vector.shape_cast %67 : vector<1x1x4x4xf32> to vector<4x4xf32>
    %cst_89 = arith.constant dense<0.000000e+00> : vector<256x4xf32>
    %69 = tpu.matmul %64, %68, %cst_89 {dimension_numbers = #tpu.dot_dimension_numbers<[1], [0], [0], [1], [0, 0, 1, 1], [], []>} : vector<256x4xf32>, vector<4x4xf32>, vector<256x4xf32> -> vector<256x4xf32>
    %70 = arith.addf %62, %69 : vector<256x4xf32>
    %c1_90 = arith.constant 1 : index
    %c0_91 = arith.constant 0 : index
    %c0_92 = arith.constant 0 : index
    %c0_93 = arith.constant 0 : index
    %71 = vector.load %arg4[%c1_90, %c0_91, %c0_92, %c0_93] : memref<3x3x4x4xf32, #tpu.memory_space<vmem>>, vector<1x1x4x4xf32>
    %72 = vector.shape_cast %71 : vector<1x1x4x4xf32> to vector<4x4xf32>
    %cst_94 = arith.constant dense<0.000000e+00> : vector<256x4xf32>
    %73 = tpu.matmul %66, %72, %cst_94 {dimension_numbers = #tpu.dot_dimension_numbers<[1], [0], [0], [1], [0, 0, 1, 1], [], []>} : vector<256x4xf32>, vector<4x4xf32>, vector<256x4xf32> -> vector<256x4xf32>
    %74 = arith.addf %70, %73 : vector<256x4xf32>
    %75 = vector.extract_strided_slice %24 {offsets = [1, 1, 0], sizes = [16, 16, 4], strides = [1, 1, 1]} : vector<18x18x4xf32> to vector<16x16x4xf32>
    %76 = vector.shape_cast %75 : vector<16x16x4xf32> to vector<256x4xf32>
    %77 = vector.extract_strided_slice %25 {offsets = [1, 1, 0], sizes = [16, 16, 4], strides = [1, 1, 1]} : vector<18x18x4xf32> to vector<16x16x4xf32>
    %78 = vector.shape_cast %77 : vector<16x16x4xf32> to vector<256x4xf32>
    %c1_95 = arith.constant 1 : index
    %c1_96 = arith.constant 1 : index
    %c0_97 = arith.constant 0 : index
    %c0_98 = arith.constant 0 : index
    %79 = vector.load %arg3[%c1_95, %c1_96, %c0_97, %c0_98] : memref<3x3x4x4xf32, #tpu.memory_space<vmem>>, vector<1x1x4x4xf32>
    %80 = vector.shape_cast %79 : vector<1x1x4x4xf32> to vector<4x4xf32>
    %cst_99 = arith.constant dense<0.000000e+00> : vector<256x4xf32>
    %81 = tpu.matmul %76, %80, %cst_99 {dimension_numbers = #tpu.dot_dimension_numbers<[1], [0], [0], [1], [0, 0, 1, 1], [], []>} : vector<256x4xf32>, vector<4x4xf32>, vector<256x4xf32> -> vector<256x4xf32>
    %82 = arith.addf %74, %81 : vector<256x4xf32>
    %c1_100 = arith.constant 1 : index
    %c1_101 = arith.constant 1 : index
    %c0_102 = arith.constant 0 : index
    %c0_103 = arith.constant 0 : index
    %83 = vector.load %arg4[%c1_100, %c1_101, %c0_102, %c0_103] : memref<3x3x4x4xf32, #tpu.memory_space<vmem>>, vector<1x1x4x4xf32>
    %84 = vector.shape_cast %83 : vector<1x1x4x4xf32> to vector<4x4xf32>
    %cst_104 = arith.constant dense<0.000000e+00> : vector<256x4xf32>
    %85 = tpu.matmul %78, %84, %cst_104 {dimension_numbers = #tpu.dot_dimension_numbers<[1], [0], [0], [1], [0, 0, 1, 1], [], []>} : vector<256x4xf32>, vector<4x4xf32>, vector<256x4xf32> -> vector<256x4xf32>
    %86 = arith.addf %82, %85 : vector<256x4xf32>
    %87 = vector.extract_strided_slice %24 {offsets = [1, 2, 0], sizes = [16, 16, 4], strides = [1, 1, 1]} : vector<18x18x4xf32> to vector<16x16x4xf32>
    %88 = vector.shape_cast %87 : vector<16x16x4xf32> to vector<256x4xf32>
    %89 = vector.extract_strided_slice %25 {offsets = [1, 2, 0], sizes = [16, 16, 4], strides = [1, 1, 1]} : vector<18x18x4xf32> to vector<16x16x4xf32>
    %90 = vector.shape_cast %89 : vector<16x16x4xf32> to vector<256x4xf32>
    %c1_105 = arith.constant 1 : index
    %c2_106 = arith.constant 2 : index
    %c0_107 = arith.constant 0 : index
    %c0_108 = arith.constant 0 : index
    %91 = vector.load %arg3[%c1_105, %c2_106, %c0_107, %c0_108] : memref<3x3x4x4xf32, #tpu.memory_space<vmem>>, vector<1x1x4x4xf32>
    %92 = vector.shape_cast %91 : vector<1x1x4x4xf32> to vector<4x4xf32>
    %cst_109 = arith.constant dense<0.000000e+00> : vector<256x4xf32>
    %93 = tpu.matmul %88, %92, %cst_109 {dimension_numbers = #tpu.dot_dimension_numbers<[1], [0], [0], [1], [0, 0, 1, 1], [], []>} : vector<256x4xf32>, vector<4x4xf32>, vector<256x4xf32> -> vector<256x4xf32>
    %94 = arith.addf %86, %93 : vector<256x4xf32>
    %c1_110 = arith.constant 1 : index
    %c2_111 = arith.constant 2 : index
    %c0_112 = arith.constant 0 : index
    %c0_113 = arith.constant 0 : index
    %95 = vector.load %arg4[%c1_110, %c2_111, %c0_112, %c0_113] : memref<3x3x4x4xf32, #tpu.memory_space<vmem>>, vector<1x1x4x4xf32>
    %96 = vector.shape_cast %95 : vector<1x1x4x4xf32> to vector<4x4xf32>
    %cst_114 = arith.constant dense<0.000000e+00> : vector<256x4xf32>
    %97 = tpu.matmul %90, %96, %cst_114 {dimension_numbers = #tpu.dot_dimension_numbers<[1], [0], [0], [1], [0, 0, 1, 1], [], []>} : vector<256x4xf32>, vector<4x4xf32>, vector<256x4xf32> -> vector<256x4xf32>
    %98 = arith.addf %94, %97 : vector<256x4xf32>
    %99 = vector.extract_strided_slice %24 {offsets = [2, 0, 0], sizes = [16, 16, 4], strides = [1, 1, 1]} : vector<18x18x4xf32> to vector<16x16x4xf32>
    %100 = vector.shape_cast %99 : vector<16x16x4xf32> to vector<256x4xf32>
    %101 = vector.extract_strided_slice %25 {offsets = [2, 0, 0], sizes = [16, 16, 4], strides = [1, 1, 1]} : vector<18x18x4xf32> to vector<16x16x4xf32>
    %102 = vector.shape_cast %101 : vector<16x16x4xf32> to vector<256x4xf32>
    %c2_115 = arith.constant 2 : index
    %c0_116 = arith.constant 0 : index
    %c0_117 = arith.constant 0 : index
    %c0_118 = arith.constant 0 : index
    %103 = vector.load %arg3[%c2_115, %c0_116, %c0_117, %c0_118] : memref<3x3x4x4xf32, #tpu.memory_space<vmem>>, vector<1x1x4x4xf32>
    %104 = vector.shape_cast %103 : vector<1x1x4x4xf32> to vector<4x4xf32>
    %cst_119 = arith.constant dense<0.000000e+00> : vector<256x4xf32>
    %105 = tpu.matmul %100, %104, %cst_119 {dimension_numbers = #tpu.dot_dimension_numbers<[1], [0], [0], [1], [0, 0, 1, 1], [], []>} : vector<256x4xf32>, vector<4x4xf32>, vector<256x4xf32> -> vector<256x4xf32>
    %106 = arith.addf %98, %105 : vector<256x4xf32>
    %c2_120 = arith.constant 2 : index
    %c0_121 = arith.constant 0 : index
    %c0_122 = arith.constant 0 : index
    %c0_123 = arith.constant 0 : index
    %107 = vector.load %arg4[%c2_120, %c0_121, %c0_122, %c0_123] : memref<3x3x4x4xf32, #tpu.memory_space<vmem>>, vector<1x1x4x4xf32>
    %108 = vector.shape_cast %107 : vector<1x1x4x4xf32> to vector<4x4xf32>
    %cst_124 = arith.constant dense<0.000000e+00> : vector<256x4xf32>
    %109 = tpu.matmul %102, %108, %cst_124 {dimension_numbers = #tpu.dot_dimension_numbers<[1], [0], [0], [1], [0, 0, 1, 1], [], []>} : vector<256x4xf32>, vector<4x4xf32>, vector<256x4xf32> -> vector<256x4xf32>
    %110 = arith.addf %106, %109 : vector<256x4xf32>
    %111 = vector.extract_strided_slice %24 {offsets = [2, 1, 0], sizes = [16, 16, 4], strides = [1, 1, 1]} : vector<18x18x4xf32> to vector<16x16x4xf32>
    %112 = vector.shape_cast %111 : vector<16x16x4xf32> to vector<256x4xf32>
    %113 = vector.extract_strided_slice %25 {offsets = [2, 1, 0], sizes = [16, 16, 4], strides = [1, 1, 1]} : vector<18x18x4xf32> to vector<16x16x4xf32>
    %114 = vector.shape_cast %113 : vector<16x16x4xf32> to vector<256x4xf32>
    %c2_125 = arith.constant 2 : index
    %c1_126 = arith.constant 1 : index
    %c0_127 = arith.constant 0 : index
    %c0_128 = arith.constant 0 : index
    %115 = vector.load %arg3[%c2_125, %c1_126, %c0_127, %c0_128] : memref<3x3x4x4xf32, #tpu.memory_space<vmem>>, vector<1x1x4x4xf32>
    %116 = vector.shape_cast %115 : vector<1x1x4x4xf32> to vector<4x4xf32>
    %cst_129 = arith.constant dense<0.000000e+00> : vector<256x4xf32>
    %117 = tpu.matmul %112, %116, %cst_129 {dimension_numbers = #tpu.dot_dimension_numbers<[1], [0], [0], [1], [0, 0, 1, 1], [], []>} : vector<256x4xf32>, vector<4x4xf32>, vector<256x4xf32> -> vector<256x4xf32>
    %118 = arith.addf %110, %117 : vector<256x4xf32>
    %c2_130 = arith.constant 2 : index
    %c1_131 = arith.constant 1 : index
    %c0_132 = arith.constant 0 : index
    %c0_133 = arith.constant 0 : index
    %119 = vector.load %arg4[%c2_130, %c1_131, %c0_132, %c0_133] : memref<3x3x4x4xf32, #tpu.memory_space<vmem>>, vector<1x1x4x4xf32>
    %120 = vector.shape_cast %119 : vector<1x1x4x4xf32> to vector<4x4xf32>
    %cst_134 = arith.constant dense<0.000000e+00> : vector<256x4xf32>
    %121 = tpu.matmul %114, %120, %cst_134 {dimension_numbers = #tpu.dot_dimension_numbers<[1], [0], [0], [1], [0, 0, 1, 1], [], []>} : vector<256x4xf32>, vector<4x4xf32>, vector<256x4xf32> -> vector<256x4xf32>
    %122 = arith.addf %118, %121 : vector<256x4xf32>
    %123 = vector.extract_strided_slice %24 {offsets = [2, 2, 0], sizes = [16, 16, 4], strides = [1, 1, 1]} : vector<18x18x4xf32> to vector<16x16x4xf32>
    %124 = vector.shape_cast %123 : vector<16x16x4xf32> to vector<256x4xf32>
    %125 = vector.extract_strided_slice %25 {offsets = [2, 2, 0], sizes = [16, 16, 4], strides = [1, 1, 1]} : vector<18x18x4xf32> to vector<16x16x4xf32>
    %126 = vector.shape_cast %125 : vector<16x16x4xf32> to vector<256x4xf32>
    %c2_135 = arith.constant 2 : index
    %c2_136 = arith.constant 2 : index
    %c0_137 = arith.constant 0 : index
    %c0_138 = arith.constant 0 : index
    %127 = vector.load %arg3[%c2_135, %c2_136, %c0_137, %c0_138] : memref<3x3x4x4xf32, #tpu.memory_space<vmem>>, vector<1x1x4x4xf32>
    %128 = vector.shape_cast %127 : vector<1x1x4x4xf32> to vector<4x4xf32>
    %cst_139 = arith.constant dense<0.000000e+00> : vector<256x4xf32>
    %129 = tpu.matmul %124, %128, %cst_139 {dimension_numbers = #tpu.dot_dimension_numbers<[1], [0], [0], [1], [0, 0, 1, 1], [], []>} : vector<256x4xf32>, vector<4x4xf32>, vector<256x4xf32> -> vector<256x4xf32>
    %130 = arith.addf %122, %129 : vector<256x4xf32>
    %c2_140 = arith.constant 2 : index
    %c2_141 = arith.constant 2 : index
    %c0_142 = arith.constant 0 : index
    %c0_143 = arith.constant 0 : index
    %131 = vector.load %arg4[%c2_140, %c2_141, %c0_142, %c0_143] : memref<3x3x4x4xf32, #tpu.memory_space<vmem>>, vector<1x1x4x4xf32>
    %132 = vector.shape_cast %131 : vector<1x1x4x4xf32> to vector<4x4xf32>
    %cst_144 = arith.constant dense<0.000000e+00> : vector<256x4xf32>
    %133 = tpu.matmul %126, %132, %cst_144 {dimension_numbers = #tpu.dot_dimension_numbers<[1], [0], [0], [1], [0, 0, 1, 1], [], []>} : vector<256x4xf32>, vector<4x4xf32>, vector<256x4xf32> -> vector<256x4xf32>
    %134 = arith.addf %130, %133 : vector<256x4xf32>
    %c0_145 = arith.constant 0 : index
    %c0_146 = arith.constant 0 : index
    %135 = vector.load %arg5[%c0_145, %c0_146] : memref<1x4xf32, #tpu.memory_space<vmem>>, vector<1x4xf32>
    %136 = vector.shape_cast %135 : vector<1x4xf32> to vector<4xf32>
    %137 = vector.shape_cast %136 : vector<4xf32> to vector<1x4xf32>
    %138 = vector.broadcast %137 : vector<1x4xf32> to vector<256x4xf32>
    %139 = arith.mulf %134, %138 : vector<256x4xf32>
    %c0_147 = arith.constant 0 : index
    %c0_148 = arith.constant 0 : index
    %140 = vector.load %arg6[%c0_147, %c0_148] : memref<1x4xf32, #tpu.memory_space<vmem>>, vector<1x4xf32>
    %141 = vector.shape_cast %140 : vector<1x4xf32> to vector<4xf32>
    %142 = vector.shape_cast %141 : vector<4xf32> to vector<1x4xf32>
    %143 = vector.broadcast %142 : vector<1x4xf32> to vector<256x4xf32>
    %144 = arith.addf %139, %143 : vector<256x4xf32>
    %145 = arith.negf %144 : vector<256x4xf32>
    %146 = math.exp %145 : vector<256x4xf32>
    %cst_149 = arith.constant 1.000000e+00 : f32
    %147 = vector.broadcast %cst_149 : f32 to vector<256x4xf32>
    %148 = arith.addf %147, %146 : vector<256x4xf32>
    %149 = arith.divf %147, %148 : vector<256x4xf32>
    %150 = arith.mulf %144, %149 : vector<256x4xf32>
    %151 = vector.shape_cast %150 : vector<256x4xf32> to vector<16x16x4xf32>
    %c1_150 = arith.constant 1 : index
    %c8_151 = arith.constant 8 : index
    %c0_152 = arith.constant 0 : index
    %152 = vector.load %arg13[%c1_150, %c8_151, %c0_152] : memref<18x25x4xf32, #tpu.memory_space<vmem>>, vector<16x16x4xf32>
    tpu.vector_store %arg13[%c1_150, %c8_151, %c0_152], %151 {strides = array<i32>} : memref<18x25x4xf32, #tpu.memory_space<vmem>>, vector<16x16x4xf32>,
    %c0_153 = arith.constant 0 : index
    %c7_154 = arith.constant 7 : index
    %c0_155 = arith.constant 0 : index
    %153 = vector.load %arg13[%c0_153, %c7_154, %c0_155] : memref<18x25x4xf32, #tpu.memory_space<vmem>>, vector<18x18x4xf32>
    %cst_156 = arith.constant 0.000000e+00 : f32
    %154 = vector.broadcast %cst_156 : f32 to vector<256x8xf32>
    %155 = vector.extract_strided_slice %153 {offsets = [0, 0, 0], sizes = [16, 16, 4], strides = [1, 1, 1]} : vector<18x18x4xf32> to vector<16x16x4xf32>
    %156 = vector.shape_cast %155 : vector<16x16x4xf32> to vector<256x4xf32>
    %c0_157 = arith.constant 0 : index
    %c0_158 = arith.constant 0 : index
    %c0_159 = arith.constant 0 : index
    %c0_160 = arith.constant 0 : index
    %157 = vector.load %arg7[%c0_157, %c0_158, %c0_159, %c0_160] : memref<3x3x4x8xf32, #tpu.memory_space<vmem>>, vector<1x1x4x8xf32>
    %158 = vector.shape_cast %157 : vector<1x1x4x8xf32> to vector<4x8xf32>
    %cst_161 = arith.constant dense<0.000000e+00> : vector<256x8xf32>
    %159 = tpu.matmul %156, %158, %cst_161 {dimension_numbers = #tpu.dot_dimension_numbers<[1], [0], [0], [1], [0, 0, 1, 1], [], []>} : vector<256x4xf32>, vector<4x8xf32>, vector<256x8xf32> -> vector<256x8xf32>
    %160 = arith.addf %154, %159 : vector<256x8xf32>
    %161 = vector.extract_strided_slice %153 {offsets = [0, 1, 0], sizes = [16, 16, 4], strides = [1, 1, 1]} : vector<18x18x4xf32> to vector<16x16x4xf32>
    %162 = vector.shape_cast %161 : vector<16x16x4xf32> to vector<256x4xf32>
    %c0_162 = arith.constant 0 : index
    %c1_163 = arith.constant 1 : index
    %c0_164 = arith.constant 0 : index
    %c0_165 = arith.constant 0 : index
    %163 = vector.load %arg7[%c0_162, %c1_163, %c0_164, %c0_165] : memref<3x3x4x8xf32, #tpu.memory_space<vmem>>, vector<1x1x4x8xf32>
    %164 = vector.shape_cast %163 : vector<1x1x4x8xf32> to vector<4x8xf32>
    %cst_166 = arith.constant dense<0.000000e+00> : vector<256x8xf32>
    %165 = tpu.matmul %162, %164, %cst_166 {dimension_numbers = #tpu.dot_dimension_numbers<[1], [0], [0], [1], [0, 0, 1, 1], [], []>} : vector<256x4xf32>, vector<4x8xf32>, vector<256x8xf32> -> vector<256x8xf32>
    %166 = arith.addf %160, %165 : vector<256x8xf32>
    %167 = vector.extract_strided_slice %153 {offsets = [0, 2, 0], sizes = [16, 16, 4], strides = [1, 1, 1]} : vector<18x18x4xf32> to vector<16x16x4xf32>
    %168 = vector.shape_cast %167 : vector<16x16x4xf32> to vector<256x4xf32>
    %c0_167 = arith.constant 0 : index
    %c2_168 = arith.constant 2 : index
    %c0_169 = arith.constant 0 : index
    %c0_170 = arith.constant 0 : index
    %169 = vector.load %arg7[%c0_167, %c2_168, %c0_169, %c0_170] : memref<3x3x4x8xf32, #tpu.memory_space<vmem>>, vector<1x1x4x8xf32>
    %170 = vector.shape_cast %169 : vector<1x1x4x8xf32> to vector<4x8xf32>
    %cst_171 = arith.constant dense<0.000000e+00> : vector<256x8xf32>
    %171 = tpu.matmul %168, %170, %cst_171 {dimension_numbers = #tpu.dot_dimension_numbers<[1], [0], [0], [1], [0, 0, 1, 1], [], []>} : vector<256x4xf32>, vector<4x8xf32>, vector<256x8xf32> -> vector<256x8xf32>
    %172 = arith.addf %166, %171 : vector<256x8xf32>
    %173 = vector.extract_strided_slice %153 {offsets = [1, 0, 0], sizes = [16, 16, 4], strides = [1, 1, 1]} : vector<18x18x4xf32> to vector<16x16x4xf32>
    %174 = vector.shape_cast %173 : vector<16x16x4xf32> to vector<256x4xf32>
    %c1_172 = arith.constant 1 : index
    %c0_173 = arith.constant 0 : index
    %c0_174 = arith.constant 0 : index
    %c0_175 = arith.constant 0 : index
    %175 = vector.load %arg7[%c1_172, %c0_173, %c0_174, %c0_175] : memref<3x3x4x8xf32, #tpu.memory_space<vmem>>, vector<1x1x4x8xf32>
    %176 = vector.shape_cast %175 : vector<1x1x4x8xf32> to vector<4x8xf32>
    %cst_176 = arith.constant dense<0.000000e+00> : vector<256x8xf32>
    %177 = tpu.matmul %174, %176, %cst_176 {dimension_numbers = #tpu.dot_dimension_numbers<[1], [0], [0], [1], [0, 0, 1, 1], [], []>} : vector<256x4xf32>, vector<4x8xf32>, vector<256x8xf32> -> vector<256x8xf32>
    %178 = arith.addf %172, %177 : vector<256x8xf32>
    %179 = vector.extract_strided_slice %153 {offsets = [1, 1, 0], sizes = [16, 16, 4], strides = [1, 1, 1]} : vector<18x18x4xf32> to vector<16x16x4xf32>
    %180 = vector.shape_cast %179 : vector<16x16x4xf32> to vector<256x4xf32>
    %c1_177 = arith.constant 1 : index
    %c1_178 = arith.constant 1 : index
    %c0_179 = arith.constant 0 : index
    %c0_180 = arith.constant 0 : index
    %181 = vector.load %arg7[%c1_177, %c1_178, %c0_179, %c0_180] : memref<3x3x4x8xf32, #tpu.memory_space<vmem>>, vector<1x1x4x8xf32>
    %182 = vector.shape_cast %181 : vector<1x1x4x8xf32> to vector<4x8xf32>
    %cst_181 = arith.constant dense<0.000000e+00> : vector<256x8xf32>
    %183 = tpu.matmul %180, %182, %cst_181 {dimension_numbers = #tpu.dot_dimension_numbers<[1], [0], [0], [1], [0, 0, 1, 1], [], []>} : vector<256x4xf32>, vector<4x8xf32>, vector<256x8xf32> -> vector<256x8xf32>
    %184 = arith.addf %178, %183 : vector<256x8xf32>
    %185 = vector.extract_strided_slice %153 {offsets = [1, 2, 0], sizes = [16, 16, 4], strides = [1, 1, 1]} : vector<18x18x4xf32> to vector<16x16x4xf32>
    %186 = vector.shape_cast %185 : vector<16x16x4xf32> to vector<256x4xf32>
    %c1_182 = arith.constant 1 : index
    %c2_183 = arith.constant 2 : index
    %c0_184 = arith.constant 0 : index
    %c0_185 = arith.constant 0 : index
    %187 = vector.load %arg7[%c1_182, %c2_183, %c0_184, %c0_185] : memref<3x3x4x8xf32, #tpu.memory_space<vmem>>, vector<1x1x4x8xf32>
    %188 = vector.shape_cast %187 : vector<1x1x4x8xf32> to vector<4x8xf32>
    %cst_186 = arith.constant dense<0.000000e+00> : vector<256x8xf32>
    %189 = tpu.matmul %186, %188, %cst_186 {dimension_numbers = #tpu.dot_dimension_numbers<[1], [0], [0], [1], [0, 0, 1, 1], [], []>} : vector<256x4xf32>, vector<4x8xf32>, vector<256x8xf32> -> vector<256x8xf32>
    %190 = arith.addf %184, %189 : vector<256x8xf32>
    %191 = vector.extract_strided_slice %153 {offsets = [2, 0, 0], sizes = [16, 16, 4], strides = [1, 1, 1]} : vector<18x18x4xf32> to vector<16x16x4xf32>
    %192 = vector.shape_cast %191 : vector<16x16x4xf32> to vector<256x4xf32>
    %c2_187 = arith.constant 2 : index
    %c0_188 = arith.constant 0 : index
    %c0_189 = arith.constant 0 : index
    %c0_190 = arith.constant 0 : index
    %193 = vector.load %arg7[%c2_187, %c0_188, %c0_189, %c0_190] : memref<3x3x4x8xf32, #tpu.memory_space<vmem>>, vector<1x1x4x8xf32>
    %194 = vector.shape_cast %193 : vector<1x1x4x8xf32> to vector<4x8xf32>
    %cst_191 = arith.constant dense<0.000000e+00> : vector<256x8xf32>
    %195 = tpu.matmul %192, %194, %cst_191 {dimension_numbers = #tpu.dot_dimension_numbers<[1], [0], [0], [1], [0, 0, 1, 1], [], []>} : vector<256x4xf32>, vector<4x8xf32>, vector<256x8xf32> -> vector<256x8xf32>
    %196 = arith.addf %190, %195 : vector<256x8xf32>
    %197 = vector.extract_strided_slice %153 {offsets = [2, 1, 0], sizes = [16, 16, 4], strides = [1, 1, 1]} : vector<18x18x4xf32> to vector<16x16x4xf32>
    %198 = vector.shape_cast %197 : vector<16x16x4xf32> to vector<256x4xf32>
    %c2_192 = arith.constant 2 : index
    %c1_193 = arith.constant 1 : index
    %c0_194 = arith.constant 0 : index
    %c0_195 = arith.constant 0 : index
    %199 = vector.load %arg7[%c2_192, %c1_193, %c0_194, %c0_195] : memref<3x3x4x8xf32, #tpu.memory_space<vmem>>, vector<1x1x4x8xf32>
    %200 = vector.shape_cast %199 : vector<1x1x4x8xf32> to vector<4x8xf32>
    %cst_196 = arith.constant dense<0.000000e+00> : vector<256x8xf32>
    %201 = tpu.matmul %198, %200, %cst_196 {dimension_numbers = #tpu.dot_dimension_numbers<[1], [0], [0], [1], [0, 0, 1, 1], [], []>} : vector<256x4xf32>, vector<4x8xf32>, vector<256x8xf32> -> vector<256x8xf32>
    %202 = arith.addf %196, %201 : vector<256x8xf32>
    %203 = vector.extract_strided_slice %153 {offsets = [2, 2, 0], sizes = [16, 16, 4], strides = [1, 1, 1]} : vector<18x18x4xf32> to vector<16x16x4xf32>
    %204 = vector.shape_cast %203 : vector<16x16x4xf32> to vector<256x4xf32>
    %c2_197 = arith.constant 2 : index
    %c2_198 = arith.constant 2 : index
    %c0_199 = arith.constant 0 : index
    %c0_200 = arith.constant 0 : index
    %205 = vector.load %arg7[%c2_197, %c2_198, %c0_199, %c0_200] : memref<3x3x4x8xf32, #tpu.memory_space<vmem>>, vector<1x1x4x8xf32>
    %206 = vector.shape_cast %205 : vector<1x1x4x8xf32> to vector<4x8xf32>
    %cst_201 = arith.constant dense<0.000000e+00> : vector<256x8xf32>
    %207 = tpu.matmul %204, %206, %cst_201 {dimension_numbers = #tpu.dot_dimension_numbers<[1], [0], [0], [1], [0, 0, 1, 1], [], []>} : vector<256x4xf32>, vector<4x8xf32>, vector<256x8xf32> -> vector<256x8xf32>
    %208 = arith.addf %202, %207 : vector<256x8xf32>
    %c0_202 = arith.constant 0 : index
    %c0_203 = arith.constant 0 : index
    %209 = vector.load %arg8[%c0_202, %c0_203] : memref<1x8xf32, #tpu.memory_space<vmem>>, vector<1x8xf32>
    %210 = vector.shape_cast %209 : vector<1x8xf32> to vector<8xf32>
    %211 = vector.shape_cast %210 : vector<8xf32> to vector<1x8xf32>
    %212 = vector.broadcast %211 : vector<1x8xf32> to vector<256x8xf32>
    %213 = arith.mulf %208, %212 : vector<256x8xf32>
    %c0_204 = arith.constant 0 : index
    %c0_205 = arith.constant 0 : index
    %214 = vector.load %arg9[%c0_204, %c0_205] : memref<1x8xf32, #tpu.memory_space<vmem>>, vector<1x8xf32>
    %215 = vector.shape_cast %214 : vector<1x8xf32> to vector<8xf32>
    %216 = vector.shape_cast %215 : vector<8xf32> to vector<1x8xf32>
    %217 = vector.broadcast %216 : vector<1x8xf32> to vector<256x8xf32>
    %218 = arith.addf %213, %217 : vector<256x8xf32>
    %219 = arith.negf %218 : vector<256x8xf32>
    %220 = math.exp %219 : vector<256x8xf32>
    %cst_206 = arith.constant 1.000000e+00 : f32
    %221 = vector.broadcast %cst_206 : f32 to vector<256x8xf32>
    %222 = arith.addf %221, %220 : vector<256x8xf32>
    %223 = arith.divf %221, %222 : vector<256x8xf32>
    %224 = arith.mulf %218, %223 : vector<256x8xf32>
    %225 = vector.shape_cast %224 : vector<256x8xf32> to vector<16x16x8xf32>
    %c0_207 = arith.constant 0 : index
    %c0_208 = arith.constant 0 : index
    %c0_209 = arith.constant 0 : index
    %c0_210 = arith.constant 0 : index
    %226 = vector.load %arg10[%c0_207, %c0_208, %c0_209, %c0_210] : memref<1x16x16x8xf32, #tpu.memory_space<vmem>>, vector<1x16x16x8xf32>
    %227 = vector.shape_cast %226 : vector<1x16x16x8xf32> to vector<16x16x8xf32>
    %228 = vector.shape_cast %225 : vector<16x16x8xf32> to vector<1x16x16x8xf32>
    tpu.vector_store %arg10[%c0_207, %c0_208, %c0_209, %c0_210], %228 {strides = array<i32>} : memref<1x16x16x8xf32, #tpu.memory_space<vmem>>, vector<1x16x16x8xf32>,
    return
  }
  func.func @transform_0(%arg0: i32) -> (i32, i32, i32, i32) {
    %c0_i32 = arith.constant 0 : i32
    %c0_i32_0 = arith.constant 0 : i32
    %c0_i32_1 = arith.constant 0 : i32
    %c0_i32_2 = arith.constant 0 : i32
    return %arg0, %c0_i32, %c0_i32_0, %c0_i32_1 : i32, i32, i32, i32
  }
  func.func @transform_1(%arg0: i32) -> (i32, i32, i32, i32) {
    %c0_i32 = arith.constant 0 : i32
    %c0_i32_0 = arith.constant 0 : i32
    %c0_i32_1 = arith.constant 0 : i32
    %c0_i32_2 = arith.constant 0 : i32
    return %arg0, %c0_i32, %c0_i32_0, %c0_i32_1 : i32, i32, i32, i32
  }
  func.func @transform_2(%arg0: i32) -> (i32, i32, i32, i32) {
    %c0_i32 = arith.constant 0 : i32
    %c0_i32_0 = arith.constant 0 : i32
    %c0_i32_1 = arith.constant 0 : i32
    %c0_i32_2 = arith.constant 0 : i32
    %c0_i32_3 = arith.constant 0 : i32
    return %c0_i32, %c0_i32_0, %c0_i32_1, %c0_i32_2 : i32, i32, i32, i32
  }
  func.func @transform_3(%arg0: i32) -> (i32, i32, i32, i32) {
    %c0_i32 = arith.constant 0 : i32
    %c0_i32_0 = arith.constant 0 : i32
    %c0_i32_1 = arith.constant 0 : i32
    %c0_i32_2 = arith.constant 0 : i32
    %c0_i32_3 = arith.constant 0 : i32
    return %c0_i32, %c0_i32_0, %c0_i32_1, %c0_i32_2 : i32, i32, i32, i32
  }
  func.func @transform_4(%arg0: i32) -> (i32, i32) {
    %c0_i32 = arith.constant 0 : i32
    %c0_i32_0 = arith.constant 0 : i32
    %c0_i32_1 = arith.constant 0 : i32
    return %c0_i32, %c0_i32_0 : i32, i32
  }
  func.func @transform_5(%arg0: i32) -> (i32, i32) {
    %c0_i32 = arith.constant 0 : i32
    %c0_i32_0 = arith.constant 0 : i32
    %c0_i32_1 = arith.constant 0 : i32
    return %c0_i32, %c0_i32_0 : i32, i32
  }
  func.func @transform_6(%arg0: i32) -> (i32, i32, i32, i32) {
    %c0_i32 = arith.constant 0 : i32
    %c0_i32_0 = arith.constant 0 : i32
    %c0_i32_1 = arith.constant 0 : i32
    %c0_i32_2 = arith.constant 0 : i32
    %c0_i32_3 = arith.constant 0 : i32
    return %c0_i32, %c0_i32_0, %c0_i32_1, %c0_i32_2 : i32, i32, i32, i32
  }
  func.func @transform_7(%arg0: i32) -> (i32, i32) {
    %c0_i32 = arith.constant 0 : i32
    %c0_i32_0 = arith.constant 0 : i32
    %c0_i32_1 = arith.constant 0 : i32
    return %c0_i32, %c0_i32_0 : i32, i32
  }
  func.func @transform_8(%arg0: i32) -> (i32, i32) {
    %c0_i32 = arith.constant 0 : i32
    %c0_i32_0 = arith.constant 0 : i32
    %c0_i32_1 = arith.constant 0 : i32
    return %c0_i32, %c0_i32_0 : i32, i32
  }
  func.func @transform_9(%arg0: i32) -> (i32, i32, i32, i32) {
    %c0_i32 = arith.constant 0 : i32
    %c0_i32_0 = arith.constant 0 : i32
    %c0_i32_1 = arith.constant 0 : i32
    %c0_i32_2 = arith.constant 0 : i32
    return %arg0, %c0_i32, %c0_i32_0, %c0_i32_1 : i32, i32, i32, i32
  }
}

</mosaic_0001>

<bundles_post_ra>
// kernel: up_forward.1
= control target key start
LH: loop header
LB: loop body
LE: loop exit
PB: predicated region body
PF: predicated region fallthrough
CT: control target
= control target key end

     0   :  { %s19341_s0 = inlined_call_operand.hbm [shape: f32[2,16,16,4], index: 0, kind: input, shape index: {}]   ;;  %s19342_s1 = inlined_call_operand.hbm [shape: f32[2,16,16,4], index: 1, kind: input, shape index: {}]   ;;  %s19343_s2 = inlined_call_operand.hbm [shape: f32[3,3,4,4], index: 2, kind: input, shape index: {}]   ;;  %s19344_s3 = inlined_call_operand.hbm [shape: f32[3,3,4,4], index: 3, kind: input, shape index: {}]   ;;  %s19345_s4 = inlined_call_operand.hbm [shape: f32[1,4], index: 4, kind: input, shape index: {}]   ;;  %s19346_s5 = inlined_call_operand.hbm [shape: f32[1,4], index: 5, kind: input, shape index: {}]   ;;  %s19347_s6 = inlined_call_operand.hbm [shape: f32[3,3,4,8], index: 6, kind: input, shape index: {}]   ;;  %s19348_s7 = inlined_call_operand.hbm [shape: f32[1,8], index: 7, kind: input, shape index: {}]   ;;  %s19349_s8 = inlined_call_operand.hbm [shape: f32[1,8], index: 8, kind: input, shape index: {}]   ;;  %s19350_s9 = inlined_call_operand.hbm [shape: f32[2,16,16,8], index: 9, kind: output, shape index: {}]  }
   0x1   :  { %19642 = sst [smem:[#allocation129_spill]] %s19341_s0 }
   0x2   :  { %19643 = sst [smem:[#allocation130_spill]] %s19343_s2 }
   0x3   :  { %19644 = sst [smem:[#allocation131_spill]] %s19344_s3 }
   0x4   :  { %19645 = sst [smem:[#allocation132_spill]] %s19345_s4 }
   0x5   :  { %19646 = sst [smem:[#allocation133_spill]] %s19346_s5 }
   0x6   :  { %19647 = sst [smem:[#allocation134_spill]] %s19350_s9 }
   0x7   :  { %14 = vsyncpa [#allocation6], 0 }
   0x8   :  { %16 = vsyncpa [#allocation6 + $0x1], 0 }
   0x9   :  { %17 = vsyncpa [#allocation9], 0 }
   0xa   :  { %19 = vsyncpa [#allocation9 + $0x1], 0 }
   0xb   :  { %20 = vsyncpa [#allocation12], 0 }
   0xc   :  { %21 = vsyncpa [#allocation15], 0 }
   0xd   :  { %22 = vsyncpa [#allocation18], 0 }
   0xe   :  { %23 = vsyncpa [#allocation7], 0 }
   0xf   :  { %25 = vsyncpa [#allocation7 + $0x1], 0  ;;  %s14965_s30 = smov 0   ;;  %s14967_s10 = smov 0  }
  0x10   :  { %s14969_s11 = smov 0   ;;  %s14971_s12 = smov 0  }
  0x11 LB: > { %s14898_s13 = smov [#allocation10]   ;;  %s14986_s15 = sadd.s32 4294967295, %s14896_s12   ;;  %s14896_s12 = sphi %s14971_s12, %s20112_s12   ;;  %s14892_s11 = sphi %s14969_s11, %s20111_s11   ;;  %s14888_s10 = sphi %s14967_s10, %s20110_s10   ;;  %s14884_s30 = sphi %s14965_s30, %s20109_s30  }
  0x12   : > { %s273_s14 = sshll.u32 %s14898_s13, 4  ;;  %p10056_p0 = scmp.ge.s32.totalorder %s14896_s12, 1  ;;  %s14991_s14 = int_to_ptr.vmem [resolvable:$true] %s273_s14 }
  0x13   : > { %p19353_p1 = scmp.eq.s32.totalorder %s14986_s15, 0  ;;  %p261_p2 = scmp.lt.s32.totalorder %s14896_s12, 3 }
  0x14   : > { %s14899_s17 = smov [#allocation11]   ;;  %s14900_s20 = smov [#allocation14]  }
  0x15   : > { %p14993_p3 = pnand %p10056_p0, %p261_p2  ;;  %s286_s18 = sshll.u32 %s14899_s17, 4  ;;  %s15006_s18 = int_to_ptr.vmem [resolvable:$true] %s286_s18 }
  0x16   : > { %s311_s21 = sshll.u32 %s14900_s20, 4  ;;  %s19650_s2 = sld [smem:[#allocation130_spill]]  ;;  %s15008_s21 = int_to_ptr.vmem [resolvable:$true] %s311_s21 }
  0x17   : > { %s19648_s16 = scalar_select %p14993_p3, 1, 0 }
  0x18   : > { %p14126_p5 = pneg %p14993_p3 }
  0x1a   : > { %p15002_p6 = pnand %p14126_p5, %p19353_p1 }
  0x1c   : > { %s14554_s24 = scalar_lea.hbm %s19650_s2, 576  ;;  %p15018_p8 = pneg %p15002_p6 }
  0x1d   : > { %p14555_p7 = scmp.ne.s32.totalorder %s19650_s2, %s14554_s24  ;;  %p14561_p11 = scmp.lt.u32.totalorder %s14554_s24, %s19650_s2 }
  0x1f   : > { %p14557_p9 = pnand %p15018_p8, %p14555_p7 }
  0x21   : > { %p14558_p10 = pneg %p14557_p9 }
  0x23   : > { %p14563_p12 = pnand %p14561_p11, %p14558_p10 }
  0x25   : > { %14566 = shalt.err (!%p14563_p12)
}
  0x26   : > { %s14567_s13 = scalar_lea.vmem %s14991_s14, 576  ;;  %p14575_p5 = scmp.lt.s32.totalorder %s14991_s14, %s14991_s14 }
  0x27   : > { %p14568_p13 = scmp.ne.s32.totalorder %s14991_s14, %s14567_s13  ;;  %p14576_p4 = scmp.lt.s32.totalorder %s14567_s13, %s14567_s13 }
  0x29   : > { %p14570_p0 = pnand %p14568_p13, %p15018_p8  ;;  %p14577_p7 = por %p14576_p4, %p14575_p5 }
  0x2b   : > { %p14571_p2 = pneg %p14570_p0 }
  0x2d   : > { %p14578_p9 = pnand %p14577_p7, %p14571_p2 }
  0x2f   : > { %14581 = shalt.err (!%p14578_p9)
}
  0x30   : > { %s19352_s17 = smov 64   ;;  %s14902_s20 = smov 4  }
  0x31   : > { %14129 = dma.hbm_to_vmem [thread:$0]  (!%p15002_p6), %s19650_s2, 576, %s14991_s14, [#allocation9], %s19352_s17, %s19352_s17, %s14902_s20  }
  0x32   : > { %s19652_s3 = sld [smem:[#allocation131_spill]] }
  0x38   : > { %s14582_s26 = scalar_lea.hbm %s19652_s3, 576 }
  0x39   : > { %p14583_p4 = scmp.ne.s32.totalorder %s19652_s3, %s14582_s26  ;;  %p14589_p12 = scmp.lt.u32.totalorder %s14582_s26, %s19652_s3 }
  0x3b   : > { %p14585_p10 = pnand %p14583_p4, %p15018_p8 }
  0x3d   : > { %p14586_p11 = pneg %p14585_p10 }
  0x3f   : > { %p14591_p13 = pnand %p14589_p12, %p14586_p11 }
  0x41   : > { %14594 = shalt.err (!%p14591_p13)
}
  0x42   : > { %s14595_s14 = scalar_lea.vmem %s15006_s18, 576  ;;  %p14603_p7 = scmp.lt.s32.totalorder %s15006_s18, %s15006_s18 }
  0x43   : > { %p14596_p0 = scmp.ne.s32.totalorder %s15006_s18, %s14595_s14  ;;  %p14604_p9 = scmp.lt.s32.totalorder %s14595_s14, %s14595_s14 }
  0x45   : > { %p14598_p2 = pnand %p14596_p0, %p15018_p8  ;;  %p14605_p4 = por %p14604_p9, %p14603_p7 }
  0x47   : > { %p14599_p5 = pneg %p14598_p2 }
  0x49   : > { %p14606_p10 = pnand %p14605_p4, %p14599_p5 }
  0x4b   : > { %14609 = shalt.err (!%p14606_p10)
}
  0x4c   : > { %14132 = dma.hbm_to_vmem [thread:$0]  (!%p15002_p6), %s19652_s3, 576, %s15006_s18, [#allocation12], %s19352_s17, %s19352_s17, %s14902_s20  }
  0x4d   : > { %s19653_s5 = sld [smem:[#allocation133_spill]] }
  0x53   : > { %s14610_s25 = scalar_lea.hbm %s19653_s5, 16 }
  0x54   : > { %p14611_p11 = scmp.ne.s32.totalorder %s19653_s5, %s14610_s25  ;;  %p14617_p0 = scmp.lt.u32.totalorder %s14610_s25, %s19653_s5 }
  0x56   : > { %p14613_p12 = pnand %p14611_p11, %p15018_p8 }
  0x58   : > { %p14614_p13 = pneg %p14613_p12 }
  0x5a   : > { %p14619_p2 = pnand %p14617_p0, %p14614_p13 }
  0x5c   : > { %14622 = shalt.err (!%p14619_p2)
}
  0x5d   : > { %s14623_s18 = scalar_lea.vmem %s15008_s21, 16  ;;  %s14630_s14 = scalar_lea.vmem %s15008_s21, 32 }
  0x5e   : > { %p14624_p5 = scmp.ne.s32.totalorder %s15008_s21, %s14623_s18  ;;  %p14631_p4 = scmp.lt.s32.totalorder %s15008_s21, %s15008_s21 }
  0x5f   : > { %p14632_p10 = scmp.lt.s32.totalorder %s14630_s14, %s14623_s18 }
  0x60   : > { %p14626_p7 = pnand %p14624_p5, %p15018_p8 }
  0x61   : > { %p14633_p11 = por %p14632_p10, %p14631_p4 }
  0x62   : > { %p14627_p9 = pneg %p14626_p7 }
  0x64   : > { %p14634_p12 = pnand %p14633_p11, %p14627_p9 }
  0x66   : > { %14637 = shalt.err (!%p14634_p12)
}
  0x67   : > { %14138 = dma.hbm_to_vmem [thread:$0]  (!%p15002_p6), %s19653_s5, 16, %s15008_s21, [#allocation15]  }
  0x68   : > { %s14903_s23 = smov [#allocation17]   ;;  %s14904_s25 = smov [#allocation13]  }
  0x69   : > { %s335_s24 = sshll.u32 %s14903_s23, 4  ;;  %s300_s26 = sshll.u32 %s14904_s25, 4  ;;  %s336_s24 = int_to_ptr.vmem [resolvable:$true] %s335_s24  ;;  %s301_s26 = int_to_ptr.vmem [resolvable:$true] %s300_s26 }
  0x6a   : > { %s14638_s13 = scalar_lea.hbm %s19348_s7, 16 }
  0x6b   : > { %p14639_p13 = scmp.ne.s32.totalorder %s19348_s7, %s14638_s13  ;;  %p14645_p5 = scmp.lt.u32.totalorder %s14638_s13, %s19348_s7 }
  0x6d   : > { %p14641_p0 = pnand %p14639_p13, %p15018_p8 }
  0x6f   : > { %p14642_p2 = pneg %p14641_p0 }
  0x71   : > { %p14647_p7 = pnand %p14645_p5, %p14642_p2 }
  0x73   : > { %14650 = shalt.err (!%p14647_p7)
}
  0x74   : > { %s14651_s21 = scalar_lea.vmem %s336_s24, 16  ;;  %s14658_s22 = scalar_lea.vmem %s336_s24, 32 }
  0x75   : > { %p14652_p9 = scmp.ne.s32.totalorder %s336_s24, %s14651_s21  ;;  %p14659_p11 = scmp.lt.s32.totalorder %s336_s24, %s336_s24 }
  0x76   : > { %p14660_p12 = scmp.lt.s32.totalorder %s14658_s22, %s14651_s21 }
  0x77   : > { %p14654_p4 = pnand %p14652_p9, %p15018_p8 }
  0x78   : > { %p14661_p1 = por %p14660_p12, %p14659_p11 }
  0x79   : > { %p14655_p10 = pneg %p14654_p4 }
  0x7b   : > { %p14662_p3 = pnand %p14661_p1, %p14655_p10 }
  0x7d   : > { %14665 = shalt.err (!%p14662_p3)
}
  0x7e   : > { %14144 = dma.hbm_to_vmem [thread:$0]  (!%p15002_p6), %s19348_s7, 16, %s336_s24, [#allocation18]  }
  0x7f   : > { %s19654_s4 = sld [smem:[#allocation132_spill]] }
  0x85   : > { %s14666_s29 = scalar_lea.hbm %s19654_s4, 16 }
  0x86   : > { %p14667_p13 = scmp.ne.s32.totalorder %s19654_s4, %s14666_s29  ;;  %p14673_p3 = scmp.lt.u32.totalorder %s14666_s29, %s19654_s4 }
  0x88   : > { %p14669_p0 = pnand %p14667_p13, %p15018_p8 }
  0x8a   : > { %p14670_p1 = pneg %p14669_p0 }
  0x8c   : > { %p14675_p2 = pnand %p14673_p3, %p14670_p1 }
  0x8e   : > { %14678 = shalt.err (!%p14675_p2)
}
  0x8f   : > { %s14679_s21 = scalar_lea.vmem %s301_s26, 16  ;;  %s14686_s24 = scalar_lea.vmem %s301_s26, 32 }
  0x90   : > { %p14680_p5 = scmp.ne.s32.totalorder %s301_s26, %s14679_s21  ;;  %p14687_p4 = scmp.lt.s32.totalorder %s301_s26, %s301_s26 }
  0x91   : > { %p14688_p10 = scmp.lt.s32.totalorder %s14686_s24, %s14679_s21 }
  0x92   : > { %p14682_p7 = pnand %p14680_p5, %p15018_p8 }
  0x93   : > { %p14689_p11 = por %p14688_p10, %p14687_p4 }
  0x94   : > { %p14683_p9 = pneg %p14682_p7 }
  0x96   : > { %p14690_p12 = pnand %p14689_p11, %p14683_p9 }
  0x98   : > { %14693 = shalt.err (!%p14690_p12)
}
  0x99   : > { %14135 = dma.hbm_to_vmem [thread:$0]  (!%p15002_p6), %s19654_s4, 16, %s301_s26, [#allocation12]  }
  0x9a   : > { %s14905_s25 = smov [#allocation16]   ;;  %s14906_s28 = smov [#allocation19]  }
  0x9b   : > { %s321_s17 = sshll.u32 %s14905_s25, 4  ;;  %s346_s29 = sshll.u32 %s14906_s28, 4  ;;  %s322_s17 = int_to_ptr.vmem [resolvable:$true] %s321_s17  ;;  %s347_s29 = int_to_ptr.vmem [resolvable:$true] %s346_s29 }
  0x9c   : > { %s14694_s14 = scalar_lea.hbm %s19347_s6, 576 }
  0x9d   : > { %p14695_p13 = scmp.ne.s32.totalorder %s19347_s6, %s14694_s14  ;;  %p14701_p3 = scmp.lt.u32.totalorder %s14694_s14, %s19347_s6 }
  0x9f   : > { %p14697_p0 = pnand %p14695_p13, %p15018_p8 }
  0xa1   : > { %p14698_p1 = pneg %p14697_p0 }
  0xa3   : > { %p14703_p2 = pnand %p14701_p3, %p14698_p1 }
  0xa5   : > { %14706 = shalt.err (!%p14703_p2)
}
  0xa6   : > { %s14707_s26 = scalar_lea.vmem %s322_s17, 576  ;;  %p14715_p4 = scmp.lt.s32.totalorder %s322_s17, %s322_s17 }
  0xa7   : > { %p14708_p5 = scmp.ne.s32.totalorder %s322_s17, %s14707_s26  ;;  %p14716_p10 = scmp.lt.s32.totalorder %s14707_s26, %s14707_s26 }
  0xa9   : > { %p14710_p7 = pnand %p14708_p5, %p15018_p8  ;;  %p14717_p11 = por %p14716_p10, %p14715_p4 }
  0xab   : > { %p14711_p9 = pneg %p14710_p7 }
  0xad   : > { %p14718_p12 = pnand %p14717_p11, %p14711_p9 }
  0xaf   : > { %14721 = shalt.err (!%p14718_p12)
}
  0xb0   : > { %s19655_s23 = smov 64   ;;  %s14722_s14 = scalar_lea.hbm %s19349_s8, 16 }
  0xb1   : > { %14141 = dma.hbm_to_vmem [thread:$0]  (!%p15002_p6), %s19347_s6, 576, %s322_s17, [#allocation15], %s19655_s23, %s19655_s23, %s14902_s20  }
  0xb2   : > { %p14723_p13 = scmp.ne.s32.totalorder %s19349_s8, %s14722_s14  ;;  %p14729_p3 = scmp.lt.u32.totalorder %s14722_s14, %s19349_s8 }
  0xb4   : > { %p14725_p0 = pnand %p14723_p13, %p15018_p8 }
  0xb6   : > { %p14726_p1 = pneg %p14725_p0 }
  0xb8   : > { %p14731_p2 = pnand %p14729_p3, %p14726_p1 }
  0xba   : > { %14734 = shalt.err (!%p14731_p2)
}
  0xbb   : > { %s14735_s26 = scalar_lea.vmem %s347_s29, 16  ;;  %s14742_s20 = scalar_lea.vmem %s347_s29, 32 }
  0xbc   : > { %p14736_p5 = scmp.ne.s32.totalorder %s347_s29, %s14735_s26  ;;  %p14743_p4 = scmp.lt.s32.totalorder %s347_s29, %s347_s29 }
  0xbd   : > { %p14744_p10 = scmp.lt.s32.totalorder %s14742_s20, %s14735_s26 }
  0xbe   : > { %p14738_p7 = pnand %p14736_p5, %p15018_p8 }
  0xbf   : > { %p14745_p11 = por %p14744_p10, %p14743_p4 }
  0xc0   : > { %p14739_p9 = pneg %p14738_p7 }
  0xc2   : > { %p14746_p12 = pnand %p14745_p11, %p14739_p9 }
  0xc4   : > { %14749 = shalt.err (!%p14746_p12)
}
  0xc5   : > { %14147 = dma.hbm_to_vmem [thread:$0]  (!%p15002_p6), %s19349_s8, 16, %s347_s29, [#allocation18]  }
  0xc6   : > { %s10055_s27 = sadd.s32 4294967294, %s14896_s12   ;;  %s15169_s19 = sadd.s32 1, %s14896_s12  }
  0xc7   : > { %s38_s25 = sadd.s32 1, %s14892_s11  ;;  %s35_s28 = ssub.s32 %s14896_s12, %s15169_s19 }
  0xc8   : > { %p45_p8 = scmp.ne.s32.totalorder %s14892_s11, %s14888_s10  ;;  %p36_p13 = scmp.eq.s32.totalorder %s35_s28, 0 }
  0xc9   : > { %p46_p0 = scmp.eq.s32.totalorder %s14896_s12, 0  ;;  %p51_p1 = scmp.ne.s32.totalorder %s14888_s10, %s14884_s30 }
  0xca   : > { %p248_p3 = scmp.eq.s32.totalorder %s14986_s15, 1  ;;  %p19656_p5 = scmp.eq.s32.totalorder %s14986_s15, 0 }
  0xcb   : > { %s15181_s13 = scalar_select %p36_p13, %s14892_s11, %s38_s25  }
  0xcc   : > { %p47_p2 = por %p46_p0, %p45_p8  ;;  %p15185_p7 = por %p19656_p5, %p51_p1 }
  0xcd   : > { %p15189_p6 = por %p248_p3, %p45_p8  ;;  %p254_p9 = scmp.eq.s32.totalorder %s10055_s27, 1 }
  0xce   : > { %p14166_p4 = scmp.lt.s32.totalorder %s14896_s12, 2  ;;  %s357_s14 = sand.u32 1, %s14892_s11  }
  0xcf   : > { %s19658_s18 = scalar_select %p15189_p6, 1, 0 }
  0xd0   : > { %p15195_p10 = por %p254_p9, %p51_p1  ;;  %s15199_s21 = sshll.u32 %s357_s14, 8 }
  0xd1   : > { %s19355_s24 = sshll.u32 %s14896_s12, 12  ;;  %s19660_s0 = sld [smem:[#allocation129_spill]] }
  0xd2   : > { %s19659_s9 = scalar_select %p15195_p10, 1, 0 }
  0xd3   : > { %s361_s17 = scalar_lea.vmem [#allocation5], %s15199_s21  ;;  %p15210_p11 = pnand %p14166_p4, %p47_p2 }
  0xd4   : > { %s368_s23 = sshll.u32 %s361_s17, 4  ;;  %s15216_s25 = scalar_lea.sflag [#allocation6], %s357_s14  ;;  %s15214_s23 = int_to_ptr.vmem [resolvable:$true] %s368_s23 }
  0xd5   : > { %p14752_p8 = pneg %p15210_p11 }
  0xd7   : > { %s15207_s20 = scalar_lea.hbm %s19660_s0, %s19355_s24  ;;  %s14755_s17 = scalar_lea.hbm %s19660_s0, 8192 }
  0xd8   : > { %s14750_s28 = scalar_lea.hbm %s15207_s20, 4096  ;;  %p14756_p1 = scmp.lt.u32.totalorder %s15207_s20, %s19660_s0 }
  0xd9   : > { %p14751_p12 = scmp.ne.s32.totalorder %s15207_s20, %s14750_s28  ;;  %p14757_p3 = scmp.lt.u32.totalorder %s14755_s17, %s14750_s28 }
  0xda   : > { %p14759_p5 = scmp.lt.u32.totalorder %s14750_s28, %s15207_s20 }
  0xdb   : > { %p14753_p13 = pnand %p14752_p8, %p14751_p12  ;;  %p14758_p2 = por %p14757_p3, %p14756_p1 }
  0xdd   : > { %p14754_p0 = pneg %p14753_p13  ;;  %p14760_p9 = por %p14759_p5, %p14758_p2 }
  0xdf   : > { %p14761_p4 = pnand %p14760_p9, %p14754_p0 }
  0xe1   : > { %14764 = shalt.err (!%p14761_p4)
}
  0xe2   : > { %s14765_s14 = scalar_lea.vmem %s15214_s23, 4096  ;;  %s14907_s22 = smov [#allocation5]  }
  0xe3   : > { %p14766_p12 = scmp.ne.s32.totalorder %s15214_s23, %s14765_s14  ;;  %s14770_s26 = sshll.u32 %s14907_s22, 4  ;;  %s14771_s26 = int_to_ptr.vmem [resolvable:$false] %s14770_s26 }
  0xe4   : > { %s14772_s2 = scalar_lea.vmem %s14771_s26, 8192  ;;  %p14773_p6 = scmp.lt.s32.totalorder %s15214_s23, %s14771_s26 }
  0xe5   : > { %p14768_p13 = pnand %p14766_p12, %p14752_p8  ;;  %p14774_p1 = scmp.lt.s32.totalorder %s14772_s2, %s14765_s14 }
  0xe7   : > { %p14769_p10 = pneg %p14768_p13  ;;  %p14775_p3 = por %p14774_p1, %p14773_p6 }
  0xe9   : > { %p14776_p2 = pnand %p14775_p3, %p14769_p10 }
  0xeb   : > { %14779 = shalt.err (!%p14776_p2)
}
  0xec   : > { %s14908_s24 = smov 128   ;;  %s14909_s28 = smov 8  }
  0xed   : > { %14151 = dma.hbm_to_vmem [thread:$0]  (!%p15210_p11), %s15207_s20, 4096, %s15214_s23, %s15216_s25, %s14908_s24, %s14908_s24, %s14909_s28  }
  0xee   : > { %s19662_s17 = sshll.u32 %s14896_s12, 12  ;;  %s382_s2 = scalar_lea.vmem [#allocation8], %s15199_s21 }
  0xef   : > { %s15252_s26 = scalar_lea.hbm %s19342_s1, %s19662_s17  ;;  %s389_s0 = sshll.u32 %s382_s2, 4  ;;  %s15256_s0 = int_to_ptr.vmem [resolvable:$true] %s389_s0 }
  0xf0   : > { %s378_s3 = sand.u32 1, %s14896_s12   ;;  %s14780_s5 = scalar_lea.hbm %s15252_s26, 4096 }
  0xf1   : > { %s15258_s4 = scalar_lea.sflag [#allocation9], %s378_s3  ;;  %p14781_p6 = scmp.ne.s32.totalorder %s15252_s26, %s14780_s5 }
  0xf2   : > { %s14785_s25 = scalar_lea.hbm %s19342_s1, 8192  ;;  %p14786_p5 = scmp.lt.u32.totalorder %s15252_s26, %s19342_s1 }
  0xf3   : > { %p14783_p10 = pnand %p14781_p6, %p14752_p8  ;;  %p14787_p9 = scmp.lt.u32.totalorder %s14785_s25, %s14780_s5 }
  0xf4   : > { %p14789_p12 = scmp.lt.u32.totalorder %s14780_s5, %s15252_s26 }
  0xf5   : > { %p14784_p0 = pneg %p14783_p10  ;;  %p14788_p4 = por %p14787_p9, %p14786_p5 }
  0xf7   : > { %p14790_p13 = por %p14789_p12, %p14788_p4 }
  0xf9   : > { %p14791_p1 = pnand %p14790_p13, %p14784_p0 }
  0xfb   : > { %14794 = shalt.err (!%p14791_p1)
}
  0xfc   : > { %s14795_s3 = scalar_lea.vmem %s15256_s0, 4096  ;;  %s14910_s21 = smov [#allocation8]  }
  0xfd   : > { %p14796_p3 = scmp.ne.s32.totalorder %s15256_s0, %s14795_s3  ;;  %s14800_s22 = sshll.u32 %s14910_s21, 4  ;;  %s14801_s22 = int_to_ptr.vmem [resolvable:$false] %s14800_s22 }
  0xfe   : > { %s14802_s2 = scalar_lea.vmem %s14801_s22, 8192  ;;  %p14803_p10 = scmp.lt.s32.totalorder %s15256_s0, %s14801_s22 }
  0xff   : > { %p14798_p2 = pnand %p14796_p3, %p14752_p8  ;;  %p14804_p5 = scmp.lt.s32.totalorder %s14802_s2, %s14795_s3 }
 0x101   : > { %p14799_p6 = pneg %p14798_p2  ;;  %p14805_p9 = por %p14804_p5, %p14803_p10 }
 0x103   : > { %p14806_p4 = pnand %p14805_p9, %p14799_p6 }
 0x105   : > { %14809 = shalt.err (!%p14806_p4)
}
 0x106   : > { %14154 = dma.hbm_to_vmem [thread:$0]  (!%p15210_p11), %s15252_s26, 4096, %s15256_s0, %s15258_s4, %s14908_s24, %s14908_s24, %s14909_s28  }
 0x107   : > { %p19663_p8 = scmp.ne.s32.totalorder %s19648_s16, 0 }
 0x109   : > { %401 = sbr.rel (%p19663_p8) target bundleno = 2270 (0x8de), region = 56 }
 0x110   : > { %s15290_s5 = sand.u32 1, %s14888_s10  }
 0x111   : > { %s15293_s20 = sshll.u32 %s15290_s5, 8  ;;  %s404_s27 = scalar_lea.sflag [#allocation6], %s15290_s5 }
 0x112   : > { %s15297_s23 = scalar_lea.vmem [#allocation5], %s15293_s20 }
 0x113   : > { %14855 = dma.done.wait (%p15185_p7), %s404_s27, 4096  }
 0x114   : > { %14857 = vsyncadd (%p15185_p7), %s404_s27, 4294963200  ;;  %s412_s0 = sand.u32 1, %s14986_s15   ;;  %s15305_s16 = scalar_lea.vmem [#allocation8], %s15293_s20 }
 0x115   : > { %s413_s4 = scalar_lea.sflag [#allocation9], %s412_s0 }
 0x116   : > { %14859 = dma.done.wait (%p15185_p7), %s413_s4, 4096  }
 0x117   : > { %14861 = vsyncadd (%p15185_p7), %s413_s4, 4294963200  ;;  %p19664_p11 = scmp.eq.s32.totalorder %s14986_s15, 0 }
 0x119   : > { %14863 = dma.done.wait (%p19664_p11), [#allocation9], 576   ;;  %p19665_p0 = pmov %p19664_p11 }
 0x11b   : > { %14865 = vsyncadd (%p19665_p0), [#allocation9], 4294966720  ;;  %p19666_p12 = pmov %p19665_p0 }
 0x11c   : > { %p19667_p13 = pmov %p19665_p0 }
 0x11d   : > { %14867 = dma.done.wait (%p19666_p12), [#allocation12], 592  }
 0x11e   : > { %14869 = vsyncadd (%p19667_p13), [#allocation12], 4294966704  ;;  %p19668_p1 = pmov %p19665_p0 }
 0x11f   : > { %p19669_p3 = pmov %p19665_p0 }
 0x120   : > { %14871 = dma.done.wait (%p19668_p1), [#allocation15], 592  }
 0x121   : > { %14873 = vsyncadd (%p19669_p3), [#allocation15], 4294966704  ;;  %p19670_p7 = pmov %p19665_p0 }
 0x122   : > { %p19671_p2 = pmov %p19665_p0 }
 0x123   : > { %14875 = dma.done.wait (%p19670_p7), [#allocation18], 32  }
 0x124   : > { %14877 = vsyncadd (%p19671_p2), [#allocation18], 4294967264  ;;  %vm484_vm0 = vcmask 31744   ;;  %vm488_vm1 = vcmask 24576   ;;  %v14911_v0 = vmov 0.0   ;;  %vm957_vm2 = vcmask 1043456  }
 0x125   : > { %485 = vst.msk [vmem:[#allocation2] sm:$0xff] %vm484_vm0, %v14911_v0  ;;  %486 = vst.msk [vmem:[#allocation2 + $0x8] sm:$0xff] %vm484_vm0, %v14911_v0  ;;  %v2517_v1 = vld [vmem:[#allocation10 + $0x8] sm:$0xf]  ;;  %v2843_v2 = vld [vmem:[#allocation11 + $0x8] sm:$0xf] }
 0x126   : > { %487 = vst.msk [vmem:[#allocation2 + $0x10] sm:$0xff] %vm484_vm0, %v14911_v0  ;;  %491 = vst.msk [vmem:[#allocation2 + $0x220] sm:$0xff] %vm484_vm0, %v14911_v0  ;;  %v621_v3 = vld [vmem:[%s15297_s23] sm:$0xff]  ;;  %12140 = vmatprep.subr.msk.mxu0 %vm957_vm2, %v2517_v1  ;;  %v622_v5 = vld [vmem:[%s15297_s23 + $0x8] sm:$0xff]  ;;  %vm2355_vm3 = vcmask 1045504   ;;  %vm1526_vm4 = vcmask 1046528  }
 0x127   : > { %489 = vst.msk [vmem:[#allocation2 + $0x18] sm:$0x1] %vm488_vm1, %v14911_v0  ;;  %494 = vst.msk [vmem:[#allocation2 + $0x238] sm:$0x1] %vm488_vm1, %v14911_v0  ;;  %v623_v6 = vld [vmem:[%s15297_s23 + $0x10] sm:$0xff]  ;;  %12141 = vmatpush3.msk.msra.mxu0 %vm957_vm2, %v2517_v1  ;;  %v624_v10 = vld [vmem:[%s15297_s23 + $0x18] sm:$0xff] }
 0x128   : > { %492 = vst.msk [vmem:[#allocation2 + $0x228] sm:$0xff] %vm484_vm0, %v14911_v0  ;;  %493 = vst.msk [vmem:[#allocation2 + $0x230] sm:$0xff] %vm484_vm0, %v14911_v0  ;;  %12190 = vmatprep.subr.msk.mxu0 %vm957_vm2, %v2843_v2  ;;  %v625_v13 = vld [vmem:[%s15297_s23 + $0x20] sm:$0xff]  ;;  %v626_v14 = vld [vmem:[%s15297_s23 + $0x28] sm:$0xff]  ;;  %vm9846_vm5 = vcmask 64512   ;;  %s19112_s29 = scalar_lea.vmem [#allocation20], %s15293_s20 }
 0x129   : > { %496 = vst.msk [vmem:[#allocation2 + $0x27] sm:$0x1] %vm488_vm1, %v14911_v0  ;;  %497 = vst.msk [vmem:[#allocation2 + $0x47] sm:$0x1] %vm488_vm1, %v14911_v0  ;;  %v627_v15 = vld [vmem:[%s15297_s23 + $0x30] sm:$0xff]  ;;  %v628_v16 = vld [vmem:[%s15297_s23 + $0x38] sm:$0xff] }
 0x12a   : > { %498 = vst.msk [vmem:[#allocation2 + $0x67] sm:$0x1] %vm488_vm1, %v14911_v0  ;;  %499 = vst.msk [vmem:[#allocation2 + $0x87] sm:$0x1] %vm488_vm1, %v14911_v0  ;;  %v629_v17 = vld [vmem:[%s15297_s23 + $0x40] sm:$0xff]  ;;  %v630_v18 = vld [vmem:[%s15297_s23 + $0x48] sm:$0xff] }
 0x12b   : > { %500 = vst.msk [vmem:[#allocation2 + $0xa7] sm:$0x1] %vm488_vm1, %v14911_v0  ;;  %501 = vst.msk [vmem:[#allocation2 + $0xc7] sm:$0x1] %vm488_vm1, %v14911_v0  ;;  %v631_v21 = vld [vmem:[%s15297_s23 + $0x50] sm:$0xff]  ;;  %v632_v22 = vld [vmem:[%s15297_s23 + $0x58] sm:$0xff] }
 0x12c   : > { %502 = vst.msk [vmem:[#allocation2 + $0xe7] sm:$0x1] %vm488_vm1, %v14911_v0  ;;  %503 = vst.msk [vmem:[#allocation2 + $0x107] sm:$0x1] %vm488_vm1, %v14911_v0  ;;  %v633_v23 = vld [vmem:[%s15297_s23 + $0x60] sm:$0xff]  ;;  %v634_v24 = vld [vmem:[%s15297_s23 + $0x68] sm:$0xff] }
 0x12d   : > { %504 = vst.msk [vmem:[#allocation2 + $0x127] sm:$0x1] %vm488_vm1, %v14911_v0  ;;  %505 = vst.msk [vmem:[#allocation2 + $0x147] sm:$0x1] %vm488_vm1, %v14911_v0  ;;  %v752_v4 = vld [vmem:[#allocation2 + $0xf] sm:$0xff]  ;;  %v686_v28 = vld [vmem:[%s15305_s16] sm:$0xff] }
 0x12e   : > { %506 = vst.msk [vmem:[#allocation2 + $0x167] sm:$0x1] %vm488_vm1, %v14911_v0  ;;  %507 = vst.msk [vmem:[#allocation2 + $0x187] sm:$0x1] %vm488_vm1, %v14911_v0  ;;  %v2357_v8 = vrot.slane %v752_v4, 2  ;;  %v687_v29 = vld [vmem:[%s15305_s16 + $0x8] sm:$0xff] }
 0x12f   : > { %508 = vst.msk [vmem:[#allocation2 + $0x1a7] sm:$0x1] %vm488_vm1, %v14911_v0  ;;  %509 = vst.msk [vmem:[#allocation2 + $0x1c7] sm:$0x1] %vm488_vm1, %v14911_v0  ;;  %v15628_v26 = vld [vmem:[#allocation10 + $0xc] sm:$0xf] }
 0x130   : > { %510 = vst.msk [vmem:[#allocation2 + $0x1e7] sm:$0x1] %vm488_vm1, %v14911_v0  ;;  %511 = vst.msk [vmem:[#allocation2 + $0x207] sm:$0x1] %vm488_vm1, %v14911_v0  ;;  %v688_v38 = vld [vmem:[%s15305_s16 + $0x10] sm:$0xff]  ;;  %v689_v61 = vld [vmem:[%s15305_s16 + $0x18] sm:$0xff] }
 0x131   : > { %514 = vst.msk [vmem:[#allocation2 + $0x38] sm:$0x1] %vm488_vm1, %v14911_v0  ;;  %515 = vst.msk [vmem:[#allocation2 + $0x58] sm:$0x1] %vm488_vm1, %v14911_v0  ;;  %v690_v62 = vld [vmem:[%s15305_s16 + $0x20] sm:$0xff]  ;;  %v692_v4 = vld [vmem:[%s15305_s16 + $0x30] sm:$0xff] }
 0x132   : > { %516 = vst.msk [vmem:[#allocation2 + $0x78] sm:$0x1] %vm488_vm1, %v14911_v0  ;;  %517 = vst.msk [vmem:[#allocation2 + $0x98] sm:$0x1] %vm488_vm1, %v14911_v0  ;;  %s11048_s24 = sshll.u32 %s14986_s15, 12  ;;  %s9893_s28 = sshll.u32 %s19112_s29, 4  ;;  %s19294_s28 = int_to_ptr.vmem [resolvable:$true] %s9893_s28 }
 0x133   : > { %518 = vst.msk [vmem:[#allocation2 + $0xb8] sm:$0x1] %vm488_vm1, %v14911_v0  ;;  %519 = vst.msk [vmem:[#allocation2 + $0xd8] sm:$0x1] %vm488_vm1, %v14911_v0  ;;  %s20105_s17 = sld [smem:[#allocation134_spill]]  ;;  %s9880_s15 = scalar_lea.sflag [#allocation7], %s15290_s5 }
 0x134   : > { %520 = vst.msk [vmem:[#allocation2 + $0xf8] sm:$0x1] %vm488_vm1, %v14911_v0  ;;  %521 = vst.msk [vmem:[#allocation2 + $0x118] sm:$0x1] %vm488_vm1, %v14911_v0  ;;  %s14810_s3 = scalar_lea.vmem %s19294_s28, 4096  ;;  %p20106_p10 = scmp.ne.s32.totalorder %s19658_s18, 0 }
 0x135   : > { %522 = vst.msk [vmem:[#allocation2 + $0x138] sm:$0x1] %vm488_vm1, %v14911_v0  ;;  %523 = vst.msk [vmem:[#allocation2 + $0x158] sm:$0x1] %vm488_vm1, %v14911_v0  ;;  %p14811_p6 = scmp.ne.s32.totalorder %s19294_s28, %s14810_s3  ;;  %s14912_s21 = smov [#allocation20]  }
 0x136   : > { %524 = vst.msk [vmem:[#allocation2 + $0x178] sm:$0x1] %vm488_vm1, %v14911_v0  ;;  %525 = vst.msk [vmem:[#allocation2 + $0x198] sm:$0x1] %vm488_vm1, %v14911_v0  ;;  %s14814_s22 = sshll.u32 %s14912_s21, 4  ;;  %s14815_s22 = int_to_ptr.vmem [resolvable:$false] %s14814_s22 }
 0x137   : > { %526 = vst.msk [vmem:[#allocation2 + $0x1b8] sm:$0x1] %vm488_vm1, %v14911_v0  ;;  %527 = vst.msk [vmem:[#allocation2 + $0x1d8] sm:$0x1] %vm488_vm1, %v14911_v0  ;;  %p14812_p5 = pnand %p14811_p6, %p20106_p10  ;;  %s14816_s2 = scalar_lea.vmem %s14815_s22, 8192 }
 0x138   : > { %528 = vst.msk [vmem:[#allocation2 + $0x1f8] sm:$0x1] %vm488_vm1, %v14911_v0  ;;  %529 = vst.msk [vmem:[#allocation2 + $0x218] sm:$0x1] %vm488_vm1, %v14911_v0  ;;  %p14817_p4 = scmp.lt.s32.totalorder %s19294_s28, %s14815_s22  ;;  %p14818_p8 = scmp.lt.s32.totalorder %s14816_s2, %s14810_s3 }
 0x139   : > { %531 = vst.msk [vmem:[#allocation3] sm:$0xff] %vm484_vm0, %v14911_v0  ;;  %532 = vst.msk [vmem:[#allocation3 + $0x8] sm:$0xff] %vm484_vm0, %v14911_v0  ;;  %s19292_s14 = scalar_lea.hbm %s20105_s17, %s11048_s24  ;;  %p14813_p9 = pneg %p14812_p5 }
 0x13a   : > { %533 = vst.msk [vmem:[#allocation3 + $0x10] sm:$0xff] %vm484_vm0, %v14911_v0  ;;  %536 = vst.msk [vmem:[#allocation3 + $0x220] sm:$0xff] %vm484_vm0, %v14911_v0  ;;  %p14819_p11 = por %p14818_p8, %p14817_p4 }
 0x13b   : > { %534 = vst.msk [vmem:[#allocation3 + $0x18] sm:$0x1] %vm488_vm1, %v14911_v0  ;;  %539 = vst.msk [vmem:[#allocation3 + $0x238] sm:$0x1] %vm488_vm1, %v14911_v0 }
 0x13c   : > { %537 = vst.msk [vmem:[#allocation3 + $0x228] sm:$0xff] %vm484_vm0, %v14911_v0  ;;  %538 = vst.msk [vmem:[#allocation3 + $0x230] sm:$0xff] %vm484_vm0, %v14911_v0  ;;  %p14820_p0 = pnand %p14819_p11, %p14813_p9 }
 0x13d   : > { %541 = vst.msk [vmem:[#allocation3 + $0x27] sm:$0x1] %vm488_vm1, %v14911_v0  ;;  %542 = vst.msk [vmem:[#allocation3 + $0x47] sm:$0x1] %vm488_vm1, %v14911_v0 }
 0x13e   : > { %543 = vst.msk [vmem:[#allocation3 + $0x67] sm:$0x1] %vm488_vm1, %v14911_v0  ;;  %544 = vst.msk [vmem:[#allocation3 + $0x87] sm:$0x1] %vm488_vm1, %v14911_v0 }
 0x13f   : > { %545 = vst.msk [vmem:[#allocation3 + $0xa7] sm:$0x1] %vm488_vm1, %v14911_v0  ;;  %546 = vst.msk [vmem:[#allocation3 + $0xc7] sm:$0x1] %vm488_vm1, %v14911_v0 }
 0x140   : > { %547 = vst.msk [vmem:[#allocation3 + $0xe7] sm:$0x1] %vm488_vm1, %v14911_v0  ;;  %548 = vst.msk [vmem:[#allocation3 + $0x107] sm:$0x1] %vm488_vm1, %v14911_v0 }
 0x141   : > { %549 = vst.msk [vmem:[#allocation3 + $0x127] sm:$0x1] %vm488_vm1, %v14911_v0  ;;  %550 = vst.msk [vmem:[#allocation3 + $0x147] sm:$0x1] %vm488_vm1, %v14911_v0 }
 0x142   : > { %551 = vst.msk [vmem:[#allocation3 + $0x167] sm:$0x1] %vm488_vm1, %v14911_v0  ;;  %552 = vst.msk [vmem:[#allocation3 + $0x187] sm:$0x1] %vm488_vm1, %v14911_v0 }
 0x143   : > { %553 = vst.msk [vmem:[#allocation3 + $0x1a7] sm:$0x1] %vm488_vm1, %v14911_v0  ;;  %554 = vst.msk [vmem:[#allocation3 + $0x1c7] sm:$0x1] %vm488_vm1, %v14911_v0 }
 0x144   : > { %555 = vst.msk [vmem:[#allocation3 + $0x1e7] sm:$0x1] %vm488_vm1, %v14911_v0  ;;  %556 = vst.msk [vmem:[#allocation3 + $0x207] sm:$0x1] %vm488_vm1, %v14911_v0 }
 0x145   : > { %559 = vst.msk [vmem:[#allocation3 + $0x38] sm:$0x1] %vm488_vm1, %v14911_v0  ;;  %560 = vst.msk [vmem:[#allocation3 + $0x58] sm:$0x1] %vm488_vm1, %v14911_v0 }
 0x146   : > { %561 = vst.msk [vmem:[#allocation3 + $0x78] sm:$0x1] %vm488_vm1, %v14911_v0  ;;  %562 = vst.msk [vmem:[#allocation3 + $0x98] sm:$0x1] %vm488_vm1, %v14911_v0 }
 0x147   : > { %563 = vst.msk [vmem:[#allocation3 + $0xb8] sm:$0x1] %vm488_vm1, %v14911_v0  ;;  %564 = vst.msk [vmem:[#allocation3 + $0xd8] sm:$0x1] %vm488_vm1, %v14911_v0 }
 0x148   : > { %565 = vst.msk [vmem:[#allocation3 + $0xf8] sm:$0x1] %vm488_vm1, %v14911_v0  ;;  %566 = vst.msk [vmem:[#allocation3 + $0x118] sm:$0x1] %vm488_vm1, %v14911_v0 }
 0x149   : > { %567 = vst.msk [vmem:[#allocation3 + $0x138] sm:$0x1] %vm488_vm1, %v14911_v0  ;;  %568 = vst.msk [vmem:[#allocation3 + $0x158] sm:$0x1] %vm488_vm1, %v14911_v0 }
 0x14a   : > { %569 = vst.msk [vmem:[#allocation3 + $0x178] sm:$0x1] %vm488_vm1, %v14911_v0  ;;  %570 = vst.msk [vmem:[#allocation3 + $0x198] sm:$0x1] %vm488_vm1, %v14911_v0 }
 0x14b   : > { %571 = vst.msk [vmem:[#allocation3 + $0x1b8] sm:$0x1] %vm488_vm1, %v14911_v0  ;;  %572 = vst.msk [vmem:[#allocation3 + $0x1d8] sm:$0x1] %vm488_vm1, %v14911_v0 }
 0x14c   : > { %573 = vst.msk [vmem:[#allocation3 + $0x1f8] sm:$0x1] %vm488_vm1, %v14911_v0  ;;  %574 = vst.msk [vmem:[#allocation3 + $0x218] sm:$0x1] %vm488_vm1, %v14911_v0 }
 0x14d   : > { %576 = vst.msk [vmem:[#allocation4] sm:$0xff] %vm484_vm0, %v14911_v0  ;;  %577 = vst.msk [vmem:[#allocation4 + $0x8] sm:$0xff] %vm484_vm0, %v14911_v0 }
 0x14e   : > { %578 = vst.msk [vmem:[#allocation4 + $0x10] sm:$0xff] %vm484_vm0, %v14911_v0  ;;  %581 = vst.msk [vmem:[#allocation4 + $0x220] sm:$0xff] %vm484_vm0, %v14911_v0 }
 0x14f   : > { %579 = vst.msk [vmem:[#allocation4 + $0x18] sm:$0x1] %vm488_vm1, %v14911_v0  ;;  %584 = vst.msk [vmem:[#allocation4 + $0x238] sm:$0x1] %vm488_vm1, %v14911_v0 }
 0x150   : > { %582 = vst.msk [vmem:[#allocation4 + $0x228] sm:$0xff] %vm484_vm0, %v14911_v0  ;;  %583 = vst.msk [vmem:[#allocation4 + $0x230] sm:$0xff] %vm484_vm0, %v14911_v0 }
 0x151   : > { %586 = vst.msk [vmem:[#allocation4 + $0x27] sm:$0x1] %vm488_vm1, %v14911_v0  ;;  %587 = vst.msk [vmem:[#allocation4 + $0x47] sm:$0x1] %vm488_vm1, %v14911_v0 }
 0x152   : > { %588 = vst.msk [vmem:[#allocation4 + $0x67] sm:$0x1] %vm488_vm1, %v14911_v0  ;;  %589 = vst.msk [vmem:[#allocation4 + $0x87] sm:$0x1] %vm488_vm1, %v14911_v0 }
 0x153   : > { %590 = vst.msk [vmem:[#allocation4 + $0xa7] sm:$0x1] %vm488_vm1, %v14911_v0  ;;  %591 = vst.msk [vmem:[#allocation4 + $0xc7] sm:$0x1] %vm488_vm1, %v14911_v0 }
 0x154   : > { %592 = vst.msk [vmem:[#allocation4 + $0xe7] sm:$0x1] %vm488_vm1, %v14911_v0  ;;  %593 = vst.msk [vmem:[#allocation4 + $0x107] sm:$0x1] %vm488_vm1, %v14911_v0 }
 0x155   : > { %594 = vst.msk [vmem:[#allocation4 + $0x127] sm:$0x1] %vm488_vm1, %v14911_v0  ;;  %595 = vst.msk [vmem:[#allocation4 + $0x147] sm:$0x1] %vm488_vm1, %v14911_v0 }
 0x156   : > { %596 = vst.msk [vmem:[#allocation4 + $0x167] sm:$0x1] %vm488_vm1, %v14911_v0  ;;  %597 = vst.msk [vmem:[#allocation4 + $0x187] sm:$0x1] %vm488_vm1, %v14911_v0 }
 0x157   : > { %598 = vst.msk [vmem:[#allocation4 + $0x1a7] sm:$0x1] %vm488_vm1, %v14911_v0  ;;  %599 = vst.msk [vmem:[#allocation4 + $0x1c7] sm:$0x1] %vm488_vm1, %v14911_v0 }
 0x158   : > { %600 = vst.msk [vmem:[#allocation4 + $0x1e7] sm:$0x1] %vm488_vm1, %v14911_v0  ;;  %601 = vst.msk [vmem:[#allocation4 + $0x207] sm:$0x1] %vm488_vm1, %v14911_v0 }
 0x159   : > { %604 = vst.msk [vmem:[#allocation4 + $0x38] sm:$0x1] %vm488_vm1, %v14911_v0  ;;  %605 = vst.msk [vmem:[#allocation4 + $0x58] sm:$0x1] %vm488_vm1, %v14911_v0 }
 0x15a   : > { %606 = vst.msk [vmem:[#allocation4 + $0x78] sm:$0x1] %vm488_vm1, %v14911_v0  ;;  %607 = vst.msk [vmem:[#allocation4 + $0x98] sm:$0x1] %vm488_vm1, %v14911_v0 }
 0x15b   : > { %608 = vst.msk [vmem:[#allocation4 + $0xb8] sm:$0x1] %vm488_vm1, %v14911_v0  ;;  %609 = vst.msk [vmem:[#allocation4 + $0xd8] sm:$0x1] %vm488_vm1, %v14911_v0 }
 0x15c   : > { %610 = vst.msk [vmem:[#allocation4 + $0xf8] sm:$0x1] %vm488_vm1, %v14911_v0  ;;  %611 = vst.msk [vmem:[#allocation4 + $0x118] sm:$0x1] %vm488_vm1, %v14911_v0 }
 0x15d   : > { %612 = vst.msk [vmem:[#allocation4 + $0x138] sm:$0x1] %vm488_vm1, %v14911_v0  ;;  %613 = vst.msk [vmem:[#allocation4 + $0x158] sm:$0x1] %vm488_vm1, %v14911_v0 }
 0x15e   : > { %614 = vst.msk [vmem:[#allocation4 + $0x178] sm:$0x1] %vm488_vm1, %v14911_v0  ;;  %615 = vst.msk [vmem:[#allocation4 + $0x198] sm:$0x1] %vm488_vm1, %v14911_v0 }
 0x15f   : > { %616 = vst.msk [vmem:[#allocation4 + $0x1b8] sm:$0x1] %vm488_vm1, %v14911_v0  ;;  %617 = vst.msk [vmem:[#allocation4 + $0x1d8] sm:$0x1] %vm488_vm1, %v14911_v0 }
 0x160   : > { %618 = vst.msk [vmem:[#allocation4 + $0x1f8] sm:$0x1] %vm488_vm1, %v14911_v0  ;;  %619 = vst.msk [vmem:[#allocation4 + $0x218] sm:$0x1] %vm488_vm1, %v14911_v0 }
 0x161   : > { %495 = vst.msk [vmem:[#allocation2 + $0x7] sm:$0x1] %vm488_vm1, %v14911_v0  ;;  %512 = vst.msk [vmem:[#allocation2 + $0x227] sm:$0x1] %vm488_vm1, %v14911_v0 }
 0x162   : > { %513 = vst.msk [vmem:[#allocation2 + $0x18] sm:$0x1] %vm488_vm1, %v14911_v0  ;;  %530 = vst.msk [vmem:[#allocation2 + $0x238] sm:$0x1] %vm488_vm1, %v14911_v0 }
 0x163   : > { %540 = vst.msk [vmem:[#allocation3 + $0x7] sm:$0x1] %vm488_vm1, %v14911_v0  ;;  %557 = vst.msk [vmem:[#allocation3 + $0x227] sm:$0x1] %vm488_vm1, %v14911_v0 }
 0x164   : > { %558 = vst.msk [vmem:[#allocation3 + $0x18] sm:$0x1] %vm488_vm1, %v14911_v0  ;;  %575 = vst.msk [vmem:[#allocation3 + $0x238] sm:$0x1] %vm488_vm1, %v14911_v0 }
 0x165   : > { %585 = vst.msk [vmem:[#allocation4 + $0x7] sm:$0x1] %vm488_vm1, %v14911_v0  ;;  %602 = vst.msk [vmem:[#allocation4 + $0x227] sm:$0x1] %vm488_vm1, %v14911_v0 }
 0x166   : > { %603 = vst.msk [vmem:[#allocation4 + $0x18] sm:$0x1] %vm488_vm1, %v14911_v0  ;;  %620 = vst.msk [vmem:[#allocation4 + $0x238] sm:$0x1] %vm488_vm1, %v14911_v0 }
 0x167   : > { %654 = vst.msk [vmem:[#allocation2 + $0x28] sm:$0xff] %vm484_vm0, %v621_v3  ;;  %655 = vst.msk [vmem:[#allocation2 + $0x30] sm:$0xff] %vm484_vm0, %v622_v5  ;;  %v691_v3 = vld [vmem:[%s15305_s16 + $0x28] sm:$0xff]  ;;  %v693_v5 = vld [vmem:[%s15305_s16 + $0x38] sm:$0xff] }
 0x168   : > { %v751_v7 = vld [vmem:[#allocation2 + $0x7] sm:$0xff]  ;;  %656 = vst.msk [vmem:[#allocation2 + $0x48] sm:$0xff] %vm484_vm0, %v623_v6  ;;  %657 = vst.msk [vmem:[#allocation2 + $0x50] sm:$0xff] %vm484_vm0, %v624_v10 }
 0x169   : > { %v753_v9 = vld [vmem:[#allocation2 + $0x17] sm:$0x3]  ;;  %v2356_v11 = vrot.slane %v751_v7, 2  ;;  %658 = vst.msk [vmem:[#allocation2 + $0x68] sm:$0xff] %vm484_vm0, %v625_v13  ;;  %659 = vst.msk [vmem:[#allocation2 + $0x70] sm:$0xff] %vm484_vm0, %v626_v14  ;;  %v695_v10 = vld [vmem:[%s15305_s16 + $0x48] sm:$0xff] }
 0x16a   : > { %v2359_v12 = vrot.slane %v753_v9, 2  ;;  %660 = vst.msk [vmem:[#allocation2 + $0x88] sm:$0xff] %vm484_vm0, %v627_v15  ;;  %661 = vst.msk [vmem:[#allocation2 + $0x90] sm:$0xff] %vm484_vm0, %v628_v16  ;;  %v15624_v25 = vld [vmem:[#allocation3 + $0x7] sm:$0xff]  ;;  %v700_v16 = vld [vmem:[%s15305_s16 + $0x70] sm:$0xff] }
 0x16b   : > { %v2358_v19 = vsel %vm2355_vm3, %v2356_v11, %v2357_v8  ;;  %662 = vst.msk [vmem:[#allocation2 + $0xa8] sm:$0xff] %vm484_vm0, %v629_v17  ;;  %663 = vst.msk [vmem:[#allocation2 + $0xb0] sm:$0xff] %vm484_vm0, %v630_v18  ;;  %11942 = vmatprep.mubr.msk.f32.mxu1 %vm484_vm0, %v15624_v25  ;;  %v694_v9 = vld [vmem:[%s15305_s16 + $0x40] sm:$0xff]  ;;  %v696_v11 = vld [vmem:[%s15305_s16 + $0x50] sm:$0xff] }
 0x16c   : > { %v2360_v20 = vsel %vm2355_vm3, %v2357_v8, %v2359_v12  ;;  %12142 = vmatprep.mubr.msk.f32.mxu0 %vm484_vm0, %v2358_v19  ;;  %664 = vst.msk [vmem:[#allocation2 + $0xc8] sm:$0xff] %vm484_vm0, %v631_v21  ;;  %665 = vst.msk [vmem:[#allocation2 + $0xd0] sm:$0xff] %vm484_vm0, %v632_v22  ;;  %v697_v12 = vld [vmem:[%s15305_s16 + $0x58] sm:$0xff]  ;;  %v698_v13 = vld [vmem:[%s15305_s16 + $0x60] sm:$0xff] }
 0x16d   : > { %666 = vst.msk [vmem:[#allocation2 + $0xe8] sm:$0xff] %vm484_vm0, %v633_v23  ;;  %12143 = vmatmul.mubr.msk.f32.vlgmr.msra.gmra.mrb[0].mxu0 %vm484_vm0, %v2360_v20  ;;  %667 = vst.msk [vmem:[#allocation2 + $0xf0] sm:$0xff] %vm484_vm0, %v634_v24  ;;  %v699_v14 = vld [vmem:[%s15305_s16 + $0x68] sm:$0xff]  ;;  %v701_v17 = vld [vmem:[%s15305_s16 + $0x78] sm:$0xff] }
 0x16e   : > { %12191 = vmatpush3.msk.msra.mxu0 %vm957_vm2, %v2843_v2  ;;  %v15633_v27 = vld [vmem:[#allocation2 + $0x27] sm:$0xff]  ;;  %v15637_v30 = vld [vmem:[#allocation2 + $0x2f] sm:$0xff]  ;;  %v15640_v32 = vld [vmem:[#allocation2 + $0x37] sm:$0x3]  ;;  %719 = vst.msk [vmem:[#allocation3 + $0x28] sm:$0xff] %vm484_vm0, %v686_v28 }
 0x16f   : > { %v2361_v31 = vrot.slane %v15633_v27, 2  ;;  %v15642_v33 = vld [vmem:[#allocation2 + $0x47] sm:$0xff]  ;;  %12240 = vmatprep.subr.msk.mxu0 %vm957_vm2, %v15628_v26  ;;  %720 = vst.msk [vmem:[#allocation3 + $0x30] sm:$0xff] %vm484_vm0, %v687_v29  ;;  %v2362_v34 = vrot.slane %v15637_v30, 2  ;;  %v2364_v35 = vrot.slane %v15640_v32, 2  ;;  %v15650_v36 = vld [vmem:[#allocation2 + $0x4f] sm:$0xff] }
 0x170   : > { %v2366_v37 = vrot.slane %v15642_v33, 2  ;;  %v2367_v39 = vrot.slane %v15650_v36, 2  ;;  %v15655_v40 = vld [vmem:[#allocation2 + $0x57] sm:$0x3]  ;;  %v15657_v41 = vld [vmem:[#allocation2 + $0x67] sm:$0xff]  ;;  %v15659_v42 = vld [vmem:[#allocation2 + $0x6f] sm:$0xff] }
 0x171   : > { %721 = vst.msk [vmem:[#allocation3 + $0x48] sm:$0xff] %vm484_vm0, %v688_v38  ;;  %v15663_v43 = vsel %vm2355_vm3, %v2361_v31, %v2362_v34  ;;  %v15666_v44 = vsel %vm2355_vm3, %v2362_v34, %v2364_v35  ;;  %v2369_v45 = vrot.slane %v15655_v40, 2  ;;  %v2371_v46 = vrot.slane %v15657_v41, 2  ;;  %v15670_v47 = vld [vmem:[#allocation2 + $0x77] sm:$0x3]  ;;  %v15678_v50 = vld [vmem:[#allocation2 + $0x87] sm:$0xff] }
 0x172   : > { %19672 = vst [vmem:[#allocation28_spill] sm:$0xff] %v15663_v43  ;;  %19673 = vst [vmem:[#allocation29_spill] sm:$0xff] %v15666_v44  ;;  %12145 = vmatprep.mubr.msk.f32.mxu0 %vm484_vm0, %v15663_v43  ;;  %v15675_v48 = vsel %vm2355_vm3, %v2366_v37, %v2367_v39  ;;  %v2372_v49 = vrot.slane %v15659_v42, 2  ;;  %v15680_v51 = vld [vmem:[#allocation2 + $0x8f] sm:$0xff]  ;;  %v2374_v53 = vrot.slane %v15670_v47, 2  ;;  %v2376_v55 = vrot.slane %v15678_v50, 2 }
 0x173   : > { %19674 = vst [vmem:[#allocation30_spill] sm:$0xff] %v15675_v48  ;;  %12146 = vmatmul.mubr.msk.f32.gmra.mrb[2].mxu0 %vm484_vm0, %v15666_v44  ;;  %v15687_v52 = vsel %vm2355_vm3, %v2367_v39, %v2369_v45  ;;  %v2377_v56 = vrot.slane %v15680_v51, 2  ;;  %v15695_v57 = vld [vmem:[#allocation2 + $0x97] sm:$0x3]  ;;  %v15697_v58 = vld [vmem:[#allocation2 + $0xa7] sm:$0xff]  ;;  %v15699_v59 = vld [vmem:[#allocation2 + $0xaf] sm:$0xff] }
 0x174   : > { %12148 = vmatprep.mubr.msk.f32.mxu0 %vm484_vm0, %v15675_v48  ;;  %19675 = vst [vmem:[#allocation31_spill] sm:$0xff] %v15687_v52  ;;  %v15691_v54 = vsel %vm2355_vm3, %v2371_v46, %v2372_v49  ;;  %v15703_v60 = vld [vmem:[#allocation2 + $0xb7] sm:$0x3]  ;;  %v15710_v63 = vsel %vm2355_vm3, %v2372_v49, %v2374_v53  ;;  %v2379_v0 = vrot.slane %v15695_v57, 2  ;;  %v15713_v1 = vld [vmem:[#allocation2 + $0xc7] sm:$0xff]  ;;  %v15715_v2 = vld [vmem:[#allocation2 + $0xcf] sm:$0xff] }
 0x175   : > { %19676 = vst [vmem:[#allocation32_spill] sm:$0xff] %v15691_v54  ;;  %19677 = vst [vmem:[#allocation33_spill] sm:$0xff] %v15703_v60  ;;  %v15723_v6 = vsel %vm2355_vm3, %v2376_v55, %v2377_v56  ;;  %v2381_v7 = vrot.slane %v15697_v58, 2  ;;  %v2382_v8 = vrot.slane %v15699_v59, 2  ;;  %v15741_v15 = vld [vmem:[#allocation2 + $0xd7] sm:$0x3] }
 0x176   : > { %19678 = vst [vmem:[#allocation34_spill] sm:$0xff] %v15710_v63  ;;  %722 = vst.msk [vmem:[#allocation3 + $0x50] sm:$0xff] %vm484_vm0, %v689_v61  ;;  %v702_v18 = vld [vmem:[%s15305_s16 + $0x80] sm:$0xff]  ;;  %v15752_v19 = vsel %vm2355_vm3, %v2377_v56, %v2379_v0  ;;  %v2384_v20 = vrot.slane %v15703_v60, 2  ;;  %v15757_v22 = vld [vmem:[#allocation2 + $0xef] sm:$0xff]  ;;  %v2386_v31 = vrot.slane %v15713_v1, 2 }
 0x177   : > { %12149 = vmatmul.mubr.msk.f32.gmra.mrb[4].mxu0 %vm484_vm0, %v15687_v52  ;;  %723 = vst.msk [vmem:[#allocation3 + $0x68] sm:$0xff] %vm484_vm0, %v690_v62  ;;  %19679 = vst [vmem:[#allocation35_spill] sm:$0xff] %v15723_v6  ;;  %v15755_v21 = vld [vmem:[#allocation2 + $0xe7] sm:$0xff]  ;;  %v704_v24 = vld [vmem:[%s15305_s16 + $0x90] sm:$0xff]  ;;  %v15766_v29 = vsel %vm2355_vm3, %v2381_v7, %v2382_v8  ;;  %v2387_v34 = vrot.slane %v15715_v2, 2  ;;  %v2389_v53 = vrot.slane %v15741_v15, 2 }
 0x178   : > { %12151 = vmatprep.mubr.msk.f32.mxu0 %vm484_vm0, %v15691_v54  ;;  %724 = vst.msk [vmem:[#allocation3 + $0x70] sm:$0xff] %vm484_vm0, %v691_v3  ;;  %725 = vst.msk [vmem:[#allocation3 + $0x88] sm:$0xff] %vm484_vm0, %v692_v4  ;;  %v703_v23 = vld [vmem:[%s15305_s16 + $0x88] sm:$0xff]  ;;  %v705_v28 = vld [vmem:[%s15305_s16 + $0x98] sm:$0xff]  ;;  %v15790_v49 = vsel %vm2355_vm3, %v2382_v8, %v2384_v20  ;;  %v2391_v56 = vrot.slane %v15755_v21, 2  ;;  %v2392_v61 = vrot.slane %v15757_v22, 2 }
 0x179   : > { %726 = vst.msk [vmem:[#allocation3 + $0x90] sm:$0xff] %vm484_vm0, %v693_v5  ;;  %727 = vst.msk [vmem:[#allocation3 + $0xa8] sm:$0xff] %vm484_vm0, %v694_v9  ;;  %v706_v35 = vld [vmem:[%s15305_s16 + $0xa0] sm:$0xff]  ;;  %v707_v37 = vld [vmem:[%s15305_s16 + $0xa8] sm:$0xff]  ;;  %v15794_v55 = vsel %vm2355_vm3, %v2386_v31, %v2387_v34  ;;  %v15807_v3 = vsel %vm2355_vm3, %v2387_v34, %v2389_v53  ;;  %v2436_v7 = vrot.slane %v15624_v25, 2 }
 0x17a   : > { %728 = vst.msk [vmem:[#allocation3 + $0xb0] sm:$0xff] %vm484_vm0, %v695_v10  ;;  %729 = vst.msk [vmem:[#allocation3 + $0xc8] sm:$0xff] %vm484_vm0, %v696_v11  ;;  %v708_v38 = vld [vmem:[%s15305_s16 + $0xb0] sm:$0xff]  ;;  %v709_v39 = vld [vmem:[%s15305_s16 + $0xb8] sm:$0xff]  ;;  %v15811_v5 = vsel %vm2355_vm3, %v2391_v56, %v2392_v61 }
 0x17b   : > { %12152 = vmatmul.mubr.msk.f32.gmra.mrb[6].mxu0 %vm484_vm0, %v15710_v63  ;;  %19680 = vst [vmem:[#allocation36_spill] sm:$0xff] %v15741_v15  ;;  %730 = vst.msk [vmem:[#allocation3 + $0xd0] sm:$0xff] %vm484_vm0, %v697_v12  ;;  %v710_v45 = vld [vmem:[%s15305_s16 + $0xc0] sm:$0xff]  ;;  %v711_v46 = vld [vmem:[%s15305_s16 + $0xc8] sm:$0xff] }
 0x17c   : > { %731 = vst.msk [vmem:[#allocation3 + $0xe8] sm:$0xff] %vm484_vm0, %v698_v13  ;;  %732 = vst.msk [vmem:[#allocation3 + $0xf0] sm:$0xff] %vm484_vm0, %v699_v14  ;;  %12154 = vmatprep.mubr.msk.f32.mxu0 %vm484_vm0, %v15723_v6  ;;  %v15798_v62 = vld [vmem:[#allocation2 + $0xf7] sm:$0x3]  ;;  %v15800_v0 = vld [vmem:[#allocation3 + $0xf] sm:$0xff] }
 0x17d   : > { %19681 = vst [vmem:[#allocation37_spill] sm:$0xff] %v15752_v19  ;;  %733 = vst.msk [vmem:[#allocation3 + $0x108] sm:$0xff] %vm484_vm0, %v700_v16  ;;  %v2394_v4 = vrot.slane %v15798_v62, 2  ;;  %v2437_v8 = vrot.slane %v15800_v0, 2  ;;  %v807_v9 = vld [vmem:[#allocation3 + $0x17] sm:$0x3] }
 0x17e   : > { %734 = vst.msk [vmem:[#allocation3 + $0x110] sm:$0xff] %vm484_vm0, %v701_v17  ;;  %735 = vst.msk [vmem:[#allocation3 + $0x128] sm:$0xff] %vm484_vm0, %v702_v18  ;;  %v15815_v10 = vld [vmem:[#allocation3 + $0x27] sm:$0xff]  ;;  %v15817_v11 = vld [vmem:[#allocation3 + $0x2f] sm:$0xff]  ;;  %v2439_v13 = vrot.slane %v807_v9, 2 }
 0x17f   : > { %19682 = vst [vmem:[#allocation38_spill] sm:$0xff] %v15766_v29  ;;  %736 = vst.msk [vmem:[#allocation3 + $0x130] sm:$0xff] %vm484_vm0, %v703_v23  ;;  %12155 = vmatmul.mubr.msk.f32.gmra.mrb[8].mxu0 %vm484_vm0, %v15752_v19  ;;  %v15824_v12 = vsel %vm2355_vm3, %v2392_v61, %v2394_v4  ;;  %v2438_v25 = vsel %vm2355_vm3, %v2436_v7, %v2437_v8  ;;  %v2441_v14 = vrot.slane %v15815_v10, 2  ;;  %v2442_v16 = vrot.slane %v15817_v11, 2  ;;  %v15829_v17 = vld [vmem:[#allocation3 + $0x37] sm:$0x3] }
 0x180   : > { %737 = vst.msk [vmem:[#allocation3 + $0x148] sm:$0xff] %vm484_vm0, %v704_v24  ;;  %738 = vst.msk [vmem:[#allocation3 + $0x150] sm:$0xff] %vm484_vm0, %v705_v28  ;;  %12157 = vmatprep.mubr.msk.f32.mxu0 %vm484_vm0, %v15766_v29  ;;  %v15831_v18 = vld [vmem:[#allocation3 + $0x47] sm:$0xff]  ;;  %v15833_v20 = vld [vmem:[#allocation3 + $0x4f] sm:$0xff]  ;;  %v2440_v24 = vsel %vm2355_vm3, %v2437_v8, %v2439_v13  ;;  %v2444_v28 = vrot.slane %v15829_v17, 2 }
 0x181   : > { %739 = vst.msk [vmem:[#allocation3 + $0x168] sm:$0xff] %vm484_vm0, %v706_v35  ;;  %740 = vst.msk [vmem:[#allocation3 + $0x170] sm:$0xff] %vm484_vm0, %v707_v37  ;;  %v15837_v23 = vld [vmem:[#allocation3 + $0x57] sm:$0x3]  ;;  %v15842_v31 = vld [vmem:[#allocation3 + $0x67] sm:$0xff] }
 0x182   : > { %741 = vst.msk [vmem:[#allocation3 + $0x188] sm:$0xff] %vm484_vm0, %v708_v38  ;;  %742 = vst.msk [vmem:[#allocation3 + $0x190] sm:$0xff] %vm484_vm0, %v709_v39  ;;  %v15844_v34 = vld [vmem:[#allocation3 + $0x6f] sm:$0xff]  ;;  %v713_v37 = vld [vmem:[%s15305_s16 + $0xd8] sm:$0xff]  ;;  %v15850_v39 = vsel %vm2355_vm3, %v2441_v14, %v2442_v16 }
 0x183   : > { %743 = vst.msk [vmem:[#allocation3 + $0x1a8] sm:$0xff] %vm484_vm0, %v710_v45  ;;  %744 = vst.msk [vmem:[#allocation3 + $0x1b0] sm:$0xff] %vm484_vm0, %v711_v46  ;;  %12158 = vmatmul.mubr.msk.f32.gmra.mrb[10].mxu0 %vm484_vm0, %v15790_v49  ;;  %v712_v35 = vld [vmem:[%s15305_s16 + $0xd0] sm:$0xff]  ;;  %v714_v38 = vld [vmem:[%s15305_s16 + $0xe0] sm:$0xff]  ;;  %v2446_v45 = vrot.slane %v15831_v18, 2  ;;  %v2447_v46 = vrot.slane %v15833_v20, 2 }
 0x184   : > { %19683 = vst [vmem:[#allocation39_spill] sm:$0xff] %v15790_v49  ;;  %19684 = vst [vmem:[#allocation40_spill] sm:$0xff] %v15794_v55  ;;  %12160 = vmatprep.mubr.msk.f32.mxu0 %vm484_vm0, %v15794_v55  ;;  %v715_v53 = vld [vmem:[%s15305_s16 + $0xe8] sm:$0xff]  ;;  %v15858_v56 = vld [vmem:[#allocation11 + $0xc] sm:$0xf] }
 0x185   : > { %19685 = vst [vmem:[#allocation41_spill] sm:$0xff] %v15798_v62  ;;  %19686 = vst [vmem:[#allocation42_spill] sm:$0xff] %v15807_v3  ;;  %v635_v61 = vld [vmem:[%s15297_s23 + $0x70] sm:$0xff]  ;;  %v636_v4 = vld [vmem:[%s15297_s23 + $0x78] sm:$0xff] }
 0x186   : > { %19687 = vst [vmem:[#allocation43_spill] sm:$0xff] %v15811_v5  ;;  %19688 = vst [vmem:[#allocation44_spill] sm:$0xff] %v15824_v12  ;;  %v637_v7 = vld [vmem:[%s15297_s23 + $0x80] sm:$0xff]  ;;  %v638_v8 = vld [vmem:[%s15297_s23 + $0x88] sm:$0xff] }
 0x187   : > { %12161 = vmatmul.mubr.msk.f32.gmra.mrb[12].mxu0 %vm484_vm0, %v15807_v3  ;;  %19689 = vst [vmem:[#allocation45_spill] sm:$0xff] %v15829_v17  ;;  %19690 = vst [vmem:[#allocation46_spill] sm:$0xff] %v15837_v23  ;;  %v15867_v9 = vld [vmem:[#allocation3 + $0x77] sm:$0x3]  ;;  %v641_v14 = vld [vmem:[%s15297_s23 + $0xa0] sm:$0xff] }
 0x188   : > { %12163 = vmatprep.mubr.msk.f32.mxu0 %vm484_vm0, %v15811_v5  ;;  %19691 = vst [vmem:[#allocation47_spill] sm:$0xff] %v15850_v39  ;;  %745 = vst.msk [vmem:[#allocation3 + $0x1c8] sm:$0xff] %vm484_vm0, %v712_v35  ;;  %v639_v13 = vld [vmem:[%s15297_s23 + $0x90] sm:$0xff]  ;;  %v2449_v35 = vrot.slane %v15837_v23, 2  ;;  %v15972_v3 = vld [vmem:[#allocation3 + $0xe7] sm:$0xff] }
 0x189   : > { %746 = vst.msk [vmem:[#allocation3 + $0x1d0] sm:$0xff] %vm484_vm0, %v713_v37  ;;  %747 = vst.msk [vmem:[#allocation3 + $0x1e8] sm:$0xff] %vm484_vm0, %v714_v38  ;;  %v15883_v37 = vld [vmem:[#allocation3 + $0x87] sm:$0xff]  ;;  %v15885_v38 = vld [vmem:[#allocation3 + $0x8f] sm:$0xff] }
 0x18a   : > { %748 = vst.msk [vmem:[#allocation3 + $0x1f0] sm:$0xff] %vm484_vm0, %v715_v53  ;;  %668 = vst.msk [vmem:[#allocation2 + $0x108] sm:$0xff] %vm484_vm0, %v635_v61  ;;  %v643_v53 = vld [vmem:[%s15297_s23 + $0xb0] sm:$0xff]  ;;  %v2451_v61 = vrot.slane %v15842_v31, 2  ;;  %v15991_v29 = vld [vmem:[#allocation3 + $0x107] sm:$0xff] }
 0x18b   : > { %12164 = vmatmul.mubr.msk.f32.gmra.mrb[14].mxu0 %vm484_vm0, %v15824_v12  ;;  %19692 = vst [vmem:[#allocation48_spill] sm:$0xff] %v15867_v9  ;;  %669 = vst.msk [vmem:[#allocation2 + $0x110] sm:$0xff] %vm484_vm0, %v636_v4  ;;  %v2452_v4 = vrot.slane %v15844_v34, 2  ;;  %v15970_v5 = vld [vmem:[#allocation3 + $0xd7] sm:$0x3]  ;;  %v16010_v63 = vld [vmem:[#allocation3 + $0x127] sm:$0xff] }
 0x18c   : > { %12192 = vmatprep.mubr.msk.f32.mxu0 %vm484_vm0, %v2438_v25  ;;  %670 = vst.msk [vmem:[#allocation2 + $0x128] sm:$0xff] %vm484_vm0, %v637_v7  ;;  %671 = vst.msk [vmem:[#allocation2 + $0x130] sm:$0xff] %vm484_vm0, %v638_v8  ;;  %v640_v25 = vld [vmem:[%s15297_s23 + $0x98] sm:$0xff]  ;;  %v645_v7 = vld [vmem:[%s15297_s23 + $0xc0] sm:$0xff] }
 0x18d   : > { %672 = vst.msk [vmem:[#allocation2 + $0x148] sm:$0xff] %vm484_vm0, %v639_v13  ;;  %673 = vst.msk [vmem:[#allocation2 + $0x150] sm:$0xff] %vm484_vm0, %v640_v25  ;;  %v646_v8 = vld [vmem:[%s15297_s23 + $0xc8] sm:$0xff]  ;;  %v647_v13 = vld [vmem:[%s15297_s23 + $0xd0] sm:$0xff] }
 0x18e   : > { %674 = vst.msk [vmem:[#allocation2 + $0x168] sm:$0xff] %vm484_vm0, %v641_v14  ;;  %676 = vst.msk [vmem:[#allocation2 + $0x188] sm:$0xff] %vm484_vm0, %v643_v53  ;;  %v649_v25 = vld [vmem:[%s15297_s23 + $0xe0] sm:$0xff]  ;;  %v650_v14 = vld [vmem:[%s15297_s23 + $0xe8] sm:$0xff] }
 0x18f   : > { %12193 = vmatmul.mubr.msk.f32.vlgmr.msra.gmra.mrb[0].mxu0 %vm484_vm0, %v2440_v24  ;;  %v15880_v24 = vsel %vm2355_vm3, %v2442_v16, %v2444_v28  ;;  %v644_v16 = vld [vmem:[%s15297_s23 + $0xb8] sm:$0xff]  ;;  %v15894_v28 = vsel %vm2355_vm3, %v2446_v45, %v2447_v46  ;;  %678 = vst.msk [vmem:[#allocation2 + $0x1a8] sm:$0xff] %vm484_vm0, %v645_v7  ;;  %679 = vst.msk [vmem:[#allocation2 + $0x1b0] sm:$0xff] %vm484_vm0, %v646_v8  ;;  %v2454_v7 = vrot.slane %v15867_v9, 2  ;;  %v16029_v48 = vld [vmem:[#allocation3 + $0x147] sm:$0xff] }
 0x190   : > { %12241 = vmatpush3.msk.msra.mxu0 %vm957_vm2, %v15628_v26  ;;  %12195 = vmatprep.mubr.msk.f32.mxu0 %vm484_vm0, %v15850_v39  ;;  %19693 = vst [vmem:[#allocation49_spill] sm:$0xff] %v15880_v24  ;;  %v642_v26 = vld [vmem:[%s15297_s23 + $0xa8] sm:$0xff]  ;;  %19694 = vst [vmem:[#allocation50_spill] sm:$0xff] %v15894_v28  ;;  %v648_v45 = vld [vmem:[%s15297_s23 + $0xd8] sm:$0xff]  ;;  %v15928_v8 = vsel %vm2355_vm3, %v2451_v61, %v2452_v4 }
 0x191   : > { %12290 = vmatprep.subr.msk.mxu0 %vm957_vm2, %v15858_v56  ;;  %675 = vst.msk [vmem:[#allocation2 + $0x170] sm:$0xff] %vm484_vm0, %v642_v26  ;;  %677 = vst.msk [vmem:[#allocation2 + $0x190] sm:$0xff] %vm484_vm0, %v644_v16  ;;  %v651_v26 = vld [vmem:[%s15297_s23 + $0xf0] sm:$0xff]  ;;  %v652_v53 = vld [vmem:[%s15297_s23 + $0xf8] sm:$0xff]  ;;  %v15922_v16 = vsel %vm2355_vm3, %v2447_v46, %v2449_v35  ;;  %v15943_v46 = vsel %vm2355_vm3, %v2452_v4, %v2454_v7 }
 0x192   : > { %680 = vst.msk [vmem:[#allocation2 + $0x1c8] sm:$0xff] %vm484_vm0, %v647_v13  ;;  %681 = vst.msk [vmem:[#allocation2 + $0x1d0] sm:$0xff] %vm484_vm0, %v648_v45  ;;  %v2456_v13 = vrot.slane %v15883_v37, 2  ;;  %v2457_v45 = vrot.slane %v15885_v38, 2  ;;  %v15953_v39 = vld [vmem:[#allocation3 + $0xc7] sm:$0xff]  ;;  %v16126_v62 = vld [vmem:[#allocation3 + $0x1ef] sm:$0xff] }
 0x193   : > { %12196 = vmatmul.mubr.msk.f32.gmra.mrb[2].mxu0 %vm484_vm0, %v15880_v24  ;;  %682 = vst.msk [vmem:[#allocation2 + $0x1e8] sm:$0xff] %vm484_vm0, %v649_v25  ;;  %683 = vst.msk [vmem:[#allocation2 + $0x1f0] sm:$0xff] %vm484_vm0, %v650_v14  ;;  %v15932_v25 = vld [vmem:[#allocation3 + $0x97] sm:$0x3]  ;;  %v15934_v14 = vld [vmem:[#allocation3 + $0xa7] sm:$0xff] }
 0x194   : > { %12198 = vmatprep.mubr.msk.f32.mxu0 %vm484_vm0, %v15894_v28  ;;  %19695 = vst [vmem:[#allocation51_spill] sm:$0xff] %v15922_v16  ;;  %684 = vst.msk [vmem:[#allocation2 + $0x208] sm:$0xff] %vm484_vm0, %v651_v26  ;;  %v15936_v28 = vld [vmem:[#allocation3 + $0xaf] sm:$0xff]  ;;  %v2459_v35 = vrot.slane %v15932_v25, 2  ;;  %v15947_v61 = vsel %vm2355_vm3, %v2456_v13, %v2457_v45  ;;  %v2461_v26 = vrot.slane %v15934_v14, 2  ;;  %v16105_v23 = vld [vmem:[#allocation3 + $0x1c7] sm:$0xff] }
 0x195   : > { %685 = vst.msk [vmem:[#allocation2 + $0x210] sm:$0xff] %vm484_vm0, %v652_v53  ;;  %19696 = vst [vmem:[#allocation52_spill] sm:$0xff] %v15928_v8  ;;  %v2462_v53 = vrot.slane %v15936_v28, 2  ;;  %v15951_v24 = vld [vmem:[#allocation3 + $0xb7] sm:$0x3] }
 0x196   : > { %19697 = vst [vmem:[#allocation53_spill] sm:$0xff] %v15932_v25  ;;  %19698 = vst [vmem:[#allocation54_spill] sm:$0xff] %v15943_v46  ;;  %v15962_v4 = vsel %vm2355_vm3, %v2457_v45, %v2459_v35  ;;  %v2464_v7 = vrot.slane %v15951_v24, 2  ;;  %v2469_v35 = vrot.slane %v15970_v5, 2  ;;  %v15989_v49 = vld [vmem:[#allocation3 + $0xf7] sm:$0x3] }
 0x197   : > { %12199 = vmatmul.mubr.msk.f32.gmra.mrb[4].mxu0 %vm484_vm0, %v15922_v16  ;;  %19699 = vst [vmem:[#allocation55_spill] sm:$0xff] %v15947_v61  ;;  %19700 = vst [vmem:[#allocation56_spill] sm:$0xff] %v15951_v24  ;;  %v15955_v16 = vld [vmem:[#allocation3 + $0xcf] sm:$0xff]  ;;  %v15966_v13 = vsel %vm2355_vm3, %v2461_v26, %v2462_v53  ;;  %v16008_v6 = vld [vmem:[#allocation3 + $0x117] sm:$0x3] }
 0x198   : > { %12201 = vmatprep.mubr.msk.f32.mxu0 %vm484_vm0, %v15928_v8  ;;  %19701 = vst [vmem:[#allocation57_spill] sm:$0xff] %v15962_v4  ;;  %19702 = vst [vmem:[#allocation58_spill] sm:$0xff] %v15966_v13  ;;  %v2466_v8 = vrot.slane %v15953_v39, 2  ;;  %v2467_v12 = vrot.slane %v15955_v16, 2  ;;  %v15981_v45 = vsel %vm2355_vm3, %v2462_v53, %v2464_v7  ;;  %v16027_v52 = vld [vmem:[#allocation3 + $0x137] sm:$0x3] }
 0x199   : > { %19703 = vst [vmem:[#allocation59_spill] sm:$0xff] %v15970_v5  ;;  %19704 = vst [vmem:[#allocation60_spill] sm:$0xff] %v15981_v45  ;;  %v16046_v43 = vld [vmem:[#allocation3 + $0x157] sm:$0x3]  ;;  %v16067_v5 = vld [vmem:[#allocation3 + $0x187] sm:$0xff] }
 0x19a   : > { %v15985_v26 = vsel %vm2355_vm3, %v2466_v8, %v2467_v12  ;;  %19706 = vst [vmem:[#allocation62_spill] sm:$0xff] %v15989_v49  ;;  %v16000_v53 = vsel %vm2355_vm3, %v2467_v12, %v2469_v35  ;;  %v2474_v8 = vrot.slane %v15989_v49, 2  ;;  %19709 = vst [vmem:[#allocation65_spill] sm:$0xff] %v16008_v6  ;;  %v16065_v49 = vld [vmem:[#allocation3 + $0x177] sm:$0x3]  ;;  %v16086_v25 = vld [vmem:[#allocation3 + $0x1a7] sm:$0xff] }
 0x19b   : > { %12202 = vmatmul.mubr.msk.f32.gmra.mrb[6].mxu0 %vm484_vm0, %v15943_v46  ;;  %v15974_v46 = vld [vmem:[#allocation3 + $0xef] sm:$0xff]  ;;  %19705 = vst [vmem:[#allocation61_spill] sm:$0xff] %v15985_v26  ;;  %19707 = vst [vmem:[#allocation63_spill] sm:$0xff] %v16000_v53  ;;  %v16084_v24 = vld [vmem:[#allocation3 + $0x197] sm:$0x3] }
 0x19c   : > { %12204 = vmatprep.mubr.msk.f32.mxu0 %vm484_vm0, %v15947_v61  ;;  %v2471_v61 = vrot.slane %v15972_v3, 2  ;;  %v2472_v55 = vrot.slane %v15974_v46, 2  ;;  %19712 = vst [vmem:[#allocation68_spill] sm:$0xff] %v16027_v52  ;;  %19715 = vst [vmem:[#allocation71_spill] sm:$0xff] %v16046_v43  ;;  %v16103_v9 = vld [vmem:[#allocation3 + $0x1b7] sm:$0x3] }
 0x19d   : > { %19718 = vst [vmem:[#allocation74_spill] sm:$0xff] %v16065_v49  ;;  %19721 = vst [vmem:[#allocation77_spill] sm:$0xff] %v16084_v24  ;;  %v16122_v17 = vld [vmem:[#allocation3 + $0x1d7] sm:$0x3] }
 0x19e   : > { %v16004_v7 = vsel %vm2355_vm3, %v2471_v61, %v2472_v55  ;;  %v16019_v12 = vsel %vm2355_vm3, %v2472_v55, %v2474_v8  ;;  %v2479_v61 = vrot.slane %v16008_v6, 2  ;;  %v16048_v6 = vld [vmem:[#allocation3 + $0x167] sm:$0xff]  ;;  %19725 = vst [vmem:[#allocation81_spill] sm:$0xff] %v16103_v9  ;;  %19726 = vst [vmem:[#allocation82_spill] sm:$0xff] %v16105_v23  ;;  %v16141_v15 = vld [vmem:[#allocation3 + $0x1f7] sm:$0x3] }
 0x19f   : > { %12205 = vmatmul.mubr.msk.f32.gmra.mrb[8].mxu0 %vm484_vm0, %v15962_v4  ;;  %v15993_v4 = vld [vmem:[#allocation3 + $0x10f] sm:$0xff]  ;;  %19708 = vst [vmem:[#allocation64_spill] sm:$0xff] %v16004_v7  ;;  %19710 = vst [vmem:[#allocation66_spill] sm:$0xff] %v16019_v12 }
 0x1a0   : > { %12207 = vmatprep.mubr.msk.f32.mxu0 %vm484_vm0, %v15966_v13  ;;  %v2476_v13 = vrot.slane %v15991_v29, 2  ;;  %v2477_v19 = vrot.slane %v15993_v4, 2  ;;  %19730 = vst [vmem:[#allocation86_spill] sm:$0xff] %v16122_v17  ;;  %19734 = vst [vmem:[#allocation90_spill] sm:$0xff] %v16141_v15  ;;  %v716_v60 = vld [vmem:[%s15305_s16 + $0xf0] sm:$0xff] }
 0x1a1   : > { %749 = vst.msk [vmem:[#allocation3 + $0x208] sm:$0xff] %vm484_vm0, %v716_v60 }
 0x1a2   : > { %v16023_v35 = vsel %vm2355_vm3, %v2476_v13, %v2477_v19  ;;  %v16038_v55 = vsel %vm2355_vm3, %v2477_v19, %v2479_v61  ;;  %v2484_v13 = vrot.slane %v16027_v52, 2 }
 0x1a3   : > { %12208 = vmatmul.mubr.msk.f32.gmra.mrb[10].mxu0 %vm484_vm0, %v15981_v45  ;;  %v16012_v45 = vld [vmem:[#allocation3 + $0x12f] sm:$0xff]  ;;  %19711 = vst [vmem:[#allocation67_spill] sm:$0xff] %v16023_v35  ;;  %19713 = vst [vmem:[#allocation69_spill] sm:$0xff] %v16038_v55 }
 0x1a4   : > { %12210 = vmatprep.mubr.msk.f32.mxu0 %vm484_vm0, %v15985_v26  ;;  %v2481_v26 = vrot.slane %v16010_v63, 2  ;;  %v2482_v54 = vrot.slane %v16012_v45, 2 }
 0x1a6   : > { %v16042_v8 = vsel %vm2355_vm3, %v2481_v26, %v2482_v54  ;;  %v16057_v19 = vsel %vm2355_vm3, %v2482_v54, %v2484_v13  ;;  %v2489_v26 = vrot.slane %v16046_v43, 2 }
 0x1a7   : > { %12211 = vmatmul.mubr.msk.f32.gmra.mrb[12].mxu0 %vm484_vm0, %v16000_v53  ;;  %v16031_v53 = vld [vmem:[#allocation3 + $0x14f] sm:$0xff]  ;;  %19714 = vst [vmem:[#allocation70_spill] sm:$0xff] %v16042_v8  ;;  %19716 = vst [vmem:[#allocation72_spill] sm:$0xff] %v16057_v19 }
 0x1a8   : > { %12213 = vmatprep.mubr.msk.f32.mxu0 %vm484_vm0, %v16004_v7  ;;  %v2486_v7 = vrot.slane %v16029_v48, 2  ;;  %v2487_v44 = vrot.slane %v16031_v53, 2 }
 0x1aa   : > { %v16061_v61 = vsel %vm2355_vm3, %v2486_v7, %v2487_v44  ;;  %v16076_v54 = vsel %vm2355_vm3, %v2487_v44, %v2489_v26  ;;  %v2494_v7 = vrot.slane %v16065_v49, 2 }
 0x1ab   : > { %12214 = vmatmul.mubr.msk.f32.gmra.mrb[14].mxu0 %vm484_vm0, %v16019_v12  ;;  %v16050_v12 = vld [vmem:[#allocation3 + $0x16f] sm:$0xff]  ;;  %19717 = vst [vmem:[#allocation73_spill] sm:$0xff] %v16061_v61  ;;  %19719 = vst [vmem:[#allocation75_spill] sm:$0xff] %v16076_v54 }
 0x1ac   : > { %12216 = vmatprep.mubr.msk.f32.mxu0 %vm484_vm0, %v16023_v35  ;;  %v2491_v35 = vrot.slane %v16048_v6, 2  ;;  %v2492_v52 = vrot.slane %v16050_v12, 2 }
 0x1ae   : > { %v16080_v13 = vsel %vm2355_vm3, %v2491_v35, %v2492_v52  ;;  %v16095_v44 = vsel %vm2355_vm3, %v2492_v52, %v2494_v7  ;;  %v2499_v35 = vrot.slane %v16084_v24, 2 }
 0x1af   : > { %12217 = vmatmul.mubr.msk.f32.gmra.mrb[16].mxu0 %vm484_vm0, %v16038_v55  ;;  %v16069_v55 = vld [vmem:[#allocation3 + $0x18f] sm:$0xff]  ;;  %19720 = vst [vmem:[#allocation76_spill] sm:$0xff] %v16080_v13  ;;  %19723 = vst [vmem:[#allocation79_spill] sm:$0xff] %v16095_v44 }
 0x1b0   : > { %12219 = vmatprep.mubr.msk.f32.mxu0 %vm484_vm0, %v16042_v8  ;;  %v2496_v8 = vrot.slane %v16067_v5, 2  ;;  %v2497_v43 = vrot.slane %v16069_v55, 2 }
 0x1b2   : > { %v16099_v26 = vsel %vm2355_vm3, %v2496_v8, %v2497_v43  ;;  %v16114_v52 = vsel %vm2355_vm3, %v2497_v43, %v2499_v35  ;;  %v2504_v8 = vrot.slane %v16103_v9, 2  ;;  %v2512_v9 = vrot.slane %v16126_v62, 2 }
 0x1b3   : > { %12220 = vmatmul.mubr.msk.f32.gmra.mrb[18].mxu0 %vm484_vm0, %v16057_v19  ;;  %v16088_v19 = vld [vmem:[#allocation3 + $0x1af] sm:$0xff]  ;;  %19724 = vst [vmem:[#allocation80_spill] sm:$0xff] %v16099_v26  ;;  %19728 = vst [vmem:[#allocation84_spill] sm:$0xff] %v16114_v52 }
 0x1b4   : > { %12222 = vmatprep.mubr.msk.f32.mxu0 %vm484_vm0, %v16061_v61  ;;  %19722 = vst [vmem:[#allocation78_spill] sm:$0xff] %v16088_v19  ;;  %v2501_v61 = vrot.slane %v16086_v25, 2  ;;  %v2502_v49 = vrot.slane %v16088_v19, 2 }
 0x1b6   : > { %v16118_v7 = vsel %vm2355_vm3, %v2501_v61, %v2502_v49  ;;  %v16133_v43 = vsel %vm2355_vm3, %v2502_v49, %v2504_v8  ;;  %v2509_v61 = vrot.slane %v16122_v17, 2  ;;  %v16250_v17 = vld [vmem:[#allocation2 + $0x1cf] sm:$0xff] }
 0x1b7   : > { %12223 = vmatmul.mubr.msk.f32.gmra.mrb[20].mxu0 %vm484_vm0, %v16076_v54  ;;  %v16107_v54 = vld [vmem:[#allocation3 + $0x1cf] sm:$0xff]  ;;  %19729 = vst [vmem:[#allocation85_spill] sm:$0xff] %v16118_v7  ;;  %19732 = vst [vmem:[#allocation88_spill] sm:$0xff] %v16133_v43 }
 0x1b8   : > { %12225 = vmatprep.mubr.msk.f32.mxu0 %vm484_vm0, %v16080_v13  ;;  %19727 = vst [vmem:[#allocation83_spill] sm:$0xff] %v16107_v54  ;;  %v2506_v13 = vrot.slane %v16105_v23, 2  ;;  %v2507_v24 = vrot.slane %v16107_v54, 2  ;;  %19742 = vst [vmem:[#allocation98_spill] sm:$0xff] %v16250_v17 }
 0x1ba   : > { %v16137_v35 = vsel %vm2355_vm3, %v2506_v13, %v2507_v24  ;;  %v16152_v49 = vsel %vm2355_vm3, %v2507_v24, %v2509_v61  ;;  %v2514_v13 = vrot.slane %v16141_v15, 2  ;;  %v3717_v24 = vld [vmem:[#allocation10 + $0x10] sm:$0xf]  ;;  %v16212_v61 = vld [vmem:[#allocation2 + $0x147] sm:$0xff] }
 0x1bb   : > { %12226 = vmatmul.mubr.msk.f32.gmra.mrb[22].mxu0 %vm484_vm0, %v16095_v44  ;;  %v16124_v44 = vld [vmem:[#allocation3 + $0x1e7] sm:$0xff]  ;;  %19733 = vst [vmem:[#allocation89_spill] sm:$0xff] %v16137_v35  ;;  %19735 = vst [vmem:[#allocation91_spill] sm:$0xff] %v16152_v49 }
 0x1bc   : > { %12228 = vmatprep.mubr.msk.f32.mxu0 %vm484_vm0, %v16099_v26  ;;  %19731 = vst [vmem:[#allocation87_spill] sm:$0xff] %v16124_v44  ;;  %v2511_v26 = vrot.slane %v16124_v44, 2  ;;  %v16163_v60 = vsel %vm2355_vm3, %v2512_v9, %v2514_v13  ;;  %v16218_v13 = vld [vmem:[#allocation2 + $0x14f] sm:$0xff]  ;;  %v16244_v15 = vld [vmem:[#allocation2 + $0x1c7] sm:$0xff] }
 0x1bd   : > { %19737 = vst [vmem:[#allocation93_spill] sm:$0xff] %v16163_v60  ;;  %19741 = vst [vmem:[#allocation97_spill] sm:$0xff] %v16244_v15 }
 0x1be   : > { %v16156_v8 = vsel %vm2355_vm3, %v2511_v26, %v2512_v9  ;;  %v16202_v9 = vld [vmem:[#allocation2 + $0x10f] sm:$0xff]  ;;  %v16204_v26 = vld [vmem:[#allocation2 + $0x127] sm:$0xff] }
 0x1bf   : > { %12229 = vmatmul.mubr.msk.f32.gmra.mrb[24].mxu0 %vm484_vm0, %v16114_v52  ;;  %v717_v52 = vld [vmem:[%s15305_s16 + $0xf8] sm:$0xff]  ;;  %19736 = vst [vmem:[#allocation92_spill] sm:$0xff] %v16156_v8 }
 0x1c0   : > { %12231 = vmatprep.mubr.msk.f32.mxu0 %vm484_vm0, %v16118_v7  ;;  %750 = vst.msk [vmem:[#allocation3 + $0x210] sm:$0xff] %vm484_vm0, %v717_v52  ;;  %v16210_v52 = vld [vmem:[#allocation2 + $0x12f] sm:$0xff] }
 0x1c1   : > { %v16242_v7 = vld [vmem:[#allocation2 + $0x1af] sm:$0xff] }
 0x1c3   : > { %12232 = vmatmul.mubr.msk.f32.gmra.mrb[26].mxu0 %vm484_vm0, %v16133_v43  ;;  %v16236_v43 = vld [vmem:[#allocation2 + $0x1a7] sm:$0xff] }
 0x1c4   : > { %12234 = vmatprep.mubr.msk.f32.mxu0 %vm484_vm0, %v16137_v35  ;;  %v16234_v35 = vld [vmem:[#allocation2 + $0x18f] sm:$0xff]  ;;  %19740 = vst [vmem:[#allocation96_spill] sm:$0xff] %v16236_v43 }
 0x1c5   : > { %19739 = vst [vmem:[#allocation95_spill] sm:$0xff] %v16234_v35 }
 0x1c7   : > { %12235 = vmatmul.mubr.msk.f32.gmra.mrb[28].mxu0 %vm484_vm0, %v16152_v49  ;;  %v16228_v49 = vld [vmem:[#allocation2 + $0x187] sm:$0xff] }
 0x1c8   : > { %12237 = vmatprep.mubr.msk.f32.mxu0 %vm484_vm0, %v16156_v8  ;;  %v16226_v8 = vld [vmem:[#allocation2 + $0x16f] sm:$0xff]  ;;  %19738 = vst [vmem:[#allocation94_spill] sm:$0xff] %v16228_v49 }
 0x1cb   : > { %12238 = vmatmul.mubr.msk.f32.gmra.mrb[30].mxu0 %vm484_vm0, %v16163_v60  ;;  %v16220_v60 = vld [vmem:[#allocation2 + $0x167] sm:$0xff] }
 0x1cc   : > { %12242 = vmatprep.mubr.msk.f32.mxu0 %vm484_vm0, %v15633_v27 }
 0x1cf   : > { %12243 = vmatmul.mubr.msk.f32.vlgmr.msra.gmra.mrb[0].mxu0 %vm484_vm0, %v15637_v30 }
 0x1d0   : > { %12291 = vmatpush3.msk.msra.mxu0 %vm957_vm2, %v15858_v56  ;;  %12245 = vmatprep.mubr.msk.f32.mxu0 %vm484_vm0, %v15642_v33  ;;  %v16196_v56 = vld [vmem:[#allocation2 + $0x107] sm:$0xff] }
 0x1d1   : > { %12340 = vmatprep.subr.msk.mxu0 %vm957_vm2, %v3717_v24 }
 0x1d3   : > { %12246 = vmatmul.mubr.msk.f32.gmra.mrb[2].mxu0 %vm484_vm0, %v15650_v36 }
 0x1d4   : > { %12248 = vmatprep.mubr.msk.f32.mxu0 %vm484_vm0, %v15657_v41 }
 0x1d7   : > { %12249 = vmatmul.mubr.msk.f32.gmra.mrb[4].mxu0 %vm484_vm0, %v15659_v42 }
 0x1d8   : > { %12251 = vmatprep.mubr.msk.f32.mxu0 %vm484_vm0, %v15678_v50 }
 0x1db   : > { %12252 = vmatmul.mubr.msk.f32.gmra.mrb[6].mxu0 %vm484_vm0, %v15680_v51 }
 0x1dc   : > { %12254 = vmatprep.mubr.msk.f32.mxu0 %vm484_vm0, %v15697_v58 }
 0x1df   : > { %12255 = vmatmul.mubr.msk.f32.gmra.mrb[8].mxu0 %vm484_vm0, %v15699_v59 }
 0x1e0   : > { %12257 = vmatprep.mubr.msk.f32.mxu0 %vm484_vm0, %v15713_v1 }
 0x1e3   : > { %12258 = vmatmul.mubr.msk.f32.gmra.mrb[10].mxu0 %vm484_vm0, %v15715_v2 }
 0x1e4   : > { %12260 = vmatprep.mubr.msk.f32.mxu0 %vm484_vm0, %v15755_v21 }
 0x1e7   : > { %12261 = vmatmul.mubr.msk.f32.gmra.mrb[12].mxu0 %vm484_vm0, %v15757_v22 }
 0x1e8   : > { %12263 = vmatprep.mubr.msk.f32.mxu0 %vm484_vm0, %v16196_v56 }
 0x1eb   : > { %12264 = vmatmul.mubr.msk.f32.gmra.mrb[14].mxu0 %vm484_vm0, %v16202_v9 }
 0x1ec   : > { %12266 = vmatprep.mubr.msk.f32.mxu0 %vm484_vm0, %v16204_v26 }
 0x1ef   : > { %12267 = vmatmul.mubr.msk.f32.gmra.mrb[16].mxu0 %vm484_vm0, %v16210_v52 }
 0x1f0   : > { %12269 = vmatprep.mubr.msk.f32.mxu0 %vm484_vm0, %v16212_v61 }
 0x1f3   : > { %12270 = vmatmul.mubr.msk.f32.gmra.mrb[18].mxu0 %vm484_vm0, %v16218_v13 }
 0x1f4   : > { %12272 = vmatprep.mubr.msk.f32.mxu0 %vm484_vm0, %v16220_v60 }
 0x1f7   : > { %12273 = vmatmul.mubr.msk.f32.gmra.mrb[20].mxu0 %vm484_vm0, %v16226_v8 }
 0x1f8   : > { %12275 = vmatprep.mubr.msk.f32.mxu0 %vm484_vm0, %v16228_v49  ;;  %v16252_v49 = vld [vmem:[#allocation2 + $0x1e7] sm:$0xff] }
 0x1fb   : > { %12276 = vmatmul.mubr.msk.f32.gmra.mrb[22].mxu0 %vm484_vm0, %v16234_v35  ;;  %v16260_v35 = vld [vmem:[#allocation2 + $0x207] sm:$0xff] }
 0x1fc   : > { %12278 = vmatprep.mubr.msk.f32.mxu0 %vm484_vm0, %v16236_v43  ;;  %v16258_v43 = vld [vmem:[#allocation2 + $0x1ef] sm:$0xff]  ;;  %19743 = vst [vmem:[#allocation99_spill] sm:$0xff] %v16260_v35 }
 0x1ff   : > { %12279 = vmatmul.mubr.msk.f32.gmra.mrb[24].mxu0 %vm484_vm0, %v16242_v7 }
 0x200   : > { %12281 = vmatprep.mubr.msk.f32.mxu0 %vm484_vm0, %v16244_v15  ;;  %v16266_v15 = vld [vmem:[#allocation2 + $0x20f] sm:$0xff] }
 0x201   : > { %19744 = vst [vmem:[#allocation100_spill] sm:$0xff] %v16266_v15 }
 0x203   : > { %12282 = vmatmul.mubr.msk.f32.gmra.mrb[26].mxu0 %vm484_vm0, %v16250_v17  ;;  %v3983_v17 = vld [vmem:[#allocation11 + $0x10] sm:$0xf] }
 0x204   : > { %12284 = vmatprep.mubr.msk.f32.mxu0 %vm484_vm0, %v16252_v49 }
 0x207   : > { %12285 = vmatmul.mubr.msk.f32.gmra.mrb[28].mxu0 %vm484_vm0, %v16258_v43 }
 0x208   : > { %12287 = vmatprep.mubr.msk.f32.mxu0 %vm484_vm0, %v16260_v35  ;;  %v1533_v35 = vrot.slane %v15637_v30, 1  ;;  %v860_v30 = vld [vmem:[#allocation11] sm:$0xf] }
 0x209   : > { %11940 = vmatprep.subr.msk.mxu1 %vm957_vm2, %v860_v30 }
 0x20a   : > { %11941 = vmatpush3.msk.msra.mxu1 %vm957_vm2, %v860_v30 }
 0x20b   : > { %12288 = vmatmul.mubr.msk.f32.gmra.mrb[30].mxu0 %vm484_vm0, %v16266_v15  ;;  %v1532_v15 = vrot.slane %v15633_v27, 1  ;;  %v1538_v27 = vrot.slane %v15650_v36, 1  ;;  %v1543_v36 = vrot.slane %v15659_v42, 1  ;;  %11943 = vmatmul.mubr.msk.f32.vlgmr.msra.gmra.mrb[0].mxu1 %vm484_vm0, %v15800_v0  ;;  %v1547_v0 = vrot.slane %v15678_v50, 1 }
 0x20c   : > { %12292 = vmatprep.mubr.msk.f32.mxu0 %vm484_vm0, %v15815_v10  ;;  %11945 = vmatprep.mubr.msk.f32.mxu1 %vm484_vm0, %v15815_v10  ;;  %v1550_v50 = vrot.slane %v15695_v57, 1 }
 0x20f   : > { %12293 = vmatmul.mubr.msk.f32.vlgmr.msra.gmra.mrb[0].mxu0 %vm484_vm0, %v15817_v11  ;;  %11946 = vmatmul.mubr.msk.f32.gmra.mrb[2].mxu1 %vm484_vm0, %v15817_v11 }
 0x210   : > { %12341 = vmatpush3.msk.msra.mxu0 %vm957_vm2, %v3717_v24  ;;  %12295 = vmatprep.mubr.msk.f32.mxu0 %vm484_vm0, %v15831_v18  ;;  %v16330_v24 = vld [vmem:[#allocation3 + $0x207] sm:$0xff] }
 0x211   : > { %12390 = vmatprep.subr.msk.mxu0 %vm957_vm2, %v3983_v17  ;;  %19745 = vst [vmem:[#allocation101_spill] sm:$0xff] %v16330_v24  ;;  %11948 = vmatprep.mubr.msk.f32.mxu1 %vm484_vm0, %v15831_v18 }
 0x213   : > { %12296 = vmatmul.mubr.msk.f32.gmra.mrb[2].mxu0 %vm484_vm0, %v15833_v20  ;;  %11949 = vmatmul.mubr.msk.f32.gmra.mrb[4].mxu1 %vm484_vm0, %v15833_v20 }
 0x214   : > { %12298 = vmatprep.mubr.msk.f32.mxu0 %vm484_vm0, %v15842_v31  ;;  %11951 = vmatprep.mubr.msk.f32.mxu1 %vm484_vm0, %v15842_v31 }
 0x217   : > { %12299 = vmatmul.mubr.msk.f32.gmra.mrb[4].mxu0 %vm484_vm0, %v15844_v34  ;;  %11952 = vmatmul.mubr.msk.f32.gmra.mrb[6].mxu1 %vm484_vm0, %v15844_v34 }
 0x218   : > { %12301 = vmatprep.mubr.msk.f32.mxu0 %vm484_vm0, %v15883_v37  ;;  %11954 = vmatprep.mubr.msk.f32.mxu1 %vm484_vm0, %v15883_v37 }
 0x21b   : > { %12302 = vmatmul.mubr.msk.f32.gmra.mrb[6].mxu0 %vm484_vm0, %v15885_v38  ;;  %11955 = vmatmul.mubr.msk.f32.gmra.mrb[8].mxu1 %vm484_vm0, %v15885_v38 }
 0x21c   : > { %12304 = vmatprep.mubr.msk.f32.mxu0 %vm484_vm0, %v15934_v14  ;;  %11957 = vmatprep.mubr.msk.f32.mxu1 %vm484_vm0, %v15934_v14 }
 0x21f   : > { %12305 = vmatmul.mubr.msk.f32.gmra.mrb[8].mxu0 %vm484_vm0, %v15936_v28  ;;  %11958 = vmatmul.mubr.msk.f32.gmra.mrb[10].mxu1 %vm484_vm0, %v15936_v28 }
 0x220   : > { %12307 = vmatprep.mubr.msk.f32.mxu0 %vm484_vm0, %v15953_v39  ;;  %11960 = vmatprep.mubr.msk.f32.mxu1 %vm484_vm0, %v15953_v39 }
 0x223   : > { %12308 = vmatmul.mubr.msk.f32.gmra.mrb[10].mxu0 %vm484_vm0, %v15955_v16  ;;  %11961 = vmatmul.mubr.msk.f32.gmra.mrb[12].mxu1 %vm484_vm0, %v15955_v16 }
 0x224   : > { %12310 = vmatprep.mubr.msk.f32.mxu0 %vm484_vm0, %v15972_v3  ;;  %11963 = vmatprep.mubr.msk.f32.mxu1 %vm484_vm0, %v15972_v3 }
 0x227   : > { %12311 = vmatmul.mubr.msk.f32.gmra.mrb[12].mxu0 %vm484_vm0, %v15974_v46  ;;  %11964 = vmatmul.mubr.msk.f32.gmra.mrb[14].mxu1 %vm484_vm0, %v15974_v46 }
 0x228   : > { %12313 = vmatprep.mubr.msk.f32.mxu0 %vm484_vm0, %v15991_v29  ;;  %11966 = vmatprep.mubr.msk.f32.mxu1 %vm484_vm0, %v15991_v29 }
 0x22b   : > { %12314 = vmatmul.mubr.msk.f32.gmra.mrb[14].mxu0 %vm484_vm0, %v15993_v4  ;;  %11967 = vmatmul.mubr.msk.f32.gmra.mrb[16].mxu1 %vm484_vm0, %v15993_v4 }
 0x22c   : > { %12316 = vmatprep.mubr.msk.f32.mxu0 %vm484_vm0, %v16010_v63  ;;  %11969 = vmatprep.mubr.msk.f32.mxu1 %vm484_vm0, %v16010_v63 }
 0x22f   : > { %12317 = vmatmul.mubr.msk.f32.gmra.mrb[16].mxu0 %vm484_vm0, %v16012_v45  ;;  %11970 = vmatmul.mubr.msk.f32.gmra.mrb[18].mxu1 %vm484_vm0, %v16012_v45 }
 0x230   : > { %12319 = vmatprep.mubr.msk.f32.mxu0 %vm484_vm0, %v16029_v48  ;;  %11972 = vmatprep.mubr.msk.f32.mxu1 %vm484_vm0, %v16029_v48 }
 0x233   : > { %12320 = vmatmul.mubr.msk.f32.gmra.mrb[18].mxu0 %vm484_vm0, %v16031_v53  ;;  %11973 = vmatmul.mubr.msk.f32.gmra.mrb[20].mxu1 %vm484_vm0, %v16031_v53 }
 0x234   : > { %12322 = vmatprep.mubr.msk.f32.mxu0 %vm484_vm0, %v16048_v6  ;;  %11975 = vmatprep.mubr.msk.f32.mxu1 %vm484_vm0, %v16048_v6 }
 0x237   : > { %12323 = vmatmul.mubr.msk.f32.gmra.mrb[20].mxu0 %vm484_vm0, %v16050_v12  ;;  %11976 = vmatmul.mubr.msk.f32.gmra.mrb[22].mxu1 %vm484_vm0, %v16050_v12 }
 0x238   : > { %12325 = vmatprep.mubr.msk.f32.mxu0 %vm484_vm0, %v16067_v5  ;;  %11978 = vmatprep.mubr.msk.f32.mxu1 %vm484_vm0, %v16067_v5 }
 0x23b   : > { %12326 = vmatmul.mubr.msk.f32.gmra.mrb[22].mxu0 %vm484_vm0, %v16069_v55  ;;  %11979 = vmatmul.mubr.msk.f32.gmra.mrb[24].mxu1 %vm484_vm0, %v16069_v55 }
 0x23c   : > { %12328 = vmatprep.mubr.msk.f32.mxu0 %vm484_vm0, %v16086_v25  ;;  %11981 = vmatprep.mubr.msk.f32.mxu1 %vm484_vm0, %v16086_v25 }
 0x23f   : > { %12329 = vmatmul.mubr.msk.f32.gmra.mrb[24].mxu0 %vm484_vm0, %v16088_v19  ;;  %v1535_v19 = vrot.slane %v15640_v32, 1 }
 0x240   : > { %12331 = vmatprep.mubr.msk.f32.mxu0 %vm484_vm0, %v16105_v23  ;;  %v16339_v23 = vld [vmem:[#allocation3 + $0x20f] sm:$0xff] }
 0x241   : > { %19746 = vst [vmem:[#allocation102_spill] sm:$0xff] %v16339_v23  ;;  %v16351_v32 = vsel %vm1526_vm4, %v1533_v35, %v1535_v19  ;;  %v1548_v19 = vrot.slane %v15680_v51, 1 }
 0x243   : > { %12332 = vmatmul.mubr.msk.f32.gmra.mrb[26].mxu0 %vm484_vm0, %v16107_v54  ;;  %v16342_v54 = vsel %vm1526_vm4, %v1532_v15, %v1533_v35  ;;  %v16396_v51 = vsel %vm1526_vm4, %v1547_v0, %v1548_v19  ;;  %v16409_v57 = vsel %vm1526_vm4, %v1548_v19, %v1550_v50  ;;  %v19749_v35 = vld [vmem:[#allocation33_spill] sm:$0xff] }
 0x244   : > { %12334 = vmatprep.mubr.msk.f32.mxu0 %vm484_vm0, %v16124_v44  ;;  %v1537_v44 = vrot.slane %v15642_v33, 1  ;;  %v1542_v33 = vrot.slane %v15657_v41, 1  ;;  %v1545_v41 = vrot.slane %v15670_v47, 1  ;;  %19747 = vst [vmem:[#allocation103_spill] sm:$0xff] %v16396_v51  ;;  %19748 = vst [vmem:[#allocation104_spill] sm:$0xff] %v16409_v57  ;;  %v19755_v19 = vld [vmem:[#allocation41_spill] sm:$0xff] }
 0x245   : > { %v1565_v50 = vrot.slane %v19755_v19, 1 }
 0x246   : > { %v16356_v15 = vsel %vm1526_vm4, %v1537_v44, %v1538_v27  ;;  %v16377_v42 = vsel %vm1526_vm4, %v1542_v33, %v1543_v36  ;;  %v16392_v47 = vsel %vm1526_vm4, %v1543_v36, %v1545_v41  ;;  %v1553_v44 = vrot.slane %v15699_v59, 1  ;;  %v19752_v33 = vld [vmem:[#allocation36_spill] sm:$0xff] }
 0x247   : > { %12335 = vmatmul.mubr.msk.f32.gmra.mrb[28].mxu0 %vm484_vm0, %v16126_v62  ;;  %v1557_v59 = vrot.slane %v15713_v1, 1  ;;  %v1560_v36 = vrot.slane %v19752_v33, 1  ;;  %v1563_v41 = vrot.slane %v15757_v22, 1  ;;  %v1567_v22 = vrot.slane %v16196_v56, 1 }
 0x248   : > { %12337 = vmatprep.mubr.msk.f32.mxu0 %vm484_vm0, %v16330_v24  ;;  %v1540_v24 = vrot.slane %v15655_v40, 1  ;;  %v1573_v33 = vrot.slane %v16210_v52, 1 }
 0x24a   : > { %v16373_v40 = vsel %vm1526_vm4, %v1538_v27, %v1540_v24  ;;  %v1555_v24 = vrot.slane %v19749_v35, 1  ;;  %v1558_v27 = vrot.slane %v15715_v2, 1  ;;  %v1562_v2 = vrot.slane %v15755_v21, 1 }
 0x24b   : > { %12338 = vmatmul.mubr.msk.f32.gmra.mrb[30].mxu0 %vm484_vm0, %v16339_v23  ;;  %v16361_v23 = vld [vmem:[#allocation10 + $0x14] sm:$0xf]  ;;  %v16462_v35 = vsel %vm1526_vm4, %v1563_v41, %v1565_v50  ;;  %v1577_v50 = vrot.slane %v16212_v61, 1 }
 0x24c   : > { %12342 = vmatprep.mubr.msk.f32.mxu0 %vm484_vm0, %v16342_v54  ;;  %v16426_v30 = vsel %vm1526_vm4, %v1553_v44, %v1555_v24  ;;  %v16430_v1 = vsel %vm1526_vm4, %v1557_v59, %v1558_v27  ;;  %v16443_v0 = vsel %vm1526_vm4, %v1558_v27, %v1560_v36  ;;  %v16447_v21 = vsel %vm1526_vm4, %v1562_v2, %v1563_v41  ;;  %v16470_v36 = vld [vmem:[#allocation2 + $0x137] sm:$0x3] }
 0x24d   : > { %19751 = vst [vmem:[#allocation105_spill] sm:$0xff] %v16426_v30  ;;  %19753 = vst [vmem:[#allocation36_spill] sm:$0xff] %v16430_v1  ;;  %v1572_v27 = vrot.slane %v16204_v26, 1  ;;  %v1575_v41 = vrot.slane %v16470_v36, 1 }
 0x24e   : > { %19754 = vst [vmem:[#allocation106_spill] sm:$0xff] %v16443_v0  ;;  %19756 = vst [vmem:[#allocation41_spill] sm:$0xff] %v16447_v21 }
 0x24f   : > { %12343 = vmatmul.mubr.msk.f32.vlgmr.msra.gmra.mrb[0].mxu0 %vm484_vm0, %v16351_v32  ;;  %19758 = vst [vmem:[#allocation108_spill] sm:$0xff] %v16462_v35  ;;  %19760 = vst [vmem:[#allocation110_spill] sm:$0xff] %v16470_v36  ;;  %v16485_v19 = vsel %vm1526_vm4, %v1572_v27, %v1573_v33  ;;  %v16508_v36 = vld [vmem:[#allocation2 + $0x177] sm:$0x3] }
 0x250   : > { %12391 = vmatpush3.msk.msra.mxu0 %vm957_vm2, %v3983_v17  ;;  %12345 = vmatprep.mubr.msk.f32.mxu0 %vm484_vm0, %v16356_v15  ;;  %v1552_v17 = vrot.slane %v15697_v58, 1  ;;  %19762 = vst [vmem:[#allocation112_spill] sm:$0xff] %v16485_v19  ;;  %19766 = vst [vmem:[#allocation116_spill] sm:$0xff] %v16508_v36 }
 0x251   : > { %12440 = vmatprep.subr.msk.mxu0 %vm957_vm2, %v16361_v23 }
 0x252   : > { %v16413_v58 = vsel %vm1526_vm4, %v1552_v17, %v1553_v44  ;;  %v1568_v17 = vrot.slane %v16202_v9, 1  ;;  %v16451_v44 = vld [vmem:[#allocation2 + $0x117] sm:$0x3] }
 0x253   : > { %12346 = vmatmul.mubr.msk.f32.gmra.mrb[2].mxu0 %vm484_vm0, %v16373_v40  ;;  %19750 = vst [vmem:[#allocation33_spill] sm:$0xff] %v16413_v58  ;;  %19757 = vst [vmem:[#allocation107_spill] sm:$0xff] %v16451_v44  ;;  %v1570_v24 = vrot.slane %v16451_v44, 1  ;;  %v16527_v44 = vld [vmem:[#allocation2 + $0x197] sm:$0x3] }
 0x254   : > { %12348 = vmatprep.mubr.msk.f32.mxu0 %vm484_vm0, %v16377_v42  ;;  %v16466_v59 = vsel %vm1526_vm4, %v1567_v22, %v1568_v17  ;;  %v1578_v22 = vrot.slane %v16218_v13, 1 }
 0x255   : > { %19759 = vst [vmem:[#allocation109_spill] sm:$0xff] %v16466_v59  ;;  %v16481_v2 = vsel %vm1526_vm4, %v1568_v17, %v1570_v24  ;;  %v16500_v17 = vsel %vm1526_vm4, %v1573_v33, %v1575_v41  ;;  %v1585_v41 = vrot.slane %v16508_v36, 1  ;;  %v1593_v36 = vrot.slane %v16242_v7, 1 }
 0x256   : > { %19761 = vst [vmem:[#allocation111_spill] sm:$0xff] %v16481_v2  ;;  %19764 = vst [vmem:[#allocation114_spill] sm:$0xff] %v16500_v17  ;;  %v16504_v27 = vsel %vm1526_vm4, %v1577_v50, %v1578_v22 }
 0x257   : > { %12349 = vmatmul.mubr.msk.f32.gmra.mrb[4].mxu0 %vm484_vm0, %v16392_v47  ;;  %19765 = vst [vmem:[#allocation115_spill] sm:$0xff] %v16504_v27 }
 0x258   : > { %12351 = vmatprep.mubr.msk.f32.mxu0 %vm484_vm0, %v16396_v51  ;;  %v16603_v51 = vld [vmem:[#allocation2 + $0x217] sm:$0x3] }
 0x259   : > { %19788 = vst [vmem:[#allocation126_spill] sm:$0xff] %v16603_v51 }
 0x25b   : > { %12352 = vmatmul.mubr.msk.f32.gmra.mrb[6].mxu0 %vm484_vm0, %v16409_v57 }
 0x25c   : > { %12354 = vmatprep.mubr.msk.f32.mxu0 %vm484_vm0, %v16413_v58  ;;  %v16565_v58 = vld [vmem:[#allocation2 + $0x1d7] sm:$0x3] }
 0x25f   : > { %12355 = vmatmul.mubr.msk.f32.gmra.mrb[8].mxu0 %vm484_vm0, %v16426_v30 }
 0x260   : > { %12357 = vmatprep.mubr.msk.f32.mxu0 %vm484_vm0, %v16430_v1  ;;  %v16546_v1 = vld [vmem:[#allocation2 + $0x1b7] sm:$0x3] }
 0x263   : > { %12358 = vmatmul.mubr.msk.f32.gmra.mrb[10].mxu0 %vm484_vm0, %v16443_v0 }
 0x264   : > { %12360 = vmatprep.mubr.msk.f32.mxu0 %vm484_vm0, %v16447_v21  ;;  %v16489_v21 = vld [vmem:[#allocation2 + $0x157] sm:$0x3] }
 0x265   : > { %19763 = vst [vmem:[#allocation113_spill] sm:$0xff] %v16489_v21  ;;  %v1580_v24 = vrot.slane %v16489_v21, 1  ;;  %v19770_v21 = vld [vmem:[#allocation95_spill] sm:$0xff] }
 0x266   : > { %v1588_v0 = vrot.slane %v19770_v21, 1 }
 0x267   : > { %12361 = vmatmul.mubr.msk.f32.gmra.mrb[12].mxu0 %vm484_vm0, %v16462_v35  ;;  %v1583_v35 = vrot.slane %v16226_v8, 1  ;;  %v16519_v33 = vsel %vm1526_vm4, %v1578_v22, %v1580_v24  ;;  %v1590_v22 = vrot.slane %v16527_v44, 1 }
 0x268   : > { %12363 = vmatprep.mubr.msk.f32.mxu0 %vm484_vm0, %v16466_v59  ;;  %v1582_v59 = vrot.slane %v16220_v60, 1  ;;  %19767 = vst [vmem:[#allocation117_spill] sm:$0xff] %v16519_v33 }
 0x26a   : > { %v16523_v50 = vsel %vm1526_vm4, %v1582_v59, %v1583_v35  ;;  %v16538_v59 = vsel %vm1526_vm4, %v1583_v35, %v1585_v41  ;;  %v16557_v35 = vsel %vm1526_vm4, %v1588_v0, %v1590_v22 }
 0x26b   : > { %12364 = vmatmul.mubr.msk.f32.gmra.mrb[14].mxu0 %vm484_vm0, %v16481_v2  ;;  %19768 = vst [vmem:[#allocation118_spill] sm:$0xff] %v16523_v50  ;;  %19772 = vst [vmem:[#allocation95_spill] sm:$0xff] %v16538_v59 }
 0x26c   : > { %12366 = vmatprep.mubr.msk.f32.mxu0 %vm484_vm0, %v16485_v19  ;;  %v19769_v19 = vld [vmem:[#allocation94_spill] sm:$0xff]  ;;  %19776 = vst [vmem:[#allocation120_spill] sm:$0xff] %v16557_v35 }
 0x26d   : > { %v1587_v2 = vrot.slane %v19769_v19, 1  ;;  %19771 = vst [vmem:[#allocation94_spill] sm:$0xff] %v16527_v44  ;;  %v19779_v44 = vld [vmem:[#allocation98_spill] sm:$0xff] }
 0x26e   : > { %v1598_v30 = vrot.slane %v19779_v44, 1 }
 0x26f   : > { %12367 = vmatmul.mubr.msk.f32.gmra.mrb[16].mxu0 %vm484_vm0, %v16500_v17  ;;  %v16542_v24 = vsel %vm1526_vm4, %v1587_v2, %v1588_v0  ;;  %v1595_v2 = vrot.slane %v16546_v1, 1 }
 0x270   : > { %12369 = vmatprep.mubr.msk.f32.mxu0 %vm484_vm0, %v16504_v27  ;;  %19773 = vst [vmem:[#allocation119_spill] sm:$0xff] %v16542_v24  ;;  %v19774_v27 = vld [vmem:[#allocation96_spill] sm:$0xff] }
 0x271   : > { %v1592_v17 = vrot.slane %v19774_v27, 1  ;;  %19775 = vst [vmem:[#allocation96_spill] sm:$0xff] %v16546_v1  ;;  %v16576_v0 = vsel %vm1526_vm4, %v1593_v36, %v1595_v2  ;;  %v16584_v1 = vld [vmem:[#allocation2 + $0x1f7] sm:$0x3]  ;;  %v19785_v2 = vld [vmem:[#allocation99_spill] sm:$0xff] }
 0x272   : > { %19781 = vst [vmem:[#allocation98_spill] sm:$0xff] %v16576_v0  ;;  %19783 = vst [vmem:[#allocation123_spill] sm:$0xff] %v16584_v1 }
 0x273   : > { %12370 = vmatmul.mubr.msk.f32.gmra.mrb[18].mxu0 %vm484_vm0, %v16519_v33  ;;  %v16561_v41 = vsel %vm1526_vm4, %v1592_v17, %v1593_v36  ;;  %v1600_v17 = vrot.slane %v16565_v58, 1 }
 0x274   : > { %12372 = vmatprep.mubr.msk.f32.mxu0 %vm484_vm0, %v16523_v50  ;;  %19777 = vst [vmem:[#allocation121_spill] sm:$0xff] %v16561_v41  ;;  %v19778_v50 = vld [vmem:[#allocation97_spill] sm:$0xff] }
 0x275   : > { %v1597_v33 = vrot.slane %v19778_v50, 1  ;;  %19780 = vst [vmem:[#allocation97_spill] sm:$0xff] %v16565_v58  ;;  %v16595_v36 = vsel %vm1526_vm4, %v1598_v30, %v1600_v17 }
 0x276   : > { %19784 = vst [vmem:[#allocation124_spill] sm:$0xff] %v16595_v36 }
 0x277   : > { %12373 = vmatmul.mubr.msk.f32.gmra.mrb[20].mxu0 %vm484_vm0, %v16538_v59  ;;  %v16580_v22 = vsel %vm1526_vm4, %v1597_v33, %v1598_v30  ;;  %v1603_v59 = vrot.slane %v16258_v43, 1  ;;  %v1605_v33 = vrot.slane %v16584_v1, 1  ;;  %v19793_v1 = vld [vmem:[#allocation83_spill] sm:$0xff] }
 0x278   : > { %12375 = vmatprep.mubr.msk.f32.mxu0 %vm484_vm0, %v16542_v24  ;;  %19782 = vst [vmem:[#allocation122_spill] sm:$0xff] %v16580_v22  ;;  %v1602_v24 = vrot.slane %v16252_v49, 1 }
 0x279   : > { %v16614_v30 = vsel %vm1526_vm4, %v1603_v59, %v1605_v33 }
 0x27a   : > { %v16601_v57 = vsel %vm1526_vm4, %v1602_v24, %v1603_v59  ;;  %v3708_v24 = vrot.slane %v16603_v51, 1  ;;  %v19795_v59 = vld [vmem:[#allocation45_spill] sm:$0xff]  ;;  %v16662_v51 = vld [vmem:[#allocation2 + $0xf] sm:$0xff] }
 0x27b   : > { %12376 = vmatmul.mubr.msk.f32.gmra.mrb[22].mxu0 %vm484_vm0, %v16557_v35  ;;  %v19786_v35 = vld [vmem:[#allocation100_spill] sm:$0xff]  ;;  %19787 = vst [vmem:[#allocation125_spill] sm:$0xff] %v16601_v57  ;;  %v1631_v33 = vrot.slane %v19795_v59, 1  ;;  %v859_v59 = vld [vmem:[#allocation10] sm:$0xf] }
 0x27c   : > { %12378 = vmatprep.mubr.msk.f32.mxu0 %vm484_vm0, %v16561_v41  ;;  %v3705_v41 = vrot.slane %v19785_v2, 1  ;;  %v3706_v58 = vrot.slane %v19786_v35, 1  ;;  %v1628_v35 = vrot.slane %v15815_v10, 1  ;;  %v1629_v2 = vrot.slane %v15817_v11, 1  ;;  %11990 = vmatprep.subr.msk.mxu1 %vm957_vm2, %v859_v59 }
 0x27d   : > { %v1633_v11 = vrot.slane %v15831_v18, 1  ;;  %v19797_v18 = vld [vmem:[#allocation46_spill] sm:$0xff]  ;;  %11991 = vmatpush3.msk.msra.mxu1 %vm957_vm2, %v859_v59  ;;  %v1643_v59 = vrot.slane %v15883_v37, 1 }
 0x27e   : > { %v16618_v17 = vsel %vm1526_vm4, %v3705_v41, %v3706_v58  ;;  %v16632_v41 = vsel %vm1526_vm4, %v3706_v58, %v3708_v24  ;;  %v16635_v10 = vsel %vm1526_vm4, %v1628_v35, %v1629_v2  ;;  %v16650_v58 = vsel %vm1526_vm4, %v1629_v2, %v1631_v33  ;;  %v14479_v2 = vld [vmem:[#allocation2 + $0x27] sm:$0xff] }
 0x27f   : > { %12379 = vmatmul.mubr.msk.f32.gmra.mrb[24].mxu0 %vm484_vm0, %v16576_v0  ;;  %v19789_v0 = vld [vmem:[#allocation78_spill] sm:$0xff]  ;;  %19796 = vst [vmem:[#allocation83_spill] sm:$0xff] %v16632_v41  ;;  %v1638_v24 = vrot.slane %v15842_v31, 1 }
 0x280   : > { %12381 = vmatprep.mubr.msk.f32.mxu0 %vm484_vm0, %v16580_v22  ;;  %11982 = vmatmul.mubr.msk.f32.gmra.mrb[26].mxu1 %vm484_vm0, %v19789_v0  ;;  %v19790_v22 = vld [vmem:[#allocation82_spill] sm:$0xff]  ;;  %19791 = vst [vmem:[#allocation78_spill] sm:$0xff] %v16614_v30 }
 0x281   : > { %11984 = vmatprep.mubr.msk.f32.mxu1 %vm484_vm0, %v19790_v22  ;;  %19792 = vst [vmem:[#allocation82_spill] sm:$0xff] %v16618_v17 }
 0x283   : > { %12382 = vmatmul.mubr.msk.f32.gmra.mrb[26].mxu0 %vm484_vm0, %v16595_v36  ;;  %v19794_v36 = vld [vmem:[#allocation87_spill] sm:$0xff] }
 0x284   : > { %12384 = vmatprep.mubr.msk.f32.mxu0 %vm484_vm0, %v16601_v57  ;;  %11985 = vmatmul.mubr.msk.f32.gmra.mrb[28].mxu1 %vm484_vm0, %v19793_v1  ;;  %v1634_v57 = vrot.slane %v15833_v20, 1  ;;  %v1636_v20 = vrot.slane %v19797_v18, 1  ;;  %v1644_v18 = vrot.slane %v15885_v38, 1  ;;  %v19800_v38 = vld [vmem:[#allocation53_spill] sm:$0xff] }
 0x285   : > { %11987 = vmatprep.mubr.msk.f32.mxu1 %vm484_vm0, %v19794_v36 }
 0x286   : > { %v16655_v35 = vsel %vm1526_vm4, %v1633_v11, %v1634_v57  ;;  %v16674_v31 = vsel %vm1526_vm4, %v1634_v57, %v1636_v20  ;;  %v1646_v57 = vrot.slane %v19800_v38, 1  ;;  %v16698_v20 = vsel %vm1526_vm4, %v1643_v59, %v1644_v18 }
 0x287   : > { %12385 = vmatmul.mubr.msk.f32.gmra.mrb[28].mxu0 %vm484_vm0, %v16614_v30  ;;  %v16643_v30 = vld [vmem:[#allocation2 + $0x7] sm:$0xff]  ;;  %v1653_v59 = vrot.slane %v15953_v39, 1  ;;  %v1654_v38 = vrot.slane %v15955_v16, 1 }
 0x288   : > { %12387 = vmatprep.mubr.msk.f32.mxu0 %vm484_vm0, %v16618_v17  ;;  %11988 = vmatmul.mubr.msk.f32.gmra.mrb[30].mxu1 %vm484_vm0, %v16126_v62  ;;  %v16660_v17 = vld [vmem:[#allocation11 + $0x14] sm:$0xf]  ;;  %v19806_v16 = vld [vmem:[#allocation59_spill] sm:$0xff] }
 0x289   : > { %11992 = vmatprep.mubr.msk.f32.mxu1 %vm484_vm0, %v16643_v30 }
 0x28b   : > { %12388 = vmatmul.mubr.msk.f32.gmra.mrb[30].mxu0 %vm484_vm0, %v16632_v41  ;;  %v1639_v41 = vrot.slane %v15844_v34, 1  ;;  %v19798_v34 = vld [vmem:[#allocation48_spill] sm:$0xff] }
 0x28c   : > { %12392 = vmatprep.mubr.msk.f32.mxu0 %vm484_vm0, %v16635_v10  ;;  %11993 = vmatmul.mubr.msk.f32.vlgmr.msra.gmra.mrb[0].mxu1 %vm484_vm0, %v16662_v51  ;;  %v1641_v33 = vrot.slane %v19798_v34, 1  ;;  %v1649_v34 = vrot.slane %v15936_v28, 1  ;;  %v19803_v28 = vld [vmem:[#allocation56_spill] sm:$0xff] }
 0x28d   : > { %11995 = vmatprep.mubr.msk.f32.mxu1 %vm484_vm0, %v14479_v2  ;;  %v16678_v11 = vsel %vm1526_vm4, %v1638_v24, %v1639_v41  ;;  %v14480_v2 = vld [vmem:[#allocation2 + $0x2f] sm:$0xff]  ;;  %v1648_v24 = vrot.slane %v15934_v14, 1  ;;  %v16715_v14 = vsel %vm1526_vm4, %v1644_v18, %v1646_v57  ;;  %v1656_v18 = vrot.slane %v19806_v16, 1 }
 0x28e   : > { %v16694_v37 = vsel %vm1526_vm4, %v1639_v41, %v1641_v33  ;;  %v1651_v41 = vrot.slane %v19803_v28, 1  ;;  %v16740_v57 = vsel %vm1526_vm4, %v1653_v59, %v1654_v38  ;;  %v1659_v28 = vrot.slane %v15974_v46, 1  ;;  %v19809_v46 = vld [vmem:[#allocation62_spill] sm:$0xff] }
 0x28f   : > { %12393 = vmatmul.mubr.msk.f32.vlgmr.msra.gmra.mrb[0].mxu0 %vm484_vm0, %v16650_v58  ;;  %v16719_v33 = vsel %vm1526_vm4, %v1648_v24, %v1649_v34  ;;  %v1658_v24 = vrot.slane %v15972_v3, 1  ;;  %v16757_v3 = vsel %vm1526_vm4, %v1654_v38, %v1656_v18  ;;  %v1663_v59 = vrot.slane %v15991_v29, 1 }
 0x290   : > { %12441 = vmatpush3.msk.msra.mxu0 %vm957_vm2, %v16361_v23  ;;  %12395 = vmatprep.mubr.msk.f32.mxu0 %vm484_vm0, %v16655_v35  ;;  %v16687_v23 = vld [vmem:[#allocation2 + $0x47] sm:$0xff]  ;;  %v16736_v39 = vsel %vm1526_vm4, %v1649_v34, %v1651_v41  ;;  %v1661_v34 = vrot.slane %v19809_v46, 1  ;;  %v1664_v16 = vrot.slane %v15993_v4, 1  ;;  %v19812_v4 = vld [vmem:[#allocation65_spill] sm:$0xff]  ;;  %v1669_v46 = vrot.slane %v16012_v45, 1  ;;  %v19815_v45 = vld [vmem:[#allocation68_spill] sm:$0xff] }
 0x291   : > { %12490 = vmatprep.subr.msk.mxu0 %vm957_vm2, %v16660_v17  ;;  %11996 = vmatmul.mubr.msk.f32.gmra.mrb[2].mxu1 %vm484_vm0, %v14480_v2  ;;  %19799 = vst [vmem:[#allocation87_spill] sm:$0xff] %v16687_v23  ;;  %v16702_v2 = vld [vmem:[#allocation2 + $0x4f] sm:$0xff]  ;;  %v16761_v41 = vsel %vm1526_vm4, %v1658_v24, %v1659_v28  ;;  %v1666_v38 = vrot.slane %v19812_v4, 1  ;;  %v1668_v24 = vrot.slane %v16010_v63, 1  ;;  %v1674_v4 = vrot.slane %v16031_v53, 1 }
 0x292   : > { %11998 = vmatprep.mubr.msk.f32.mxu1 %vm484_vm0, %v16687_v23  ;;  %19801 = vst [vmem:[#allocation45_spill] sm:$0xff] %v16702_v2  ;;  %v16708_v23 = vld [vmem:[#allocation2 + $0x67] sm:$0xff]  ;;  %v16778_v29 = vsel %vm1526_vm4, %v1659_v28, %v1661_v34  ;;  %v16782_v18 = vsel %vm1526_vm4, %v1663_v59, %v1664_v16  ;;  %v1671_v28 = vrot.slane %v19815_v45, 1  ;;  %v1673_v59 = vrot.slane %v16029_v48, 1 }
 0x293   : > { %12396 = vmatmul.mubr.msk.f32.gmra.mrb[2].mxu0 %vm484_vm0, %v16674_v31  ;;  %19802 = vst [vmem:[#allocation46_spill] sm:$0xff] %v16708_v23  ;;  %v16799_v63 = vsel %vm1526_vm4, %v1664_v16, %v1666_v38  ;;  %v16803_v34 = vsel %vm1526_vm4, %v1668_v24, %v1669_v46  ;;  %v19817_v48 = vld [vmem:[#allocation71_spill] sm:$0xff]  ;;  %v1678_v24 = vrot.slane %v16048_v6, 1  ;;  %v1679_v45 = vrot.slane %v16050_v12, 1 }
 0x294   : > { %12398 = vmatprep.mubr.msk.f32.mxu0 %vm484_vm0, %v16678_v11  ;;  %v16818_v16 = vsel %vm1526_vm4, %v1669_v46, %v1671_v28  ;;  %v1676_v38 = vrot.slane %v19817_v48, 1  ;;  %v16822_v53 = vsel %vm1526_vm4, %v1673_v59, %v1674_v4  ;;  %v19818_v28 = vld [vmem:[#allocation74_spill] sm:$0xff]  ;;  %v1683_v12 = vrot.slane %v16067_v5, 1 }
 0x295   : > { %11999 = vmatmul.mubr.msk.f32.gmra.mrb[4].mxu1 %vm484_vm0, %v16702_v2  ;;  %v16723_v2 = vld [vmem:[#allocation2 + $0x6f] sm:$0xff]  ;;  %v1681_v59 = vrot.slane %v19818_v28, 1  ;;  %v16839_v6 = vsel %vm1526_vm4, %v1678_v24, %v1679_v45  ;;  %v1684_v48 = vrot.slane %v16069_v55, 1  ;;  %v1688_v55 = vrot.slane %v16086_v25, 1 }
 0x296   : > { %12001 = vmatprep.mubr.msk.f32.mxu1 %vm484_vm0, %v16708_v23  ;;  %19804 = vst [vmem:[#allocation48_spill] sm:$0xff] %v16723_v2  ;;  %v16729_v23 = vld [vmem:[#allocation2 + $0x87] sm:$0xff]  ;;  %v16835_v46 = vsel %vm1526_vm4, %v1674_v4, %v1676_v38  ;;  %v19819_v38 = vld [vmem:[#allocation77_spill] sm:$0xff]  ;;  %v1689_v28 = vrot.slane %v19789_v0, 1  ;;  %v1693_v0 = vrot.slane %v19790_v22, 1 }
 0x297   : > { %12399 = vmatmul.mubr.msk.f32.gmra.mrb[4].mxu0 %vm484_vm0, %v16694_v37  ;;  %19805 = vst [vmem:[#allocation53_spill] sm:$0xff] %v16729_v23  ;;  %v16852_v4 = vsel %vm1526_vm4, %v1679_v45, %v1681_v59  ;;  %v1686_v24 = vrot.slane %v19819_v38, 1  ;;  %v16856_v5 = vsel %vm1526_vm4, %v1683_v12, %v1684_v48  ;;  %v19820_v59 = vld [vmem:[#allocation81_spill] sm:$0xff]  ;;  %v1694_v38 = vrot.slane %v19793_v1, 1 }
 0x298   : > { %12401 = vmatprep.mubr.msk.f32.mxu0 %vm484_vm0, %v16698_v20  ;;  %v1691_v12 = vrot.slane %v19820_v59, 1  ;;  %v16873_v25 = vsel %vm1526_vm4, %v1688_v55, %v1689_v28  ;;  %v1698_v1 = vrot.slane %v19794_v36, 1  ;;  %v1699_v59 = vrot.slane %v16126_v62, 1  ;;  %v19825_v36 = vld [vmem:[#allocation101_spill] sm:$0xff]  ;;  %v19826_v62 = vld [vmem:[#allocation102_spill] sm:$0xff] }
 0x299   : > { %12002 = vmatmul.mubr.msk.f32.gmra.mrb[6].mxu1 %vm484_vm0, %v16723_v2  ;;  %v16744_v2 = vld [vmem:[#allocation2 + $0x8f] sm:$0xff]  ;;  %v16869_v45 = vsel %vm1526_vm4, %v1684_v48, %v1686_v24  ;;  %19821 = vst [vmem:[#allocation71_spill] sm:$0xff] %v16873_v25  ;;  %v19822_v24 = vld [vmem:[#allocation86_spill] sm:$0xff]  ;;  %v16890_v22 = vsel %vm1526_vm4, %v1693_v0, %v1694_v38 }
 0x29a   : > { %12004 = vmatprep.mubr.msk.f32.mxu1 %vm484_vm0, %v16729_v23  ;;  %19807 = vst [vmem:[#allocation56_spill] sm:$0xff] %v16744_v2  ;;  %v16750_v23 = vld [vmem:[#allocation2 + $0xa7] sm:$0xff]  ;;  %v16886_v48 = vsel %vm1526_vm4, %v1689_v28, %v1691_v12  ;;  %v1696_v55 = vrot.slane %v19822_v24, 1  ;;  %v3711_v24 = vrot.slane %v19825_v36, 1 }
 0x29b   : > { %12402 = vmatmul.mubr.msk.f32.gmra.mrb[6].mxu0 %vm484_vm0, %v16715_v14  ;;  %19808 = vst [vmem:[#allocation59_spill] sm:$0xff] %v16750_v23  ;;  %v19824_v12 = vld [vmem:[#allocation90_spill] sm:$0xff] }
 0x29c   : > { %12404 = vmatprep.mubr.msk.f32.mxu0 %vm484_vm0, %v16719_v33  ;;  %v16903_v28 = vsel %vm1526_vm4, %v1694_v38, %v1696_v55  ;;  %v1701_v0 = vrot.slane %v19824_v12, 1  ;;  %v14493_v12 = vld [vmem:[#allocation2 + $0x17] sm:$0x3] }
 0x29d   : > { %12005 = vmatmul.mubr.msk.f32.gmra.mrb[8].mxu1 %vm484_vm0, %v16744_v2  ;;  %v16765_v2 = vld [vmem:[#allocation2 + $0xaf] sm:$0xff]  ;;  %19823 = vst [vmem:[#allocation74_spill] sm:$0xff] %v16903_v28 }
 0x29e   : > { %12007 = vmatprep.mubr.msk.f32.mxu1 %vm484_vm0, %v16750_v23  ;;  %19810 = vst [vmem:[#allocation62_spill] sm:$0xff] %v16765_v2  ;;  %v16771_v23 = vld [vmem:[#allocation2 + $0xc7] sm:$0xff]  ;;  %v16922_v38 = vsel %vm1526_vm4, %v1699_v59, %v1701_v0  ;;  %v1527_v0 = vrot.slane %v16643_v30, 1  ;;  %v16952_v30 = vld [vmem:[#allocation10 + $0x18] sm:$0xf] }
 0x29f   : > { %12405 = vmatmul.mubr.msk.f32.gmra.mrb[8].mxu0 %vm484_vm0, %v16736_v39  ;;  %19811 = vst [vmem:[#allocation127_spill] sm:$0xff] %v16771_v23  ;;  %19828 = vst [vmem:[#allocation81_spill] sm:$0xff] %v16922_v38 }
 0x2a0   : > { %12407 = vmatprep.mubr.msk.f32.mxu0 %vm484_vm0, %v16740_v57 }
 0x2a1   : > { %12008 = vmatmul.mubr.msk.f32.gmra.mrb[10].mxu1 %vm484_vm0, %v16765_v2  ;;  %v16786_v2 = vld [vmem:[#allocation2 + $0xcf] sm:$0xff] }
 0x2a2   : > { %12010 = vmatprep.mubr.msk.f32.mxu1 %vm484_vm0, %v16771_v23  ;;  %19813 = vst [vmem:[#allocation65_spill] sm:$0xff] %v16786_v2  ;;  %v16792_v23 = vld [vmem:[#allocation2 + $0xe7] sm:$0xff] }
 0x2a3   : > { %12408 = vmatmul.mubr.msk.f32.gmra.mrb[10].mxu0 %vm484_vm0, %v16757_v3  ;;  %19814 = vst [vmem:[#allocation128_spill] sm:$0xff] %v16792_v23 }
 0x2a4   : > { %12410 = vmatprep.mubr.msk.f32.mxu0 %vm484_vm0, %v16761_v41 }
 0x2a5   : > { %12011 = vmatmul.mubr.msk.f32.gmra.mrb[12].mxu1 %vm484_vm0, %v16786_v2  ;;  %v16807_v2 = vld [vmem:[#allocation2 + $0xef] sm:$0xff] }
 0x2a6   : > { %12013 = vmatprep.mubr.msk.f32.mxu1 %vm484_vm0, %v16792_v23  ;;  %19816 = vst [vmem:[#allocation68_spill] sm:$0xff] %v16807_v2  ;;  %v16909_v23 = vsel %vm1526_vm4, %v1698_v1, %v1699_v59 }
 0x2a7   : > { %12411 = vmatmul.mubr.msk.f32.gmra.mrb[12].mxu0 %vm484_vm0, %v16778_v29  ;;  %19827 = vst [vmem:[#allocation77_spill] sm:$0xff] %v16909_v23 }
 0x2a8   : > { %12413 = vmatprep.mubr.msk.f32.mxu0 %vm484_vm0, %v16782_v18 }
 0x2a9   : > { %12014 = vmatmul.mubr.msk.f32.gmra.mrb[14].mxu1 %vm484_vm0, %v16807_v2  ;;  %v3712_v2 = vrot.slane %v19826_v62, 1 }
 0x2aa   : > { %12016 = vmatprep.mubr.msk.f32.mxu1 %vm484_vm0, %v16196_v56 }
 0x2ab   : > { %12414 = vmatmul.mubr.msk.f32.gmra.mrb[14].mxu0 %vm484_vm0, %v16799_v63  ;;  %v16926_v1 = vsel %vm1526_vm4, %v3711_v24, %v3712_v2  ;;  %v1528_v24 = vrot.slane %v16662_v51, 1  ;;  %v19832_v51 = vld [vmem:[#allocation29_spill] sm:$0xff] }
 0x2ac   : > { %12416 = vmatprep.mubr.msk.f32.mxu0 %vm484_vm0, %v16803_v34  ;;  %19829 = vst [vmem:[#allocation86_spill] sm:$0xff] %v16926_v1 }
 0x2ad   : > { %12017 = vmatmul.mubr.msk.f32.gmra.mrb[16].mxu1 %vm484_vm0, %v16202_v9 }
 0x2ae   : > { %12019 = vmatprep.mubr.msk.f32.mxu1 %vm484_vm0, %v16204_v26 }
 0x2af   : > { %12417 = vmatmul.mubr.msk.f32.gmra.mrb[16].mxu0 %vm484_vm0, %v16818_v16 }
 0x2b0   : > { %12419 = vmatprep.mubr.msk.f32.mxu0 %vm484_vm0, %v16822_v53 }
 0x2b1   : > { %12020 = vmatmul.mubr.msk.f32.gmra.mrb[18].mxu1 %vm484_vm0, %v16210_v52 }
 0x2b2   : > { %12022 = vmatprep.mubr.msk.f32.mxu1 %vm484_vm0, %v16212_v61 }
 0x2b3   : > { %12420 = vmatmul.mubr.msk.f32.gmra.mrb[18].mxu0 %vm484_vm0, %v16835_v46 }
 0x2b4   : > { %12422 = vmatprep.mubr.msk.f32.mxu0 %vm484_vm0, %v16839_v6 }
 0x2b5   : > { %12023 = vmatmul.mubr.msk.f32.gmra.mrb[20].mxu1 %vm484_vm0, %v16218_v13 }
 0x2b6   : > { %12025 = vmatprep.mubr.msk.f32.mxu1 %vm484_vm0, %v16220_v60 }
 0x2b7   : > { %12423 = vmatmul.mubr.msk.f32.gmra.mrb[20].mxu0 %vm484_vm0, %v16852_v4 }
 0x2b8   : > { %12425 = vmatprep.mubr.msk.f32.mxu0 %vm484_vm0, %v16856_v5 }
 0x2b9   : > { %12026 = vmatmul.mubr.msk.f32.gmra.mrb[22].mxu1 %vm484_vm0, %v16226_v8 }
 0x2ba   : > { %12028 = vmatprep.mubr.msk.f32.mxu1 %vm484_vm0, %v19769_v19 }
 0x2bb   : > { %12426 = vmatmul.mubr.msk.f32.gmra.mrb[22].mxu0 %vm484_vm0, %v16869_v45 }
 0x2bc   : > { %12428 = vmatprep.mubr.msk.f32.mxu0 %vm484_vm0, %v16873_v25  ;;  %v16911_v25 = vld [vmem:[#allocation3 + $0x217] sm:$0x3] }
 0x2bd   : > { %12029 = vmatmul.mubr.msk.f32.gmra.mrb[24].mxu1 %vm484_vm0, %v19770_v21  ;;  %v3714_v55 = vrot.slane %v16911_v25, 1 }
 0x2be   : > { %12031 = vmatprep.mubr.msk.f32.mxu1 %vm484_vm0, %v19774_v27 }
 0x2bf   : > { %12429 = vmatmul.mubr.msk.f32.gmra.mrb[24].mxu0 %vm484_vm0, %v16886_v48  ;;  %v16937_v59 = vsel %vm1526_vm4, %v3712_v2, %v3714_v55  ;;  %v19839_v55 = vld [vmem:[#allocation103_spill] sm:$0xff] }
 0x2c0   : > { %12431 = vmatprep.mubr.msk.f32.mxu0 %vm484_vm0, %v16890_v22  ;;  %19830 = vst [vmem:[#allocation90_spill] sm:$0xff] %v16937_v59 }
 0x2c1   : > { %12032 = vmatmul.mubr.msk.f32.gmra.mrb[26].mxu1 %vm484_vm0, %v16242_v7 }
 0x2c2   : > { %12034 = vmatprep.mubr.msk.f32.mxu1 %vm484_vm0, %v19778_v50 }
 0x2c3   : > { %12432 = vmatmul.mubr.msk.f32.gmra.mrb[26].mxu0 %vm484_vm0, %v16903_v28  ;;  %v1530_v28 = vrot.slane %v14493_v12, 1  ;;  %v1529_v12 = vsel %vm1526_vm4, %v1527_v0, %v1528_v24  ;;  %v19840_v0 = vld [vmem:[#allocation38_spill] sm:$0xff] }
 0x2c4   : > { %12434 = vmatprep.mubr.msk.f32.mxu0 %vm484_vm0, %v16909_v23  ;;  %v19831_v23 = vld [vmem:[#allocation28_spill] sm:$0xff] }
 0x2c5   : > { %12035 = vmatmul.mubr.msk.f32.gmra.mrb[28].mxu1 %vm484_vm0, %v19779_v44  ;;  %v1531_v2 = vsel %vm1526_vm4, %v1528_v24, %v1530_v28  ;;  %v19834_v28 = vld [vmem:[#allocation31_spill] sm:$0xff]  ;;  %v19841_v24 = vld [vmem:[#allocation104_spill] sm:$0xff] }
 0x2c6   : > { %12037 = vmatprep.mubr.msk.f32.mxu1 %vm484_vm0, %v16252_v49 }
 0x2c7   : > { %12435 = vmatmul.mubr.msk.f32.gmra.mrb[28].mxu0 %vm484_vm0, %v16922_v38  ;;  %v1704_v38 = vld [vmem:[#allocation10 + $0x4] sm:$0xf] }
 0x2c8   : > { %12437 = vmatprep.mubr.msk.f32.mxu0 %vm484_vm0, %v16926_v1  ;;  %12040 = vmatprep.subr.msk.mxu1 %vm957_vm2, %v1704_v38  ;;  %v19851_v1 = vld [vmem:[#allocation44_spill] sm:$0xff] }
 0x2c9   : > { %12038 = vmatmul.mubr.msk.f32.gmra.mrb[30].mxu1 %vm484_vm0, %v16258_v43 }
 0x2ca   : > { %12041 = vmatpush3.msk.msra.mxu1 %vm957_vm2, %v1704_v38  ;;  %12042 = vmatprep.mubr.msk.f32.mxu1 %vm484_vm0, %v1529_v12  ;;  %v19835_v38 = vld [vmem:[#allocation32_spill] sm:$0xff]  ;;  %v19842_v12 = vld [vmem:[#allocation39_spill] sm:$0xff] }
 0x2cb   : > { %12438 = vmatmul.mubr.msk.f32.gmra.mrb[30].mxu0 %vm484_vm0, %v16937_v59  ;;  %v19850_v59 = vld [vmem:[#allocation106_spill] sm:$0xff] }
 0x2cc   : > { %12442 = vmatprep.mubr.msk.f32.mxu0 %vm484_vm0, %v19831_v23  ;;  %v19833_v23 = vld [vmem:[#allocation30_spill] sm:$0xff] }
 0x2cd   : > { %12043 = vmatmul.mubr.msk.f32.vlgmr.msra.gmra.mrb[0].mxu1 %vm484_vm0, %v1531_v2  ;;  %v19843_v2 = vld [vmem:[#allocation33_spill] sm:$0xff] }
 0x2ce   : > { %12045 = vmatprep.mubr.msk.f32.mxu1 %vm484_vm0, %v16342_v54  ;;  %v19836_v54 = vld [vmem:[#allocation34_spill] sm:$0xff] }
 0x2cf   : > { %12443 = vmatmul.mubr.msk.f32.vlgmr.msra.gmra.mrb[0].mxu0 %vm484_vm0, %v19832_v51  ;;  %v19844_v51 = vld [vmem:[#allocation40_spill] sm:$0xff] }
 0x2d0   : > { %12491 = vmatpush3.msk.msra.mxu0 %vm957_vm2, %v16660_v17  ;;  %12445 = vmatprep.mubr.msk.f32.mxu0 %vm484_vm0, %v19833_v23  ;;  %v19837_v17 = vld [vmem:[#allocation35_spill] sm:$0xff] }
 0x2d1   : > { %12540 = vmatprep.subr.msk.mxu0 %vm957_vm2, %v16952_v30  ;;  %12046 = vmatmul.mubr.msk.f32.gmra.mrb[2].mxu1 %vm484_vm0, %v16351_v32  ;;  %v19838_v32 = vld [vmem:[#allocation37_spill] sm:$0xff] }
 0x2d2   : > { %12048 = vmatprep.mubr.msk.f32.mxu1 %vm484_vm0, %v16356_v15 }
 0x2d3   : > { %12446 = vmatmul.mubr.msk.f32.gmra.mrb[2].mxu0 %vm484_vm0, %v19834_v28  ;;  %v19849_v28 = vld [vmem:[#allocation107_spill] sm:$0xff] }
 0x2d4   : > { %12448 = vmatprep.mubr.msk.f32.mxu0 %vm484_vm0, %v19835_v38  ;;  %v19847_v38 = vld [vmem:[#allocation36_spill] sm:$0xff]  ;;  %v2399_v23 = vrot.slane %v19849_v28, 2 }
 0x2d5   : > { %12049 = vmatmul.mubr.msk.f32.gmra.mrb[4].mxu1 %vm484_vm0, %v16373_v40 }
 0x2d6   : > { %12051 = vmatprep.mubr.msk.f32.mxu1 %vm484_vm0, %v16377_v42 }
 0x2d7   : > { %12449 = vmatmul.mubr.msk.f32.gmra.mrb[4].mxu0 %vm484_vm0, %v19836_v54  ;;  %v19845_v54 = vld [vmem:[#allocation105_spill] sm:$0xff] }
 0x2d8   : > { %12451 = vmatprep.mubr.msk.f32.mxu0 %vm484_vm0, %v19837_v17  ;;  %v2397_v17 = vrot.slane %v16202_v9, 2  ;;  %v2402_v9 = vrot.slane %v16210_v52, 2  ;;  %v2406_v52 = vrot.slane %v16212_v61, 2 }
 0x2d9   : > { %12052 = vmatmul.mubr.msk.f32.gmra.mrb[6].mxu1 %vm484_vm0, %v16392_v47 }
 0x2da   : > { %12054 = vmatprep.mubr.msk.f32.mxu1 %vm484_vm0, %v19839_v55  ;;  %v17022_v28 = vsel %vm2355_vm3, %v2397_v17, %v2399_v23 }
 0x2db   : > { %12452 = vmatmul.mubr.msk.f32.gmra.mrb[6].mxu0 %vm484_vm0, %v19838_v32  ;;  %v2396_v32 = vrot.slane %v16196_v56, 2  ;;  %v2401_v56 = vrot.slane %v16204_v26, 2 }
 0x2dc   : > { %12454 = vmatprep.mubr.msk.f32.mxu0 %vm484_vm0, %v19840_v0  ;;  %v19846_v0 = vld [vmem:[#allocation42_spill] sm:$0xff] }
 0x2dd   : > { %12055 = vmatmul.mubr.msk.f32.gmra.mrb[8].mxu1 %vm484_vm0, %v19841_v24  ;;  %v17026_v26 = vsel %vm2355_vm3, %v2401_v56, %v2402_v9 }
 0x2de   : > { %12057 = vmatprep.mubr.msk.f32.mxu1 %vm484_vm0, %v19843_v2  ;;  %v14496_v2 = vld [vmem:[#allocation3 + $0x17] sm:$0x3] }
 0x2df   : > { %12455 = vmatmul.mubr.msk.f32.gmra.mrb[8].mxu0 %vm484_vm0, %v19842_v12  ;;  %v19848_v12 = vld [vmem:[#allocation43_spill] sm:$0xff]  ;;  %v1626_v24 = vrot.slane %v14496_v2, 1  ;;  %v19881_v2 = vld [vmem:[#allocation49_spill] sm:$0xff] }
 0x2e0   : > { %12457 = vmatprep.mubr.msk.f32.mxu0 %vm484_vm0, %v19844_v51  ;;  %v17009_v51 = vsel %vm2355_vm3, %v2396_v32, %v2397_v17  ;;  %v19853_v32 = vld [vmem:[#allocation110_spill] sm:$0xff]  ;;  %v19856_v17 = vld [vmem:[#allocation113_spill] sm:$0xff] }
 0x2e1   : > { %12058 = vmatmul.mubr.msk.f32.gmra.mrb[10].mxu1 %vm484_vm0, %v19845_v54  ;;  %v2409_v56 = vrot.slane %v19856_v17, 2  ;;  %v2417_v17 = vrot.slane %v19770_v21, 2  ;;  %v2421_v21 = vrot.slane %v19774_v27, 2  ;;  %v19874_v54 = vld [vmem:[#allocation98_spill] sm:$0xff] }
 0x2e2   : > { %12060 = vmatprep.mubr.msk.f32.mxu1 %vm484_vm0, %v19847_v38  ;;  %v19854_v38 = vld [vmem:[#allocation108_spill] sm:$0xff] }
 0x2e3   : > { %12458 = vmatmul.mubr.msk.f32.gmra.mrb[10].mxu0 %vm484_vm0, %v19846_v0  ;;  %v19852_v0 = vld [vmem:[#allocation41_spill] sm:$0xff] }
 0x2e4   : > { %12460 = vmatprep.mubr.msk.f32.mxu0 %vm484_vm0, %v19848_v12  ;;  %v2404_v12 = vrot.slane %v19853_v32, 2  ;;  %v2412_v32 = vrot.slane %v16226_v8, 2  ;;  %v2416_v8 = vrot.slane %v19769_v19, 2 }
 0x2e5   : > { %12061 = vmatmul.mubr.msk.f32.gmra.mrb[12].mxu1 %vm484_vm0, %v19850_v59  ;;  %v2407_v59 = vrot.slane %v16218_v13, 2  ;;  %v2411_v13 = vrot.slane %v16220_v60, 2 }
 0x2e6   : > { %12063 = vmatprep.mubr.msk.f32.mxu1 %vm484_vm0, %v19852_v0  ;;  %v17039_v23 = vsel %vm2355_vm3, %v2402_v9, %v2404_v12  ;;  %v19859_v9 = vld [vmem:[#allocation116_spill] sm:$0xff]  ;;  %v17077_v19 = vsel %vm2355_vm3, %v2416_v8, %v2417_v17 }
 0x2e7   : > { %12461 = vmatmul.mubr.msk.f32.gmra.mrb[12].mxu0 %vm484_vm0, %v19851_v1  ;;  %v19855_v1 = vld [vmem:[#allocation109_spill] sm:$0xff]  ;;  %v17043_v61 = vsel %vm2355_vm3, %v2406_v52, %v2407_v59  ;;  %v17056_v12 = vsel %vm2355_vm3, %v2407_v59, %v2409_v56  ;;  %v2414_v52 = vrot.slane %v19859_v9, 2  ;;  %v17060_v60 = vsel %vm2355_vm3, %v2411_v13, %v2412_v32  ;;  %v19862_v56 = vld [vmem:[#allocation94_spill] sm:$0xff] }
 0x2e8   : > { %12463 = vmatprep.mubr.msk.f32.mxu0 %vm484_vm0, %v17009_v51  ;;  %v2419_v13 = vrot.slane %v19862_v56, 2  ;;  %v2422_v9 = vrot.slane %v16242_v7, 2  ;;  %v2426_v7 = vrot.slane %v19778_v50, 2  ;;  %v2427_v56 = vrot.slane %v19779_v44, 2 }
 0x2e9   : > { %12064 = vmatmul.mubr.msk.f32.gmra.mrb[14].mxu1 %vm484_vm0, %v19854_v38  ;;  %v19857_v38 = vld [vmem:[#allocation111_spill] sm:$0xff]  ;;  %v17073_v59 = vsel %vm2355_vm3, %v2412_v32, %v2414_v52  ;;  %v19865_v52 = vld [vmem:[#allocation96_spill] sm:$0xff]  ;;  %v2431_v44 = vrot.slane %v16252_v49, 2 }
 0x2ea   : > { %12066 = vmatprep.mubr.msk.f32.mxu1 %vm484_vm0, %v19855_v1  ;;  %v19858_v1 = vld [vmem:[#allocation112_spill] sm:$0xff]  ;;  %v17090_v32 = vsel %vm2355_vm3, %v2417_v17, %v2419_v13  ;;  %v2424_v8 = vrot.slane %v19865_v52, 2  ;;  %v17094_v27 = vsel %vm2355_vm3, %v2421_v21, %v2422_v9  ;;  %v19868_v13 = vld [vmem:[#allocation97_spill] sm:$0xff]  ;;  %v17111_v50 = vsel %vm2355_vm3, %v2426_v7, %v2427_v56  ;;  %v19872_v49 = vld [vmem:[#allocation99_spill] sm:$0xff] }
 0x2eb   : > { %12464 = vmatmul.mubr.msk.f32.gmra.mrb[14].mxu0 %vm484_vm0, %v17022_v28  ;;  %v2429_v21 = vrot.slane %v19868_v13, 2  ;;  %v2432_v52 = vrot.slane %v16258_v43, 2  ;;  %v4248_v13 = vrot.slane %v19872_v49, 2  ;;  %v19873_v43 = vld [vmem:[#allocation100_spill] sm:$0xff] }
 0x2ec   : > { %12466 = vmatprep.mubr.msk.f32.mxu0 %vm484_vm0, %v17026_v26  ;;  %v17107_v17 = vsel %vm2355_vm3, %v2422_v9, %v2424_v8  ;;  %v19871_v8 = vld [vmem:[#allocation123_spill] sm:$0xff]  ;;  %v4249_v0 = vrot.slane %v19873_v43, 2  ;;  %v19877_v49 = vld [vmem:[#allocation124_spill] sm:$0xff]  ;;  %v19878_v43 = vld [vmem:[#allocation125_spill] sm:$0xff] }
 0x2ed   : > { %12067 = vmatmul.mubr.msk.f32.gmra.mrb[16].mxu1 %vm484_vm0, %v19857_v38  ;;  %v19860_v38 = vld [vmem:[#allocation114_spill] sm:$0xff]  ;;  %v17124_v9 = vsel %vm2355_vm3, %v2427_v56, %v2429_v21  ;;  %v2434_v7 = vrot.slane %v19871_v8, 2 }
 0x2ee   : > { %12069 = vmatprep.mubr.msk.f32.mxu1 %vm484_vm0, %v19858_v1  ;;  %v19861_v1 = vld [vmem:[#allocation115_spill] sm:$0xff]  ;;  %v19876_v21 = vld [vmem:[#allocation126_spill] sm:$0xff] }
 0x2ef   : > { %12467 = vmatmul.mubr.msk.f32.gmra.mrb[16].mxu0 %vm484_vm0, %v17039_v23  ;;  %v17141_v56 = vsel %vm2355_vm3, %v2432_v52, %v2434_v7  ;;  %v4251_v8 = vrot.slane %v19876_v21, 2  ;;  %v19879_v7 = vld [vmem:[#allocation78_spill] sm:$0xff] }
 0x2f0   : > { %12469 = vmatprep.mubr.msk.f32.mxu0 %vm484_vm0, %v17043_v61 }
 0x2f1   : > { %12070 = vmatmul.mubr.msk.f32.gmra.mrb[18].mxu1 %vm484_vm0, %v19860_v38  ;;  %v19863_v38 = vld [vmem:[#allocation117_spill] sm:$0xff] }
 0x2f2   : > { %12072 = vmatprep.mubr.msk.f32.mxu1 %vm484_vm0, %v19861_v1  ;;  %v19864_v1 = vld [vmem:[#allocation118_spill] sm:$0xff] }
 0x2f3   : > { %12470 = vmatmul.mubr.msk.f32.gmra.mrb[18].mxu0 %vm484_vm0, %v17056_v12 }
 0x2f4   : > { %12472 = vmatprep.mubr.msk.f32.mxu0 %vm484_vm0, %v17060_v60 }
 0x2f5   : > { %12073 = vmatmul.mubr.msk.f32.gmra.mrb[20].mxu1 %vm484_vm0, %v19863_v38  ;;  %v19866_v38 = vld [vmem:[#allocation95_spill] sm:$0xff] }
 0x2f6   : > { %12075 = vmatprep.mubr.msk.f32.mxu1 %vm484_vm0, %v19864_v1  ;;  %v19867_v1 = vld [vmem:[#allocation119_spill] sm:$0xff] }
 0x2f7   : > { %12473 = vmatmul.mubr.msk.f32.gmra.mrb[20].mxu0 %vm484_vm0, %v17073_v59 }
 0x2f8   : > { %12475 = vmatprep.mubr.msk.f32.mxu0 %vm484_vm0, %v17077_v19 }
 0x2f9   : > { %12076 = vmatmul.mubr.msk.f32.gmra.mrb[22].mxu1 %vm484_vm0, %v19866_v38  ;;  %v19869_v38 = vld [vmem:[#allocation120_spill] sm:$0xff] }
 0x2fa   : > { %12078 = vmatprep.mubr.msk.f32.mxu1 %vm484_vm0, %v19867_v1  ;;  %v19870_v1 = vld [vmem:[#allocation121_spill] sm:$0xff] }
 0x2fb   : > { %12476 = vmatmul.mubr.msk.f32.gmra.mrb[22].mxu0 %vm484_vm0, %v17090_v32 }
 0x2fc   : > { %12478 = vmatprep.mubr.msk.f32.mxu0 %vm484_vm0, %v17094_v27 }
 0x2fd   : > { %12079 = vmatmul.mubr.msk.f32.gmra.mrb[24].mxu1 %vm484_vm0, %v19869_v38  ;;  %v17130_v38 = vsel %vm2355_vm3, %v2431_v44, %v2432_v52  ;;  %v17145_v44 = vsel %vm2355_vm3, %v4248_v13, %v4249_v0  ;;  %v17156_v52 = vsel %vm2355_vm3, %v4249_v0, %v4251_v8  ;;  %v14494_v13 = vld [vmem:[#allocation3 + $0x7] sm:$0xff] }
 0x2fe   : > { %12081 = vmatprep.mubr.msk.f32.mxu1 %vm484_vm0, %v19870_v1  ;;  %v19875_v1 = vld [vmem:[#allocation122_spill] sm:$0xff]  ;;  %v1623_v21 = vrot.slane %v14494_v13, 1 }
 0x2ff   : > { %12479 = vmatmul.mubr.msk.f32.gmra.mrb[24].mxu0 %vm484_vm0, %v17107_v17  ;;  %v14497_v13 = vld [vmem:[#allocation10 + $0x8] sm:$0xf] }
 0x300   : > { %12481 = vmatprep.mubr.msk.f32.mxu0 %vm484_vm0, %v17111_v50 }
 0x301   : > { %12082 = vmatmul.mubr.msk.f32.gmra.mrb[26].mxu1 %vm484_vm0, %v19874_v54 }
 0x302   : > { %12084 = vmatprep.mubr.msk.f32.mxu1 %vm484_vm0, %v19875_v1  ;;  %v14495_v1 = vld [vmem:[#allocation3 + $0xf] sm:$0xff] }
 0x303   : > { %12482 = vmatmul.mubr.msk.f32.gmra.mrb[26].mxu0 %vm484_vm0, %v17124_v9  ;;  %v1624_v54 = vrot.slane %v14495_v1, 1  ;;  %v17169_v1 = vld [vmem:[#allocation11 + $0x18] sm:$0xf] }
 0x304   : > { %12484 = vmatprep.mubr.msk.f32.mxu0 %vm484_vm0, %v17130_v38 }
 0x305   : > { %12085 = vmatmul.mubr.msk.f32.gmra.mrb[28].mxu1 %vm484_vm0, %v19877_v49  ;;  %v2030_v49 = vld [vmem:[#allocation11 + $0x4] sm:$0xf]  ;;  %v1625_v0 = vsel %vm1526_vm4, %v1623_v21, %v1624_v54  ;;  %v1627_v8 = vsel %vm1526_vm4, %v1624_v54, %v1626_v24  ;;  %v19883_v54 = vld [vmem:[#allocation51_spill] sm:$0xff]  ;;  %v19889_v21 = vld [vmem:[#allocation60_spill] sm:$0xff] }
 0x306   : > { %12087 = vmatprep.mubr.msk.f32.mxu1 %vm484_vm0, %v19878_v43  ;;  %v19880_v43 = vld [vmem:[#allocation47_spill] sm:$0xff]  ;;  %12090 = vmatprep.subr.msk.mxu1 %vm957_vm2, %v2030_v49 }
 0x307   : > { %12485 = vmatmul.mubr.msk.f32.gmra.mrb[28].mxu0 %vm484_vm0, %v17141_v56  ;;  %12091 = vmatpush3.msk.msra.mxu1 %vm957_vm2, %v2030_v49  ;;  %v19882_v49 = vld [vmem:[#allocation50_spill] sm:$0xff]  ;;  %v19886_v24 = vld [vmem:[#allocation55_spill] sm:$0xff] }
 0x308   : > { %12487 = vmatprep.mubr.msk.f32.mxu0 %vm484_vm0, %v17145_v44  ;;  %13290 = vmatprep.subr.msk.mxu1 %vm957_vm2, %v14497_v13 }
 0x309   : > { %12088 = vmatmul.mubr.msk.f32.gmra.mrb[30].mxu1 %vm484_vm0, %v19879_v7 }
 0x30a   : > { %12092 = vmatprep.mubr.msk.f32.mxu1 %vm484_vm0, %v1625_v0  ;;  %v19890_v0 = vld [vmem:[#allocation61_spill] sm:$0xff] }
 0x30b   : > { %12488 = vmatmul.mubr.msk.f32.gmra.mrb[30].mxu0 %vm484_vm0, %v17156_v52 }
 0x30c   : > { %12492 = vmatprep.mubr.msk.f32.mxu0 %vm484_vm0, %v19880_v43  ;;  %v19888_v43 = vld [vmem:[#allocation58_spill] sm:$0xff] }
 0x30d   : > { %12093 = vmatmul.mubr.msk.f32.vlgmr.msra.gmra.mrb[0].mxu1 %vm484_vm0, %v1627_v8  ;;  %v19891_v8 = vld [vmem:[#allocation63_spill] sm:$0xff] }
 0x30e   : > { %12095 = vmatprep.mubr.msk.f32.mxu1 %vm484_vm0, %v16635_v10  ;;  %13291 = vmatpush3.msk.msra.mxu1 %vm957_vm2, %v14497_v13  ;;  %v19884_v10 = vld [vmem:[#allocation52_spill] sm:$0xff] }
 0x30f   : > { %12493 = vmatmul.mubr.msk.f32.vlgmr.msra.gmra.mrb[0].mxu0 %vm484_vm0, %v19881_v2  ;;  %v19892_v13 = vld [vmem:[#allocation64_spill] sm:$0xff]  ;;  %v19893_v2 = vld [vmem:[#allocation66_spill] sm:$0xff] }
 0x310   : > { %12541 = vmatpush3.msk.msra.mxu0 %vm957_vm2, %v16952_v30  ;;  %12495 = vmatprep.mubr.msk.f32.mxu0 %vm484_vm0, %v19882_v49  ;;  %v19885_v30 = vld [vmem:[#allocation54_spill] sm:$0xff] }
 0x311   : > { %12590 = vmatprep.subr.msk.mxu0 %vm957_vm2, %v17169_v1  ;;  %12096 = vmatmul.mubr.msk.f32.gmra.mrb[2].mxu1 %vm484_vm0, %v16650_v58  ;;  %v19887_v58 = vld [vmem:[#allocation57_spill] sm:$0xff] }
 0x312   : > { %12098 = vmatprep.mubr.msk.f32.mxu1 %vm484_vm0, %v16655_v35 }
 0x313   : > { %12496 = vmatmul.mubr.msk.f32.gmra.mrb[2].mxu0 %vm484_vm0, %v19883_v54  ;;  %v14526_v54 = vld [vmem:[#allocation3 + $0xe7] sm:$0xff] }
 0x314   : > { %12498 = vmatprep.mubr.msk.f32.mxu0 %vm484_vm0, %v19884_v10  ;;  %v14522_v10 = vld [vmem:[#allocation3 + $0xa7] sm:$0xff] }
 0x315   : > { %12099 = vmatmul.mubr.msk.f32.gmra.mrb[4].mxu1 %vm484_vm0, %v16674_v31 }
 0x316   : > { %12101 = vmatprep.mubr.msk.f32.mxu1 %vm484_vm0, %v16678_v11 }
 0x317   : > { %12499 = vmatmul.mubr.msk.f32.gmra.mrb[4].mxu0 %vm484_vm0, %v19885_v30  ;;  %v14508_v30 = vld [vmem:[#allocation2 + $0x1a7] sm:$0xff] }
 0x318   : > { %12501 = vmatprep.mubr.msk.f32.mxu0 %vm484_vm0, %v19886_v24  ;;  %v19913_v24 = vld [vmem:[#allocation77_spill] sm:$0xff] }
 0x319   : > { %12102 = vmatmul.mubr.msk.f32.gmra.mrb[6].mxu1 %vm484_vm0, %v16694_v37 }
 0x31a   : > { %12104 = vmatprep.mubr.msk.f32.mxu1 %vm484_vm0, %v16698_v20 }
 0x31b   : > { %12502 = vmatmul.mubr.msk.f32.gmra.mrb[6].mxu0 %vm484_vm0, %v19887_v58  ;;  %v4256_v58 = vrot.slane %v16911_v25, 2  ;;  %v19916_v25 = vld [vmem:[#allocation87_spill] sm:$0xff] }
 0x31c   : > { %12504 = vmatprep.mubr.msk.f32.mxu0 %vm484_vm0, %v19888_v43  ;;  %v4254_v43 = vrot.slane %v19826_v62, 2  ;;  %v19912_v62 = vld [vmem:[#allocation93_spill] sm:$0xff] }
 0x31d   : > { %12105 = vmatmul.mubr.msk.f32.gmra.mrb[8].mxu1 %vm484_vm0, %v16715_v14 }
 0x31e   : > { %12107 = vmatprep.mubr.msk.f32.mxu1 %vm484_vm0, %v16719_v33 }
 0x31f   : > { %12505 = vmatmul.mubr.msk.f32.gmra.mrb[8].mxu0 %vm484_vm0, %v19889_v21  ;;  %v19906_v21 = vld [vmem:[#allocation71_spill] sm:$0xff] }
 0x320   : > { %12507 = vmatprep.mubr.msk.f32.mxu0 %vm484_vm0, %v19890_v0  ;;  %v19894_v0 = vld [vmem:[#allocation67_spill] sm:$0xff] }
 0x321   : > { %12108 = vmatmul.mubr.msk.f32.gmra.mrb[10].mxu1 %vm484_vm0, %v16736_v39 }
 0x322   : > { %12110 = vmatprep.mubr.msk.f32.mxu1 %vm484_vm0, %v16740_v57 }
 0x323   : > { %12508 = vmatmul.mubr.msk.f32.gmra.mrb[10].mxu0 %vm484_vm0, %v19891_v8  ;;  %v19895_v8 = vld [vmem:[#allocation69_spill] sm:$0xff] }
 0x324   : > { %12510 = vmatprep.mubr.msk.f32.mxu0 %vm484_vm0, %v19892_v13  ;;  %v19896_v13 = vld [vmem:[#allocation70_spill] sm:$0xff] }
 0x325   : > { %12111 = vmatmul.mubr.msk.f32.gmra.mrb[12].mxu1 %vm484_vm0, %v16757_v3 }
 0x326   : > { %12113 = vmatprep.mubr.msk.f32.mxu1 %vm484_vm0, %v16761_v41 }
 0x327   : > { %12511 = vmatmul.mubr.msk.f32.gmra.mrb[12].mxu0 %vm484_vm0, %v19893_v2  ;;  %v19897_v2 = vld [vmem:[#allocation72_spill] sm:$0xff] }
 0x328   : > { %12513 = vmatprep.mubr.msk.f32.mxu0 %vm484_vm0, %v19894_v0  ;;  %v19898_v0 = vld [vmem:[#allocation73_spill] sm:$0xff] }
 0x329   : > { %12114 = vmatmul.mubr.msk.f32.gmra.mrb[14].mxu1 %vm484_vm0, %v16778_v29 }
 0x32a   : > { %12116 = vmatprep.mubr.msk.f32.mxu1 %vm484_vm0, %v16782_v18 }
 0x32b   : > { %12514 = vmatmul.mubr.msk.f32.gmra.mrb[14].mxu0 %vm484_vm0, %v19895_v8  ;;  %v19899_v8 = vld [vmem:[#allocation75_spill] sm:$0xff] }
 0x32c   : > { %12516 = vmatprep.mubr.msk.f32.mxu0 %vm484_vm0, %v19896_v13  ;;  %v19900_v13 = vld [vmem:[#allocation76_spill] sm:$0xff] }
 0x32d   : > { %12117 = vmatmul.mubr.msk.f32.gmra.mrb[16].mxu1 %vm484_vm0, %v16799_v63 }
 0x32e   : > { %12119 = vmatprep.mubr.msk.f32.mxu1 %vm484_vm0, %v16803_v34 }
 0x32f   : > { %12517 = vmatmul.mubr.msk.f32.gmra.mrb[16].mxu0 %vm484_vm0, %v19897_v2  ;;  %v19901_v2 = vld [vmem:[#allocation79_spill] sm:$0xff] }
 0x330   : > { %12519 = vmatprep.mubr.msk.f32.mxu0 %vm484_vm0, %v19898_v0  ;;  %v19902_v0 = vld [vmem:[#allocation80_spill] sm:$0xff] }
 0x331   : > { %12120 = vmatmul.mubr.msk.f32.gmra.mrb[18].mxu1 %vm484_vm0, %v16818_v16 }
 0x332   : > { %12122 = vmatprep.mubr.msk.f32.mxu1 %vm484_vm0, %v16822_v53 }
 0x333   : > { %12520 = vmatmul.mubr.msk.f32.gmra.mrb[18].mxu0 %vm484_vm0, %v19899_v8  ;;  %v19903_v8 = vld [vmem:[#allocation84_spill] sm:$0xff] }
 0x334   : > { %12522 = vmatprep.mubr.msk.f32.mxu0 %vm484_vm0, %v19900_v13  ;;  %v19904_v13 = vld [vmem:[#allocation85_spill] sm:$0xff] }
 0x335   : > { %12123 = vmatmul.mubr.msk.f32.gmra.mrb[20].mxu1 %vm484_vm0, %v16835_v46 }
 0x336   : > { %12125 = vmatprep.mubr.msk.f32.mxu1 %vm484_vm0, %v16839_v6 }
 0x337   : > { %12523 = vmatmul.mubr.msk.f32.gmra.mrb[20].mxu0 %vm484_vm0, %v19901_v2  ;;  %v19905_v2 = vld [vmem:[#allocation88_spill] sm:$0xff] }
 0x338   : > { %12525 = vmatprep.mubr.msk.f32.mxu0 %vm484_vm0, %v19902_v0  ;;  %v19907_v0 = vld [vmem:[#allocation89_spill] sm:$0xff] }
 0x339   : > { %12126 = vmatmul.mubr.msk.f32.gmra.mrb[22].mxu1 %vm484_vm0, %v16852_v4 }
 0x33a   : > { %12128 = vmatprep.mubr.msk.f32.mxu1 %vm484_vm0, %v16856_v5 }
 0x33b   : > { %12526 = vmatmul.mubr.msk.f32.gmra.mrb[22].mxu0 %vm484_vm0, %v19903_v8  ;;  %v4253_v8 = vrot.slane %v19825_v36, 2  ;;  %v19911_v36 = vld [vmem:[#allocation74_spill] sm:$0xff] }
 0x33c   : > { %12528 = vmatprep.mubr.msk.f32.mxu0 %vm484_vm0, %v19904_v13  ;;  %v19908_v13 = vld [vmem:[#allocation91_spill] sm:$0xff] }
 0x33d   : > { %12129 = vmatmul.mubr.msk.f32.gmra.mrb[24].mxu1 %vm484_vm0, %v16869_v45 }
 0x33e   : > { %12131 = vmatprep.mubr.msk.f32.mxu1 %vm484_vm0, %v19906_v21 }
 0x33f   : > { %12529 = vmatmul.mubr.msk.f32.gmra.mrb[24].mxu0 %vm484_vm0, %v19905_v2  ;;  %v19909_v2 = vld [vmem:[#allocation92_spill] sm:$0xff] }
 0x340   : > { %12531 = vmatprep.mubr.msk.f32.mxu0 %vm484_vm0, %v19907_v0  ;;  %v17292_v0 = vsel %vm2355_vm3, %v4253_v8, %v4254_v43  ;;  %v17313_v8 = vld [vmem:[#allocation10 + $0x1c] sm:$0xf] }
 0x341   : > { %12132 = vmatmul.mubr.msk.f32.gmra.mrb[26].mxu1 %vm484_vm0, %v16886_v48  ;;  %19910 = vst [vmem:[#allocation101_spill] sm:$0xff] %v17292_v0 }
 0x342   : > { %12134 = vmatprep.mubr.msk.f32.mxu1 %vm484_vm0, %v16890_v22 }
 0x343   : > { %12532 = vmatmul.mubr.msk.f32.gmra.mrb[26].mxu0 %vm484_vm0, %v19908_v13  ;;  %v17303_v13 = vsel %vm2355_vm3, %v4254_v43, %v4256_v58  ;;  %v19918_v58 = vld [vmem:[#allocation46_spill] sm:$0xff]  ;;  %v19919_v43 = vld [vmem:[#allocation48_spill] sm:$0xff] }
 0x344   : > { %12534 = vmatprep.mubr.msk.f32.mxu0 %vm484_vm0, %v19909_v2  ;;  %19914 = vst [vmem:[#allocation102_spill] sm:$0xff] %v17303_v13  ;;  %v19915_v2 = vld [vmem:[#allocation81_spill] sm:$0xff] }
 0x345   : > { %12135 = vmatmul.mubr.msk.f32.gmra.mrb[28].mxu1 %vm484_vm0, %v19911_v36 }
 0x346   : > { %12137 = vmatprep.mubr.msk.f32.mxu1 %vm484_vm0, %v19913_v24 }
 0x347   : > { %12535 = vmatmul.mubr.msk.f32.gmra.mrb[28].mxu0 %vm484_vm0, %v19912_v62  ;;  %v14506_v62 = vld [vmem:[#allocation2 + $0x187] sm:$0xff] }
 0x348   : > { %12537 = vmatprep.mubr.msk.f32.mxu0 %vm484_vm0, %v17292_v0  ;;  %v19917_v0 = vld [vmem:[#allocation45_spill] sm:$0xff] }
 0x349   : > { %12138 = vmatmul.mubr.msk.f32.gmra.mrb[30].mxu1 %vm484_vm0, %v19915_v2 }
 0x34a   : > { %12166 = vmatprep.mubr.msk.f32.mxu1 %vm484_vm0, %v17009_v51 }
 0x34b   : > { %12538 = vmatmul.mubr.msk.f32.gmra.mrb[30].mxu0 %vm484_vm0, %v17303_v13  ;;  %v14504_v13 = vld [vmem:[#allocation2 + $0x167] sm:$0xff] }
 0x34c   : > { %12542 = vmatprep.mubr.msk.f32.mxu0 %vm484_vm0, %v19916_v25  ;;  %v19922_v25 = vld [vmem:[#allocation59_spill] sm:$0xff] }
 0x34d   : > { %12167 = vmatmul.mubr.msk.f32.vlgmr.msra.gmra.mrb[16].mxu1 %vm484_vm0, %v17022_v28 }
 0x34e   : > { %12169 = vmatprep.mubr.msk.f32.mxu1 %vm484_vm0, %v17026_v26 }
 0x34f   : > { %12543 = vmatmul.mubr.msk.f32.vlgmr.msra.gmra.mrb[0].mxu0 %vm484_vm0, %v19917_v0  ;;  %v19920_v0 = vld [vmem:[#allocation53_spill] sm:$0xff] }
 0x350   : > { %12591 = vmatpush3.msk.msra.mxu0 %vm957_vm2, %v17169_v1  ;;  %12545 = vmatprep.mubr.msk.f32.mxu0 %vm484_vm0, %v19918_v58  ;;  %v19921_v1 = vld [vmem:[#allocation56_spill] sm:$0xff]  ;;  %v19923_v58 = vld [vmem:[#allocation62_spill] sm:$0xff] }
 0x351   : > { %12640 = vmatprep.subr.msk.mxu0 %vm957_vm2, %v17313_v8  ;;  %12170 = vmatmul.mubr.msk.f32.gmra.mrb[18].mxu1 %vm484_vm0, %v17039_v23 }
 0x352   : > { %12172 = vmatprep.mubr.msk.f32.mxu1 %vm484_vm0, %v17043_v61 }
 0x353   : > { %12546 = vmatmul.mubr.msk.f32.gmra.mrb[2].mxu0 %vm484_vm0, %v19919_v43  ;;  %v19924_v43 = vld [vmem:[#allocation127_spill] sm:$0xff] }
 0x354   : > { %12548 = vmatprep.mubr.msk.f32.mxu0 %vm484_vm0, %v19920_v0  ;;  %v19925_v0 = vld [vmem:[#allocation65_spill] sm:$0xff] }
 0x355   : > { %12173 = vmatmul.mubr.msk.f32.gmra.mrb[20].mxu1 %vm484_vm0, %v17056_v12 }
 0x356   : > { %12175 = vmatprep.mubr.msk.f32.mxu1 %vm484_vm0, %v17060_v60 }
 0x357   : > { %12549 = vmatmul.mubr.msk.f32.gmra.mrb[4].mxu0 %vm484_vm0, %v19921_v1  ;;  %v19926_v1 = vld [vmem:[#allocation128_spill] sm:$0xff] }
 0x358   : > { %12551 = vmatprep.mubr.msk.f32.mxu0 %vm484_vm0, %v19922_v25  ;;  %v19927_v25 = vld [vmem:[#allocation68_spill] sm:$0xff] }
 0x359   : > { %12176 = vmatmul.mubr.msk.f32.gmra.mrb[22].mxu1 %vm484_vm0, %v17073_v59 }
 0x35a   : > { %12178 = vmatprep.mubr.msk.f32.mxu1 %vm484_vm0, %v17077_v19 }
 0x35b   : > { %12552 = vmatmul.mubr.msk.f32.gmra.mrb[6].mxu0 %vm484_vm0, %v19923_v58  ;;  %v14498_v58 = vld [vmem:[#allocation2 + $0x107] sm:$0xff] }
 0x35c   : > { %12554 = vmatprep.mubr.msk.f32.mxu0 %vm484_vm0, %v19924_v43  ;;  %v14499_v43 = vld [vmem:[#allocation2 + $0x10f] sm:$0xff] }
 0x35d   : > { %12179 = vmatmul.mubr.msk.f32.gmra.mrb[24].mxu1 %vm484_vm0, %v17090_v32 }
 0x35e   : > { %12181 = vmatprep.mubr.msk.f32.mxu1 %vm484_vm0, %v17094_v27 }
 0x35f   : > { %12555 = vmatmul.mubr.msk.f32.gmra.mrb[8].mxu0 %vm484_vm0, %v19925_v0  ;;  %v14500_v0 = vld [vmem:[#allocation2 + $0x127] sm:$0xff] }
 0x360   : > { %12557 = vmatprep.mubr.msk.f32.mxu0 %vm484_vm0, %v19926_v1  ;;  %v14501_v1 = vld [vmem:[#allocation2 + $0x12f] sm:$0xff] }
 0x361   : > { %12182 = vmatmul.mubr.msk.f32.gmra.mrb[26].mxu1 %vm484_vm0, %v17107_v17 }
 0x362   : > { %12184 = vmatprep.mubr.msk.f32.mxu1 %vm484_vm0, %v17111_v50 }
 0x363   : > { %12558 = vmatmul.mubr.msk.f32.gmra.mrb[10].mxu0 %vm484_vm0, %v19927_v25  ;;  %v14502_v25 = vld [vmem:[#allocation2 + $0x147] sm:$0xff] }
 0x364   : > { %12560 = vmatprep.mubr.msk.f32.mxu0 %vm484_vm0, %v14498_v58  ;;  %v14503_v58 = vld [vmem:[#allocation2 + $0x14f] sm:$0xff] }
 0x365   : > { %12185 = vmatmul.mubr.msk.f32.gmra.mrb[28].mxu1 %vm484_vm0, %v17124_v9 }
 0x366   : > { %12187 = vmatprep.mubr.msk.f32.mxu1 %vm484_vm0, %v17130_v38 }
 0x367   : > { %12561 = vmatmul.mubr.msk.f32.gmra.mrb[12].mxu0 %vm484_vm0, %v14499_v43  ;;  %v14505_v43 = vld [vmem:[#allocation2 + $0x16f] sm:$0xff] }
 0x368   : > { %12563 = vmatprep.mubr.msk.f32.mxu0 %vm484_vm0, %v14500_v0  ;;  %v14507_v0 = vld [vmem:[#allocation2 + $0x18f] sm:$0xff] }
 0x369   : > { %12188 = vmatmul.mubr.msk.f32.gmra.mrb[30].mxu1 %vm484_vm0, %v17141_v56 }
 0x36b   : > { %12564 = vmatmul.mubr.msk.f32.gmra.mrb[14].mxu0 %vm484_vm0, %v14501_v1  ;;  %v14509_v1 = vld [vmem:[#allocation2 + $0x1af] sm:$0xff] }
 0x36c   : > { %12566 = vmatprep.mubr.msk.f32.mxu0 %vm484_vm0, %v14502_v25  ;;  %v14510_v25 = vld [vmem:[#allocation2 + $0x1c7] sm:$0xff] }
 0x36f   : > { %12567 = vmatmul.mubr.msk.f32.gmra.mrb[16].mxu0 %vm484_vm0, %v14503_v58  ;;  %v14511_v58 = vld [vmem:[#allocation2 + $0x1cf] sm:$0xff] }
 0x370   : > { %12569 = vmatprep.mubr.msk.f32.mxu0 %vm484_vm0, %v14504_v13  ;;  %v14512_v13 = vld [vmem:[#allocation2 + $0x1e7] sm:$0xff] }
 0x373   : > { %12570 = vmatmul.mubr.msk.f32.gmra.mrb[18].mxu0 %vm484_vm0, %v14505_v43  ;;  %v14513_v43 = vld [vmem:[#allocation2 + $0x1ef] sm:$0xff] }
 0x374   : > { %12572 = vmatprep.mubr.msk.f32.mxu0 %vm484_vm0, %v14506_v62  ;;  %v14514_v62 = vld [vmem:[#allocation2 + $0x207] sm:$0xff] }
 0x377   : > { %12573 = vmatmul.mubr.msk.f32.gmra.mrb[20].mxu0 %vm484_vm0, %v14507_v0  ;;  %v17388_v0 = vld [vmem:[#allocation2 + $0x227] sm:$0xff] }
 0x378   : > { %12575 = vmatprep.mubr.msk.f32.mxu0 %vm484_vm0, %v14508_v30  ;;  %v14515_v30 = vld [vmem:[#allocation2 + $0x20f] sm:$0xff] }
 0x37b   : > { %12576 = vmatmul.mubr.msk.f32.gmra.mrb[22].mxu0 %vm484_vm0, %v14509_v1  ;;  %v17393_v1 = vld [vmem:[#allocation2 + $0x22f] sm:$0xff] }
 0x37c   : > { %12578 = vmatprep.mubr.msk.f32.mxu0 %vm484_vm0, %v14510_v25  ;;  %v14516_v25 = vld [vmem:[#allocation3 + $0x47] sm:$0xff] }
 0x37f   : > { %12579 = vmatmul.mubr.msk.f32.gmra.mrb[24].mxu0 %vm484_vm0, %v14511_v58  ;;  %v17398_v58 = vld [vmem:[#allocation11 + $0x1c] sm:$0xf] }
 0x380   : > { %12581 = vmatprep.mubr.msk.f32.mxu0 %vm484_vm0, %v14512_v13  ;;  %v14517_v13 = vld [vmem:[#allocation3 + $0x4f] sm:$0xff] }
 0x383   : > { %12582 = vmatmul.mubr.msk.f32.gmra.mrb[26].mxu0 %vm484_vm0, %v14513_v43  ;;  %v14518_v43 = vld [vmem:[#allocation3 + $0x67] sm:$0xff] }
 0x384   : > { %12584 = vmatprep.mubr.msk.f32.mxu0 %vm484_vm0, %v14514_v62  ;;  %v14519_v62 = vld [vmem:[#allocation3 + $0x6f] sm:$0xff] }
 0x387   : > { %12585 = vmatmul.mubr.msk.f32.gmra.mrb[28].mxu0 %vm484_vm0, %v14515_v30  ;;  %v14520_v30 = vld [vmem:[#allocation3 + $0x87] sm:$0xff] }
 0x388   : > { %12587 = vmatprep.mubr.msk.f32.mxu0 %vm484_vm0, %v17388_v0 }
 0x38b   : > { %12588 = vmatmul.mubr.msk.f32.gmra.mrb[30].mxu0 %vm484_vm0, %v17393_v1 }
 0x38c   : > { %12592 = vmatprep.mubr.msk.f32.mxu0 %vm484_vm0, %v14516_v25  ;;  %v14521_v25 = vld [vmem:[#allocation3 + $0x8f] sm:$0xff] }
 0x38f   : > { %12593 = vmatmul.mubr.msk.f32.vlgmr.msra.gmra.mrb[0].mxu0 %vm484_vm0, %v14517_v13  ;;  %v14523_v13 = vld [vmem:[#allocation3 + $0xaf] sm:$0xff] }
 0x390   : > { %12641 = vmatpush3.msk.msra.mxu0 %vm957_vm2, %v17313_v8  ;;  %12595 = vmatprep.mubr.msk.f32.mxu0 %vm484_vm0, %v14518_v43  ;;  %v14524_v8 = vld [vmem:[#allocation3 + $0xc7] sm:$0xff]  ;;  %v14525_v43 = vld [vmem:[#allocation3 + $0xcf] sm:$0xff] }
 0x391   : > { %12690 = vmatprep.subr.msk.mxu0 %vm957_vm2, %v17398_v58 }
 0x393   : > { %12596 = vmatmul.mubr.msk.f32.gmra.mrb[2].mxu0 %vm484_vm0, %v14519_v62  ;;  %v14527_v62 = vld [vmem:[#allocation3 + $0xef] sm:$0xff] }
 0x394   : > { %12598 = vmatprep.mubr.msk.f32.mxu0 %vm484_vm0, %v14520_v30  ;;  %v14528_v30 = vld [vmem:[#allocation3 + $0x107] sm:$0xff] }
 0x397   : > { %12599 = vmatmul.mubr.msk.f32.gmra.mrb[4].mxu0 %vm484_vm0, %v14521_v25  ;;  %v14529_v25 = vld [vmem:[#allocation3 + $0x10f] sm:$0xff] }
 0x398   : > { %12601 = vmatprep.mubr.msk.f32.mxu0 %vm484_vm0, %v14522_v10  ;;  %v14530_v10 = vld [vmem:[#allocation3 + $0x127] sm:$0xff] }
 0x39b   : > { %12602 = vmatmul.mubr.msk.f32.gmra.mrb[6].mxu0 %vm484_vm0, %v14523_v13  ;;  %v14531_v13 = vld [vmem:[#allocation3 + $0x12f] sm:$0xff] }
 0x39c   : > { %12604 = vmatprep.mubr.msk.f32.mxu0 %vm484_vm0, %v14524_v8  ;;  %v14532_v8 = vld [vmem:[#allocation3 + $0x147] sm:$0xff] }
 0x39f   : > { %12605 = vmatmul.mubr.msk.f32.gmra.mrb[8].mxu0 %vm484_vm0, %v14525_v43  ;;  %v14533_v43 = vld [vmem:[#allocation3 + $0x14f] sm:$0xff] }
 0x3a0   : > { %12607 = vmatprep.mubr.msk.f32.mxu0 %vm484_vm0, %v14526_v54  ;;  %v14534_v54 = vld [vmem:[#allocation3 + $0x167] sm:$0xff] }
 0x3a3   : > { %12608 = vmatmul.mubr.msk.f32.gmra.mrb[10].mxu0 %vm484_vm0, %v14527_v62  ;;  %v14535_v62 = vld [vmem:[#allocation3 + $0x16f] sm:$0xff] }
 0x3a4   : > { %12610 = vmatprep.mubr.msk.f32.mxu0 %vm484_vm0, %v14528_v30  ;;  %v14536_v30 = vld [vmem:[#allocation3 + $0x187] sm:$0xff] }
 0x3a7   : > { %12611 = vmatmul.mubr.msk.f32.gmra.mrb[12].mxu0 %vm484_vm0, %v14529_v25  ;;  %v14537_v25 = vld [vmem:[#allocation3 + $0x18f] sm:$0xff] }
 0x3a8   : > { %12613 = vmatprep.mubr.msk.f32.mxu0 %vm484_vm0, %v14530_v10  ;;  %v14538_v10 = vld [vmem:[#allocation3 + $0x1a7] sm:$0xff] }
 0x3ab   : > { %12614 = vmatmul.mubr.msk.f32.gmra.mrb[14].mxu0 %vm484_vm0, %v14531_v13  ;;  %v14539_v13 = vld [vmem:[#allocation3 + $0x1af] sm:$0xff] }
 0x3ac   : > { %12616 = vmatprep.mubr.msk.f32.mxu0 %vm484_vm0, %v14532_v8  ;;  %v14540_v8 = vld [vmem:[#allocation3 + $0x1c7] sm:$0xff] }
 0x3af   : > { %12617 = vmatmul.mubr.msk.f32.gmra.mrb[16].mxu0 %vm484_vm0, %v14533_v43  ;;  %v14541_v43 = vld [vmem:[#allocation3 + $0x1cf] sm:$0xff] }
 0x3b0   : > { %12619 = vmatprep.mubr.msk.f32.mxu0 %vm484_vm0, %v14534_v54  ;;  %v14542_v54 = vld [vmem:[#allocation3 + $0x1e7] sm:$0xff] }
 0x3b3   : > { %12620 = vmatmul.mubr.msk.f32.gmra.mrb[18].mxu0 %vm484_vm0, %v14535_v62  ;;  %v14543_v62 = vld [vmem:[#allocation3 + $0x1ef] sm:$0xff] }
 0x3b4   : > { %12622 = vmatprep.mubr.msk.f32.mxu0 %vm484_vm0, %v14536_v30  ;;  %v14544_v30 = vld [vmem:[#allocation3 + $0x207] sm:$0xff] }
 0x3b7   : > { %12623 = vmatmul.mubr.msk.f32.gmra.mrb[20].mxu0 %vm484_vm0, %v14537_v25  ;;  %v17432_v25 = vld [vmem:[#allocation3 + $0x227] sm:$0xff] }
 0x3b8   : > { %12625 = vmatprep.mubr.msk.f32.mxu0 %vm484_vm0, %v14538_v10  ;;  %v14545_v10 = vld [vmem:[#allocation3 + $0x20f] sm:$0xff] }
 0x3bb   : > { %12626 = vmatmul.mubr.msk.f32.gmra.mrb[22].mxu0 %vm484_vm0, %v14539_v13  ;;  %v17437_v13 = vld [vmem:[#allocation3 + $0x22f] sm:$0xff] }
 0x3bc   : > { %12628 = vmatprep.mubr.msk.f32.mxu0 %vm484_vm0, %v14540_v8  ;;  %v5881_v8 = vld [vmem:[#allocation10 + $0x20] sm:$0xf] }
 0x3bf   : > { %12629 = vmatmul.mubr.msk.f32.gmra.mrb[24].mxu0 %vm484_vm0, %v14541_v43  ;;  %v19928_v43 = vld [vmem:[#allocation104_spill] sm:$0xff] }
 0x3c0   : > { %12631 = vmatprep.mubr.msk.f32.mxu0 %vm484_vm0, %v14542_v54  ;;  %v19933_v54 = vld [vmem:[#allocation41_spill] sm:$0xff] }
 0x3c3   : > { %12632 = vmatmul.mubr.msk.f32.gmra.mrb[26].mxu0 %vm484_vm0, %v14543_v62  ;;  %v19936_v62 = vld [vmem:[#allocation111_spill] sm:$0xff] }
 0x3c4   : > { %12634 = vmatprep.mubr.msk.f32.mxu0 %vm484_vm0, %v14544_v30  ;;  %v19937_v30 = vld [vmem:[#allocation112_spill] sm:$0xff] }
 0x3c7   : > { %12635 = vmatmul.mubr.msk.f32.gmra.mrb[28].mxu0 %vm484_vm0, %v14545_v10  ;;  %v19938_v10 = vld [vmem:[#allocation114_spill] sm:$0xff] }
 0x3c8   : > { %12637 = vmatprep.mubr.msk.f32.mxu0 %vm484_vm0, %v17432_v25 }
 0x3cb   : > { %12638 = vmatmul.mubr.msk.f32.gmra.mrb[30].mxu0 %vm484_vm0, %v17437_v13 }
 0x3cc   : > { %12642 = vmatprep.mubr.msk.f32.mxu0 %vm484_vm0, %v16356_v15  ;;  %v19929_v15 = vld [vmem:[#allocation33_spill] sm:$0xff] }
 0x3cf   : > { %12643 = vmatmul.mubr.msk.f32.vlgmr.msra.gmra.mrb[0].mxu0 %vm484_vm0, %v16373_v40  ;;  %v19930_v40 = vld [vmem:[#allocation105_spill] sm:$0xff] }
 0x3d0   : > { %12691 = vmatpush3.msk.msra.mxu0 %vm957_vm2, %v17398_v58  ;;  %12645 = vmatprep.mubr.msk.f32.mxu0 %vm484_vm0, %v16377_v42  ;;  %v19931_v58 = vld [vmem:[#allocation36_spill] sm:$0xff]  ;;  %v19932_v42 = vld [vmem:[#allocation106_spill] sm:$0xff] }
 0x3d1   : > { %12740 = vmatprep.subr.msk.mxu0 %vm957_vm2, %v5881_v8 }
 0x3d3   : > { %12646 = vmatmul.mubr.msk.f32.gmra.mrb[2].mxu0 %vm484_vm0, %v16392_v47  ;;  %v19934_v47 = vld [vmem:[#allocation108_spill] sm:$0xff] }
 0x3d4   : > { %12648 = vmatprep.mubr.msk.f32.mxu0 %vm484_vm0, %v19839_v55  ;;  %v19935_v55 = vld [vmem:[#allocation109_spill] sm:$0xff] }
 0x3d7   : > { %12649 = vmatmul.mubr.msk.f32.gmra.mrb[4].mxu0 %vm484_vm0, %v19928_v43  ;;  %v19939_v43 = vld [vmem:[#allocation115_spill] sm:$0xff] }
 0x3d8   : > { %12651 = vmatprep.mubr.msk.f32.mxu0 %vm484_vm0, %v19929_v15  ;;  %v19940_v15 = vld [vmem:[#allocation117_spill] sm:$0xff] }
 0x3db   : > { %12652 = vmatmul.mubr.msk.f32.gmra.mrb[6].mxu0 %vm484_vm0, %v19930_v40  ;;  %v19941_v40 = vld [vmem:[#allocation118_spill] sm:$0xff] }
 0x3dc   : > { %12654 = vmatprep.mubr.msk.f32.mxu0 %vm484_vm0, %v19931_v58  ;;  %v19942_v58 = vld [vmem:[#allocation95_spill] sm:$0xff] }
 0x3df   : > { %12655 = vmatmul.mubr.msk.f32.gmra.mrb[8].mxu0 %vm484_vm0, %v19932_v42  ;;  %v19943_v42 = vld [vmem:[#allocation119_spill] sm:$0xff] }
 0x3e0   : > { %12657 = vmatprep.mubr.msk.f32.mxu0 %vm484_vm0, %v19933_v54  ;;  %v19944_v54 = vld [vmem:[#allocation120_spill] sm:$0xff] }
 0x3e3   : > { %12658 = vmatmul.mubr.msk.f32.gmra.mrb[10].mxu0 %vm484_vm0, %v19934_v47  ;;  %v19945_v47 = vld [vmem:[#allocation121_spill] sm:$0xff] }
 0x3e4   : > { %12660 = vmatprep.mubr.msk.f32.mxu0 %vm484_vm0, %v19935_v55  ;;  %v19946_v55 = vld [vmem:[#allocation98_spill] sm:$0xff] }
 0x3e7   : > { %12661 = vmatmul.mubr.msk.f32.gmra.mrb[12].mxu0 %vm484_vm0, %v19936_v62  ;;  %v19947_v62 = vld [vmem:[#allocation122_spill] sm:$0xff] }
 0x3e8   : > { %12663 = vmatprep.mubr.msk.f32.mxu0 %vm484_vm0, %v19937_v30  ;;  %v19948_v30 = vld [vmem:[#allocation124_spill] sm:$0xff] }
 0x3eb   : > { %12664 = vmatmul.mubr.msk.f32.gmra.mrb[14].mxu0 %vm484_vm0, %v19938_v10  ;;  %v17496_v10 = vpop.f32.mrb[0].mxu1 }
 0x3ec   : > { %12666 = vmatprep.mubr.msk.f32.mxu0 %vm484_vm0, %v19939_v43  ;;  %19949 = vst [vmem:[#allocation28_spill] sm:$0xff] %v17496_v10  ;;  %v19950_v43 = vld [vmem:[#allocation125_spill] sm:$0xff] }
 0x3ef   : > { %12667 = vmatmul.mubr.msk.f32.gmra.mrb[16].mxu0 %vm484_vm0, %v19940_v15  ;;  %v17500_v15 = vpop.f32.mrb[1].mxu1 }
 0x3f0   : > { %12669 = vmatprep.mubr.msk.f32.mxu0 %vm484_vm0, %v19941_v40  ;;  %19951 = vst [vmem:[#allocation29_spill] sm:$0xff] %v17500_v15  ;;  %v5327_v40 = vrot.slane %v17388_v0, 1 }
 0x3f3   : > { %12670 = vmatmul.mubr.msk.f32.gmra.mrb[18].mxu0 %vm484_vm0, %v19942_v58  ;;  %v5328_v58 = vrot.slane %v17393_v1, 1 }
 0x3f4   : > { %12672 = vmatprep.mubr.msk.f32.mxu0 %vm484_vm0, %v19943_v42  ;;  %v17504_v42 = vld [vmem:[#allocation2 + $0x237] sm:$0x3] }
 0x3f7   : > { %12673 = vmatmul.mubr.msk.f32.gmra.mrb[20].mxu0 %vm484_vm0, %v19944_v54  ;;  %v17508_v54 = vpop.f32.mrb[2].mxu1 }
 0x3f8   : > { %12675 = vmatprep.mubr.msk.f32.mxu0 %vm484_vm0, %v19945_v47  ;;  %v19952_v47 = vld [vmem:[#allocation82_spill] sm:$0xff] }
 0x3fb   : > { %12676 = vmatmul.mubr.msk.f32.gmra.mrb[22].mxu0 %vm484_vm0, %v19946_v55  ;;  %v5330_v55 = vrot.slane %v17504_v42, 1 }
 0x3fc   : > { %12678 = vmatprep.mubr.msk.f32.mxu0 %vm484_vm0, %v19947_v62  ;;  %v17513_v62 = vpop.f32.mrb[3].mxu1 }
 0x3fd   : > { %19953 = vst [vmem:[#allocation103_spill] sm:$0xff] %v17513_v62  ;;  %v17518_v15 = vpop.f32.mrb[4].mxu1 }
 0x3fe   : > { %v17522_v10 = vpop.f32.mrb[5].mxu1 }
 0x3ff   : > { %12679 = vmatmul.mubr.msk.f32.gmra.mrb[24].mxu0 %vm484_vm0, %v19948_v30  ;;  %v5329_v30 = vsel %vm1526_vm4, %v5327_v40, %v5328_v58  ;;  %v17531_v40 = vld [vmem:[#allocation11 + $0x20] sm:$0xf] }
 0x400   : > { %12681 = vmatprep.mubr.msk.f32.mxu0 %vm484_vm0, %v19950_v43  ;;  %v19954_v43 = vld [vmem:[#allocation83_spill] sm:$0xff] }
 0x403   : > { %12682 = vmatmul.mubr.msk.f32.gmra.mrb[26].mxu0 %vm484_vm0, %v19879_v7  ;;  %v5331_v7 = vsel %vm1526_vm4, %v5328_v58, %v5330_v55  ;;  %v17638_v55 = vld [vmem:[#allocation3 + $0x237] sm:$0x3] }
 0x404   : > { %12684 = vmatprep.mubr.msk.f32.mxu0 %vm484_vm0, %v19952_v47  ;;  %v17525_v47 = vpop.f32.mrb[6].mxu1 }
 0x405   : > { %v17529_v62 = vpop.f32.mrb[7].mxu1 }
 0x407   : > { %12685 = vmatmul.mubr.msk.f32.gmra.mrb[28].mxu0 %vm484_vm0, %v19954_v43  ;;  %v17535_v43 = vpop.f32.mrb[8].mxu1 }
 0x408   : > { %12687 = vmatprep.mubr.msk.f32.mxu0 %vm484_vm0, %v5329_v30  ;;  %v17540_v58 = vpop.f32.mrb[9].mxu1 }
 0x40b   : > { %12688 = vmatmul.mubr.msk.f32.gmra.mrb[30].mxu0 %vm484_vm0, %v5331_v7  ;;  %v19957_v7 = vld [vmem:[#allocation30_spill] sm:$0xff] }
 0x40c   : > { %12692 = vmatprep.mubr.msk.f32.mxu0 %vm484_vm0, %v16655_v35  ;;  %v17546_v35 = vpop.f32.mrb[10].mxu1 }
 0x40f   : > { %12693 = vmatmul.mubr.msk.f32.vlgmr.msra.gmra.mrb[0].mxu0 %vm484_vm0, %v16674_v31  ;;  %v17550_v31 = vpop.f32.mrb[11].mxu1 }
 0x410   : > { %12741 = vmatpush3.msk.msra.mxu0 %vm957_vm2, %v5881_v8  ;;  %12695 = vmatprep.mubr.msk.f32.mxu0 %vm484_vm0, %v16678_v11  ;;  %v17554_v8 = vpop.f32.mrb[12].mxu1 }
 0x411   : > { %12790 = vmatprep.subr.msk.mxu0 %vm957_vm2, %v17531_v40  ;;  %v17558_v11 = vpop.f32.mrb[13].mxu1 }
 0x413   : > { %12696 = vmatmul.mubr.msk.f32.gmra.mrb[2].mxu0 %vm484_vm0, %v16694_v37  ;;  %v17562_v37 = vpop.f32.mrb[14].mxu1 }
 0x414   : > { %12698 = vmatprep.mubr.msk.f32.mxu0 %vm484_vm0, %v16698_v20  ;;  %v17566_v20 = vpop.f32.mrb[15].mxu1 }
 0x417   : > { %12699 = vmatmul.mubr.msk.f32.gmra.mrb[4].mxu0 %vm484_vm0, %v16715_v14 }
 0x418   : > { %12701 = vmatprep.mubr.msk.f32.mxu0 %vm484_vm0, %v16719_v33 }
 0x41b   : > { %12702 = vmatmul.mubr.msk.f32.gmra.mrb[6].mxu0 %vm484_vm0, %v16736_v39 }
 0x41c   : > { %12704 = vmatprep.mubr.msk.f32.mxu0 %vm484_vm0, %v16740_v57 }
 0x41f   : > { %12705 = vmatmul.mubr.msk.f32.gmra.mrb[8].mxu0 %vm484_vm0, %v16757_v3 }
 0x420   : > { %12707 = vmatprep.mubr.msk.f32.mxu0 %vm484_vm0, %v16761_v41  ;;  %v17572_v14 = vpop.f32.mrb[16].mxu1 }
 0x421   : > { %v17574_v33 = vpop.f32.mrb[17].mxu1 }
 0x423   : > { %12708 = vmatmul.mubr.msk.f32.gmra.mrb[10].mxu0 %vm484_vm0, %v16778_v29 }
 0x424   : > { %12710 = vmatprep.mubr.msk.f32.mxu0 %vm484_vm0, %v16782_v18  ;;  %v17580_v39 = vpop.f32.mrb[18].mxu1 }
 0x425   : > { %v17582_v57 = vpop.f32.mrb[19].mxu1 }
 0x427   : > { %12711 = vmatmul.mubr.msk.f32.gmra.mrb[12].mxu0 %vm484_vm0, %v16799_v63 }
 0x428   : > { %12713 = vmatprep.mubr.msk.f32.mxu0 %vm484_vm0, %v16803_v34  ;;  %v17588_v3 = vpop.f32.mrb[20].mxu1 }
 0x429   : > { %v17590_v41 = vpop.f32.mrb[21].mxu1 }
 0x42b   : > { %12714 = vmatmul.mubr.msk.f32.gmra.mrb[14].mxu0 %vm484_vm0, %v16818_v16 }
 0x42c   : > { %12716 = vmatprep.mubr.msk.f32.mxu0 %vm484_vm0, %v16822_v53  ;;  %v17596_v29 = vpop.f32.mrb[22].mxu1 }
 0x42d   : > { %v17598_v18 = vpop.f32.mrb[23].mxu1 }
 0x42f   : > { %12717 = vmatmul.mubr.msk.f32.gmra.mrb[16].mxu0 %vm484_vm0, %v16835_v46 }
 0x430   : > { %12719 = vmatprep.mubr.msk.f32.mxu0 %vm484_vm0, %v16839_v6  ;;  %v17604_v63 = vpop.f32.mrb[24].mxu1 }
 0x431   : > { %v17606_v34 = vpop.f32.mrb[25].mxu1 }
 0x433   : > { %12720 = vmatmul.mubr.msk.f32.gmra.mrb[18].mxu0 %vm484_vm0, %v16852_v4 }
 0x434   : > { %12722 = vmatprep.mubr.msk.f32.mxu0 %vm484_vm0, %v16856_v5  ;;  %v17612_v16 = vpop.f32.mrb[26].mxu1 }
 0x435   : > { %v17614_v53 = vpop.f32.mrb[27].mxu1 }
 0x437   : > { %12723 = vmatmul.mubr.msk.f32.gmra.mrb[20].mxu0 %vm484_vm0, %v16869_v45  ;;  %v5333_v45 = vrot.slane %v17432_v25, 1 }
 0x438   : > { %12725 = vmatprep.mubr.msk.f32.mxu0 %vm484_vm0, %v19906_v21  ;;  %v17620_v46 = vpop.f32.mrb[28].mxu1  ;;  %v5334_v21 = vrot.slane %v17437_v13, 1 }
 0x439   : > { %v17622_v6 = vpop.f32.mrb[29].mxu1 }
 0x43a   : > { %v5335_v30 = vsel %vm1526_vm4, %v5333_v45, %v5334_v21  ;;  %v19960_v45 = vld [vmem:[#allocation34_spill] sm:$0xff] }
 0x43b   : > { %12726 = vmatmul.mubr.msk.f32.gmra.mrb[22].mxu0 %vm484_vm0, %v16886_v48  ;;  %v19955_v48 = vld [vmem:[#allocation86_spill] sm:$0xff] }
 0x43c   : > { %12728 = vmatprep.mubr.msk.f32.mxu0 %vm484_vm0, %v16890_v22  ;;  %v17628_v4 = vpop.f32.mrb[30].mxu1  ;;  %v5336_v22 = vrot.slane %v17638_v55, 1 }
 0x43d   : > { %v17630_v5 = vpop.f32.mrb[31].mxu1 }
 0x43f   : > { %12729 = vmatmul.mubr.msk.f32.gmra.mrb[24].mxu0 %vm484_vm0, %v19911_v36  ;;  %v19956_v36 = vld [vmem:[#allocation90_spill] sm:$0xff] }
 0x440   : > { %12731 = vmatprep.mubr.msk.f32.mxu0 %vm484_vm0, %v19913_v24  ;;  %v5337_v24 = vsel %vm1526_vm4, %v5334_v21, %v5336_v22  ;;  %v19962_v21 = vld [vmem:[#allocation37_spill] sm:$0xff]  ;;  %v19963_v22 = vld [vmem:[#allocation38_spill] sm:$0xff] }
 0x443   : > { %12732 = vmatmul.mubr.msk.f32.gmra.mrb[26].mxu0 %vm484_vm0, %v19915_v2  ;;  %v19958_v2 = vld [vmem:[#allocation31_spill] sm:$0xff] }
 0x444   : > { %12734 = vmatprep.mubr.msk.f32.mxu0 %vm484_vm0, %v19955_v48  ;;  %v19959_v48 = vld [vmem:[#allocation32_spill] sm:$0xff] }
 0x447   : > { %12735 = vmatmul.mubr.msk.f32.gmra.mrb[28].mxu0 %vm484_vm0, %v19956_v36  ;;  %v19964_v36 = vld [vmem:[#allocation39_spill] sm:$0xff] }
 0x448   : > { %12737 = vmatprep.mubr.msk.f32.mxu0 %vm484_vm0, %v5335_v30  ;;  %v19961_v30 = vld [vmem:[#allocation35_spill] sm:$0xff] }
 0x44b   : > { %12738 = vmatmul.mubr.msk.f32.gmra.mrb[30].mxu0 %vm484_vm0, %v5337_v24  ;;  %v19965_v24 = vld [vmem:[#allocation40_spill] sm:$0xff] }
 0x44c   : > { %12742 = vmatprep.mubr.msk.f32.mxu0 %vm484_vm0, %v19957_v7  ;;  %v19967_v7 = vld [vmem:[#allocation43_spill] sm:$0xff] }
 0x44f   : > { %12743 = vmatmul.mubr.msk.f32.vlgmr.msra.gmra.mrb[0].mxu0 %vm484_vm0, %v19958_v2  ;;  %v19968_v2 = vld [vmem:[#allocation44_spill] sm:$0xff] }
 0x450   : > { %12791 = vmatpush3.msk.msra.mxu0 %vm957_vm2, %v17531_v40  ;;  %12745 = vmatprep.mubr.msk.f32.mxu0 %vm484_vm0, %v19959_v48  ;;  %v19966_v40 = vld [vmem:[#allocation42_spill] sm:$0xff]  ;;  %v19986_v48 = vld [vmem:[#allocation76_spill] sm:$0xff] }
 0x453   : > { %12746 = vmatmul.mubr.msk.f32.gmra.mrb[2].mxu0 %vm484_vm0, %v19960_v45  ;;  %v19987_v45 = vld [vmem:[#allocation79_spill] sm:$0xff] }
 0x454   : > { %12748 = vmatprep.mubr.msk.f32.mxu0 %vm484_vm0, %v19961_v30  ;;  %v19988_v30 = vld [vmem:[#allocation80_spill] sm:$0xff] }
 0x457   : > { %12749 = vmatmul.mubr.msk.f32.gmra.mrb[4].mxu0 %vm484_vm0, %v19962_v21  ;;  %v19989_v21 = vld [vmem:[#allocation84_spill] sm:$0xff] }
 0x458   : > { %12751 = vmatprep.mubr.msk.f32.mxu0 %vm484_vm0, %v19963_v22  ;;  %v19990_v22 = vld [vmem:[#allocation85_spill] sm:$0xff] }
 0x45b   : > { %12752 = vmatmul.mubr.msk.f32.gmra.mrb[6].mxu0 %vm484_vm0, %v19964_v36  ;;  %v19991_v36 = vld [vmem:[#allocation88_spill] sm:$0xff] }
 0x45c   : > { %12754 = vmatprep.mubr.msk.f32.mxu0 %vm484_vm0, %v19965_v24  ;;  %v19992_v24 = vld [vmem:[#allocation89_spill] sm:$0xff] }
 0x45f   : > { %12755 = vmatmul.mubr.msk.f32.gmra.mrb[8].mxu0 %vm484_vm0, %v19966_v40  ;;  %v19993_v40 = vld [vmem:[#allocation91_spill] sm:$0xff] }
 0x460   : > { %12757 = vmatprep.mubr.msk.f32.mxu0 %vm484_vm0, %v19967_v7  ;;  %v19994_v7 = vld [vmem:[#allocation92_spill] sm:$0xff] }
 0x463   : > { %12758 = vmatmul.mubr.msk.f32.gmra.mrb[10].mxu0 %vm484_vm0, %v19968_v2  ;;  %v5875_v2 = vrot.slane %v17432_v25, 2  ;;  %v6931_v25 = vld [vmem:[#allocation16 + $0x4] sm:$0xf] }
 0x464   : > { %12760 = vmatprep.mubr.msk.f32.mxu0 %vm484_vm0, %v17009_v51  ;;  %v5870_v51 = vrot.slane %v17388_v0, 2  ;;  %v19983_v0 = vld [vmem:[#allocation72_spill] sm:$0xff]  ;;  %12840 = vmatprep.subr.msk.mxu1 %vm957_vm2, %v6931_v25 }
 0x465   : > { %12841 = vmatpush3.msk.msra.mxu1 %vm957_vm2, %v6931_v25 }
 0x467   : > { %12761 = vmatmul.mubr.msk.f32.gmra.mrb[12].mxu0 %vm484_vm0, %v17022_v28  ;;  %v5871_v28 = vrot.slane %v17393_v1, 2  ;;  %v19984_v1 = vld [vmem:[#allocation73_spill] sm:$0xff] }
 0x468   : > { %12763 = vmatprep.mubr.msk.f32.mxu0 %vm484_vm0, %v17026_v26  ;;  %v5873_v26 = vrot.slane %v17504_v42, 2  ;;  %v19985_v42 = vld [vmem:[#allocation75_spill] sm:$0xff] }
 0x46b   : > { %12764 = vmatmul.mubr.msk.f32.gmra.mrb[14].mxu0 %vm484_vm0, %v17039_v23  ;;  %v5872_v23 = vsel %vm2355_vm3, %v5870_v51, %v5871_v28  ;;  %v5876_v51 = vrot.slane %v17437_v13, 2  ;;  %v6747_v13 = vld [vmem:[#allocation4 + $0x7] sm:$0xff] }
 0x46c   : > { %12766 = vmatprep.mubr.msk.f32.mxu0 %vm484_vm0, %v17043_v61  ;;  %v19969_v61 = vld [vmem:[#allocation51_spill] sm:$0xff] }
 0x46f   : > { %12767 = vmatmul.mubr.msk.f32.gmra.mrb[16].mxu0 %vm484_vm0, %v17056_v12  ;;  %v19970_v12 = vld [vmem:[#allocation52_spill] sm:$0xff] }
 0x470   : > { %12769 = vmatprep.mubr.msk.f32.mxu0 %vm484_vm0, %v17060_v60  ;;  %v19971_v60 = vld [vmem:[#allocation54_spill] sm:$0xff] }
 0x473   : > { %12770 = vmatmul.mubr.msk.f32.gmra.mrb[18].mxu0 %vm484_vm0, %v17073_v59  ;;  %v19972_v59 = vld [vmem:[#allocation55_spill] sm:$0xff] }
 0x474   : > { %12772 = vmatprep.mubr.msk.f32.mxu0 %vm484_vm0, %v17077_v19  ;;  %v19973_v19 = vld [vmem:[#allocation57_spill] sm:$0xff] }
 0x477   : > { %12773 = vmatmul.mubr.msk.f32.gmra.mrb[20].mxu0 %vm484_vm0, %v17090_v32  ;;  %v19974_v32 = vld [vmem:[#allocation58_spill] sm:$0xff] }
 0x478   : > { %12775 = vmatprep.mubr.msk.f32.mxu0 %vm484_vm0, %v17094_v27  ;;  %v19975_v27 = vld [vmem:[#allocation60_spill] sm:$0xff] }
 0x47b   : > { %12776 = vmatmul.mubr.msk.f32.gmra.mrb[22].mxu0 %vm484_vm0, %v17107_v17  ;;  %v19976_v17 = vld [vmem:[#allocation61_spill] sm:$0xff] }
 0x47c   : > { %12778 = vmatprep.mubr.msk.f32.mxu0 %vm484_vm0, %v17111_v50  ;;  %v19977_v50 = vld [vmem:[#allocation63_spill] sm:$0xff] }
 0x47f   : > { %12779 = vmatmul.mubr.msk.f32.gmra.mrb[24].mxu0 %vm484_vm0, %v17124_v9  ;;  %v19978_v9 = vld [vmem:[#allocation64_spill] sm:$0xff] }
 0x480   : > { %12781 = vmatprep.mubr.msk.f32.mxu0 %vm484_vm0, %v17130_v38  ;;  %v5874_v38 = vsel %vm2355_vm3, %v5871_v28, %v5873_v26  ;;  %v19995_v28 = vld [vmem:[#allocation93_spill] sm:$0xff] }
 0x481   : > { %v19996_v26 = vld [vmem:[#allocation101_spill] sm:$0xff] }
 0x483   : > { %12782 = vmatmul.mubr.msk.f32.gmra.mrb[26].mxu0 %vm484_vm0, %v17141_v56  ;;  %v19979_v56 = vld [vmem:[#allocation66_spill] sm:$0xff] }
 0x484   : > { %12784 = vmatprep.mubr.msk.f32.mxu0 %vm484_vm0, %v17145_v44  ;;  %v19980_v44 = vld [vmem:[#allocation67_spill] sm:$0xff] }
 0x487   : > { %12785 = vmatmul.mubr.msk.f32.gmra.mrb[28].mxu0 %vm484_vm0, %v17156_v52  ;;  %v19981_v52 = vld [vmem:[#allocation69_spill] sm:$0xff] }
 0x488   : > { %12787 = vmatprep.mubr.msk.f32.mxu0 %vm484_vm0, %v5872_v23  ;;  %v5878_v23 = vrot.slane %v17638_v55, 2 }
 0x48b   : > { %12788 = vmatmul.mubr.msk.f32.gmra.mrb[30].mxu0 %vm484_vm0, %v5874_v38  ;;  %v5877_v38 = vsel %vm2355_vm3, %v5875_v2, %v5876_v51 }
 0x48c   : > { %12792 = vmatprep.mubr.msk.f32.mxu0 %vm484_vm0, %v19882_v49  ;;  %v19982_v49 = vld [vmem:[#allocation70_spill] sm:$0xff] }
 0x48f   : > { %12793 = vmatmul.mubr.msk.f32.vlgmr.msra.gmra.mrb[0].mxu0 %vm484_vm0, %v19969_v61  ;;  %v19997_v61 = vld [vmem:[#allocation102_spill] sm:$0xff] }
 0x490   : > { %12795 = vmatprep.mubr.msk.f32.mxu0 %vm484_vm0, %v19970_v12  ;;  %v5879_v12 = vsel %vm2355_vm3, %v5876_v51, %v5878_v23 }
 0x493   : > { %12796 = vmatmul.mubr.msk.f32.gmra.mrb[2].mxu0 %vm484_vm0, %v19971_v60  ;;  %v6748_v60 = vld [vmem:[#allocation4 + $0xf] sm:$0xff] }
 0x494   : > { %12798 = vmatprep.mubr.msk.f32.mxu0 %vm484_vm0, %v19972_v59  ;;  %v6850_v59 = vrot.slane %v6747_v13, 1  ;;  %v6851_v55 = vrot.slane %v6748_v60, 1 }
 0x497   : > { %12799 = vmatmul.mubr.msk.f32.gmra.mrb[4].mxu0 %vm484_vm0, %v19973_v19  ;;  %v6749_v19 = vld [vmem:[#allocation4 + $0x17] sm:$0x3] }
 0x498   : > { %12801 = vmatprep.mubr.msk.f32.mxu0 %vm484_vm0, %v19974_v32  ;;  %v6853_v32 = vrot.slane %v6749_v19, 1 }
 0x49b   : > { %12802 = vmatmul.mubr.msk.f32.gmra.mrb[6].mxu0 %vm484_vm0, %v19975_v27  ;;  %v6852_v27 = vsel %vm1526_vm4, %v6850_v59, %v6851_v55 }
 0x49c   : > { %12804 = vmatprep.mubr.msk.f32.mxu0 %vm484_vm0, %v19976_v17  ;;  %12842 = vmatprep.mubr.msk.f32.mxu1 %vm484_vm0, %v6852_v27  ;;  %v6854_v17 = vsel %vm1526_vm4, %v6851_v55, %v6853_v32 }
 0x49d   : > { %12843 = vmatmul.mubr.msk.f32.vlgmr.msra.gmra.mrb[32].mxu1 %vm484_vm0, %v6854_v17 }
 0x49f   : > { %12805 = vmatmul.mubr.msk.f32.gmra.mrb[8].mxu0 %vm484_vm0, %v19977_v50  ;;  %v6801_v50 = vld [vmem:[#allocation16] sm:$0xf] }
 0x4a0   : > { %12807 = vmatprep.mubr.msk.f32.mxu0 %vm484_vm0, %v19978_v9  ;;  %12890 = vmatprep.subr.msk.mxu1 %vm957_vm2, %v6801_v50  ;;  %v7597_v9 = vld [vmem:[#allocation16 + $0x8] sm:$0xf] }
 0x4a1   : > { %12891 = vmatpush3.msk.msra.mxu1 %vm957_vm2, %v6801_v50 }
 0x4a2   : > { %12940 = vmatprep.subr.msk.mxu1 %vm957_vm2, %v7597_v9 }
 0x4a3   : > { %12808 = vmatmul.mubr.msk.f32.gmra.mrb[10].mxu0 %vm484_vm0, %v19979_v56 }
 0x4a4   : > { %12810 = vmatprep.mubr.msk.f32.mxu0 %vm484_vm0, %v19980_v44  ;;  %v17796_v44 = vld [vmem:[#allocation13] ss:$0 sm:$0xff] }
 0x4a7   : > { %12811 = vmatmul.mubr.msk.f32.gmra.mrb[12].mxu0 %vm484_vm0, %v19981_v52  ;;  %v19998_v52 = vld [vmem:[#allocation28_spill] sm:$0xff] }
 0x4a8   : > { %12813 = vmatprep.mubr.msk.f32.mxu0 %vm484_vm0, %v19982_v49 }
 0x4ab   : > { %12814 = vmatmul.mubr.msk.f32.gmra.mrb[14].mxu0 %vm484_vm0, %v19983_v0 }
 0x4ac   : > { %12816 = vmatprep.mubr.msk.f32.mxu0 %vm484_vm0, %v19984_v1  ;;  %v17799_v1 = vld [vmem:[#allocation14] ss:$0 sm:$0xff] }
 0x4af   : > { %12817 = vmatmul.mubr.msk.f32.gmra.mrb[16].mxu0 %vm484_vm0, %v19985_v42  ;;  %v19999_v42 = vld [vmem:[#allocation29_spill] sm:$0xff] }
 0x4b0   : > { %12819 = vmatprep.mubr.msk.f32.mxu0 %vm484_vm0, %v19986_v48 }
 0x4b3   : > { %12820 = vmatmul.mubr.msk.f32.gmra.mrb[18].mxu0 %vm484_vm0, %v19987_v45 }
 0x4b4   : > { %12822 = vmatprep.mubr.msk.f32.mxu0 %vm484_vm0, %v19988_v30 }
 0x4b7   : > { %12823 = vmatmul.mubr.msk.f32.gmra.mrb[20].mxu0 %vm484_vm0, %v19989_v21 }
 0x4b8   : > { %12825 = vmatprep.mubr.msk.f32.mxu0 %vm484_vm0, %v19990_v22 }
 0x4bb   : > { %12826 = vmatmul.mubr.msk.f32.gmra.mrb[22].mxu0 %vm484_vm0, %v19991_v36 }
 0x4bc   : > { %12828 = vmatprep.mubr.msk.f32.mxu0 %vm484_vm0, %v19992_v24 }
 0x4bf   : > { %12829 = vmatmul.mubr.msk.f32.gmra.mrb[24].mxu0 %vm484_vm0, %v19993_v40 }
 0x4c0   : > { %12831 = vmatprep.mubr.msk.f32.mxu0 %vm484_vm0, %v19994_v7  ;;  %v20000_v7 = vld [vmem:[#allocation103_spill] sm:$0xff] }
 0x4c3   : > { %12832 = vmatmul.mubr.msk.f32.gmra.mrb[26].mxu0 %vm484_vm0, %v19995_v28 }
 0x4c4   : > { %12834 = vmatprep.mubr.msk.f32.mxu0 %vm484_vm0, %v19996_v26 }
 0x4c7   : > { %12835 = vmatmul.mubr.msk.f32.gmra.mrb[28].mxu0 %vm484_vm0, %v19997_v61 }
 0x4c8   : > { %12837 = vmatprep.mubr.msk.f32.mxu0 %vm484_vm0, %v5877_v38 }
 0x4cb   : > { %12838 = vmatmul.mubr.msk.f32.gmra.mrb[30].mxu0 %vm484_vm0, %v5879_v12 }
 0x562   : > { %v12794_v56 = vpop.f32.mrb[0].mxu0 }
 0x563   : > { %v13292_v49 = vadd.f32 %v12794_v56, %v19998_v52  ;;  %v6221_v0 = vpop.f32.mrb[1].mxu0 }
 0x564   : > { %v13293_v48 = vadd.f32 %v6221_v0, %v19999_v42 }
 0x565   : > { %v6420_v45 = vmul.f32 %v13292_v49, %v17796_v44 }
 0x566   : > { %v6419_v30 = vmul.f32 %v13293_v48, %v17796_v44  ;;  %v12797_v21 = vpop.f32.mrb[2].mxu0 }
 0x567   : > { %v17805_v22 = vadd.f32 %v17799_v1, %v6420_v45  ;;  %v13294_v36 = vadd.f32 %v12797_v21, %v17508_v54  ;;  %v6231_v24 = vpop.f32.mrb[3].mxu0 }
 0x568   : > { %v17809_v40 = vadd.f32 %v17799_v1, %v6419_v30  ;;  %v13295_v2 = vadd.f32 %v6231_v24, %v20000_v7 }
 0x569   : > { %v10679_v51 = vmul.f32 -1.442695, %v17805_v22  ;;  %v6422_v28 = vmul.f32 %v13294_v36, %v17796_v44 }
 0x56a   : > { %v10678_v26 = vmul.f32 -1.442695, %v17809_v40  ;;  %v6421_v23 = vmul.f32 %v13295_v2, %v17796_v44  ;;  %v12800_v38 = vpop.f32.mrb[4].mxu0 }
 0x56b   : > { %14221 = vpow2.f32 %v10679_v51  ;;  %v17817_v61 = vadd.f32 %v17799_v1, %v6422_v28  ;;  %v13296_v54 = vadd.f32 %v12800_v38, %v17518_v15  ;;  %v6241_v12 = vpop.f32.mrb[5].mxu0 }
 0x56c   : > { %14223 = vpow2.f32 %v10678_v26  ;;  %v17821_v25 = vadd.f32 %v17799_v1, %v6421_v23  ;;  %v13297_v13 = vadd.f32 %v6241_v12, %v17522_v10 }
 0x56d   : > { %v10681_v60 = vmul.f32 -1.442695, %v17817_v61  ;;  %v6424_v59 = vmul.f32 %v13296_v54, %v17796_v44 }
 0x56e   : > { %v10680_v55 = vmul.f32 -1.442695, %v17821_v25  ;;  %v6423_v19 = vmul.f32 %v13297_v13, %v17796_v44  ;;  %v12803_v32 = vpop.f32.mrb[6].mxu0 }
 0x56f   : > { %14225 = vpow2.f32 %v10681_v60  ;;  %v17829_v27 = vadd.f32 %v17799_v1, %v6424_v59  ;;  %v13298_v15 = vadd.f32 %v12803_v32, %v17525_v47  ;;  %v6251_v17 = vpop.f32.mrb[7].mxu0 }
 0x570   : > { %14227 = vpow2.f32 %v10680_v55  ;;  %v17833_v50 = vadd.f32 %v17799_v1, %v6423_v19  ;;  %v13299_v10 = vadd.f32 %v6251_v17, %v17529_v62 }
 0x571   : > { %v10683_v9 = vmul.f32 -1.442695, %v17829_v27  ;;  %v6426_v56 = vmul.f32 %v13298_v15, %v17796_v44 }
 0x572   : > { %v10682_v52 = vmul.f32 -1.442695, %v17833_v50  ;;  %v6425_v49 = vmul.f32 %v13299_v10, %v17796_v44  ;;  %v12806_v0 = vpop.f32.mrb[8].mxu0 }
 0x573   : > { %14229 = vpow2.f32 %v10683_v9  ;;  %v17841_v42 = vadd.f32 %v17799_v1, %v6426_v56  ;;  %v13300_v47 = vadd.f32 %v12806_v0, %v17535_v43  ;;  %v6261_v48 = vpop.f32.mrb[9].mxu0 }
 0x574   : > { %14231 = vpow2.f32 %v10682_v52  ;;  %v17845_v45 = vadd.f32 %v17799_v1, %v6425_v49  ;;  %v13301_v62 = vadd.f32 %v6261_v48, %v17540_v58 }
 0x575   : > { %v14222_v30 = vpop.eup %14221  ;;  %v10685_v21 = vmul.f32 -1.442695, %v17841_v42  ;;  %v6428_v36 = vmul.f32 %v13300_v47, %v17796_v44 }
 0x576   : > { %v14224_v24 = vpop.eup %14223  ;;  %v6587_v7 = vadd.f32 1.0, %v14222_v30  ;;  %v10684_v2 = vmul.f32 -1.442695, %v17845_v45  ;;  %v6427_v51 = vmul.f32 %v13301_v62, %v17796_v44  ;;  %v12809_v28 = vpop.f32.mrb[10].mxu0 }
 0x577   : > { %v6586_v43 = vadd.f32 1.0, %v14224_v24  ;;  %14233 = vpow2.f32 %v10685_v21  ;;  %v17853_v26 = vadd.f32 %v17799_v1, %v6428_v36  ;;  %v13302_v23 = vadd.f32 %v12809_v28, %v17546_v35  ;;  %v6271_v58 = vpop.f32.mrb[11].mxu0 }
 0x578   : > { %14235 = vrcp.f32 %v6587_v7  ;;  %v17857_v38 = vadd.f32 %v17799_v1, %v6427_v51  ;;  %v13303_v54 = vadd.f32 %v6271_v58, %v17550_v31 }
 0x579   : > { %v14226_v12 = vpop.eup %14225  ;;  %14237 = vrcp.f32 %v6586_v43  ;;  %v10687_v13 = vmul.f32 -1.442695, %v17853_v26  ;;  %v6430_v60 = vmul.f32 %v13302_v23, %v17796_v44 }
 0x57a   : > { %v14228_v59 = vpop.eup %14227  ;;  %v6589_v55 = vadd.f32 1.0, %v14226_v12  ;;  %14239 = vpow2.f32 %v10684_v2  ;;  %v10686_v19 = vmul.f32 -1.442695, %v17857_v38  ;;  %v6429_v35 = vmul.f32 %v13303_v54, %v17796_v44  ;;  %v12812_v32 = vpop.f32.mrb[12].mxu0 }
 0x57b   : > { %v6588_v15 = vadd.f32 1.0, %v14228_v59  ;;  %14241 = vpow2.f32 %v10687_v13  ;;  %v17865_v17 = vadd.f32 %v17799_v1, %v6430_v60  ;;  %v13304_v31 = vadd.f32 %v12812_v32, %v17554_v8  ;;  %v6281_v10 = vpop.f32.mrb[13].mxu0 }
 0x57c   : > { %14243 = vrcp.f32 %v6589_v55  ;;  %v17869_v9 = vadd.f32 %v17799_v1, %v6429_v35  ;;  %v13305_v56 = vadd.f32 %v6281_v10, %v17558_v11 }
 0x57d   : > { %v14230_v52 = vpop.eup %14229  ;;  %14245 = vrcp.f32 %v6588_v15  ;;  %v10689_v49 = vmul.f32 -1.442695, %v17865_v17  ;;  %v6432_v0 = vmul.f32 %v13304_v31, %v17796_v44 }
 0x57e   : > { %v14232_v47 = vpop.eup %14231  ;;  %v6591_v48 = vadd.f32 1.0, %v14230_v52  ;;  %14247 = vpow2.f32 %v10686_v19  ;;  %v10688_v62 = vmul.f32 -1.442695, %v17869_v9  ;;  %v6431_v8 = vmul.f32 %v13305_v56, %v17796_v44  ;;  %v12815_v30 = vpop.f32.mrb[14].mxu0 }
 0x57f   : > { %v6590_v21 = vadd.f32 1.0, %v14232_v47  ;;  %14249 = vpow2.f32 %v10689_v49  ;;  %v17877_v36 = vadd.f32 %v17799_v1, %v6432_v0  ;;  %v13306_v11 = vadd.f32 %v12815_v30, %v17562_v37  ;;  %v6291_v24 = vpop.f32.mrb[15].mxu0 }
 0x580   : > { %14251 = vrcp.f32 %v6591_v48  ;;  %v17881_v7 = vadd.f32 %v17799_v1, %v6431_v8  ;;  %v13307_v2 = vadd.f32 %v6291_v24, %v17566_v20 }
 0x581   : > { %v14234_v51 = vpop.eup %14233  ;;  %14253 = vrcp.f32 %v6590_v21  ;;  %v10691_v28 = vmul.f32 -1.442695, %v17877_v36  ;;  %v6434_v43 = vmul.f32 %v13306_v11, %v17796_v44 }
 0x582   : > { %v14236_v23 = vpop.eup %14235  ;;  %v6593_v58 = vadd.f32 1.0, %v14234_v51  ;;  %14255 = vpow2.f32 %v10688_v62  ;;  %v10690_v54 = vmul.f32 -1.442695, %v17881_v7  ;;  %v6433_v37 = vmul.f32 %v13307_v2, %v17796_v44  ;;  %v12818_v12 = vpop.f32.mrb[16].mxu0 }
 0x583   : > { %v14238_v13 = vpop.eup %14237  ;;  %v6683_v60 = vmul.f32 %v14236_v23, %v17805_v22  ;;  %14257 = vpow2.f32 %v10691_v28  ;;  %v17890_v20 = vadd.f32 %v17799_v1, %v6434_v43  ;;  %v13308_v59 = vadd.f32 %v12818_v12, %v17572_v14  ;;  %v6301_v55 = vpop.f32.mrb[17].mxu0 }
 0x584   : > { %v14240_v19 = vpop.eup %14239  ;;  %v6682_v35 = vmul.f32 %v14238_v13, %v17809_v40  ;;  %14259 = vrcp.f32 %v6593_v58  ;;  %v17895_v32 = vadd.f32 %v17799_v1, %v6433_v37  ;;  %v13309_v15 = vadd.f32 %v6301_v55, %v17574_v33 }
 0x585   : > { %v14242_v31 = vpop.eup %14241  ;;  %6716 = vst.msk [vmem:[#allocation4 + $0x30] sm:$0xff] %vm484_vm0, %v6683_v60  ;;  %v6592_v22 = vadd.f32 1.0, %v14240_v19  ;;  %14261 = vpow2.f32 %v10690_v54  ;;  %v10693_v10 = vmul.f32 -1.442695, %v17890_v20  ;;  %v6436_v56 = vmul.f32 %v13308_v59, %v17796_v44 }
 0x586   : > { %v14244_v14 = vpop.eup %14243  ;;  %6715 = vst.msk [vmem:[#allocation4 + $0x28] sm:$0xff] %vm484_vm0, %v6682_v35  ;;  %v6595_v52 = vadd.f32 1.0, %v14242_v31  ;;  %v10692_v40 = vmul.f32 -1.442695, %v17895_v32  ;;  %v6435_v49 = vmul.f32 %v13309_v15, %v17796_v44  ;;  %v12821_v0 = vpop.f32.mrb[18].mxu0 }
 0x587   : > { %v14246_v47 = vpop.eup %14245  ;;  %v6685_v33 = vmul.f32 %v14244_v14, %v17817_v61  ;;  %14263 = vrcp.f32 %v6592_v22  ;;  %v17906_v48 = vadd.f32 %v17799_v1, %v6436_v56  ;;  %v13310_v62 = vadd.f32 %v12821_v0, %v17580_v39  ;;  %v6311_v8 = vpop.f32.mrb[19].mxu0 }
 0x588   : > { %v14248_v30 = vpop.eup %14247  ;;  %v6684_v21 = vmul.f32 %v14246_v47, %v17821_v25  ;;  %14265 = vrcp.f32 %v6595_v52  ;;  %v17911_v11 = vadd.f32 %v17799_v1, %v6435_v49  ;;  %v13311_v24 = vadd.f32 %v6311_v8, %v17582_v57 }
 0x589   : > { %v14250_v2 = vpop.eup %14249  ;;  %6718 = vst.msk [vmem:[#allocation4 + $0x50] sm:$0xff] %vm484_vm0, %v6685_v33  ;;  %v6594_v61 = vadd.f32 1.0, %v14248_v30  ;;  %14267 = vpow2.f32 %v10693_v10  ;;  %v10695_v51 = vmul.f32 -1.442695, %v17906_v48  ;;  %v6438_v28 = vmul.f32 %v13310_v62, %v17796_v44 }
 0x58a   : > { %v14252_v39 = vpop.eup %14251  ;;  %6717 = vst.msk [vmem:[#allocation4 + $0x48] sm:$0xff] %vm484_vm0, %v6684_v21  ;;  %v6597_v43 = vadd.f32 1.0, %v14250_v2  ;;  %14269 = vpow2.f32 %v10692_v40  ;;  %v10694_v25 = vmul.f32 -1.442695, %v17911_v11  ;;  %v6437_v23 = vmul.f32 %v13311_v24, %v17796_v44  ;;  %v12824_v58 = vpop.f32.mrb[20].mxu0 }
 0x58b   : > { %v14254_v57 = vpop.eup %14253  ;;  %v6687_v54 = vmul.f32 %v14252_v39, %v17829_v27  ;;  %14271 = vrcp.f32 %v6594_v61  ;;  %v17922_v37 = vadd.f32 %v17799_v1, %v6438_v28  ;;  %v13312_v12 = vadd.f32 %v12824_v58, %v17588_v3  ;;  %v6321_v13 = vpop.f32.mrb[21].mxu0 }
 0x58c   : > { %v14256_v60 = vpop.eup %14255  ;;  %v6686_v59 = vmul.f32 %v14254_v57, %v17833_v50  ;;  %14273 = vrcp.f32 %v6597_v43  ;;  %v17927_v55 = vadd.f32 %v17799_v1, %v6437_v23  ;;  %v13313_v19 = vadd.f32 %v6321_v13, %v17590_v41 }
 0x58d   : > { %v14258_v35 = vpop.eup %14257  ;;  %6720 = vst.msk [vmem:[#allocation4 + $0x70] sm:$0xff] %vm484_vm0, %v6687_v54  ;;  %v6596_v27 = vadd.f32 1.0, %v14256_v60  ;;  %14275 = vpow2.f32 %v10695_v51  ;;  %v10697_v15 = vmul.f32 -1.442695, %v17922_v37  ;;  %v6440_v31 = vmul.f32 %v13312_v12, %v17796_v44  ;;  %v17936_v41 = vld [vmem:[#allocation4 + $0x27] sm:$0xff]  ;;  %v17947_v8 = vld [vmem:[#allocation4 + $0x2f] sm:$0xff] }
 0x58e   : > { %v14260_v3 = vpop.eup %14259  ;;  %6719 = vst.msk [vmem:[#allocation4 + $0x68] sm:$0xff] %vm484_vm0, %v6686_v59  ;;  %v6599_v22 = vadd.f32 1.0, %v14258_v35  ;;  %14277 = vpow2.f32 %v10694_v25  ;;  %v10696_v50 = vmul.f32 -1.442695, %v17927_v55  ;;  %v6439_v10 = vmul.f32 %v13313_v19, %v17796_v44  ;;  %v12827_v56 = vpop.f32.mrb[22].mxu0 }
 0x58f   : > { %v14262_v14 = vpop.eup %14261  ;;  %v6689_v52 = vmul.f32 %v14260_v3, %v17841_v42  ;;  %14279 = vrcp.f32 %v6596_v27  ;;  %v17940_v40 = vadd.f32 %v17799_v1, %v6440_v31  ;;  %v13314_v49 = vadd.f32 %v12827_v56, %v17596_v29  ;;  %v6331_v0 = vpop.f32.mrb[23].mxu0  ;;  %v17966_v12 = vld [vmem:[#allocation4 + $0x37] sm:$0x3] }
 0x590   : > { %14281 = vrcp.f32 %v6599_v22  ;;  %v6598_v47 = vadd.f32 1.0, %v14262_v14  ;;  %v17944_v33 = vadd.f32 %v17799_v1, %v6439_v10  ;;  %v13315_v62 = vadd.f32 %v6331_v0, %v17598_v18 }
 0x591   : > { %v14264_v30 = vpop.eup %14263  ;;  %6722 = vst.msk [vmem:[#allocation4 + $0x90] sm:$0xff] %vm484_vm0, %v6689_v52  ;;  %14283 = vpow2.f32 %v10697_v15  ;;  %v10699_v42 = vmul.f32 -1.442695, %v17940_v40  ;;  %v6442_v21 = vmul.f32 %v13314_v49, %v17796_v44  ;;  %v6855_v29 = vrot.slane %v17936_v41, 1  ;;  %v17973_v19 = vld [vmem:[#allocation4 + $0x47] sm:$0xff]  ;;  %v17983_v56 = vld [vmem:[#allocation4 + $0x4f] sm:$0xff] }
 0x592   : > { %v14266_v24 = vpop.eup %14265  ;;  %v6688_v2 = vmul.f32 %v14264_v30, %v17845_v45  ;;  %14285 = vrcp.f32 %v6598_v47  ;;  %v10698_v61 = vmul.f32 -1.442695, %v17944_v33  ;;  %v6441_v18 = vmul.f32 %v13315_v62, %v17796_v44  ;;  %v12830_v51 = vpop.f32.mrb[24].mxu0  ;;  %v17995_v30 = vld [vmem:[#allocation4 + $0x57] sm:$0x3] }
 0x593   : > { %v14268_v28 = vpop.eup %14267  ;;  %v6691_v39 = vmul.f32 %v14266_v24, %v17853_v26  ;;  %14287 = vpow2.f32 %v10696_v50  ;;  %v17958_v43 = vadd.f32 %v17799_v1, %v6442_v21  ;;  %v6856_v25 = vrot.slane %v17947_v8, 1  ;;  %v6341_v23 = vpop.f32.mrb[25].mxu0 }
 0x594   : > { %v14270_v58 = vpop.eup %14269  ;;  %6721 = vst.msk [vmem:[#allocation4 + $0x88] sm:$0xff] %vm484_vm0, %v6688_v2  ;;  %v6601_v45 = vadd.f32 1.0, %v14268_v28  ;;  %14289 = vpow2.f32 %v10699_v42  ;;  %v17963_v57 = vadd.f32 %v17799_v1, %v6441_v18  ;;  %v13316_v54 = vadd.f32 %v12830_v51, %v17604_v63 }
 0x595   : > { %v14272_v26 = vpop.eup %14271  ;;  %6724 = vst.msk [vmem:[#allocation4 + $0xb0] sm:$0xff] %vm484_vm0, %v6691_v39  ;;  %v6600_v13 = vadd.f32 1.0, %v14270_v58  ;;  %14291 = vpow2.f32 %v10698_v61  ;;  %v10701_v60 = vmul.f32 -1.442695, %v17958_v43  ;;  %v17971_v59 = vsel %vm1526_vm4, %v6855_v29, %v6856_v25  ;;  %v18007_v39 = vld [vmem:[#allocation4 + $0x67] sm:$0xff] }
 0x596   : > { %v14274_v35 = vpop.eup %14273  ;;  %v6690_v27 = vmul.f32 %v14272_v26, %v17857_v38  ;;  %14293 = vrcp.f32 %v6601_v45  ;;  %v10700_v63 = vmul.f32 -1.442695, %v17963_v57  ;;  %12845 = vmatprep.mubr.msk.f32.mxu1 %vm484_vm0, %v17971_v59  ;;  %v6444_v15 = vmul.f32 %v13316_v54, %v17796_v44  ;;  %v12833_v31 = vpop.f32.mrb[26].mxu0 }
 0x597   : > { %v14276_v3 = vpop.eup %14275  ;;  %v6693_v22 = vmul.f32 %v14274_v35, %v17865_v17  ;;  %14295 = vrcp.f32 %v6600_v13  ;;  %v6858_v50 = vrot.slane %v17966_v12, 1  ;;  %v13317_v10 = vadd.f32 %v6341_v23, %v17606_v34  ;;  %v6351_v38 = vpop.f32.mrb[27].mxu0 }
 0x598   : > { %v14278_v14 = vpop.eup %14277  ;;  %6723 = vst.msk [vmem:[#allocation4 + $0xa8] sm:$0xff] %vm484_vm0, %v6690_v27  ;;  %v6603_v52 = vadd.f32 1.0, %v14276_v3  ;;  %14297 = vpow2.f32 %v10701_v60  ;;  %v17987_v49 = vadd.f32 %v17799_v1, %v6444_v15  ;;  %v6860_v0 = vrot.slane %v17973_v19, 1  ;;  %v18021_v60 = vld [vmem:[#allocation4 + $0x6f] sm:$0xff] }
 0x599   : > { %v14280_v47 = vpop.eup %14279  ;;  %6726 = vst.msk [vmem:[#allocation4 + $0xd0] sm:$0xff] %vm484_vm0, %v6693_v22  ;;  %v6602_v17 = vadd.f32 1.0, %v14278_v14  ;;  %14299 = vpow2.f32 %v10700_v63  ;;  %v17992_v34 = vsel %vm1526_vm4, %v6856_v25, %v6858_v50  ;;  %v6443_v62 = vmul.f32 %v13317_v10, %v17796_v44 }
 0x59a   : > { %v14282_v42 = vpop.eup %14281  ;;  %v6692_v21 = vmul.f32 %v14280_v47, %v17869_v9  ;;  %14301 = vrcp.f32 %v6603_v52  ;;  %v10703_v29 = vmul.f32 -1.442695, %v17987_v49  ;;  %12846 = vmatmul.mubr.msk.f32.gmra.mrb[34].mxu1 %vm484_vm0, %v17992_v34  ;;  %v6861_v24 = vrot.slane %v17983_v56, 1  ;;  %v12836_v2 = vpop.f32.mrb[28].mxu0 }
 0x59b   : > { %v14284_v61 = vpop.eup %14283  ;;  %v6695_v18 = vmul.f32 %v14282_v42, %v17877_v36  ;;  %14303 = vrcp.f32 %v6602_v17  ;;  %v18004_v51 = vadd.f32 %v17799_v1, %v6443_v62  ;;  %v13318_v28 = vadd.f32 %v12833_v31, %v17612_v16  ;;  %v6361_v9 = vpop.f32.mrb[29].mxu0 }
 0x59c   : > { %v14286_v25 = vpop.eup %14285  ;;  %6725 = vst.msk [vmem:[#allocation4 + $0xc8] sm:$0xff] %vm484_vm0, %v6692_v21  ;;  %v6605_v23 = vadd.f32 1.0, %v14284_v61  ;;  %14305 = vpow2.f32 %v10703_v29  ;;  %v18011_v58 = vsel %vm1526_vm4, %v6860_v0, %v6861_v24  ;;  %v6863_v45 = vrot.slane %v17995_v30, 1  ;;  %v18036_v0 = vld [vmem:[#allocation4 + $0x77] sm:$0x3]  ;;  %v18043_v21 = vld [vmem:[#allocation4 + $0x87] sm:$0xff] }
 0x59d   : > { %v14288_v36 = vpop.eup %14287  ;;  %6728 = vst.msk [vmem:[#allocation4 + $0xf0] sm:$0xff] %vm484_vm0, %v6695_v18  ;;  %v6694_v54 = vmul.f32 %v14286_v25, %v17881_v7  ;;  %v10702_v16 = vmul.f32 -1.442695, %v18004_v51  ;;  %12848 = vmatprep.mubr.msk.f32.mxu1 %vm484_vm0, %v18011_v58  ;;  %v6446_v26 = vmul.f32 %v13318_v28, %v17796_v44  ;;  %v13319_v13 = vadd.f32 %v6351_v38, %v17614_v53 }
 0x59e   : > { %v14290_v35 = vpop.eup %14289  ;;  %14307 = vrcp.f32 %v6605_v23  ;;  %v6604_v27 = vadd.f32 1.0, %v14288_v36  ;;  %v18024_v63 = vsel %vm1526_vm4, %v6861_v24, %v6863_v45  ;;  %v6865_v15 = vrot.slane %v18007_v39, 1  ;;  %v12839_v7 = vpop.f32.mrb[30].mxu0 }
 0x59f   : > { %v14292_v31 = vpop.eup %14291  ;;  %6727 = vst.msk [vmem:[#allocation4 + $0xe8] sm:$0xff] %vm484_vm0, %v6694_v54  ;;  %v6607_v3 = vadd.f32 1.0, %v14290_v35  ;;  %14309 = vpow2.f32 %v10702_v16  ;;  %v18029_v22 = vadd.f32 %v17799_v1, %v6446_v26  ;;  %12849 = vmatmul.mubr.msk.f32.gmra.mrb[36].mxu1 %vm484_vm0, %v18024_v63  ;;  %v6445_v53 = vmul.f32 %v13319_v13, %v17796_v44  ;;  %v6371_v50 = vpop.f32.mrb[31].mxu0 }
 0x5a0   : > { %v14294_v10 = vpop.eup %14293  ;;  %14311 = vrcp.f32 %v6604_v27  ;;  %v6606_v38 = vadd.f32 1.0, %v14292_v31  ;;  %v6866_v14 = vrot.slane %v18021_v60, 1  ;;  %v13320_v52 = vadd.f32 %v12836_v2, %v17620_v46  ;;  %v18050_v2 = vld [vmem:[#allocation4 + $0x8f] sm:$0xff]  ;;  %v18068_v27 = vld [vmem:[#allocation4 + $0x97] sm:$0x3] }
 0x5a1   : > { %v14296_v47 = vpop.eup %14295  ;;  %v6697_v17 = vmul.f32 %v14294_v10, %v17890_v20  ;;  %14313 = vrcp.f32 %v6607_v3  ;;  %v10705_v62 = vmul.f32 -1.442695, %v18029_v22  ;;  %v18041_v42 = vadd.f32 %v17799_v1, %v6445_v53 }
 0x5a2   : > { %v14298_v29 = vpop.eup %14297  ;;  %v6696_v24 = vmul.f32 %v14296_v47, %v17895_v32  ;;  %14315 = vrcp.f32 %v6606_v38  ;;  %v18047_v61 = vsel %vm1526_vm4, %v6865_v15, %v6866_v14  ;;  %v6448_v46 = vmul.f32 %v13320_v52, %v17796_v44  ;;  %v18090_v47 = vld [vmem:[#allocation4 + $0xaf] sm:$0xff] }
 0x5a3   : > { %v14300_v20 = vpop.eup %14299  ;;  %6730 = vst.msk [vmem:[#allocation4 + $0x110] sm:$0xff] %vm484_vm0, %v6697_v17  ;;  %v6609_v18 = vadd.f32 1.0, %v14298_v29  ;;  %14317 = vpow2.f32 %v10705_v62  ;;  %v10704_v28 = vmul.f32 -1.442695, %v18041_v42  ;;  %12851 = vmatprep.mubr.msk.f32.mxu1 %vm484_vm0, %v18047_v61  ;;  %v6868_v32 = vrot.slane %v18036_v0, 1 }
 0x5a4   : > { %v14302_v25 = vpop.eup %14301  ;;  %6729 = vst.msk [vmem:[#allocation4 + $0x108] sm:$0xff] %vm484_vm0, %v6696_v24  ;;  %v6608_v23 = vadd.f32 1.0, %v14300_v20  ;;  %v18059_v45 = vadd.f32 %v17799_v1, %v6448_v46  ;;  %v13321_v36 = vadd.f32 %v6361_v9, %v17622_v6  ;;  %v6870_v54 = vrot.slane %v18043_v21, 1  ;;  %v18092_v17 = vld [vmem:[#allocation4 + $0xb7] sm:$0x3]  ;;  %v18097_v24 = vld [vmem:[#allocation4 + $0xc7] sm:$0xff] }
 0x5a5   : > { %v14304_v16 = vpop.eup %14303  ;;  %v6699_v26 = vmul.f32 %v14302_v25, %v17906_v48  ;;  %14319 = vrcp.f32 %v6609_v18  ;;  %v18065_v13 = vsel %vm1526_vm4, %v6866_v14, %v6868_v32  ;;  %v6871_v35 = vrot.slane %v18050_v2, 1  ;;  %v18075_v48 = vld [vmem:[#allocation4 + $0xa7] sm:$0xff] }
 0x5a6   : > { %v14306_v15 = vpop.eup %14305  ;;  %v6698_v31 = vmul.f32 %v14304_v16, %v17911_v11  ;;  %14321 = vrcp.f32 %v6608_v23  ;;  %v10707_v3 = vmul.f32 -1.442695, %v18059_v45  ;;  %12852 = vmatmul.mubr.msk.f32.gmra.mrb[38].mxu1 %vm484_vm0, %v18065_v13  ;;  %v6447_v6 = vmul.f32 %v13321_v36, %v17796_v44  ;;  %v18113_v36 = vld [vmem:[#allocation4 + $0xcf] sm:$0xff] }
 0x5a7   : > { %6732 = vst.msk [vmem:[#allocation4 + $0x130] sm:$0xff] %vm484_vm0, %v6699_v26  ;;  %v6611_v9 = vadd.f32 1.0, %v14306_v15  ;;  %14323 = vpow2.f32 %v10704_v28  ;;  %v18079_v53 = vsel %vm1526_vm4, %v6870_v54, %v6871_v35  ;;  %v13322_v10 = vadd.f32 %v12839_v7, %v17628_v4  ;;  %v18120_v26 = vld [vmem:[#allocation4 + $0xd7] sm:$0x3]  ;;  %v18124_v15 = vld [vmem:[#allocation4 + $0xef] sm:$0xff] }
 0x5a8   : > { %v14308_v11 = vpop.eup %14307  ;;  %6731 = vst.msk [vmem:[#allocation4 + $0x128] sm:$0xff] %vm484_vm0, %v6698_v31  ;;  %14325 = vpow2.f32 %v10707_v3  ;;  %v18084_v38 = vadd.f32 %v17799_v1, %v6447_v6  ;;  %12854 = vmatprep.mubr.msk.f32.mxu1 %vm484_vm0, %v18079_v53  ;;  %v6873_v14 = vrot.slane %v18068_v27, 1  ;;  %v13323_v52 = vadd.f32 %v6371_v50, %v17630_v5 }
 0x5a9   : > { %v14310_v62 = vpop.eup %14309  ;;  %v6701_v4 = vmul.f32 %v14308_v11, %v17922_v37  ;;  %14327 = vrcp.f32 %v6611_v9  ;;  %v6450_v7 = vmul.f32 %v13322_v10, %v17796_v44  ;;  %v6875_v29 = vrot.slane %v18075_v48, 1 }
 0x5aa   : > { %v14312_v46 = vpop.eup %14311  ;;  %v6610_v20 = vadd.f32 1.0, %v14310_v62  ;;  %v10706_v18 = vmul.f32 -1.442695, %v18084_v38  ;;  %v18101_v5 = vsel %vm1526_vm4, %v6871_v35, %v6873_v14  ;;  %v6449_v50 = vmul.f32 %v13323_v52, %v17796_v44  ;;  %v18122_v35 = vld [vmem:[#allocation4 + $0xe7] sm:$0xff] }
 0x5ab   : > { %20001 = vst [vmem:[#allocation107_spill] sm:$0xff] %v18101_v5  ;;  %v14314_v28 = vpop.eup %14313  ;;  %6734 = vst.msk [vmem:[#allocation4 + $0x150] sm:$0xff] %vm484_vm0, %v6701_v4  ;;  %v6700_v37 = vmul.f32 %v14312_v46, %v17927_v55  ;;  %v18107_v32 = vadd.f32 %v17799_v1, %v6450_v7  ;;  %12855 = vmatmul.mubr.msk.f32.gmra.mrb[40].mxu1 %vm484_vm0, %v18101_v5  ;;  %v6876_v25 = vrot.slane %v18090_v47, 1  ;;  %v6878_v23 = vrot.slane %v18092_v17, 1  ;;  %v18148_v7 = vld [vmem:[#allocation4 + $0x107] sm:$0xff] }
 0x5ac   : > { %v14316_v54 = vpop.eup %14315  ;;  %v6703_v44 = vmul.f32 %v14314_v28, %v17940_v40  ;;  %14329 = vrcp.f32 %v6610_v20  ;;  %v18117_v16 = vadd.f32 %v17799_v1, %v6449_v50  ;;  %v6880_v55 = vrot.slane %v18097_v24, 1  ;;  %v18132_v1 = vld [vmem:[#allocation4 + $0xf7] sm:$0x3] }
 0x5ad   : > { %v14318_v31 = vpop.eup %14317  ;;  %6733 = vst.msk [vmem:[#allocation4 + $0x148] sm:$0xff] %vm484_vm0, %v6700_v37  ;;  %v6702_v3 = vmul.f32 %v14316_v54, %v17944_v33  ;;  %14331 = vpow2.f32 %v10706_v18  ;;  %v10709_v40 = vmul.f32 -1.442695, %v18107_v32  ;;  %v18130_v6 = vsel %vm1526_vm4, %v6875_v29, %v6876_v25  ;;  %v18150_v29 = vld [vmem:[#allocation4 + $0x10f] sm:$0xff] }
 0x5ae   : > { %20002 = vst [vmem:[#allocation110_spill] sm:$0xff] %v18130_v6  ;;  %6736 = vst.msk [vmem:[#allocation4 + $0x170] sm:$0xff] %vm484_vm0, %v6703_v44  ;;  %v6613_v9 = vadd.f32 1.0, %v14318_v31  ;;  %v10708_v10 = vmul.f32 -1.442695, %v18117_v16  ;;  %12857 = vmatprep.mubr.msk.f32.mxu1 %vm484_vm0, %v18130_v6  ;;  %v18139_v11 = vsel %vm1526_vm4, %v6876_v25, %v6878_v23  ;;  %v6881_v33 = vrot.slane %v18113_v36, 1 }
 0x5af   : > { %20003 = vst [vmem:[#allocation113_spill] sm:$0xff] %v18139_v11  ;;  %v14320_v14 = vpop.eup %14319  ;;  %6735 = vst.msk [vmem:[#allocation4 + $0x168] sm:$0xff] %vm484_vm0, %v6702_v3  ;;  %14333 = vpow2.f32 %v10709_v40  ;;  %12858 = vmatmul.mubr.msk.f32.gmra.mrb[42].mxu1 %vm484_vm0, %v18139_v11  ;;  %v6883_v52 = vrot.slane %v18120_v26, 1  ;;  %v6885_v62 = vrot.slane %v18122_v35, 1  ;;  %v6886_v4 = vrot.slane %v18124_v15, 1  ;;  %v18171_v31 = vld [vmem:[#allocation4 + $0x127] sm:$0xff] }
 0x5b0   : > { %v14322_v46 = vpop.eup %14321  ;;  %v6705_v20 = vmul.f32 %v14320_v14, %v17958_v43  ;;  %14335 = vrcp.f32 %v6613_v9  ;;  %v18154_v18 = vsel %vm1526_vm4, %v6880_v55, %v6881_v33  ;;  %v6888_v50 = vrot.slane %v18132_v1, 1  ;;  %v18166_v43 = vld [vmem:[#allocation4 + $0x117] sm:$0x3]  ;;  %v18173_v3 = vld [vmem:[#allocation4 + $0x12f] sm:$0xff]  ;;  %v18411_v6 = vld [vmem:[#allocation16 + $0x10] sm:$0xf] }
 0x5b1   : > { %20004 = vst [vmem:[#allocation116_spill] sm:$0xff] %v18154_v18  ;;  %v14324_v28 = vpop.eup %14323  ;;  %v6704_v37 = vmul.f32 %v14322_v46, %v17963_v57  ;;  %14337 = vpow2.f32 %v10708_v10  ;;  %12860 = vmatprep.mubr.msk.f32.mxu1 %vm484_vm0, %v18154_v18  ;;  %v18161_v25 = vsel %vm1526_vm4, %v6881_v33, %v6883_v52  ;;  %v18164_v23 = vsel %vm1526_vm4, %v6885_v62, %v6886_v4 }
 0x5b2   : > { %20005 = vst [vmem:[#allocation94_spill] sm:$0xff] %v18161_v25  ;;  %20006 = vst [vmem:[#allocation96_spill] sm:$0xff] %v18164_v23  ;;  %v14326_v54 = vpop.eup %14325  ;;  %v6612_v44 = vadd.f32 1.0, %v14324_v28  ;;  %v6890_v55 = vrot.slane %v18148_v7, 1  ;;  %v6891_v57 = vrot.slane %v18150_v29, 1  ;;  %v18182_v33 = vsel %vm1526_vm4, %v6886_v4, %v6888_v50 }
 0x5b3   : > { %6738 = vst.msk [vmem:[#allocation4 + $0x190] sm:$0xff] %vm484_vm0, %v6705_v20  ;;  %v14328_v40 = vpop.eup %14327  ;;  %6737 = vst.msk [vmem:[#allocation4 + $0x188] sm:$0xff] %vm484_vm0, %v6704_v37  ;;  %v6615_v9 = vadd.f32 1.0, %v14326_v54  ;;  %12861 = vmatmul.mubr.msk.f32.gmra.mrb[44].mxu1 %vm484_vm0, %v18161_v25  ;;  %v6893_v14 = vrot.slane %v18166_v43, 1  ;;  %v6895_v62 = vrot.slane %v18171_v31, 1  ;;  %v6896_v46 = vrot.slane %v18173_v3, 1 }
 0x5b4   : > { %v6707_v10 = vmul.f32 %v14328_v40, %v17987_v49  ;;  %14339 = vrcp.f32 %v6612_v44  ;;  %12863 = vmatprep.mubr.msk.f32.mxu1 %vm484_vm0, %v18164_v23  ;;  %20007 = vst [vmem:[#allocation97_spill] sm:$0xff] %v18182_v33  ;;  %v18186_v52 = vsel %vm1526_vm4, %v6890_v55, %v6891_v57  ;;  %v18190_v20 = vld [vmem:[#allocation4 + $0x137] sm:$0x3]  ;;  %v18193_v28 = vld [vmem:[#allocation4 + $0x147] sm:$0xff]  ;;  %v18195_v37 = vld [vmem:[#allocation4 + $0x14f] sm:$0xff]  ;;  %v7527_v5 = vrot.slane %v17983_v56, 2 }
 0x5b5   : > { %14341 = vrcp.f32 %v6615_v9  ;;  %20008 = vst [vmem:[#allocation123_spill] sm:$0xff] %v18186_v52  ;;  %v18203_v44 = vsel %vm1526_vm4, %v6891_v57, %v6893_v14  ;;  %v6898_v55 = vrot.slane %v18190_v20, 1  ;;  %v18208_v9 = vsel %vm1526_vm4, %v6895_v62, %v6896_v46 }
 0x5b6   : > { %v14330_v49 = vpop.eup %14329  ;;  %6740 = vst.msk [vmem:[#allocation4 + $0x1b0] sm:$0xff] %vm484_vm0, %v6707_v10  ;;  %20009 = vst [vmem:[#allocation99_spill] sm:$0xff] %v18203_v44  ;;  %v6901_v10 = vrot.slane %v18195_v37, 1  ;;  %v18216_v57 = vld [vmem:[#allocation4 + $0x16f] sm:$0xff] }
 0x5b7   : > { %v14332_v4 = vpop.eup %14331  ;;  %v6706_v50 = vmul.f32 %v14330_v49, %v18004_v51  ;;  %12864 = vmatmul.mubr.msk.f32.gmra.mrb[46].mxu1 %vm484_vm0, %v18182_v33  ;;  %20010 = vst [vmem:[#allocation100_spill] sm:$0xff] %v18208_v9  ;;  %v6900_v51 = vrot.slane %v18193_v28, 1  ;;  %v18212_v49 = vld [vmem:[#allocation4 + $0x157] sm:$0x3]  ;;  %v18214_v33 = vld [vmem:[#allocation4 + $0x167] sm:$0xff] }
 0x5b8   : > { %v6614_v54 = vadd.f32 1.0, %v14332_v4  ;;  %12866 = vmatprep.mubr.msk.f32.mxu1 %vm484_vm0, %v18186_v52 }
 0x5b9   : > { %v14334_v40 = vpop.eup %14333  ;;  %6739 = vst.msk [vmem:[#allocation4 + $0x1a8] sm:$0xff] %vm484_vm0, %v6706_v50  ;;  %v18224_v50 = vsel %vm1526_vm4, %v6896_v46, %v6898_v55 }
 0x5ba   : > { %v14336_v4 = vpop.eup %14335  ;;  %14343 = vrcp.f32 %v6614_v54  ;;  %v6617_v52 = vadd.f32 1.0, %v14334_v40  ;;  %20011 = vst [vmem:[#allocation126_spill] sm:$0xff] %v18224_v50  ;;  %v6903_v54 = vrot.slane %v18212_v49, 1  ;;  %v18229_v40 = vsel %vm1526_vm4, %v6900_v51, %v6901_v10 }
 0x5bb   : > { %v14338_v14 = vpop.eup %14337  ;;  %v6709_v23 = vmul.f32 %v14336_v4, %v18029_v22  ;;  %12867 = vmatmul.mubr.msk.f32.gmra.mrb[48].mxu1 %vm484_vm0, %v18203_v44  ;;  %20012 = vst [vmem:[#allocation78_spill] sm:$0xff] %v18229_v40  ;;  %v6905_v22 = vrot.slane %v18214_v33, 1  ;;  %v6906_v4 = vrot.slane %v18216_v57, 1  ;;  %v18233_v44 = vld [vmem:[#allocation4 + $0x177] sm:$0x3] }
 0x5bc   : > { %14345 = vrcp.f32 %v6617_v52  ;;  %v6616_v62 = vadd.f32 1.0, %v14338_v14  ;;  %12869 = vmatprep.mubr.msk.f32.mxu1 %vm484_vm0, %v18208_v9  ;;  %v18235_v14 = vld [vmem:[#allocation4 + $0x187] sm:$0xff]  ;;  %v18237_v9 = vld [vmem:[#allocation4 + $0x18f] sm:$0xff]  ;;  %v18246_v51 = vsel %vm1526_vm4, %v6901_v10, %v6903_v54 }
 0x5bd   : > { %6742 = vst.msk [vmem:[#allocation4 + $0x1d0] sm:$0xff] %vm484_vm0, %v6709_v23  ;;  %20013 = vst [vmem:[#allocation47_spill] sm:$0xff] %v18246_v51  ;;  %v18251_v25 = vsel %vm1526_vm4, %v6905_v22, %v6906_v4  ;;  %v18276_v11 = vld [vmem:[#allocation4 + $0x1b7] sm:$0x3] }
 0x5be   : > { %v14340_v52 = vpop.eup %14339  ;;  %14347 = vrcp.f32 %v6616_v62  ;;  %v6908_v62 = vrot.slane %v18233_v44, 1  ;;  %20014 = vst [vmem:[#allocation49_spill] sm:$0xff] %v18251_v25 }
 0x5bf   : > { %v14342_v46 = vpop.eup %14341  ;;  %v6708_v55 = vmul.f32 %v14340_v52, %v18041_v42  ;;  %12870 = vmatmul.mubr.msk.f32.gmra.mrb[50].mxu1 %vm484_vm0, %v18224_v50  ;;  %v6910_v42 = vrot.slane %v18235_v14, 1  ;;  %v6911_v52 = vrot.slane %v18237_v9, 1  ;;  %v18255_v50 = vld [vmem:[#allocation4 + $0x197] sm:$0x3] }
 0x5c0   : > { %v6711_v23 = vmul.f32 %v14342_v46, %v18059_v45  ;;  %12872 = vmatprep.mubr.msk.f32.mxu1 %vm484_vm0, %v18229_v40  ;;  %v18258_v45 = vld [vmem:[#allocation4 + $0x1a7] sm:$0xff]  ;;  %v18260_v46 = vld [vmem:[#allocation4 + $0x1af] sm:$0xff]  ;;  %v18267_v54 = vsel %vm1526_vm4, %v6906_v4, %v6908_v62  ;;  %v6913_v22 = vrot.slane %v18255_v50, 1  ;;  %v6918_v62 = vrot.slane %v18276_v11, 1 }
 0x5c1   : > { %6741 = vst.msk [vmem:[#allocation4 + $0x1c8] sm:$0xff] %vm484_vm0, %v6708_v55  ;;  %20015 = vst [vmem:[#allocation50_spill] sm:$0xff] %v18267_v54  ;;  %v6915_v40 = vrot.slane %v18258_v45, 1  ;;  %v6916_v18 = vrot.slane %v18260_v46, 1 }
 0x5c2   : > { %6744 = vst.msk [vmem:[#allocation4 + $0x1f0] sm:$0xff] %vm484_vm0, %v6711_v23  ;;  %v18272_v23 = vsel %vm1526_vm4, %v6910_v42, %v6911_v52 }
 0x5c3   : > { %12873 = vmatmul.mubr.msk.f32.gmra.mrb[52].mxu1 %vm484_vm0, %v18246_v51  ;;  %20016 = vst [vmem:[#allocation71_spill] sm:$0xff] %v18272_v23 }
 0x5c4   : > { %v14344_v10 = vpop.eup %14343  ;;  %12875 = vmatprep.mubr.msk.f32.mxu1 %vm484_vm0, %v18251_v25 }
 0x5c5   : > { %v6710_v55 = vmul.f32 %v14344_v10, %v18084_v38  ;;  %v18285_v38 = vsel %vm1526_vm4, %v6911_v52, %v6913_v22 }
 0x5c6   : > { %v14346_v51 = vpop.eup %14345  ;;  %20017 = vst [vmem:[#allocation74_spill] sm:$0xff] %v18285_v38 }
 0x5c7   : > { %6743 = vst.msk [vmem:[#allocation4 + $0x1e8] sm:$0xff] %vm484_vm0, %v6710_v55  ;;  %v6713_v25 = vmul.f32 %v14346_v51, %v18107_v32  ;;  %12876 = vmatmul.mubr.msk.f32.gmra.mrb[54].mxu1 %vm484_vm0, %v18267_v54  ;;  %v18295_v51 = vsel %vm1526_vm4, %v6915_v40, %v6916_v18  ;;  %v18299_v54 = vld [vmem:[#allocation4 + $0x1d7] sm:$0x3] }
 0x5c8   : > { %v14348_v4 = vpop.eup %14347  ;;  %12878 = vmatprep.mubr.msk.f32.mxu1 %vm484_vm0, %v18272_v23  ;;  %v18288_v42 = vld [vmem:[#allocation4 + $0x1c7] sm:$0xff]  ;;  %v18290_v10 = vld [vmem:[#allocation4 + $0x1cf] sm:$0xff]  ;;  %20018 = vst [vmem:[#allocation77_spill] sm:$0xff] %v18295_v51 }
 0x5c9   : > { %6746 = vst.msk [vmem:[#allocation4 + $0x210] sm:$0xff] %vm484_vm0, %v6713_v25  ;;  %v6712_v32 = vmul.f32 %v14348_v4, %v18117_v16  ;;  %v6920_v55 = vrot.slane %v18288_v42, 1  ;;  %v6921_v23 = vrot.slane %v18290_v10, 1  ;;  %v18307_v25 = vsel %vm1526_vm4, %v6916_v18, %v6918_v62  ;;  %v18313_v52 = vld [vmem:[#allocation4 + $0x1f7] sm:$0x3] }
 0x5ca   : > { %20019 = vst [vmem:[#allocation81_spill] sm:$0xff] %v18307_v25  ;;  %v6923_v16 = vrot.slane %v18299_v54, 1  ;;  %v6928_v62 = vrot.slane %v18313_v52, 1 }
 0x5cb   : > { %6745 = vst.msk [vmem:[#allocation4 + $0x208] sm:$0xff] %vm484_vm0, %v6712_v32  ;;  %12879 = vmatmul.mubr.msk.f32.gmra.mrb[56].mxu1 %vm484_vm0, %v18285_v38  ;;  %v18311_v40 = vsel %vm1526_vm4, %v6920_v55, %v6921_v23  ;;  %v7522_v38 = vrot.slane %v17947_v8, 2 }
 0x5cc   : > { %12881 = vmatprep.mubr.msk.f32.mxu1 %vm484_vm0, %v18295_v51  ;;  %20020 = vst [vmem:[#allocation87_spill] sm:$0xff] %v18311_v40  ;;  %v18326_v18 = vsel %vm1526_vm4, %v6921_v23, %v6923_v16  ;;  %v7923_v23 = vld [vmem:[#allocation16 + $0xc] sm:$0xf]  ;;  %v14547_v16 = vld [vmem:[#allocation4 + $0xf] sm:$0xff] }
 0x5cd   : > { %20021 = vst [vmem:[#allocation45_spill] sm:$0xff] %v18326_v18 }
 0x5ce   : > { %v18315_v22 = vld [vmem:[#allocation4 + $0x1e7] sm:$0xff]  ;;  %v18317_v4 = vld [vmem:[#allocation4 + $0x1ef] sm:$0xff] }
 0x5cf   : > { %12882 = vmatmul.mubr.msk.f32.gmra.mrb[58].mxu1 %vm484_vm0, %v18307_v25  ;;  %v6925_v32 = vrot.slane %v18315_v22, 1  ;;  %v6926_v51 = vrot.slane %v18317_v4, 1 }
 0x5d0   : > { %12884 = vmatprep.mubr.msk.f32.mxu1 %vm484_vm0, %v18311_v40  ;;  %v14546_v40 = vld [vmem:[#allocation4 + $0x7] sm:$0xff] }
 0x5d1   : > { %v18330_v55 = vsel %vm1526_vm4, %v6925_v32, %v6926_v51  ;;  %v18337_v25 = vsel %vm1526_vm4, %v6926_v51, %v6928_v62  ;;  %v14548_v32 = vld [vmem:[#allocation16 + $0x8] sm:$0xf]  ;;  %v7516_v51 = vrot.slane %v14546_v40, 2  ;;  %v7517_v62 = vrot.slane %v14547_v16, 2 }
 0x5d2   : > { %20022 = vst [vmem:[#allocation46_spill] sm:$0xff] %v18330_v55  ;;  %20023 = vst [vmem:[#allocation48_spill] sm:$0xff] %v18337_v25 }
 0x5d3   : > { %12885 = vmatmul.mubr.msk.f32.gmra.mrb[60].mxu1 %vm484_vm0, %v18326_v18  ;;  %v7521_v18 = vrot.slane %v17936_v41, 2 }
 0x5d4   : > { %12887 = vmatprep.mubr.msk.f32.mxu1 %vm484_vm0, %v18330_v55  ;;  %v7518_v55 = vsel %vm2355_vm3, %v7516_v51, %v7517_v62  ;;  %v7526_v51 = vrot.slane %v17973_v19, 2 }
 0x5d7   : > { %12888 = vmatmul.mubr.msk.f32.gmra.mrb[62].mxu1 %vm484_vm0, %v18337_v25 }
 0x5d8   : > { %12892 = vmatprep.mubr.msk.f32.mxu1 %vm484_vm0, %v14546_v40 }
 0x5db   : > { %12893 = vmatmul.mubr.msk.f32.vlgmr.msra.gmra.mrb[32].mxu1 %vm484_vm0, %v14547_v16  ;;  %v7524_v16 = vrot.slane %v17966_v12, 2 }
 0x5dc   : > { %12941 = vmatpush3.msk.msra.mxu1 %vm957_vm2, %v14548_v32  ;;  %12895 = vmatprep.mubr.msk.f32.mxu1 %vm484_vm0, %v17936_v41  ;;  %v14549_v32 = vld [vmem:[#allocation4 + $0x17] sm:$0x3] }
 0x5dd   : > { %12990 = vmatprep.subr.msk.mxu1 %vm957_vm2, %v7923_v23  ;;  %v7519_v25 = vrot.slane %v14549_v32, 2  ;;  %v18415_v32 = vsel %vm2355_vm3, %v7521_v18, %v7522_v38  ;;  %v18425_v12 = vsel %vm2355_vm3, %v7522_v38, %v7524_v16  ;;  %v18431_v18 = vsel %vm2355_vm3, %v7526_v51, %v7527_v5 }
 0x5de   : > { %v7534_v38 = vrot.slane %v18036_v0, 2  ;;  %v7537_v16 = vrot.slane %v18050_v2, 2 }
 0x5df   : > { %12896 = vmatmul.mubr.msk.f32.gmra.mrb[34].mxu1 %vm484_vm0, %v17947_v8  ;;  %v7520_v40 = vsel %vm2355_vm3, %v7517_v62, %v7519_v25  ;;  %v7529_v25 = vrot.slane %v17995_v30, 2 }
 0x5e0   : > { %12898 = vmatprep.mubr.msk.f32.mxu1 %vm484_vm0, %v17973_v19 }
 0x5e1   : > { %v18438_v62 = vsel %vm2355_vm3, %v7527_v5, %v7529_v25  ;;  %v7539_v5 = vrot.slane %v18068_v27, 2  ;;  %v7541_v25 = vrot.slane %v18075_v48, 2 }
 0x5e3   : > { %12899 = vmatmul.mubr.msk.f32.gmra.mrb[36].mxu1 %vm484_vm0, %v17983_v56 }
 0x5e4   : > { %12901 = vmatprep.mubr.msk.f32.mxu1 %vm484_vm0, %v18007_v39 }
 0x5e7   : > { %12902 = vmatmul.mubr.msk.f32.gmra.mrb[38].mxu1 %vm484_vm0, %v18021_v60 }
 0x5e8   : > { %12904 = vmatprep.mubr.msk.f32.mxu1 %vm484_vm0, %v18043_v21 }
 0x5eb   : > { %12905 = vmatmul.mubr.msk.f32.gmra.mrb[40].mxu1 %vm484_vm0, %v18050_v2 }
 0x5ec   : > { %12907 = vmatprep.mubr.msk.f32.mxu1 %vm484_vm0, %v18075_v48 }
 0x5ef   : > { %12908 = vmatmul.mubr.msk.f32.gmra.mrb[42].mxu1 %vm484_vm0, %v18090_v47 }
 0x5f0   : > { %12910 = vmatprep.mubr.msk.f32.mxu1 %vm484_vm0, %v18097_v24 }
 0x5f3   : > { %12911 = vmatmul.mubr.msk.f32.gmra.mrb[44].mxu1 %vm484_vm0, %v18113_v36 }
 0x5f4   : > { %12913 = vmatprep.mubr.msk.f32.mxu1 %vm484_vm0, %v18122_v35 }
 0x5f7   : > { %12914 = vmatmul.mubr.msk.f32.gmra.mrb[46].mxu1 %vm484_vm0, %v18124_v15 }
 0x5f8   : > { %12916 = vmatprep.mubr.msk.f32.mxu1 %vm484_vm0, %v18148_v7 }
 0x5fb   : > { %12917 = vmatmul.mubr.msk.f32.gmra.mrb[48].mxu1 %vm484_vm0, %v18150_v29 }
 0x5fc   : > { %12919 = vmatprep.mubr.msk.f32.mxu1 %vm484_vm0, %v18171_v31 }
 0x5ff   : > { %12920 = vmatmul.mubr.msk.f32.gmra.mrb[50].mxu1 %vm484_vm0, %v18173_v3 }
 0x600   : > { %12922 = vmatprep.mubr.msk.f32.mxu1 %vm484_vm0, %v18193_v28 }
 0x603   : > { %12923 = vmatmul.mubr.msk.f32.gmra.mrb[52].mxu1 %vm484_vm0, %v18195_v37 }
 0x604   : > { %12925 = vmatprep.mubr.msk.f32.mxu1 %vm484_vm0, %v18214_v33 }
 0x607   : > { %12926 = vmatmul.mubr.msk.f32.gmra.mrb[54].mxu1 %vm484_vm0, %v18216_v57 }
 0x608   : > { %12928 = vmatprep.mubr.msk.f32.mxu1 %vm484_vm0, %v18235_v14 }
 0x60b   : > { %12929 = vmatmul.mubr.msk.f32.gmra.mrb[56].mxu1 %vm484_vm0, %v18237_v9 }
 0x60c   : > { %12931 = vmatprep.mubr.msk.f32.mxu1 %vm484_vm0, %v18258_v45 }
 0x60f   : > { %12932 = vmatmul.mubr.msk.f32.gmra.mrb[58].mxu1 %vm484_vm0, %v18260_v46 }
 0x610   : > { %12934 = vmatprep.mubr.msk.f32.mxu1 %vm484_vm0, %v18288_v42 }
 0x613   : > { %12935 = vmatmul.mubr.msk.f32.gmra.mrb[60].mxu1 %vm484_vm0, %v18290_v10 }
 0x614   : > { %12937 = vmatprep.mubr.msk.f32.mxu1 %vm484_vm0, %v18315_v22 }
 0x617   : > { %12938 = vmatmul.mubr.msk.f32.gmra.mrb[62].mxu1 %vm484_vm0, %v18317_v4 }
 0x618   : > { %12942 = vmatprep.mubr.msk.f32.mxu1 %vm484_vm0, %v7518_v55  ;;  %v7531_v55 = vrot.slane %v18007_v39, 2 }
 0x61b   : > { %12943 = vmatmul.mubr.msk.f32.vlgmr.msra.gmra.mrb[32].mxu1 %vm484_vm0, %v7520_v40  ;;  %v7536_v40 = vrot.slane %v18043_v21, 2 }
 0x61c   : > { %12991 = vmatpush3.msk.msra.mxu1 %vm957_vm2, %v7923_v23  ;;  %12945 = vmatprep.mubr.msk.f32.mxu1 %vm484_vm0, %v18415_v32  ;;  %v7532_v23 = vrot.slane %v18021_v60, 2 }
 0x61d   : > { %13040 = vmatprep.subr.msk.mxu1 %vm957_vm2, %v18411_v6  ;;  %v18457_v0 = vsel %vm2355_vm3, %v7536_v40, %v7537_v16  ;;  %v7547_v40 = vrot.slane %v18113_v36, 2 }
 0x61e   : > { %v18444_v30 = vsel %vm2355_vm3, %v7531_v55, %v7532_v23  ;;  %v18451_v51 = vsel %vm2355_vm3, %v7532_v23, %v7534_v38  ;;  %20025 = vst [vmem:[#allocation56_spill] sm:$0xff] %v18457_v0  ;;  %v7542_v55 = vrot.slane %v18090_v47, 2  ;;  %v7544_v23 = vrot.slane %v18092_v17, 2 }
 0x61f   : > { %12946 = vmatmul.mubr.msk.f32.gmra.mrb[34].mxu1 %vm484_vm0, %v18425_v12  ;;  %20024 = vst [vmem:[#allocation53_spill] sm:$0xff] %v18444_v30  ;;  %v7546_v38 = vrot.slane %v18097_v24, 2 }
 0x620   : > { %12948 = vmatprep.mubr.msk.f32.mxu1 %vm484_vm0, %v18431_v18  ;;  %v18470_v27 = vsel %vm2355_vm3, %v7541_v25, %v7542_v55  ;;  %v7552_v25 = vrot.slane %v18124_v15, 2 }
 0x621   : > { %20026 = vst [vmem:[#allocation59_spill] sm:$0xff] %v18470_v27  ;;  %v18483_v17 = vsel %vm2355_vm3, %v7546_v38, %v7547_v40  ;;  %v7557_v38 = vrot.slane %v18150_v29, 2 }
 0x622   : > { %20027 = vst [vmem:[#allocation62_spill] sm:$0xff] %v18483_v17 }
 0x623   : > { %12949 = vmatmul.mubr.msk.f32.gmra.mrb[36].mxu1 %vm484_vm0, %v18438_v62 }
 0x624   : > { %12951 = vmatprep.mubr.msk.f32.mxu1 %vm484_vm0, %v18444_v30  ;;  %v18464_v30 = vsel %vm2355_vm3, %v7537_v16, %v7539_v5  ;;  %v7549_v16 = vrot.slane %v18120_v26, 2  ;;  %v7551_v5 = vrot.slane %v18122_v35, 2 }
 0x626   : > { %v18496_v26 = vsel %vm2355_vm3, %v7551_v5, %v7552_v25  ;;  %v7562_v5 = vrot.slane %v18173_v3, 2 }
 0x627   : > { %12952 = vmatmul.mubr.msk.f32.gmra.mrb[38].mxu1 %vm484_vm0, %v18451_v51  ;;  %20028 = vst [vmem:[#allocation127_spill] sm:$0xff] %v18496_v26 }
 0x628   : > { %12954 = vmatprep.mubr.msk.f32.mxu1 %vm484_vm0, %v18457_v0  ;;  %v18477_v0 = vsel %vm2355_vm3, %v7542_v55, %v7544_v23  ;;  %v7554_v55 = vrot.slane %v18132_v1, 2  ;;  %v7556_v23 = vrot.slane %v18148_v7, 2 }
 0x62a   : > { %v18509_v1 = vsel %vm2355_vm3, %v7556_v23, %v7557_v38  ;;  %v7567_v23 = vrot.slane %v18195_v37, 2 }
 0x62b   : > { %12955 = vmatmul.mubr.msk.f32.gmra.mrb[40].mxu1 %vm484_vm0, %v18464_v30  ;;  %20029 = vst [vmem:[#allocation65_spill] sm:$0xff] %v18509_v1 }
 0x62c   : > { %12957 = vmatprep.mubr.msk.f32.mxu1 %vm484_vm0, %v18470_v27  ;;  %v18490_v27 = vsel %vm2355_vm3, %v7547_v40, %v7549_v16  ;;  %v7559_v40 = vrot.slane %v18166_v43, 2  ;;  %v7561_v16 = vrot.slane %v18171_v31, 2 }
 0x62e   : > { %v18522_v43 = vsel %vm2355_vm3, %v7561_v16, %v7562_v5  ;;  %v7572_v16 = vrot.slane %v18216_v57, 2 }
 0x62f   : > { %12958 = vmatmul.mubr.msk.f32.gmra.mrb[42].mxu1 %vm484_vm0, %v18477_v0  ;;  %20030 = vst [vmem:[#allocation128_spill] sm:$0xff] %v18522_v43 }
 0x630   : > { %12960 = vmatprep.mubr.msk.f32.mxu1 %vm484_vm0, %v18483_v17  ;;  %v18503_v17 = vsel %vm2355_vm3, %v7552_v25, %v7554_v55  ;;  %v7564_v25 = vrot.slane %v18190_v20, 2  ;;  %v7566_v55 = vrot.slane %v18193_v28, 2 }
 0x632   : > { %v18535_v20 = vsel %vm2355_vm3, %v7566_v55, %v7567_v23  ;;  %v7577_v55 = vrot.slane %v18237_v9, 2 }
 0x633   : > { %12961 = vmatmul.mubr.msk.f32.gmra.mrb[44].mxu1 %vm484_vm0, %v18490_v27  ;;  %20031 = vst [vmem:[#allocation68_spill] sm:$0xff] %v18535_v20 }
 0x634   : > { %12963 = vmatprep.mubr.msk.f32.mxu1 %vm484_vm0, %v18496_v26  ;;  %v18516_v26 = vsel %vm2355_vm3, %v7557_v38, %v7559_v40  ;;  %v7569_v38 = vrot.slane %v18212_v49, 2  ;;  %v7571_v40 = vrot.slane %v18214_v33, 2 }
 0x636   : > { %v18548_v49 = vsel %vm2355_vm3, %v7571_v40, %v7572_v16  ;;  %v7582_v40 = vrot.slane %v18260_v46, 2 }
 0x637   : > { %12964 = vmatmul.mubr.msk.f32.gmra.mrb[46].mxu1 %vm484_vm0, %v18503_v17  ;;  %20033 = vst [vmem:[#allocation33_spill] sm:$0xff] %v18548_v49 }
 0x638   : > { %12966 = vmatprep.mubr.msk.f32.mxu1 %vm484_vm0, %v18509_v1  ;;  %v18529_v1 = vsel %vm2355_vm3, %v7562_v5, %v7564_v25  ;;  %v7574_v5 = vrot.slane %v18233_v44, 2  ;;  %v7576_v25 = vrot.slane %v18235_v14, 2 }
 0x63a   : > { %v18561_v44 = vsel %vm2355_vm3, %v7576_v25, %v7577_v55  ;;  %v7587_v25 = vrot.slane %v18290_v10, 2 }
 0x63b   : > { %12967 = vmatmul.mubr.msk.f32.gmra.mrb[48].mxu1 %vm484_vm0, %v18516_v26  ;;  %20034 = vst [vmem:[#allocation105_spill] sm:$0xff] %v18561_v44 }
 0x63c   : > { %12969 = vmatprep.mubr.msk.f32.mxu1 %vm484_vm0, %v18522_v43  ;;  %v18542_v43 = vsel %vm2355_vm3, %v7567_v23, %v7569_v38  ;;  %v7579_v23 = vrot.slane %v18255_v50, 2  ;;  %v7581_v38 = vrot.slane %v18258_v45, 2 }
 0x63d   : > { %20032 = vst [vmem:[#allocation104_spill] sm:$0xff] %v18542_v43 }
 0x63e   : > { %v18574_v50 = vsel %vm2355_vm3, %v7581_v38, %v7582_v40  ;;  %v7592_v38 = vrot.slane %v18317_v4, 2 }
 0x63f   : > { %12970 = vmatmul.mubr.msk.f32.gmra.mrb[50].mxu1 %vm484_vm0, %v18529_v1  ;;  %20036 = vst [vmem:[#allocation106_spill] sm:$0xff] %v18574_v50 }
 0x640   : > { %12972 = vmatprep.mubr.msk.f32.mxu1 %vm484_vm0, %v18535_v20  ;;  %v18555_v20 = vsel %vm2355_vm3, %v7572_v16, %v7574_v5  ;;  %v7584_v16 = vrot.slane %v18276_v11, 2  ;;  %v7586_v5 = vrot.slane %v18288_v42, 2 }
 0x642   : > { %v18587_v11 = vsel %vm2355_vm3, %v7586_v5, %v7587_v25  ;;  %v8468_v5 = vld [vmem:[#allocation16 + $0x14] sm:$0xf] }
 0x643   : > { %12973 = vmatmul.mubr.msk.f32.gmra.mrb[52].mxu1 %vm484_vm0, %v18542_v43  ;;  %20037 = vst [vmem:[#allocation41_spill] sm:$0xff] %v18587_v11 }
 0x644   : > { %12975 = vmatprep.mubr.msk.f32.mxu1 %vm484_vm0, %v18548_v49  ;;  %v18568_v49 = vsel %vm2355_vm3, %v7577_v55, %v7579_v23  ;;  %v7589_v55 = vrot.slane %v18299_v54, 2  ;;  %v7591_v23 = vrot.slane %v18315_v22, 2 }
 0x645   : > { %20035 = vst [vmem:[#allocation36_spill] sm:$0xff] %v18568_v49 }
 0x646   : > { %v18600_v54 = vsel %vm2355_vm3, %v7591_v23, %v7592_v38  ;;  %v20049_v23 = vld [vmem:[#allocation100_spill] sm:$0xff] }
 0x647   : > { %12976 = vmatmul.mubr.msk.f32.gmra.mrb[54].mxu1 %vm484_vm0, %v18555_v20  ;;  %20039 = vst [vmem:[#allocation109_spill] sm:$0xff] %v18600_v54 }
 0x648   : > { %12978 = vmatprep.mubr.msk.f32.mxu1 %vm484_vm0, %v18561_v44  ;;  %v18581_v44 = vsel %vm2355_vm3, %v7582_v40, %v7584_v16  ;;  %v7594_v40 = vrot.slane %v18313_v52, 2  ;;  %v20046_v52 = vld [vmem:[#allocation97_spill] sm:$0xff] }
 0x64a   : > { %v18605_v16 = vsel %vm2355_vm3, %v7592_v38, %v7594_v40  ;;  %v20050_v38 = vld [vmem:[#allocation126_spill] sm:$0xff] }
 0x64b   : > { %12979 = vmatmul.mubr.msk.f32.gmra.mrb[56].mxu1 %vm484_vm0, %v18568_v49  ;;  %v20051_v40 = vld [vmem:[#allocation78_spill] sm:$0xff] }
 0x64c   : > { %12981 = vmatprep.mubr.msk.f32.mxu1 %vm484_vm0, %v18574_v50  ;;  %v18594_v50 = vsel %vm2355_vm3, %v7587_v25, %v7589_v55  ;;  %v20047_v25 = vld [vmem:[#allocation123_spill] sm:$0xff] }
 0x64d   : > { %20038 = vst [vmem:[#allocation108_spill] sm:$0xff] %v18594_v50  ;;  %v20048_v55 = vld [vmem:[#allocation99_spill] sm:$0xff] }
 0x64f   : > { %12982 = vmatmul.mubr.msk.f32.gmra.mrb[58].mxu1 %vm484_vm0, %v18581_v44 }
 0x650   : > { %12984 = vmatprep.mubr.msk.f32.mxu1 %vm484_vm0, %v18587_v11 }
 0x653   : > { %12985 = vmatmul.mubr.msk.f32.gmra.mrb[60].mxu1 %vm484_vm0, %v18594_v50 }
 0x654   : > { %12987 = vmatprep.mubr.msk.f32.mxu1 %vm484_vm0, %v18600_v54 }
 0x657   : > { %12988 = vmatmul.mubr.msk.f32.gmra.mrb[62].mxu1 %vm484_vm0, %v18605_v16 }
 0x658   : > { %12992 = vmatprep.mubr.msk.f32.mxu1 %vm484_vm0, %v17936_v41  ;;  %v18672_v41 = vld [vmem:[#allocation4 + $0x207] sm:$0xff] }
 0x65b   : > { %12993 = vmatmul.mubr.msk.f32.vlgmr.msra.gmra.mrb[32].mxu1 %vm484_vm0, %v17947_v8  ;;  %v18676_v8 = vld [vmem:[#allocation4 + $0x20f] sm:$0xff] }
 0x65c   : > { %13041 = vmatpush3.msk.msra.mxu1 %vm957_vm2, %v18411_v6  ;;  %12995 = vmatprep.mubr.msk.f32.mxu1 %vm484_vm0, %v17973_v19  ;;  %v8734_v19 = vld [vmem:[#allocation16 + $0x18] sm:$0xf]  ;;  %v20045_v6 = vld [vmem:[#allocation96_spill] sm:$0xff] }
 0x65d   : > { %13090 = vmatprep.subr.msk.mxu1 %vm957_vm2, %v8468_v5 }
 0x65f   : > { %12996 = vmatmul.mubr.msk.f32.gmra.mrb[34].mxu1 %vm484_vm0, %v17983_v56  ;;  %v20041_v56 = vld [vmem:[#allocation110_spill] sm:$0xff] }
 0x660   : > { %12998 = vmatprep.mubr.msk.f32.mxu1 %vm484_vm0, %v18007_v39  ;;  %v20043_v39 = vld [vmem:[#allocation116_spill] sm:$0xff] }
 0x663   : > { %12999 = vmatmul.mubr.msk.f32.gmra.mrb[36].mxu1 %vm484_vm0, %v18021_v60  ;;  %v20044_v60 = vld [vmem:[#allocation94_spill] sm:$0xff] }
 0x664   : > { %13001 = vmatprep.mubr.msk.f32.mxu1 %vm484_vm0, %v18043_v21 }
 0x667   : > { %13002 = vmatmul.mubr.msk.f32.gmra.mrb[38].mxu1 %vm484_vm0, %v18050_v2 }
 0x668   : > { %13004 = vmatprep.mubr.msk.f32.mxu1 %vm484_vm0, %v18075_v48 }
 0x66b   : > { %13005 = vmatmul.mubr.msk.f32.gmra.mrb[40].mxu1 %vm484_vm0, %v18090_v47 }
 0x66c   : > { %13007 = vmatprep.mubr.msk.f32.mxu1 %vm484_vm0, %v18097_v24 }
 0x66f   : > { %13008 = vmatmul.mubr.msk.f32.gmra.mrb[42].mxu1 %vm484_vm0, %v18113_v36 }
 0x670   : > { %13010 = vmatprep.mubr.msk.f32.mxu1 %vm484_vm0, %v18122_v35 }
 0x673   : > { %13011 = vmatmul.mubr.msk.f32.gmra.mrb[44].mxu1 %vm484_vm0, %v18124_v15 }
 0x674   : > { %13013 = vmatprep.mubr.msk.f32.mxu1 %vm484_vm0, %v18148_v7 }
 0x677   : > { %13014 = vmatmul.mubr.msk.f32.gmra.mrb[46].mxu1 %vm484_vm0, %v18150_v29 }
 0x678   : > { %13016 = vmatprep.mubr.msk.f32.mxu1 %vm484_vm0, %v18171_v31 }
 0x67b   : > { %13017 = vmatmul.mubr.msk.f32.gmra.mrb[48].mxu1 %vm484_vm0, %v18173_v3 }
 0x67c   : > { %13019 = vmatprep.mubr.msk.f32.mxu1 %vm484_vm0, %v18193_v28 }
 0x67f   : > { %13020 = vmatmul.mubr.msk.f32.gmra.mrb[50].mxu1 %vm484_vm0, %v18195_v37 }
 0x680   : > { %13022 = vmatprep.mubr.msk.f32.mxu1 %vm484_vm0, %v18214_v33 }
 0x683   : > { %13023 = vmatmul.mubr.msk.f32.gmra.mrb[52].mxu1 %vm484_vm0, %v18216_v57 }
 0x684   : > { %13025 = vmatprep.mubr.msk.f32.mxu1 %vm484_vm0, %v18235_v14 }
 0x687   : > { %13026 = vmatmul.mubr.msk.f32.gmra.mrb[54].mxu1 %vm484_vm0, %v18237_v9 }
 0x688   : > { %13028 = vmatprep.mubr.msk.f32.mxu1 %vm484_vm0, %v18258_v45 }
 0x68b   : > { %13029 = vmatmul.mubr.msk.f32.gmra.mrb[56].mxu1 %vm484_vm0, %v18260_v46 }
 0x68c   : > { %13031 = vmatprep.mubr.msk.f32.mxu1 %vm484_vm0, %v18288_v42 }
 0x68f   : > { %13032 = vmatmul.mubr.msk.f32.gmra.mrb[58].mxu1 %vm484_vm0, %v18290_v10 }
 0x690   : > { %13034 = vmatprep.mubr.msk.f32.mxu1 %vm484_vm0, %v18315_v22 }
 0x693   : > { %13035 = vmatmul.mubr.msk.f32.gmra.mrb[60].mxu1 %vm484_vm0, %v18317_v4 }
 0x694   : > { %13037 = vmatprep.mubr.msk.f32.mxu1 %vm484_vm0, %v18672_v41 }
 0x697   : > { %13038 = vmatmul.mubr.msk.f32.gmra.mrb[62].mxu1 %vm484_vm0, %v18676_v8 }
 0x698   : > { %13042 = vmatprep.mubr.msk.f32.mxu1 %vm484_vm0, %v17971_v59  ;;  %v20040_v59 = vld [vmem:[#allocation107_spill] sm:$0xff] }
 0x69b   : > { %13043 = vmatmul.mubr.msk.f32.vlgmr.msra.gmra.mrb[32].mxu1 %vm484_vm0, %v17992_v34  ;;  %v20042_v34 = vld [vmem:[#allocation113_spill] sm:$0xff] }
 0x69c   : > { %13091 = vmatpush3.msk.msra.mxu1 %vm957_vm2, %v8468_v5  ;;  %13045 = vmatprep.mubr.msk.f32.mxu1 %vm484_vm0, %v18011_v58  ;;  %v20052_v5 = vld [vmem:[#allocation47_spill] sm:$0xff] }
 0x69d   : > { %13140 = vmatprep.subr.msk.mxu1 %vm957_vm2, %v8734_v19 }
 0x69f   : > { %13046 = vmatmul.mubr.msk.f32.gmra.mrb[34].mxu1 %vm484_vm0, %v18024_v63 }
 0x6a0   : > { %13048 = vmatprep.mubr.msk.f32.mxu1 %vm484_vm0, %v18047_v61 }
 0x6a3   : > { %13049 = vmatmul.mubr.msk.f32.gmra.mrb[36].mxu1 %vm484_vm0, %v18065_v13 }
 0x6a4   : > { %13051 = vmatprep.mubr.msk.f32.mxu1 %vm484_vm0, %v18079_v53 }
 0x6a7   : > { %13052 = vmatmul.mubr.msk.f32.gmra.mrb[38].mxu1 %vm484_vm0, %v20040_v59 }
 0x6a8   : > { %13054 = vmatprep.mubr.msk.f32.mxu1 %vm484_vm0, %v20041_v56 }
 0x6ab   : > { %13055 = vmatmul.mubr.msk.f32.gmra.mrb[40].mxu1 %vm484_vm0, %v20042_v34 }
 0x6ac   : > { %13057 = vmatprep.mubr.msk.f32.mxu1 %vm484_vm0, %v20043_v39  ;;  %v20062_v39 = vld [vmem:[#allocation48_spill] sm:$0xff] }
 0x6af   : > { %13058 = vmatmul.mubr.msk.f32.gmra.mrb[42].mxu1 %vm484_vm0, %v20044_v60  ;;  %v20061_v60 = vld [vmem:[#allocation46_spill] sm:$0xff] }
 0x6b0   : > { %13060 = vmatprep.mubr.msk.f32.mxu1 %vm484_vm0, %v20045_v6  ;;  %v20053_v6 = vld [vmem:[#allocation49_spill] sm:$0xff] }
 0x6b3   : > { %13061 = vmatmul.mubr.msk.f32.gmra.mrb[44].mxu1 %vm484_vm0, %v20046_v52  ;;  %v20054_v52 = vld [vmem:[#allocation50_spill] sm:$0xff] }
 0x6b4   : > { %13063 = vmatprep.mubr.msk.f32.mxu1 %vm484_vm0, %v20047_v25  ;;  %v20055_v25 = vld [vmem:[#allocation71_spill] sm:$0xff] }
 0x6b7   : > { %13064 = vmatmul.mubr.msk.f32.gmra.mrb[46].mxu1 %vm484_vm0, %v20048_v55  ;;  %v20056_v55 = vld [vmem:[#allocation74_spill] sm:$0xff] }
 0x6b8   : > { %13066 = vmatprep.mubr.msk.f32.mxu1 %vm484_vm0, %v20049_v23  ;;  %v20057_v23 = vld [vmem:[#allocation77_spill] sm:$0xff] }
 0x6bb   : > { %13067 = vmatmul.mubr.msk.f32.gmra.mrb[48].mxu1 %vm484_vm0, %v20050_v38  ;;  %v20058_v38 = vld [vmem:[#allocation81_spill] sm:$0xff] }
 0x6bc   : > { %13069 = vmatprep.mubr.msk.f32.mxu1 %vm484_vm0, %v20051_v40  ;;  %v20059_v40 = vld [vmem:[#allocation87_spill] sm:$0xff] }
 0x6bf   : > { %13070 = vmatmul.mubr.msk.f32.gmra.mrb[50].mxu1 %vm484_vm0, %v20052_v5  ;;  %v8192_v5 = vrot.slane %v18676_v8, 1 }
 0x6c0   : > { %13072 = vmatprep.mubr.msk.f32.mxu1 %vm484_vm0, %v20053_v6  ;;  %v8191_v6 = vrot.slane %v18672_v41, 1 }
 0x6c3   : > { %13073 = vmatmul.mubr.msk.f32.gmra.mrb[52].mxu1 %vm484_vm0, %v20054_v52  ;;  %v20060_v52 = vld [vmem:[#allocation45_spill] sm:$0xff] }
 0x6c4   : > { %13075 = vmatprep.mubr.msk.f32.mxu1 %vm484_vm0, %v20055_v25  ;;  %v6797_v25 = vld [vmem:[#allocation4 + $0x217] sm:$0x3] }
 0x6c7   : > { %13076 = vmatmul.mubr.msk.f32.gmra.mrb[54].mxu1 %vm484_vm0, %v20056_v55  ;;  %v8194_v55 = vrot.slane %v6797_v25, 1 }
 0x6c8   : > { %13078 = vmatprep.mubr.msk.f32.mxu1 %vm484_vm0, %v20057_v23 }
 0x6cb   : > { %13079 = vmatmul.mubr.msk.f32.gmra.mrb[56].mxu1 %vm484_vm0, %v20058_v38  ;;  %v18745_v38 = vsel %vm1526_vm4, %v8191_v6, %v8192_v5  ;;  %v20063_v6 = vld [vmem:[#allocation53_spill] sm:$0xff] }
 0x6cc   : > { %13081 = vmatprep.mubr.msk.f32.mxu1 %vm484_vm0, %v20059_v40  ;;  %v18750_v40 = vsel %vm1526_vm4, %v8192_v5, %v8194_v55  ;;  %v20067_v55 = vld [vmem:[#allocation127_spill] sm:$0xff]  ;;  %v20068_v5 = vld [vmem:[#allocation65_spill] sm:$0xff] }
 0x6cf   : > { %13082 = vmatmul.mubr.msk.f32.gmra.mrb[58].mxu1 %vm484_vm0, %v20060_v52 }
 0x6d0   : > { %13084 = vmatprep.mubr.msk.f32.mxu1 %vm484_vm0, %v20061_v60  ;;  %v9008_v60 = vld [vmem:[#allocation16 + $0x1c] sm:$0xf] }
 0x6d3   : > { %13085 = vmatmul.mubr.msk.f32.gmra.mrb[60].mxu1 %vm484_vm0, %v20062_v39 }
 0x6d4   : > { %13087 = vmatprep.mubr.msk.f32.mxu1 %vm484_vm0, %v18745_v38 }
 0x6d7   : > { %13088 = vmatmul.mubr.msk.f32.gmra.mrb[62].mxu1 %vm484_vm0, %v18750_v40 }
 0x6d8   : > { %13092 = vmatprep.mubr.msk.f32.mxu1 %vm484_vm0, %v18415_v32  ;;  %v20064_v32 = vld [vmem:[#allocation56_spill] sm:$0xff] }
 0x6db   : > { %13093 = vmatmul.mubr.msk.f32.vlgmr.msra.gmra.mrb[32].mxu1 %vm484_vm0, %v18425_v12  ;;  %v20065_v12 = vld [vmem:[#allocation59_spill] sm:$0xff] }
 0x6dc   : > { %13141 = vmatpush3.msk.msra.mxu1 %vm957_vm2, %v8734_v19  ;;  %13095 = vmatprep.mubr.msk.f32.mxu1 %vm484_vm0, %v18431_v18  ;;  %v20066_v19 = vld [vmem:[#allocation62_spill] sm:$0xff] }
 0x6dd   : > { %13190 = vmatprep.subr.msk.mxu1 %vm957_vm2, %v9008_v60 }
 0x6df   : > { %13096 = vmatmul.mubr.msk.f32.gmra.mrb[34].mxu1 %vm484_vm0, %v18438_v62 }
 0x6e0   : > { %13098 = vmatprep.mubr.msk.f32.mxu1 %vm484_vm0, %v20063_v6 }
 0x6e3   : > { %13099 = vmatmul.mubr.msk.f32.gmra.mrb[36].mxu1 %vm484_vm0, %v18451_v51 }
 0x6e4   : > { %13101 = vmatprep.mubr.msk.f32.mxu1 %vm484_vm0, %v20064_v32 }
 0x6e7   : > { %13102 = vmatmul.mubr.msk.f32.gmra.mrb[38].mxu1 %vm484_vm0, %v18464_v30 }
 0x6e8   : > { %13104 = vmatprep.mubr.msk.f32.mxu1 %vm484_vm0, %v20065_v12  ;;  %v20069_v12 = vld [vmem:[#allocation128_spill] sm:$0xff] }
 0x6eb   : > { %13105 = vmatmul.mubr.msk.f32.gmra.mrb[40].mxu1 %vm484_vm0, %v18477_v0 }
 0x6ec   : > { %13107 = vmatprep.mubr.msk.f32.mxu1 %vm484_vm0, %v20066_v19  ;;  %v20070_v19 = vld [vmem:[#allocation68_spill] sm:$0xff] }
 0x6ef   : > { %13108 = vmatmul.mubr.msk.f32.gmra.mrb[42].mxu1 %vm484_vm0, %v18490_v27 }
 0x6f0   : > { %13110 = vmatprep.mubr.msk.f32.mxu1 %vm484_vm0, %v20067_v55  ;;  %v20071_v55 = vld [vmem:[#allocation33_spill] sm:$0xff] }
 0x6f3   : > { %13111 = vmatmul.mubr.msk.f32.gmra.mrb[44].mxu1 %vm484_vm0, %v18503_v17 }
 0x6f4   : > { %13113 = vmatprep.mubr.msk.f32.mxu1 %vm484_vm0, %v20068_v5  ;;  %v20072_v5 = vld [vmem:[#allocation105_spill] sm:$0xff] }
 0x6f7   : > { %13114 = vmatmul.mubr.msk.f32.gmra.mrb[46].mxu1 %vm484_vm0, %v18516_v26 }
 0x6f8   : > { %13116 = vmatprep.mubr.msk.f32.mxu1 %vm484_vm0, %v20069_v12  ;;  %v20073_v12 = vld [vmem:[#allocation106_spill] sm:$0xff] }
 0x6fb   : > { %13117 = vmatmul.mubr.msk.f32.gmra.mrb[48].mxu1 %vm484_vm0, %v18529_v1 }
 0x6fc   : > { %13119 = vmatprep.mubr.msk.f32.mxu1 %vm484_vm0, %v20070_v19 }
 0x6ff   : > { %13120 = vmatmul.mubr.msk.f32.gmra.mrb[50].mxu1 %vm484_vm0, %v18542_v43  ;;  %v8463_v43 = vrot.slane %v18676_v8, 2 }
 0x700   : > { %13122 = vmatprep.mubr.msk.f32.mxu1 %vm484_vm0, %v20071_v55  ;;  %v8462_v55 = vrot.slane %v18672_v41, 2 }
 0x703   : > { %13123 = vmatmul.mubr.msk.f32.gmra.mrb[52].mxu1 %vm484_vm0, %v18555_v20 }
 0x704   : > { %13125 = vmatprep.mubr.msk.f32.mxu1 %vm484_vm0, %v20072_v5 }
 0x707   : > { %13126 = vmatmul.mubr.msk.f32.gmra.mrb[54].mxu1 %vm484_vm0, %v18568_v49  ;;  %v8465_v49 = vrot.slane %v6797_v25, 2  ;;  %v14551_v25 = vld [vmem:[#allocation4 + $0x4f] sm:$0xff] }
 0x708   : > { %13128 = vmatprep.mubr.msk.f32.mxu1 %vm484_vm0, %v20073_v12  ;;  %v18819_v12 = vsel %vm2355_vm3, %v8462_v55, %v8463_v43  ;;  %v14552_v55 = vld [vmem:[#allocation4 + $0x67] sm:$0xff] }
 0x709   : > { %20074 = vst [vmem:[#allocation111_spill] sm:$0xff] %v18819_v12 }
 0x70b   : > { %13129 = vmatmul.mubr.msk.f32.gmra.mrb[56].mxu1 %vm484_vm0, %v18581_v44 }
 0x70c   : > { %13131 = vmatprep.mubr.msk.f32.mxu1 %vm484_vm0, %v18587_v11  ;;  %v18824_v11 = vsel %vm2355_vm3, %v8463_v43, %v8465_v49 }
 0x70f   : > { %13132 = vmatmul.mubr.msk.f32.gmra.mrb[58].mxu1 %vm484_vm0, %v18594_v50  ;;  %v14550_v50 = vld [vmem:[#allocation4 + $0x47] sm:$0xff] }
 0x710   : > { %13134 = vmatprep.mubr.msk.f32.mxu1 %vm484_vm0, %v18600_v54  ;;  %v9279_v54 = vld [vmem:[#allocation16 + $0x20] sm:$0xf] }
 0x713   : > { %13135 = vmatmul.mubr.msk.f32.gmra.mrb[60].mxu1 %vm484_vm0, %v18605_v16 }
 0x714   : > { %13137 = vmatprep.mubr.msk.f32.mxu1 %vm484_vm0, %v18819_v12  ;;  %v14553_v12 = vld [vmem:[#allocation4 + $0x6f] sm:$0xff] }
 0x717   : > { %13138 = vmatmul.mubr.msk.f32.gmra.mrb[62].mxu1 %vm484_vm0, %v18824_v11 }
 0x718   : > { %13142 = vmatprep.mubr.msk.f32.mxu1 %vm484_vm0, %v14550_v50 }
 0x71b   : > { %13143 = vmatmul.mubr.msk.f32.vlgmr.msra.gmra.mrb[32].mxu1 %vm484_vm0, %v14551_v25 }
 0x71c   : > { %13191 = vmatpush3.msk.msra.mxu1 %vm957_vm2, %v9008_v60  ;;  %13145 = vmatprep.mubr.msk.f32.mxu1 %vm484_vm0, %v14552_v55 }
 0x71d   : > { %13240 = vmatprep.subr.msk.mxu1 %vm957_vm2, %v9279_v54 }
 0x71f   : > { %13146 = vmatmul.mubr.msk.f32.gmra.mrb[34].mxu1 %vm484_vm0, %v14553_v12 }
 0x720   : > { %13148 = vmatprep.mubr.msk.f32.mxu1 %vm484_vm0, %v18043_v21  ;;  %v18884_v21 = vld [vmem:[#allocation4 + $0x227] sm:$0xff] }
 0x723   : > { %13149 = vmatmul.mubr.msk.f32.gmra.mrb[36].mxu1 %vm484_vm0, %v18050_v2  ;;  %v18890_v2 = vld [vmem:[#allocation4 + $0x22f] sm:$0xff] }
 0x724   : > { %13151 = vmatprep.mubr.msk.f32.mxu1 %vm484_vm0, %v18075_v48  ;;  %v20079_v48 = vld [vmem:[#allocation123_spill] sm:$0xff]  ;;  %v9274_v43 = vrot.slane %v18890_v2, 2 }
 0x727   : > { %13152 = vmatmul.mubr.msk.f32.gmra.mrb[38].mxu1 %vm484_vm0, %v18090_v47  ;;  %v20081_v47 = vld [vmem:[#allocation100_spill] sm:$0xff] }
 0x728   : > { %13154 = vmatprep.mubr.msk.f32.mxu1 %vm484_vm0, %v18097_v24  ;;  %v20082_v24 = vld [vmem:[#allocation126_spill] sm:$0xff] }
 0x72b   : > { %13155 = vmatmul.mubr.msk.f32.gmra.mrb[40].mxu1 %vm484_vm0, %v18113_v36  ;;  %v20083_v36 = vld [vmem:[#allocation78_spill] sm:$0xff] }
 0x72c   : > { %13157 = vmatprep.mubr.msk.f32.mxu1 %vm484_vm0, %v18122_v35  ;;  %v20084_v35 = vld [vmem:[#allocation47_spill] sm:$0xff] }
 0x72f   : > { %13158 = vmatmul.mubr.msk.f32.gmra.mrb[42].mxu1 %vm484_vm0, %v18124_v15  ;;  %v20085_v15 = vld [vmem:[#allocation49_spill] sm:$0xff] }
 0x730   : > { %13160 = vmatprep.mubr.msk.f32.mxu1 %vm484_vm0, %v18148_v7  ;;  %v20086_v7 = vld [vmem:[#allocation50_spill] sm:$0xff] }
 0x733   : > { %13161 = vmatmul.mubr.msk.f32.gmra.mrb[44].mxu1 %vm484_vm0, %v18150_v29  ;;  %v20087_v29 = vld [vmem:[#allocation71_spill] sm:$0xff] }
 0x734   : > { %13163 = vmatprep.mubr.msk.f32.mxu1 %vm484_vm0, %v18171_v31  ;;  %v20088_v31 = vld [vmem:[#allocation74_spill] sm:$0xff] }
 0x737   : > { %13164 = vmatmul.mubr.msk.f32.gmra.mrb[46].mxu1 %vm484_vm0, %v18173_v3  ;;  %v20089_v3 = vld [vmem:[#allocation81_spill] sm:$0xff] }
 0x738   : > { %13166 = vmatprep.mubr.msk.f32.mxu1 %vm484_vm0, %v18193_v28  ;;  %v20091_v28 = vld [vmem:[#allocation46_spill] sm:$0xff] }
 0x73b   : > { %13167 = vmatmul.mubr.msk.f32.gmra.mrb[48].mxu1 %vm484_vm0, %v18195_v37  ;;  %v9002_v37 = vrot.slane %v18884_v21, 1 }
 0x73c   : > { %13169 = vmatprep.mubr.msk.f32.mxu1 %vm484_vm0, %v18214_v33  ;;  %v20090_v33 = vld [vmem:[#allocation87_spill] sm:$0xff] }
 0x73f   : > { %13170 = vmatmul.mubr.msk.f32.gmra.mrb[50].mxu1 %vm484_vm0, %v18216_v57  ;;  %v6800_v57 = vld [vmem:[#allocation4 + $0x237] sm:$0x3] }
 0x740   : > { %13172 = vmatprep.mubr.msk.f32.mxu1 %vm484_vm0, %v18235_v14  ;;  %v9005_v14 = vrot.slane %v6800_v57, 1  ;;  %v9276_v49 = vrot.slane %v6800_v57, 2 }
 0x742   : > { %v9277_v50 = vsel %vm2355_vm3, %v9274_v43, %v9276_v49 }
 0x743   : > { %13173 = vmatmul.mubr.msk.f32.gmra.mrb[52].mxu1 %vm484_vm0, %v18237_v9  ;;  %v9003_v9 = vrot.slane %v18890_v2, 1 }
 0x744   : > { %13175 = vmatprep.mubr.msk.f32.mxu1 %vm484_vm0, %v18258_v45 }
 0x745   : > { %v9004_v45 = vsel %vm1526_vm4, %v9002_v37, %v9003_v9 }
 0x747   : > { %13176 = vmatmul.mubr.msk.f32.gmra.mrb[54].mxu1 %vm484_vm0, %v18260_v46  ;;  %v9006_v46 = vsel %vm1526_vm4, %v9003_v9, %v9005_v14 }
 0x748   : > { %13178 = vmatprep.mubr.msk.f32.mxu1 %vm484_vm0, %v18288_v42  ;;  %v20092_v42 = vld [vmem:[#allocation59_spill] sm:$0xff] }
 0x74b   : > { %13179 = vmatmul.mubr.msk.f32.gmra.mrb[56].mxu1 %vm484_vm0, %v18290_v10  ;;  %v20093_v10 = vld [vmem:[#allocation62_spill] sm:$0xff] }
 0x74c   : > { %13181 = vmatprep.mubr.msk.f32.mxu1 %vm484_vm0, %v18315_v22  ;;  %v20094_v22 = vld [vmem:[#allocation127_spill] sm:$0xff] }
 0x74f   : > { %13182 = vmatmul.mubr.msk.f32.gmra.mrb[58].mxu1 %vm484_vm0, %v18317_v4  ;;  %v20095_v4 = vld [vmem:[#allocation65_spill] sm:$0xff] }
 0x750   : > { %13184 = vmatprep.mubr.msk.f32.mxu1 %vm484_vm0, %v18672_v41 }
 0x753   : > { %13185 = vmatmul.mubr.msk.f32.gmra.mrb[60].mxu1 %vm484_vm0, %v18676_v8  ;;  %v19029_v8 = vld [vmem:[#allocation19] ss:$0 sm:$0xff] }
 0x754   : > { %13187 = vmatprep.mubr.msk.f32.mxu1 %vm484_vm0, %v18884_v21 }
 0x757   : > { %13188 = vmatmul.mubr.msk.f32.gmra.mrb[62].mxu1 %vm484_vm0, %v18890_v2 }
 0x758   : > { %13192 = vmatprep.mubr.msk.f32.mxu1 %vm484_vm0, %v18011_v58  ;;  %v20075_v58 = vld [vmem:[#allocation116_spill] sm:$0xff] }
 0x75b   : > { %13193 = vmatmul.mubr.msk.f32.vlgmr.msra.gmra.mrb[32].mxu1 %vm484_vm0, %v18024_v63  ;;  %v20076_v63 = vld [vmem:[#allocation94_spill] sm:$0xff] }
 0x75c   : > { %13241 = vmatpush3.msk.msra.mxu1 %vm957_vm2, %v9279_v54  ;;  %13195 = vmatprep.mubr.msk.f32.mxu1 %vm484_vm0, %v18047_v61  ;;  %v20077_v61 = vld [vmem:[#allocation96_spill] sm:$0xff]  ;;  %v19027_v54 = vld [vmem:[#allocation17] ss:$0 sm:$0xff] }
 0x75f   : > { %13196 = vmatmul.mubr.msk.f32.gmra.mrb[34].mxu1 %vm484_vm0, %v18065_v13  ;;  %v20078_v13 = vld [vmem:[#allocation97_spill] sm:$0xff] }
 0x760   : > { %13198 = vmatprep.mubr.msk.f32.mxu1 %vm484_vm0, %v18079_v53  ;;  %v20080_v53 = vld [vmem:[#allocation99_spill] sm:$0xff] }
 0x763   : > { %13199 = vmatmul.mubr.msk.f32.gmra.mrb[36].mxu1 %vm484_vm0, %v20040_v59 }
 0x764   : > { %13201 = vmatprep.mubr.msk.f32.mxu1 %vm484_vm0, %v20041_v56 }
 0x767   : > { %13202 = vmatmul.mubr.msk.f32.gmra.mrb[38].mxu1 %vm484_vm0, %v20042_v34 }
 0x768   : > { %13204 = vmatprep.mubr.msk.f32.mxu1 %vm484_vm0, %v20075_v58 }
 0x76b   : > { %13205 = vmatmul.mubr.msk.f32.gmra.mrb[40].mxu1 %vm484_vm0, %v20076_v63 }
 0x76c   : > { %13207 = vmatprep.mubr.msk.f32.mxu1 %vm484_vm0, %v20077_v61 }
 0x76f   : > { %13208 = vmatmul.mubr.msk.f32.gmra.mrb[42].mxu1 %vm484_vm0, %v20078_v13 }
 0x770   : > { %13210 = vmatprep.mubr.msk.f32.mxu1 %vm484_vm0, %v20079_v48 }
 0x773   : > { %13211 = vmatmul.mubr.msk.f32.gmra.mrb[44].mxu1 %vm484_vm0, %v20080_v53 }
 0x774   : > { %13213 = vmatprep.mubr.msk.f32.mxu1 %vm484_vm0, %v20081_v47 }
 0x777   : > { %13214 = vmatmul.mubr.msk.f32.gmra.mrb[46].mxu1 %vm484_vm0, %v20082_v24 }
 0x778   : > { %13216 = vmatprep.mubr.msk.f32.mxu1 %vm484_vm0, %v20083_v36 }
 0x77b   : > { %13217 = vmatmul.mubr.msk.f32.gmra.mrb[48].mxu1 %vm484_vm0, %v20084_v35 }
 0x77c   : > { %13219 = vmatprep.mubr.msk.f32.mxu1 %vm484_vm0, %v20085_v15 }
 0x77f   : > { %13220 = vmatmul.mubr.msk.f32.gmra.mrb[50].mxu1 %vm484_vm0, %v20086_v7 }
 0x780   : > { %13222 = vmatprep.mubr.msk.f32.mxu1 %vm484_vm0, %v20087_v29 }
 0x783   : > { %13223 = vmatmul.mubr.msk.f32.gmra.mrb[52].mxu1 %vm484_vm0, %v20088_v31 }
 0x784   : > { %13225 = vmatprep.mubr.msk.f32.mxu1 %vm484_vm0, %v20057_v23 }
 0x787   : > { %13226 = vmatmul.mubr.msk.f32.gmra.mrb[54].mxu1 %vm484_vm0, %v20089_v3 }
 0x788   : > { %13228 = vmatprep.mubr.msk.f32.mxu1 %vm484_vm0, %v20090_v33 }
 0x78b   : > { %13229 = vmatmul.mubr.msk.f32.gmra.mrb[56].mxu1 %vm484_vm0, %v20060_v52 }
 0x78c   : > { %13231 = vmatprep.mubr.msk.f32.mxu1 %vm484_vm0, %v20091_v28 }
 0x78f   : > { %13232 = vmatmul.mubr.msk.f32.gmra.mrb[58].mxu1 %vm484_vm0, %v20062_v39 }
 0x790   : > { %13234 = vmatprep.mubr.msk.f32.mxu1 %vm484_vm0, %v18745_v38 }
 0x793   : > { %13235 = vmatmul.mubr.msk.f32.gmra.mrb[60].mxu1 %vm484_vm0, %v18750_v40 }
 0x794   : > { %13237 = vmatprep.mubr.msk.f32.mxu1 %vm484_vm0, %v9004_v45 }
 0x797   : > { %13238 = vmatmul.mubr.msk.f32.gmra.mrb[62].mxu1 %vm484_vm0, %v9006_v46 }
 0x798   : > { %13242 = vmatprep.mubr.msk.f32.mxu1 %vm484_vm0, %v18431_v18  ;;  %v20096_v18 = vld [vmem:[#allocation128_spill] sm:$0xff] }
 0x79b   : > { %13243 = vmatmul.mubr.msk.f32.vlgmr.msra.gmra.mrb[32].mxu1 %vm484_vm0, %v18438_v62  ;;  %v20097_v62 = vld [vmem:[#allocation104_spill] sm:$0xff] }
 0x79c   : > { %13245 = vmatprep.mubr.msk.f32.mxu1 %vm484_vm0, %v20063_v6 }
 0x79f   : > { %13246 = vmatmul.mubr.msk.f32.gmra.mrb[34].mxu1 %vm484_vm0, %v18451_v51  ;;  %v20099_v51 = vld [vmem:[#allocation36_spill] sm:$0xff] }
 0x7a0   : > { %13248 = vmatprep.mubr.msk.f32.mxu1 %vm484_vm0, %v20064_v32 }
 0x7a3   : > { %13249 = vmatmul.mubr.msk.f32.gmra.mrb[36].mxu1 %vm484_vm0, %v18464_v30  ;;  %v20098_v30 = vld [vmem:[#allocation33_spill] sm:$0xff] }
 0x7a4   : > { %13251 = vmatprep.mubr.msk.f32.mxu1 %vm484_vm0, %v20092_v42 }
 0x7a7   : > { %13252 = vmatmul.mubr.msk.f32.gmra.mrb[38].mxu1 %vm484_vm0, %v18477_v0  ;;  %v20100_v0 = vld [vmem:[#allocation106_spill] sm:$0xff] }
 0x7a8   : > { %13254 = vmatprep.mubr.msk.f32.mxu1 %vm484_vm0, %v20093_v10 }
 0x7ab   : > { %13255 = vmatmul.mubr.msk.f32.gmra.mrb[40].mxu1 %vm484_vm0, %v18490_v27  ;;  %v20101_v27 = vld [vmem:[#allocation41_spill] sm:$0xff] }
 0x7ac   : > { %13257 = vmatprep.mubr.msk.f32.mxu1 %vm484_vm0, %v20094_v22 }
 0x7af   : > { %13258 = vmatmul.mubr.msk.f32.gmra.mrb[42].mxu1 %vm484_vm0, %v18503_v17  ;;  %v20102_v17 = vld [vmem:[#allocation108_spill] sm:$0xff] }
 0x7b0   : > { %13260 = vmatprep.mubr.msk.f32.mxu1 %vm484_vm0, %v20095_v4 }
 0x7b3   : > { %13261 = vmatmul.mubr.msk.f32.gmra.mrb[44].mxu1 %vm484_vm0, %v18516_v26  ;;  %v20103_v26 = vld [vmem:[#allocation109_spill] sm:$0xff] }
 0x7b4   : > { %13263 = vmatprep.mubr.msk.f32.mxu1 %vm484_vm0, %v20096_v18 }
 0x7b7   : > { %13264 = vmatmul.mubr.msk.f32.gmra.mrb[46].mxu1 %vm484_vm0, %v18529_v1  ;;  %v9273_v1 = vrot.slane %v18884_v21, 2 }
 0x7b8   : > { %13266 = vmatprep.mubr.msk.f32.mxu1 %vm484_vm0, %v20070_v19 }
 0x7bb   : > { %13267 = vmatmul.mubr.msk.f32.gmra.mrb[48].mxu1 %vm484_vm0, %v20097_v62 }
 0x7bc   : > { %13269 = vmatprep.mubr.msk.f32.mxu1 %vm484_vm0, %v20098_v30 }
 0x7bf   : > { %13270 = vmatmul.mubr.msk.f32.gmra.mrb[50].mxu1 %vm484_vm0, %v18555_v20  ;;  %v20104_v20 = vld [vmem:[#allocation111_spill] sm:$0xff] }
 0x7c0   : > { %13272 = vmatprep.mubr.msk.f32.mxu1 %vm484_vm0, %v20072_v5 }
 0x7c3   : > { %13273 = vmatmul.mubr.msk.f32.gmra.mrb[52].mxu1 %vm484_vm0, %v20099_v51 }
 0x7c4   : > { %13275 = vmatprep.mubr.msk.f32.mxu1 %vm484_vm0, %v20100_v0 }
 0x7c7   : > { %13276 = vmatmul.mubr.msk.f32.gmra.mrb[54].mxu1 %vm484_vm0, %v18581_v44  ;;  %v9275_v44 = vsel %vm2355_vm3, %v9273_v1, %v9274_v43 }
 0x7c8   : > { %13278 = vmatprep.mubr.msk.f32.mxu1 %vm484_vm0, %v20101_v27 }
 0x7cb   : > { %13279 = vmatmul.mubr.msk.f32.gmra.mrb[56].mxu1 %vm484_vm0, %v20102_v17 }
 0x7cc   : > { %13281 = vmatprep.mubr.msk.f32.mxu1 %vm484_vm0, %v20103_v26 }
 0x7cf   : > { %13282 = vmatmul.mubr.msk.f32.gmra.mrb[58].mxu1 %vm484_vm0, %v18605_v16 }
 0x7d0   : > { %13284 = vmatprep.mubr.msk.f32.mxu1 %vm484_vm0, %v20104_v20 }
 0x7d3   : > { %13285 = vmatmul.mubr.msk.f32.gmra.mrb[60].mxu1 %vm484_vm0, %v18824_v11 }
 0x7d4   : > { %13287 = vmatprep.mubr.msk.f32.mxu1 %vm484_vm0, %v9275_v44 }
 0x7d7   : > { %13288 = vmatmul.mubr.msk.f32.gmra.mrb[62].mxu1 %vm484_vm0, %v9277_v50 }
 0x86e   : > { %v13244_v41 = vpop.f32.mrb[32].mxu1 }
 0x86f   : > { %v9552_v16 = vmul.f32 %v13244_v41, %v19027_v54  ;;  %v9353_v59 = vpop.f32.mrb[33].mxu1 }
 0x870   : > { %v9551_v56 = vmul.f32 %v19027_v54, %v9353_v59 }
 0x871   : > { %v19034_v34 = vadd.f32 %v19029_v8, %v9552_v16 }
 0x872   : > { %v19037_v11 = vadd.f32 %v19029_v8, %v9551_v56  ;;  %v13247_v39 = vpop.f32.mrb[34].mxu1 }
 0x873   : > { %v11010_v60 = vmul.f32 -1.442695, %v19034_v34  ;;  %v9554_v52 = vmul.f32 %v13247_v39, %v19027_v54  ;;  %v9363_v23 = vpop.f32.mrb[35].mxu1 }
 0x874   : > { %v11009_v38 = vmul.f32 -1.442695, %v19037_v11  ;;  %v9553_v40 = vmul.f32 %v19027_v54, %v9363_v23 }
 0x875   : > { %14349 = vpow2.f32 %v11010_v60  ;;  %v19044_v6 = vadd.f32 %v19029_v8, %v9554_v52 }
 0x876   : > { %14351 = vpow2.f32 %v11009_v38  ;;  %v19047_v32 = vadd.f32 %v19029_v8, %v9553_v40  ;;  %v13250_v12 = vpop.f32.mrb[36].mxu1 }
 0x877   : > { %v11012_v19 = vmul.f32 -1.442695, %v19044_v6  ;;  %v9556_v5 = vmul.f32 %v13250_v12, %v19027_v54  ;;  %v9373_v25 = vpop.f32.mrb[37].mxu1 }
 0x878   : > { %v11011_v55 = vmul.f32 -1.442695, %v19047_v32  ;;  %v9555_v21 = vmul.f32 %v19027_v54, %v9373_v25 }
 0x879   : > { %14353 = vpow2.f32 %v11012_v19  ;;  %v19054_v2 = vadd.f32 %v19029_v8, %v9556_v5 }
 0x87a   : > { %14355 = vpow2.f32 %v11011_v55  ;;  %v19057_v58 = vadd.f32 %v19029_v8, %v9555_v21  ;;  %v13253_v63 = vpop.f32.mrb[38].mxu1 }
 0x87b   : > { %v11014_v61 = vmul.f32 -1.442695, %v19054_v2  ;;  %v9558_v13 = vmul.f32 %v13253_v63, %v19027_v54  ;;  %v9383_v48 = vpop.f32.mrb[39].mxu1 }
 0x87c   : > { %v11013_v53 = vmul.f32 -1.442695, %v19057_v58  ;;  %v9557_v47 = vmul.f32 %v19027_v54, %v9383_v48 }
 0x87d   : > { %14357 = vpow2.f32 %v11014_v61  ;;  %v19064_v24 = vadd.f32 %v19029_v8, %v9558_v13 }
 0x87e   : > { %14359 = vpow2.f32 %v11013_v53  ;;  %v19067_v36 = vadd.f32 %v19029_v8, %v9557_v47  ;;  %v13256_v35 = vpop.f32.mrb[40].mxu1 }
 0x87f   : > { %v14350_v15 = vpop.eup %14349  ;;  %v11016_v7 = vmul.f32 -1.442695, %v19064_v24  ;;  %v9560_v29 = vmul.f32 %v13256_v35, %v19027_v54  ;;  %v9393_v31 = vpop.f32.mrb[41].mxu1 }
 0x880   : > { %v14352_v3 = vpop.eup %14351  ;;  %v9719_v33 = vadd.f32 1.0, %v14350_v15  ;;  %v11015_v28 = vmul.f32 -1.442695, %v19067_v36  ;;  %v9559_v37 = vmul.f32 %v19027_v54, %v9393_v31 }
 0x881   : > { %v9718_v9 = vadd.f32 1.0, %v14352_v3  ;;  %14361 = vpow2.f32 %v11016_v7  ;;  %v19074_v57 = vadd.f32 %v19029_v8, %v9560_v29 }
 0x882   : > { %14363 = vrcp.f32 %v9719_v33  ;;  %v19077_v14 = vadd.f32 %v19029_v8, %v9559_v37  ;;  %v13259_v45 = vpop.f32.mrb[42].mxu1 }
 0x883   : > { %v14354_v46 = vpop.eup %14353  ;;  %14365 = vrcp.f32 %v9718_v9  ;;  %v11018_v42 = vmul.f32 -1.442695, %v19074_v57  ;;  %v9562_v10 = vmul.f32 %v13259_v45, %v19027_v54  ;;  %v9403_v22 = vpop.f32.mrb[43].mxu1 }
 0x884   : > { %v14356_v4 = vpop.eup %14355  ;;  %v9721_v18 = vadd.f32 1.0, %v14354_v46  ;;  %14367 = vpow2.f32 %v11015_v28  ;;  %v11017_v62 = vmul.f32 -1.442695, %v19077_v14  ;;  %v9561_v30 = vmul.f32 %v19027_v54, %v9403_v22 }
 0x885   : > { %v9720_v51 = vadd.f32 1.0, %v14356_v4  ;;  %14369 = vpow2.f32 %v11018_v42  ;;  %v19084_v0 = vadd.f32 %v19029_v8, %v9562_v10 }
 0x886   : > { %14371 = vrcp.f32 %v9721_v18  ;;  %v19087_v27 = vadd.f32 %v19029_v8, %v9561_v30  ;;  %v13262_v17 = vpop.f32.mrb[44].mxu1 }
 0x887   : > { %v14358_v26 = vpop.eup %14357  ;;  %14373 = vrcp.f32 %v9720_v51  ;;  %v11020_v1 = vmul.f32 -1.442695, %v19084_v0  ;;  %v9564_v43 = vmul.f32 %v13262_v17, %v19027_v54  ;;  %v9413_v20 = vpop.f32.mrb[45].mxu1 }
 0x888   : > { %v14360_v49 = vpop.eup %14359  ;;  %v9723_v44 = vadd.f32 1.0, %v14358_v26  ;;  %14375 = vpow2.f32 %v11017_v62  ;;  %v11019_v50 = vmul.f32 -1.442695, %v19087_v27  ;;  %v9563_v41 = vmul.f32 %v19027_v54, %v9413_v20 }
 0x889   : > { %v9722_v16 = vadd.f32 1.0, %v14360_v49  ;;  %14377 = vpow2.f32 %v11020_v1  ;;  %v19094_v59 = vadd.f32 %v19029_v8, %v9564_v43 }
 0x88a   : > { %14379 = vrcp.f32 %v9723_v44  ;;  %v19097_v56 = vadd.f32 %v19029_v8, %v9563_v41  ;;  %v13265_v39 = vpop.f32.mrb[46].mxu1 }
 0x88b   : > { %v14362_v60 = vpop.eup %14361  ;;  %14381 = vrcp.f32 %v9722_v16  ;;  %v11022_v52 = vmul.f32 -1.442695, %v19094_v59  ;;  %v9566_v23 = vmul.f32 %v13265_v39, %v19027_v54  ;;  %v9423_v38 = vpop.f32.mrb[47].mxu1 }
 0x88c   : > { %v14364_v40 = vpop.eup %14363  ;;  %v9725_v12 = vadd.f32 1.0, %v14362_v60  ;;  %14383 = vpow2.f32 %v11019_v50  ;;  %v11021_v19 = vmul.f32 -1.442695, %v19097_v56  ;;  %v9565_v5 = vmul.f32 %v19027_v54, %v9423_v38 }
 0x88d   : > { %v14366_v25 = vpop.eup %14365  ;;  %v9815_v55 = vmul.f32 %v14364_v40, %v19034_v34  ;;  %14385 = vpow2.f32 %v11022_v52  ;;  %v19105_v21 = vadd.f32 %v19029_v8, %v9566_v23 }
 0x88e   : > { %v14368_v63 = vpop.eup %14367  ;;  %v9814_v61 = vmul.f32 %v14366_v25, %v19037_v11  ;;  %14387 = vrcp.f32 %v9725_v12  ;;  %v19109_v13 = vadd.f32 %v19029_v8, %v9565_v5  ;;  %v13268_v48 = vpop.f32.mrb[48].mxu1 }
 0x88f   : > { %v14370_v53 = vpop.eup %14369  ;;  %9848 = vst.msk [vmem:[%s19112_s29 + $0x8] sm:$0xff] %vm9846_vm5, %v9815_v55  ;;  %v9724_v34 = vadd.f32 1.0, %v14368_v63  ;;  %14389 = vpow2.f32 %v11021_v19  ;;  %v11024_v47 = vmul.f32 -1.442695, %v19105_v21  ;;  %v9568_v35 = vmul.f32 %v13268_v48, %v19027_v54  ;;  %v9433_v15 = vpop.f32.mrb[49].mxu1 }
 0x890   : > { %v14372_v11 = vpop.eup %14371  ;;  %9847 = vst.msk [vmem:[%s19112_s29] sm:$0xff] %vm9846_vm5, %v9814_v61  ;;  %v9727_v7 = vadd.f32 1.0, %v14370_v53  ;;  %v11023_v29 = vmul.f32 -1.442695, %v19109_v13  ;;  %v9567_v31 = vmul.f32 %v19027_v54, %v9433_v15 }
 0x891   : > { %v14374_v3 = vpop.eup %14373  ;;  %v9817_v33 = vmul.f32 %v14372_v11, %v19044_v6  ;;  %14391 = vrcp.f32 %v9724_v34  ;;  %v19124_v28 = vadd.f32 %v19029_v8, %v9568_v35 }
 0x892   : > { %v14376_v37 = vpop.eup %14375  ;;  %v9816_v9 = vmul.f32 %v14374_v3, %v19047_v32  ;;  %14393 = vrcp.f32 %v9727_v7  ;;  %v19128_v45 = vadd.f32 %v19029_v8, %v9567_v31  ;;  %v13271_v46 = vpop.f32.mrb[50].mxu1 }
 0x893   : > { %v14378_v42 = vpop.eup %14377  ;;  %9850 = vst.msk [vmem:[%s19112_s29 + $0x18] sm:$0xff] %vm9846_vm5, %v9817_v33  ;;  %v9726_v10 = vadd.f32 1.0, %v14376_v37  ;;  %14395 = vpow2.f32 %v11024_v47  ;;  %v11026_v6 = vmul.f32 -1.442695, %v19124_v28  ;;  %v9570_v22 = vmul.f32 %v13271_v46, %v19027_v54  ;;  %v9443_v4 = vpop.f32.mrb[51].mxu1 }
 0x894   : > { %v14380_v18 = vpop.eup %14379  ;;  %9849 = vst.msk [vmem:[%s19112_s29 + $0x10] sm:$0xff] %vm9846_vm5, %v9816_v9  ;;  %v9729_v32 = vadd.f32 1.0, %v14378_v42  ;;  %14397 = vpow2.f32 %v11023_v29  ;;  %v11025_v62 = vmul.f32 -1.442695, %v19128_v45  ;;  %v9569_v30 = vmul.f32 %v19027_v54, %v9443_v4 }
 0x895   : > { %v14382_v51 = vpop.eup %14381  ;;  %v9819_v17 = vmul.f32 %v14380_v18, %v19054_v2  ;;  %14399 = vrcp.f32 %v9726_v10  ;;  %v19140_v26 = vadd.f32 %v19029_v8, %v9570_v22 }
 0x896   : > { %v14384_v1 = vpop.eup %14383  ;;  %v9818_v43 = vmul.f32 %v14382_v51, %v19057_v58  ;;  %14401 = vrcp.f32 %v9729_v32  ;;  %v19144_v20 = vadd.f32 %v19029_v8, %v9569_v30  ;;  %v13274_v49 = vpop.f32.mrb[52].mxu1 }
 0x897   : > { %v14386_v44 = vpop.eup %14385  ;;  %9852 = vst.msk [vmem:[%s19112_s29 + $0x28] sm:$0xff] %vm9846_vm5, %v9819_v17  ;;  %v9728_v50 = vadd.f32 1.0, %v14384_v1  ;;  %14403 = vpow2.f32 %v11026_v6  ;;  %v11028_v2 = vmul.f32 -1.442695, %v19140_v26  ;;  %v9572_v41 = vmul.f32 %v13274_v49, %v19027_v54  ;;  %v9453_v16 = vpop.f32.mrb[53].mxu1 }
 0x898   : > { %v14388_v39 = vpop.eup %14387  ;;  %9851 = vst.msk [vmem:[%s19112_s29 + $0x20] sm:$0xff] %vm9846_vm5, %v9818_v43  ;;  %v9731_v58 = vadd.f32 1.0, %v14386_v44  ;;  %14405 = vpow2.f32 %v11025_v62  ;;  %v9571_v60 = vmul.f32 %v19027_v54, %v9453_v16  ;;  %v11027_v38 = vmul.f32 -1.442695, %v19144_v20 }
 0x899   : > { %v14390_v52 = vpop.eup %14389  ;;  %v9821_v23 = vmul.f32 %v14388_v39, %v19064_v24  ;;  %14407 = vrcp.f32 %v9728_v50  ;;  %v19156_v40 = vadd.f32 %v19029_v8, %v9572_v41 }
 0x89a   : > { %14409 = vrcp.f32 %v9731_v58  ;;  %v9730_v12 = vadd.f32 1.0, %v14390_v52  ;;  %v19159_v19 = vadd.f32 %v19029_v8, %v9571_v60  ;;  %v13277_v5 = vpop.f32.mrb[54].mxu1 }
 0x89b   : > { %v14392_v25 = vpop.eup %14391  ;;  %9854 = vst.msk [vmem:[%s19112_s29 + $0x38] sm:$0xff] %vm9846_vm5, %v9821_v23  ;;  %14411 = vpow2.f32 %v11028_v2  ;;  %v11030_v55 = vmul.f32 -1.442695, %v19156_v40  ;;  %v9574_v24 = vmul.f32 %v13277_v5, %v19027_v54  ;;  %v9463_v63 = vpop.f32.mrb[55].mxu1 }
 0x89c   : > { %v14394_v61 = vpop.eup %14393  ;;  %v9820_v48 = vmul.f32 %v14392_v25, %v19067_v36  ;;  %14413 = vrcp.f32 %v9730_v12  ;;  %v11029_v53 = vmul.f32 -1.442695, %v19159_v19  ;;  %v9573_v34 = vmul.f32 %v19027_v54, %v9463_v63 }
 0x89d   : > { %v14396_v47 = vpop.eup %14395  ;;  %v9823_v35 = vmul.f32 %v14394_v61, %v19074_v57  ;;  %14415 = vpow2.f32 %v11027_v38  ;;  %v19170_v15 = vadd.f32 %v19029_v8, %v9574_v24 }
 0x89e   : > { %v14398_v11 = vpop.eup %14397  ;;  %9853 = vst.msk [vmem:[%s19112_s29 + $0x30] sm:$0xff] %vm9846_vm5, %v9820_v48  ;;  %v9733_v7 = vadd.f32 1.0, %v14396_v47  ;;  %14417 = vpow2.f32 %v11030_v55  ;;  %v19175_v29 = vadd.f32 %v19029_v8, %v9573_v34  ;;  %v13280_v36 = vpop.f32.mrb[56].mxu1 }
 0x89f   : > { %v14400_v31 = vpop.eup %14399  ;;  %9856 = vst.msk [vmem:[%s19112_s29 + $0x48] sm:$0xff] %vm9846_vm5, %v9823_v35  ;;  %v9732_v3 = vadd.f32 1.0, %v14398_v11  ;;  %14419 = vpow2.f32 %v11029_v53  ;;  %v11032_v57 = vmul.f32 -1.442695, %v19170_v15  ;;  %v9576_v33 = vmul.f32 %v13280_v36, %v19027_v54  ;;  %v9473_v37 = vpop.f32.mrb[57].mxu1 }
 0x8a0   : > { %v14402_v9 = vpop.eup %14401  ;;  %v9822_v46 = vmul.f32 %v14400_v31, %v19077_v14  ;;  %14421 = vrcp.f32 %v9733_v7  ;;  %v11031_v42 = vmul.f32 -1.442695, %v19175_v29  ;;  %v9575_v10 = vmul.f32 %v19027_v54, %v9473_v37 }
 0x8a1   : > { %v14404_v6 = vpop.eup %14403  ;;  %v9825_v22 = vmul.f32 %v14402_v9, %v19084_v0  ;;  %14423 = vrcp.f32 %v9732_v3  ;;  %v19186_v4 = vadd.f32 %v19029_v8, %v9576_v33 }
 0x8a2   : > { %v14406_v18 = vpop.eup %14405  ;;  %9855 = vst.msk [vmem:[%s19112_s29 + $0x40] sm:$0xff] %vm9846_vm5, %v9822_v46  ;;  %v9735_v32 = vadd.f32 1.0, %v14404_v6  ;;  %14425 = vpow2.f32 %v11032_v57  ;;  %v19191_v62 = vadd.f32 %v19029_v8, %v9575_v10  ;;  %v13283_v14 = vpop.f32.mrb[58].mxu1 }
 0x8a3   : > { %v14408_v30 = vpop.eup %14407  ;;  %9858 = vst.msk [vmem:[%s19112_s29 + $0x58] sm:$0xff] %vm9846_vm5, %v9825_v22  ;;  %v9734_v51 = vadd.f32 1.0, %v14406_v18  ;;  %14427 = vpow2.f32 %v11031_v42  ;;  %v11034_v0 = vmul.f32 -1.442695, %v19186_v4  ;;  %v9578_v17 = vmul.f32 %v13283_v14, %v19027_v54  ;;  %v9483_v1 = vpop.f32.mrb[59].mxu1 }
 0x8a4   : > { %v14410_v43 = vpop.eup %14409  ;;  %v9824_v49 = vmul.f32 %v14408_v30, %v19087_v27  ;;  %14429 = vrcp.f32 %v9735_v32  ;;  %v11033_v44 = vmul.f32 -1.442695, %v19191_v62  ;;  %v9577_v50 = vmul.f32 %v19027_v54, %v9483_v1 }
 0x8a5   : > { %v14412_v2 = vpop.eup %14411  ;;  %v9827_v41 = vmul.f32 %v14410_v43, %v19094_v59  ;;  %14431 = vrcp.f32 %v9734_v51  ;;  %v19202_v16 = vadd.f32 %v19029_v8, %v9578_v17 }
 0x8a6   : > { %v14414_v39 = vpop.eup %14413  ;;  %9857 = vst.msk [vmem:[%s19112_s29 + $0x50] sm:$0xff] %vm9846_vm5, %v9824_v49  ;;  %v9737_v58 = vadd.f32 1.0, %v14412_v2  ;;  %14433 = vpow2.f32 %v11034_v0  ;;  %v19207_v27 = vadd.f32 %v19029_v8, %v9577_v50  ;;  %v13286_v60 = vpop.f32.mrb[60].mxu1 }
 0x8a7   : > { %v14416_v52 = vpop.eup %14415  ;;  %9860 = vst.msk [vmem:[%s19112_s29 + $0x68] sm:$0xff] %vm9846_vm5, %v9827_v41  ;;  %v9826_v23 = vmul.f32 %v14414_v39, %v19097_v56  ;;  %14435 = vpow2.f32 %v11033_v44  ;;  %v11036_v59 = vmul.f32 -1.442695, %v19202_v16  ;;  %v9580_v38 = vmul.f32 %v13286_v60, %v19027_v54  ;;  %v9493_v12 = vpop.f32.mrb[61].mxu1 }
 0x8a8   : > { %v14418_v5 = vpop.eup %14417  ;;  %14437 = vrcp.f32 %v9737_v58  ;;  %v9736_v25 = vadd.f32 1.0, %v14416_v52  ;;  %v9579_v55 = vmul.f32 %v19027_v54, %v9493_v12  ;;  %v11035_v61 = vmul.f32 -1.442695, %v19207_v27 }
 0x8a9   : > { %v14420_v24 = vpop.eup %14419  ;;  %9859 = vst.msk [vmem:[%s19112_s29 + $0x60] sm:$0xff] %vm9846_vm5, %v9826_v23  ;;  %v9739_v63 = vadd.f32 1.0, %v14418_v5  ;;  %14439 = vpow2.f32 %v11036_v59  ;;  %v19219_v56 = vadd.f32 %v19029_v8, %v9580_v38 }
 0x8aa   : > { %v14422_v48 = vpop.eup %14421  ;;  %14441 = vrcp.f32 %v9736_v25  ;;  %v9738_v53 = vadd.f32 1.0, %v14420_v24  ;;  %v19222_v34 = vadd.f32 %v19029_v8, %v9579_v55  ;;  %v13289_v47 = vpop.f32.mrb[62].mxu1 }
 0x8ab   : > { %v14424_v35 = vpop.eup %14423  ;;  %v9829_v11 = vmul.f32 %v14422_v48, %v19105_v21  ;;  %14443 = vrcp.f32 %v9739_v63  ;;  %v11038_v7 = vmul.f32 -1.442695, %v19219_v56  ;;  %v9582_v36 = vmul.f32 %v13289_v47, %v19027_v54  ;;  %v9503_v31 = vpop.f32.mrb[63].mxu1 }
 0x8ac   : > { %v14426_v3 = vpop.eup %14425  ;;  %v9828_v57 = vmul.f32 %v14424_v35, %v19109_v13  ;;  %14445 = vrcp.f32 %v9738_v53  ;;  %v9581_v33 = vmul.f32 %v19027_v54, %v9503_v31  ;;  %v11037_v21 = vmul.f32 -1.442695, %v19222_v34 }
 0x8ad   : > { %v14428_v37 = vpop.eup %14427  ;;  %9862 = vst.msk [vmem:[%s19112_s29 + $0x78] sm:$0xff] %vm9846_vm5, %v9829_v11  ;;  %v9741_v9 = vadd.f32 1.0, %v14426_v3  ;;  %14447 = vpow2.f32 %v11035_v61  ;;  %v19233_v46 = vadd.f32 %v19029_v8, %v9582_v36 }
 0x8ae   : > { %v14430_v42 = vpop.eup %14429  ;;  %9861 = vst.msk [vmem:[%s19112_s29 + $0x70] sm:$0xff] %vm9846_vm5, %v9828_v57  ;;  %v9740_v10 = vadd.f32 1.0, %v14428_v37  ;;  %14449 = vpow2.f32 %v11038_v7  ;;  %v19238_v13 = vadd.f32 %v19029_v8, %v9581_v33 }
 0x8af   : > { %v14432_v54 = vpop.eup %14431  ;;  %v9831_v6 = vmul.f32 %v14430_v42, %v19124_v28  ;;  %14451 = vrcp.f32 %v9741_v9  ;;  %v11040_v22 = vmul.f32 -1.442695, %v19233_v46 }
 0x8b0   : > { %v14434_v18 = vpop.eup %14433  ;;  %v9830_v32 = vmul.f32 %v14432_v54, %v19128_v45  ;;  %14453 = vrcp.f32 %v9740_v10  ;;  %v11039_v51 = vmul.f32 -1.442695, %v19238_v13 }
 0x8b1   : > { %v14436_v14 = vpop.eup %14435  ;;  %9864 = vst.msk [vmem:[%s19112_s29 + $0x88] sm:$0xff] %vm9846_vm5, %v9831_v6  ;;  %v9743_v30 = vadd.f32 1.0, %v14434_v18  ;;  %14455 = vpow2.f32 %v11037_v21 }
 0x8b2   : > { %v14438_v8 = vpop.eup %14437  ;;  %9863 = vst.msk [vmem:[%s19112_s29 + $0x80] sm:$0xff] %vm9846_vm5, %v9830_v32  ;;  %v9742_v0 = vadd.f32 1.0, %v14436_v14  ;;  %14457 = vpow2.f32 %v11040_v22 }
 0x8b3   : > { %v14440_v28 = vpop.eup %14439  ;;  %v9833_v17 = vmul.f32 %v14438_v8, %v19140_v26  ;;  %14459 = vrcp.f32 %v9743_v30 }
 0x8b4   : > { %v14442_v45 = vpop.eup %14441  ;;  %14461 = vrcp.f32 %v9742_v0  ;;  %v9745_v1 = vadd.f32 1.0, %v14440_v28 }
 0x8b5   : > { %v14444_v43 = vpop.eup %14443  ;;  %9866 = vst.msk [vmem:[%s19112_s29 + $0x98] sm:$0xff] %vm9846_vm5, %v9833_v17  ;;  %v9832_v49 = vmul.f32 %v14442_v45, %v19144_v20  ;;  %14463 = vpow2.f32 %v11039_v51 }
 0x8b6   : > { %v14446_v44 = vpop.eup %14445  ;;  %v9835_v50 = vmul.f32 %v14444_v43, %v19156_v40  ;;  %14465 = vrcp.f32 %v9745_v1 }
 0x8b7   : > { %v14448_v2 = vpop.eup %14447  ;;  %9865 = vst.msk [vmem:[%s19112_s29 + $0x90] sm:$0xff] %vm9846_vm5, %v9832_v49  ;;  %v9834_v26 = vmul.f32 %v14446_v44, %v19159_v19 }
 0x8b8   : > { %v14450_v41 = vpop.eup %14449  ;;  %9868 = vst.msk [vmem:[%s19112_s29 + $0xa8] sm:$0xff] %vm9846_vm5, %v9835_v50  ;;  %v9744_v39 = vadd.f32 1.0, %v14448_v2 }
 0x8b9   : > { %v14452_v58 = vpop.eup %14451  ;;  %9867 = vst.msk [vmem:[%s19112_s29 + $0xa0] sm:$0xff] %vm9846_vm5, %v9834_v26  ;;  %v9747_v20 = vadd.f32 1.0, %v14450_v41 }
 0x8ba   : > { %v14454_v60 = vpop.eup %14453  ;;  %v9837_v52 = vmul.f32 %v14452_v58, %v19170_v15  ;;  %14467 = vrcp.f32 %v9744_v39 }
 0x8bb   : > { %v14456_v40 = vpop.eup %14455  ;;  %v9836_v23 = vmul.f32 %v14454_v60, %v19175_v29  ;;  %14469 = vrcp.f32 %v9747_v20 }
 0x8bc   : > { %v14458_v19 = vpop.eup %14457  ;;  %9870 = vst.msk [vmem:[%s19112_s29 + $0xb8] sm:$0xff] %vm9846_vm5, %v9837_v52  ;;  %v9746_v59 = vadd.f32 1.0, %v14456_v40 }
 0x8bd   : > { %v14460_v38 = vpop.eup %14459  ;;  %9869 = vst.msk [vmem:[%s19112_s29 + $0xb0] sm:$0xff] %vm9846_vm5, %v9836_v23  ;;  %v9749_v12 = vadd.f32 1.0, %v14458_v19 }
 0x8be   : > { %v14462_v5 = vpop.eup %14461  ;;  %v9839_v25 = vmul.f32 %v14460_v38, %v19186_v4  ;;  %14471 = vrcp.f32 %v9746_v59 }
 0x8bf   : > { %v14464_v15 = vpop.eup %14463  ;;  %v9838_v29 = vmul.f32 %v14462_v5, %v19191_v62  ;;  %14473 = vrcp.f32 %v9749_v12 }
 0x8c0   : > { %v14466_v55 = vpop.eup %14465  ;;  %9872 = vst.msk [vmem:[%s19112_s29 + $0xc8] sm:$0xff] %vm9846_vm5, %v9839_v25  ;;  %v9748_v24 = vadd.f32 1.0, %v14464_v15 }
 0x8c1   : > { %9871 = vst.msk [vmem:[%s19112_s29 + $0xc0] sm:$0xff] %vm9846_vm5, %v9838_v29  ;;  %v9841_v63 = vmul.f32 %v14466_v55, %v19202_v16 }
 0x8c2   : > { %14475 = vrcp.f32 %v9748_v24 }
 0x8c3   : > { %9874 = vst.msk [vmem:[%s19112_s29 + $0xd8] sm:$0xff] %vm9846_vm5, %v9841_v63 }
 0x8c4   : > { %v14468_v4 = vpop.eup %14467 }
 0x8c5   : > { %v14470_v61 = vpop.eup %14469  ;;  %v9840_v62 = vmul.f32 %v14468_v4, %v19207_v27 }
 0x8c6   : > { %v9843_v48 = vmul.f32 %v14470_v61, %v19219_v56 }
 0x8c7   : > { %9873 = vst.msk [vmem:[%s19112_s29 + $0xd0] sm:$0xff] %vm9846_vm5, %v9840_v62 }
 0x8c8   : > { %v14472_v53 = vpop.eup %14471  ;;  %9876 = vst.msk [vmem:[%s19112_s29 + $0xe8] sm:$0xff] %vm9846_vm5, %v9843_v48 }
 0x8c9   : > { %v14474_v47 = vpop.eup %14473  ;;  %v9842_v16 = vmul.f32 %v14472_v53, %v19222_v34 }
 0x8ca   : > { %v9845_v35 = vmul.f32 %v14474_v47, %v19233_v46 }
 0x8cb   : > { %9875 = vst.msk [vmem:[%s19112_s29 + $0xe0] sm:$0xff] %vm9846_vm5, %v9842_v16 }
 0x8cc   : > { %v14476_v27 = vpop.eup %14475  ;;  %9878 = vst.msk [vmem:[%s19112_s29 + $0xf8] sm:$0xff] %vm9846_vm5, %v9845_v35 }
 0x8cd   : > { %v9844_v56 = vmul.f32 %v14476_v27, %v19238_v13 }
 0x8cf   : > { %9877 = vst.msk [vmem:[%s19112_s29 + $0xf0] sm:$0xff] %vm9846_vm5, %v9844_v56 }
 0x8d0   : > { %14823 = shalt.err (!%p14820_p0)
}
 0x8d1   : > { %s14824_s20 = scalar_lea.hbm %s19292_s14, 4096  ;;  %s14828_s0 = scalar_lea.hbm %s20105_s17, 8192 }
 0x8d2   : > { %p14825_p12 = scmp.ne.s32.totalorder %s19292_s14, %s14824_s20  ;;  %p14829_p3 = scmp.lt.u32.totalorder %s19292_s14, %s20105_s17 }
 0x8d3   : > { %p14830_p7 = scmp.lt.u32.totalorder %s14828_s0, %s14824_s20  ;;  %p14832_p6 = scmp.lt.u32.totalorder %s14824_s20, %s19292_s14 }
 0x8d4   : > { %p14826_p13 = pnand %p14825_p12, %p20106_p10 }
 0x8d5   : > { %p14831_p2 = por %p14830_p7, %p14829_p3 }
 0x8d6   : > { %p14827_p1 = pneg %p14826_p13 }
 0x8d7   : > { %p14833_p5 = por %p14832_p6, %p14831_p2 }
 0x8d9   : > { %p14834_p9 = pnand %p14833_p5, %p14827_p1 }
 0x8db   : > { %14837 = shalt.err (!%p14834_p9)
}
 0x8dc   : > { %s14913_s29 = smov 128   ;;  %s14914_s24 = smov 8  }
 0x8dd   : > { %14124 = dma.vmem_to_hbm [thread:$0]  (%p20106_p10), %s19294_s28, 4096, %s19292_s14, %s9880_s15, %s14913_s29, %s14913_s29, %s14914_s24  }
 0x8de PF: > { %s9908_s26 = sand.u32 1, %s14884_s30   ;;  %p20107_p4 = scmp.ne.s32.totalorder %s19659_s9, 0 }
 0x8df   : > { %p20108_p8 = scmp.ge.s32.totalorder %s14896_s12, 2  ;;  %s9909_s25 = scalar_lea.sflag [#allocation7], %s9908_s26 }
 0x8e1   : > { %p14156_p11 = pnand %p20108_p8, %p20107_p4 }
 0x8e3   : > { %14879 = dma.done.wait (!%p14156_p11), %s9909_s25, 4096  }
 0x8e4   : > { %14881 = vsyncadd (!%p14156_p11), %s9909_s25, 4294963200  ;;  %p28_p0 = scmp.ge.s32.totalorder %s15169_s19, 4   ;;  %s20109_s30 = smov %s14888_s10 }
 0x8e5   : > { %s20110_s10 = smov %s14892_s11  ;;  %s20111_s11 = smov %s15181_s13 }
 0x8e6   : > { %s20112_s12 = smov %s15169_s19  ;;  %30 = sbr.rel (!%p28_p0) target bundleno = 17 (0x11), region = 172 }
 0x8ed   :  { %9914 = vsyncpa [#allocation6], 1 }
 0x8ee   :  { %9916 = vsyncpa [#allocation6 + $0x1], 1 }
 0x8ef   :  { %9917 = vsyncpa [#allocation9], 1 }
 0x8f0   :  { %9919 = vsyncpa [#allocation9 + $0x1], 1 }
 0x8f1   :  { %9920 = vsyncpa [#allocation12], 1 }
 0x8f2   :  { %9921 = vsyncpa [#allocation15], 1 }
 0x8f3   :  { %9922 = vsyncpa [#allocation18], 1 }
 0x8f4   :  { %9923 = vsyncpa [#allocation7], 1 }
 0x8f5   :  { %9925 = vsyncpa [#allocation7 + $0x1], 1 }

</bundles_post_ra>
